<compile_context>
chip_gen: v6e
topology: v6e:2x2x1
jax: 0.10.0
libtpu: 0.0.40
codegen_flags: <defaults>
</compile_context>

<pallas_src>
import jax
import jax.numpy as jnp
import numpy as np
from jax.experimental import pallas as pl
from jax.experimental.pallas import tpu as pltpu

NEG_SLOPE = 0.01      # nn.LeakyReLU default
BN_EPS = 1e-5         # nn.BatchNorm2d default

# Flip to jnp.bfloat16 on v6e/v7x for MXU feed rate (accumulation stays f32 via
# preferred_element_type); kept f32 so the 2e-4 numerical check stays tight.
MATMUL_DTYPE = jnp.float32


def _leaky(x):
    return jnp.where(x >= 0, x, NEG_SLOPE * x)


def _banded_weights(w_hwio, width, halo_out):
    """Fold a 3x3 / stride-1 / pad-1 conv into 3 banded matmul weights (one per ky).

    Activation layout: row = n*(H+2) + y, lane = x*Cin + ci (x in padded coords).
    For output pixel w the column block is (w+1)*Cout when `halo_out` (result goes
    straight into the next padded buffer, halo lanes land on zero weight columns)
    else w*Cout (final lane-dense output). One-time init transform, done eagerly.
    """
    kh, kw, cin, cout = w_hwio.shape
    w_np = np.asarray(w_hwio, np.float32)
    off = 1 if halo_out else 0
    wb = np.zeros((kh, (width + 2) * cin, (width + 2 * off) * cout), np.float32)
    for ky in range(kh):
        for kx in range(kw):
            for w in range(width):
                r0 = (w + kx) * cin
                c0 = (w + off) * cout
                wb[ky, r0:r0 + cin, c0:c0 + cout] = w_np[ky, kx]
    return jnp.asarray(wb)


def _channel_gather(width, cmid):
    """G[(w+1)*Cmid + c, c] = 1: gathers per-channel sums across the W interior lane
    groups (halo lane groups excluded); G^T broadcasts per-channel vectors back."""
    g = np.zeros(((width + 2) * cmid, cmid), np.float32)
    for w in range(width):
        for c in range(cmid):
            g[(w + 1) * cmid + c, c] = 1.0
    return jnp.asarray(g), jnp.asarray(np.ascontiguousarray(g.T))


def bottleneck_forward(x_nchw, params):
    """Whole BottleneckBlock in one Pallas call (toy sizes fit VMEM easily).

    # TODO(synk): for realistic N/H/W add a grid over batch / row bands with
    # dimension_semantics=("parallel",) + partial-sum BatchNorm so the kernel uses
    # both v7x TensorCores and respects its 64 MiB VMEM (and M per dot stays >=512).
    """
    w1, b1, gamma, beta, w2, b2, w3, b3 = params            # HWIO weights, (1,C) biases
    x = jnp.transpose(x_nchw, (0, 2, 3, 1)).astype(jnp.float32)   # NCHW -> NHWC
    N, H, W, Cin = x.shape
    Cmid = w1.shape[-1]
    Cout = w3.shape[-1]
    P = H + 2
    LMID = (W + 2) * Cmid
    LOUT = W * Cout
    NHW = N * H * W

    # Halo-pad in the wrapper (tiny HBM op) and flatten to the lane-dense layout.
    x2d = jnp.pad(x, ((0, 0), (1, 1), (1, 1), (0, 0))).reshape(N * P, (W + 2) * Cin)

    # One-time weight transforms (would live at module init in real code).
    wb1 = _banded_weights(w1, W, halo_out=True)             # (3, (W+2)*Cin, LMID)
    wb2 = _banded_weights(w2, W, halo_out=True)             # (3, LMID, LMID)
    wb3 = _banded_weights(w3, W, halo_out=False)            # (3, LMID, LOUT)
    gmat, gmat_t = _channel_gather(W, Cmid)                 # (LMID, Cmid), (Cmid, LMID)

    b1_l = b1 @ gmat_t                                      # (1, LMID), 0 at halo lanes
    b2_l = b2 @ gmat_t
    b3_l = jnp.tile(b3, (1, W))                             # (1, LOUT)

    def kernel(x_ref, wb1_ref, b1_ref, g_ref, gt_ref, gamma_ref, beta_ref,
               wb2_ref, b2_ref, wb3_ref, b3_ref, out_ref, a_ref):
        inv_nhw = jnp.float32(1.0 / NHW)

        # Zero the single shared padded scratch once (halo rows/lanes must be 0).
        a_ref[...] = jnp.zeros_like(a_ref)

        def conv_band(src_ref, r0, wb_ref, bias, lanes_out):
            """3x3 conv for one batch band: three MXU dots (one per vertical tap)."""
            acc = jnp.zeros((H, lanes_out), jnp.float32)
            for ky in range(3):
                lhs = src_ref[r0 + ky:r0 + ky + H, :].astype(MATMUL_DTYPE)
                acc = acc + jnp.dot(lhs, wb_ref[ky].astype(MATMUL_DTYPE),
                                    preferred_element_type=jnp.float32)
            return _leaky(acc + bias)

        # ---- conv1 + LeakyReLU: straight into the padded buffer interior ----
        for n in range(N):
            r0 = n * P
            a_ref[r0 + 1:r0 + 1 + H, :] = conv_band(x_ref, r0, wb1_ref,
                                                    b1_ref[...], LMID)

        # ---- BatchNorm2d (training mode), two-pass batch statistics ----
        # TODO(synk): running_mean/running_var buffer updates (training side effect)
        # are not emitted; the forward output does not depend on them.
        row_sum = jnp.sum(a_ref[...], axis=0, keepdims=True)             # (1, LMID)
        mean_c = jnp.dot(row_sum, g_ref[...],
                         preferred_element_type=jnp.float32) * inv_nhw   # (1, Cmid)
        mean_l = jnp.dot(mean_c, gt_ref[...],
                         preferred_element_type=jnp.float32)             # 0 at halo lanes
        sq_sum = jnp.zeros((1, LMID), jnp.float32)
        for n in range(N):
            r0 = n * P
            cen = a_ref[r0 + 1:r0 + 1 + H, :] - mean_l                   # halos stay 0
            sq_sum = sq_sum + jnp.sum(cen * cen, axis=0, keepdims=True)
        var_c = jnp.dot(sq_sum, g_ref[...],
                        preferred_element_type=jnp.float32) * inv_nhw    # biased (PyTorch)
        scale_c = gamma_ref[...] * jax.lax.rsqrt(var_c + BN_EPS)
        shift_c = beta_ref[...] - mean_c * scale_c
        scale_l = jnp.dot(scale_c, gt_ref[...], preferred_element_type=jnp.float32)
        shift_l = jnp.dot(shift_c, gt_ref[...], preferred_element_type=jnp.float32)
        for n in range(N):
            r0 = n * P
            rows = a_ref[r0 + 1:r0 + 1 + H, :]
            a_ref[r0 + 1:r0 + 1 + H, :] = rows * scale_l + shift_l       # halo lanes stay 0

        # ---- conv2 + LeakyReLU: in-place band update of the padded buffer ----
        for n in range(N):
            r0 = n * P
            a_ref[r0 + 1:r0 + 1 + H, :] = conv_band(a_ref, r0, wb2_ref,
                                                    b2_ref[...], LMID)

        # ---- conv3 + LeakyReLU: straight to the lane-dense (N*H, W*Cout) output ----
        for n in range(N):
            out_ref[n * H:(n + 1) * H, :] = conv_band(a_ref, n * P, wb3_ref,
                                                      b3_ref[...], LOUT)

    vmem = pl.BlockSpec(memory_space=pltpu.MemorySpace.VMEM)
    out2d = pl.pallas_call(
        kernel,
        out_shape=jax.ShapeDtypeStruct((N * H, LOUT), jnp.float32),
        in_specs=[vmem] * 11,
        out_specs=vmem,
        scratch_shapes=[pltpu.VMEM((N * P, LMID), jnp.float32)],   # one padded scratch
    )(x2d, wb1, b1_l, gmat, gmat_t, gamma, beta, wb2, b2_l, wb3, b3_l)

    out = out2d.reshape(N, H, W, Cout)
    return jnp.transpose(out, (0, 3, 1, 2))                        # NHWC -> NCHW


def make_params(key, in_channels=1, intermediate_channels=16, out_channels=16):
    """Deterministic synthetic params matching the module's __init__ shapes."""
    ks = jax.random.split(key, 6)

    def conv_params(kw_, kb_, cin, cout):
        bound = 1.0 / np.sqrt(cin * 3 * 3)
        w = jax.random.uniform(kw_, (cout, cin, 3, 3), jnp.float32, -bound, bound)
        b = jax.random.uniform(kb_, (1, cout), jnp.float32, -bound, bound)
        return jnp.transpose(w, (2, 3, 1, 0)), b                   # OIHW -> HWIO

    w1, b1 = conv_params(ks[0], ks[1], in_channels, intermediate_channels)
    w2, b2 = conv_params(ks[2], ks[3], intermediate_channels, intermediate_channels)
    w3, b3 = conv_params(ks[4], ks[5], intermediate_channels, out_channels)
    gamma = jnp.ones((1, intermediate_channels), jnp.float32)
    beta = jnp.zeros((1, intermediate_channels), jnp.float32)
    return (w1, b1, gamma, beta, w2, b2, w3, b3)


def reference_forward(x_nchw, params):
    """Pure-JAX reference (lax.conv, two-pass BN) to sanity-check the kernel."""
    w1, b1, gamma, beta, w2, b2, w3, b3 = params
    x = jnp.transpose(x_nchw, (0, 2, 3, 1)).astype(jnp.float32)

    def conv(x_, w, b):
        y = jax.lax.conv_general_dilated(
            x_, w, (1, 1), [(1, 1), (1, 1)],
            dimension_numbers=('NHWC', 'HWIO', 'NHWC'))
        return y + b[0]

    y = _leaky(conv(x, w1, b1))
    mean = jnp.mean(y, axis=(0, 1, 2), keepdims=True)
    var = jnp.mean((y - mean) ** 2, axis=(0, 1, 2), keepdims=True)
    y = (y - mean) / jnp.sqrt(var + BN_EPS) * gamma[0] + beta[0]
    y = _leaky(conv(y, w2, b2))
    y = _leaky(conv(y, w3, b3))
    return jnp.transpose(y, (0, 3, 1, 2))


if __name__ == "__main__":
    key = jax.random.PRNGKey(0)
    kx, kp = jax.random.split(key)

    # Module defaults: in_channels=1, intermediate_channels=16, out_channels=16
    x = jax.random.normal(kx, (2, 1, 16, 16), jnp.float32)         # NCHW, like PyTorch
    params = make_params(kp)

    out = jax.block_until_ready(bottleneck_forward(x, params))
    ref = jax.block_until_ready(reference_forward(x, params))

    np.testing.assert_allclose(np.asarray(out), np.asarray(ref),
                               rtol=2e-4, atol=2e-4)
    assert out.shape == (2, 16, 16, 16)
    print("KERNEL_OK")
</pallas_src>

<mosaic_0001>
module attributes {stable_mosaic.version = 11 : i64} {
  func.func @kernel(%arg0: memref<36x18xf32, #tpu.memory_space<vmem>>, %arg1: memref<3x18x288xf32, #tpu.memory_space<vmem>>, %arg2: memref<1x288xf32, #tpu.memory_space<vmem>>, %arg3: memref<288x16xf32, #tpu.memory_space<vmem>>, %arg4: memref<16x288xf32, #tpu.memory_space<vmem>>, %arg5: memref<1x16xf32, #tpu.memory_space<vmem>>, %arg6: memref<1x16xf32, #tpu.memory_space<vmem>>, %arg7: memref<3x288x288xf32, #tpu.memory_space<vmem>>, %arg8: memref<1x288xf32, #tpu.memory_space<vmem>>, %arg9: memref<3x288x256xf32, #tpu.memory_space<vmem>>, %arg10: memref<1x256xf32, #tpu.memory_space<vmem>>, %arg11: memref<32x256xf32, #tpu.memory_space<vmem>>, %arg12: memref<36x288xf32, #tpu.memory_space<vmem>>) attributes {dimension_semantics = [], scalar_prefetch = 0 : i64, scratch_operands = 1 : i64, tpu.core_type = #tpu.core_type<tc>} {
    %cst = arith.constant 0.000000e+00 : f32
    %0 = vector.broadcast %cst : f32 to vector<36x288xf32>
    %c0 = arith.constant 0 : index
    %c0_0 = arith.constant 0 : index
    %1 = vector.load %arg12[%c0, %c0_0] : memref<36x288xf32, #tpu.memory_space<vmem>>, vector<36x288xf32>
    tpu.vector_store %arg12[%c0, %c0_0], %0 {strides = array<i32>} : memref<36x288xf32, #tpu.memory_space<vmem>>, vector<36x288xf32>,
    %c0_1 = arith.constant 0 : index
    %c0_2 = arith.constant 0 : index
    %2 = vector.load %arg2[%c0_1, %c0_2] : memref<1x288xf32, #tpu.memory_space<vmem>>, vector<1x288xf32>
    %cst_3 = arith.constant 0.000000e+00 : f32
    %3 = vector.broadcast %cst_3 : f32 to vector<16x288xf32>
    %c0_4 = arith.constant 0 : index
    %c0_5 = arith.constant 0 : index
    %4 = vector.load %arg0[%c0_4, %c0_5] : memref<36x18xf32, #tpu.memory_space<vmem>>, vector<16x18xf32>
    %c0_6 = arith.constant 0 : index
    %c0_7 = arith.constant 0 : index
    %c0_8 = arith.constant 0 : index
    %5 = vector.load %arg1[%c0_6, %c0_7, %c0_8] : memref<3x18x288xf32, #tpu.memory_space<vmem>>, vector<1x18x288xf32>
    %6 = vector.shape_cast %5 : vector<1x18x288xf32> to vector<18x288xf32>
    %cst_9 = arith.constant dense<0.000000e+00> : vector<16x288xf32>
    %7 = tpu.matmul %4, %6, %cst_9 {dimension_numbers = #tpu.dot_dimension_numbers<[1], [0], [0], [1], [0, 0, 1, 1], [], []>} : vector<16x18xf32>, vector<18x288xf32>, vector<16x288xf32> -> vector<16x288xf32>
    %8 = arith.addf %3, %7 : vector<16x288xf32>
    %c1 = arith.constant 1 : index
    %c0_10 = arith.constant 0 : index
    %9 = vector.load %arg0[%c1, %c0_10] : memref<36x18xf32, #tpu.memory_space<vmem>>, vector<16x18xf32>
    %c1_11 = arith.constant 1 : index
    %c0_12 = arith.constant 0 : index
    %c0_13 = arith.constant 0 : index
    %10 = vector.load %arg1[%c1_11, %c0_12, %c0_13] : memref<3x18x288xf32, #tpu.memory_space<vmem>>, vector<1x18x288xf32>
    %11 = vector.shape_cast %10 : vector<1x18x288xf32> to vector<18x288xf32>
    %cst_14 = arith.constant dense<0.000000e+00> : vector<16x288xf32>
    %12 = tpu.matmul %9, %11, %cst_14 {dimension_numbers = #tpu.dot_dimension_numbers<[1], [0], [0], [1], [0, 0, 1, 1], [], []>} : vector<16x18xf32>, vector<18x288xf32>, vector<16x288xf32> -> vector<16x288xf32>
    %13 = arith.addf %8, %12 : vector<16x288xf32>
    %c2 = arith.constant 2 : index
    %c0_15 = arith.constant 0 : index
    %14 = vector.load %arg0[%c2, %c0_15] : memref<36x18xf32, #tpu.memory_space<vmem>>, vector<16x18xf32>
    %c2_16 = arith.constant 2 : index
    %c0_17 = arith.constant 0 : index
    %c0_18 = arith.constant 0 : index
    %15 = vector.load %arg1[%c2_16, %c0_17, %c0_18] : memref<3x18x288xf32, #tpu.memory_space<vmem>>, vector<1x18x288xf32>
    %16 = vector.shape_cast %15 : vector<1x18x288xf32> to vector<18x288xf32>
    %cst_19 = arith.constant dense<0.000000e+00> : vector<16x288xf32>
    %17 = tpu.matmul %14, %16, %cst_19 {dimension_numbers = #tpu.dot_dimension_numbers<[1], [0], [0], [1], [0, 0, 1, 1], [], []>} : vector<16x18xf32>, vector<18x288xf32>, vector<16x288xf32> -> vector<16x288xf32>
    %18 = arith.addf %13, %17 : vector<16x288xf32>
    %19 = vector.broadcast %2 : vector<1x288xf32> to vector<16x288xf32>
    %20 = arith.addf %18, %19 : vector<16x288xf32>
    %cst_20 = arith.constant 0.000000e+00 : f32
    %21 = vector.broadcast %cst_20 : f32 to vector<16x288xf32>
    %22 = arith.cmpf oge, %20, %21 : vector<16x288xf32>
    %cst_21 = arith.constant 0.00999999977 : f32
    %23 = vector.broadcast %cst_21 : f32 to vector<16x288xf32>
    %24 = arith.mulf %23, %20 : vector<16x288xf32>
    %25 = arith.select %22, %20, %24 : vector<16x288xi1>, vector<16x288xf32>
    %c1_22 = arith.constant 1 : index
    %c0_23 = arith.constant 0 : index
    %26 = vector.load %arg12[%c1_22, %c0_23] : memref<36x288xf32, #tpu.memory_space<vmem>>, vector<16x288xf32>
    tpu.vector_store %arg12[%c1_22, %c0_23], %25 {strides = array<i32>} : memref<36x288xf32, #tpu.memory_space<vmem>>, vector<16x288xf32>,
    %c0_24 = arith.constant 0 : index
    %c0_25 = arith.constant 0 : index
    %27 = vector.load %arg2[%c0_24, %c0_25] : memref<1x288xf32, #tpu.memory_space<vmem>>, vector<1x288xf32>
    %cst_26 = arith.constant 0.000000e+00 : f32
    %28 = vector.broadcast %cst_26 : f32 to vector<16x288xf32>
    %c18 = arith.constant 18 : index
    %c0_27 = arith.constant 0 : index
    %29 = vector.load %arg0[%c18, %c0_27] : memref<36x18xf32, #tpu.memory_space<vmem>>, vector<16x18xf32>
    %c0_28 = arith.constant 0 : index
    %c0_29 = arith.constant 0 : index
    %c0_30 = arith.constant 0 : index
    %30 = vector.load %arg1[%c0_28, %c0_29, %c0_30] : memref<3x18x288xf32, #tpu.memory_space<vmem>>, vector<1x18x288xf32>
    %31 = vector.shape_cast %30 : vector<1x18x288xf32> to vector<18x288xf32>
    %cst_31 = arith.constant dense<0.000000e+00> : vector<16x288xf32>
    %32 = tpu.matmul %29, %31, %cst_31 {dimension_numbers = #tpu.dot_dimension_numbers<[1], [0], [0], [1], [0, 0, 1, 1], [], []>} : vector<16x18xf32>, vector<18x288xf32>, vector<16x288xf32> -> vector<16x288xf32>
    %33 = arith.addf %28, %32 : vector<16x288xf32>
    %c19 = arith.constant 19 : index
    %c0_32 = arith.constant 0 : index
    %34 = vector.load %arg0[%c19, %c0_32] : memref<36x18xf32, #tpu.memory_space<vmem>>, vector<16x18xf32>
    %c1_33 = arith.constant 1 : index
    %c0_34 = arith.constant 0 : index
    %c0_35 = arith.constant 0 : index
    %35 = vector.load %arg1[%c1_33, %c0_34, %c0_35] : memref<3x18x288xf32, #tpu.memory_space<vmem>>, vector<1x18x288xf32>
    %36 = vector.shape_cast %35 : vector<1x18x288xf32> to vector<18x288xf32>
    %cst_36 = arith.constant dense<0.000000e+00> : vector<16x288xf32>
    %37 = tpu.matmul %34, %36, %cst_36 {dimension_numbers = #tpu.dot_dimension_numbers<[1], [0], [0], [1], [0, 0, 1, 1], [], []>} : vector<16x18xf32>, vector<18x288xf32>, vector<16x288xf32> -> vector<16x288xf32>
    %38 = arith.addf %33, %37 : vector<16x288xf32>
    %c20 = arith.constant 20 : index
    %c0_37 = arith.constant 0 : index
    %39 = vector.load %arg0[%c20, %c0_37] : memref<36x18xf32, #tpu.memory_space<vmem>>, vector<16x18xf32>
    %c2_38 = arith.constant 2 : index
    %c0_39 = arith.constant 0 : index
    %c0_40 = arith.constant 0 : index
    %40 = vector.load %arg1[%c2_38, %c0_39, %c0_40] : memref<3x18x288xf32, #tpu.memory_space<vmem>>, vector<1x18x288xf32>
    %41 = vector.shape_cast %40 : vector<1x18x288xf32> to vector<18x288xf32>
    %cst_41 = arith.constant dense<0.000000e+00> : vector<16x288xf32>
    %42 = tpu.matmul %39, %41, %cst_41 {dimension_numbers = #tpu.dot_dimension_numbers<[1], [0], [0], [1], [0, 0, 1, 1], [], []>} : vector<16x18xf32>, vector<18x288xf32>, vector<16x288xf32> -> vector<16x288xf32>
    %43 = arith.addf %38, %42 : vector<16x288xf32>
    %44 = vector.broadcast %27 : vector<1x288xf32> to vector<16x288xf32>
    %45 = arith.addf %43, %44 : vector<16x288xf32>
    %cst_42 = arith.constant 0.000000e+00 : f32
    %46 = vector.broadcast %cst_42 : f32 to vector<16x288xf32>
    %47 = arith.cmpf oge, %45, %46 : vector<16x288xf32>
    %cst_43 = arith.constant 0.00999999977 : f32
    %48 = vector.broadcast %cst_43 : f32 to vector<16x288xf32>
    %49 = arith.mulf %48, %45 : vector<16x288xf32>
    %50 = arith.select %47, %45, %49 : vector<16x288xi1>, vector<16x288xf32>
    %c19_44 = arith.constant 19 : index
    %c0_45 = arith.constant 0 : index
    %51 = vector.load %arg12[%c19_44, %c0_45] : memref<36x288xf32, #tpu.memory_space<vmem>>, vector<16x288xf32>
    tpu.vector_store %arg12[%c19_44, %c0_45], %50 {strides = array<i32>} : memref<36x288xf32, #tpu.memory_space<vmem>>, vector<16x288xf32>,
    %c0_46 = arith.constant 0 : index
    %c0_47 = arith.constant 0 : index
    %52 = vector.load %arg12[%c0_46, %c0_47] : memref<36x288xf32, #tpu.memory_space<vmem>>, vector<36x288xf32>
    %cst_48 = arith.constant dense<0.000000e+00> : vector<288xf32>
    %53 = vector.multi_reduction <add>, %52, %cst_48 [0] : vector<36x288xf32> to vector<288xf32>
    %54 = vector.shape_cast %53 : vector<288xf32> to vector<1x288xf32>
    %c0_49 = arith.constant 0 : index
    %c0_50 = arith.constant 0 : index
    %55 = vector.load %arg3[%c0_49, %c0_50] : memref<288x16xf32, #tpu.memory_space<vmem>>, vector<288x16xf32>
    %cst_51 = arith.constant dense<0.000000e+00> : vector<1x16xf32>
    %56 = tpu.matmul %54, %55, %cst_51 {dimension_numbers = #tpu.dot_dimension_numbers<[1], [0], [0], [1], [0, 0, 1, 1], [], []>} : vector<1x288xf32>, vector<288x16xf32>, vector<1x16xf32> -> vector<1x16xf32>
    %cst_52 = arith.constant 0.001953125 : f32
    %57 = vector.broadcast %cst_52 : f32 to vector<1x16xf32>
    %58 = arith.mulf %56, %57 : vector<1x16xf32>
    %c0_53 = arith.constant 0 : index
    %c0_54 = arith.constant 0 : index
    %59 = vector.load %arg4[%c0_53, %c0_54] : memref<16x288xf32, #tpu.memory_space<vmem>>, vector<16x288xf32>
    %cst_55 = arith.constant dense<0.000000e+00> : vector<1x288xf32>
    %60 = tpu.matmul %58, %59, %cst_55 {dimension_numbers = #tpu.dot_dimension_numbers<[1], [0], [0], [1], [0, 0, 1, 1], [], []>} : vector<1x16xf32>, vector<16x288xf32>, vector<1x288xf32> -> vector<1x288xf32>
    %cst_56 = arith.constant 0.000000e+00 : f32
    %61 = vector.broadcast %cst_56 : f32 to vector<1x288xf32>
    %c1_57 = arith.constant 1 : index
    %c0_58 = arith.constant 0 : index
    %62 = vector.load %arg12[%c1_57, %c0_58] : memref<36x288xf32, #tpu.memory_space<vmem>>, vector<16x288xf32>
    %63 = vector.broadcast %60 : vector<1x288xf32> to vector<16x288xf32>
    %64 = arith.subf %62, %63 : vector<16x288xf32>
    %65 = arith.mulf %64, %64 : vector<16x288xf32>
    %cst_59 = arith.constant dense<0.000000e+00> : vector<288xf32>
    %66 = vector.multi_reduction <add>, %65, %cst_59 [0] : vector<16x288xf32> to vector<288xf32>
    %67 = vector.shape_cast %66 : vector<288xf32> to vector<1x288xf32>
    %68 = arith.addf %61, %67 : vector<1x288xf32>
    %c19_60 = arith.constant 19 : index
    %c0_61 = arith.constant 0 : index
    %69 = vector.load %arg12[%c19_60, %c0_61] : memref<36x288xf32, #tpu.memory_space<vmem>>, vector<16x288xf32>
    %70 = vector.broadcast %60 : vector<1x288xf32> to vector<16x288xf32>
    %71 = arith.subf %69, %70 : vector<16x288xf32>
    %72 = arith.mulf %71, %71 : vector<16x288xf32>
    %cst_62 = arith.constant dense<0.000000e+00> : vector<288xf32>
    %73 = vector.multi_reduction <add>, %72, %cst_62 [0] : vector<16x288xf32> to vector<288xf32>
    %74 = vector.shape_cast %73 : vector<288xf32> to vector<1x288xf32>
    %75 = arith.addf %68, %74 : vector<1x288xf32>
    %c0_63 = arith.constant 0 : index
    %c0_64 = arith.constant 0 : index
    %76 = vector.load %arg3[%c0_63, %c0_64] : memref<288x16xf32, #tpu.memory_space<vmem>>, vector<288x16xf32>
    %cst_65 = arith.constant dense<0.000000e+00> : vector<1x16xf32>
    %77 = tpu.matmul %75, %76, %cst_65 {dimension_numbers = #tpu.dot_dimension_numbers<[1], [0], [0], [1], [0, 0, 1, 1], [], []>} : vector<1x288xf32>, vector<288x16xf32>, vector<1x16xf32> -> vector<1x16xf32>
    %cst_66 = arith.constant 0.001953125 : f32
    %78 = vector.broadcast %cst_66 : f32 to vector<1x16xf32>
    %79 = arith.mulf %77, %78 : vector<1x16xf32>
    %c0_67 = arith.constant 0 : index
    %c0_68 = arith.constant 0 : index
    %80 = vector.load %arg5[%c0_67, %c0_68] : memref<1x16xf32, #tpu.memory_space<vmem>>, vector<1x16xf32>
    %cst_69 = arith.constant 9.99999974E-6 : f32
    %81 = vector.broadcast %cst_69 : f32 to vector<1x16xf32>
    %82 = arith.addf %79, %81 : vector<1x16xf32>
    %83 = math.rsqrt %82 : vector<1x16xf32>
    %84 = arith.mulf %80, %83 : vector<1x16xf32>
    %c0_70 = arith.constant 0 : index
    %c0_71 = arith.constant 0 : index
    %85 = vector.load %arg6[%c0_70, %c0_71] : memref<1x16xf32, #tpu.memory_space<vmem>>, vector<1x16xf32>
    %86 = arith.mulf %58, %84 : vector<1x16xf32>
    %87 = arith.subf %85, %86 : vector<1x16xf32>
    %c0_72 = arith.constant 0 : index
    %c0_73 = arith.constant 0 : index
    %88 = vector.load %arg4[%c0_72, %c0_73] : memref<16x288xf32, #tpu.memory_space<vmem>>, vector<16x288xf32>
    %cst_74 = arith.constant dense<0.000000e+00> : vector<1x288xf32>
    %89 = tpu.matmul %84, %88, %cst_74 {dimension_numbers = #tpu.dot_dimension_numbers<[1], [0], [0], [1], [0, 0, 1, 1], [], []>} : vector<1x16xf32>, vector<16x288xf32>, vector<1x288xf32> -> vector<1x288xf32>
    %c0_75 = arith.constant 0 : index
    %c0_76 = arith.constant 0 : index
    %90 = vector.load %arg4[%c0_75, %c0_76] : memref<16x288xf32, #tpu.memory_space<vmem>>, vector<16x288xf32>
    %cst_77 = arith.constant dense<0.000000e+00> : vector<1x288xf32>
    %91 = tpu.matmul %87, %90, %cst_77 {dimension_numbers = #tpu.dot_dimension_numbers<[1], [0], [0], [1], [0, 0, 1, 1], [], []>} : vector<1x16xf32>, vector<16x288xf32>, vector<1x288xf32> -> vector<1x288xf32>
    %c1_78 = arith.constant 1 : index
    %c0_79 = arith.constant 0 : index
    %92 = vector.load %arg12[%c1_78, %c0_79] : memref<36x288xf32, #tpu.memory_space<vmem>>, vector<16x288xf32>
    %93 = vector.broadcast %89 : vector<1x288xf32> to vector<16x288xf32>
    %94 = arith.mulf %92, %93 : vector<16x288xf32>
    %95 = vector.broadcast %91 : vector<1x288xf32> to vector<16x288xf32>
    %96 = arith.addf %94, %95 : vector<16x288xf32>
    %c1_80 = arith.constant 1 : index
    %c0_81 = arith.constant 0 : index
    %97 = vector.load %arg12[%c1_80, %c0_81] : memref<36x288xf32, #tpu.memory_space<vmem>>, vector<16x288xf32>
    tpu.vector_store %arg12[%c1_80, %c0_81], %96 {strides = array<i32>} : memref<36x288xf32, #tpu.memory_space<vmem>>, vector<16x288xf32>,
    %c19_82 = arith.constant 19 : index
    %c0_83 = arith.constant 0 : index
    %98 = vector.load %arg12[%c19_82, %c0_83] : memref<36x288xf32, #tpu.memory_space<vmem>>, vector<16x288xf32>
    %99 = vector.broadcast %89 : vector<1x288xf32> to vector<16x288xf32>
    %100 = arith.mulf %98, %99 : vector<16x288xf32>
    %101 = vector.broadcast %91 : vector<1x288xf32> to vector<16x288xf32>
    %102 = arith.addf %100, %101 : vector<16x288xf32>
    %c19_84 = arith.constant 19 : index
    %c0_85 = arith.constant 0 : index
    %103 = vector.load %arg12[%c19_84, %c0_85] : memref<36x288xf32, #tpu.memory_space<vmem>>, vector<16x288xf32>
    tpu.vector_store %arg12[%c19_84, %c0_85], %102 {strides = array<i32>} : memref<36x288xf32, #tpu.memory_space<vmem>>, vector<16x288xf32>,
    %c0_86 = arith.constant 0 : index
    %c0_87 = arith.constant 0 : index
    %104 = vector.load %arg8[%c0_86, %c0_87] : memref<1x288xf32, #tpu.memory_space<vmem>>, vector<1x288xf32>
    %cst_88 = arith.constant 0.000000e+00 : f32
    %105 = vector.broadcast %cst_88 : f32 to vector<16x288xf32>
    %c0_89 = arith.constant 0 : index
    %c0_90 = arith.constant 0 : index
    %106 = vector.load %arg12[%c0_89, %c0_90] : memref<36x288xf32, #tpu.memory_space<vmem>>, vector<16x288xf32>
    %c0_91 = arith.constant 0 : index
    %c0_92 = arith.constant 0 : index
    %c0_93 = arith.constant 0 : index
    %107 = vector.load %arg7[%c0_91, %c0_92, %c0_93] : memref<3x288x288xf32, #tpu.memory_space<vmem>>, vector<1x288x288xf32>
    %108 = vector.shape_cast %107 : vector<1x288x288xf32> to vector<288x288xf32>
    %cst_94 = arith.constant dense<0.000000e+00> : vector<16x288xf32>
    %109 = tpu.matmul %106, %108, %cst_94 {dimension_numbers = #tpu.dot_dimension_numbers<[1], [0], [0], [1], [0, 0, 1, 1], [], []>} : vector<16x288xf32>, vector<288x288xf32>, vector<16x288xf32> -> vector<16x288xf32>
    %110 = arith.addf %105, %109 : vector<16x288xf32>
    %c1_95 = arith.constant 1 : index
    %c0_96 = arith.constant 0 : index
    %111 = vector.load %arg12[%c1_95, %c0_96] : memref<36x288xf32, #tpu.memory_space<vmem>>, vector<16x288xf32>
    %c1_97 = arith.constant 1 : index
    %c0_98 = arith.constant 0 : index
    %c0_99 = arith.constant 0 : index
    %112 = vector.load %arg7[%c1_97, %c0_98, %c0_99] : memref<3x288x288xf32, #tpu.memory_space<vmem>>, vector<1x288x288xf32>
    %113 = vector.shape_cast %112 : vector<1x288x288xf32> to vector<288x288xf32>
    %cst_100 = arith.constant dense<0.000000e+00> : vector<16x288xf32>
    %114 = tpu.matmul %111, %113, %cst_100 {dimension_numbers = #tpu.dot_dimension_numbers<[1], [0], [0], [1], [0, 0, 1, 1], [], []>} : vector<16x288xf32>, vector<288x288xf32>, vector<16x288xf32> -> vector<16x288xf32>
    %115 = arith.addf %110, %114 : vector<16x288xf32>
    %c2_101 = arith.constant 2 : index
    %c0_102 = arith.constant 0 : index
    %116 = vector.load %arg12[%c2_101, %c0_102] : memref<36x288xf32, #tpu.memory_space<vmem>>, vector<16x288xf32>
    %c2_103 = arith.constant 2 : index
    %c0_104 = arith.constant 0 : index
    %c0_105 = arith.constant 0 : index
    %117 = vector.load %arg7[%c2_103, %c0_104, %c0_105] : memref<3x288x288xf32, #tpu.memory_space<vmem>>, vector<1x288x288xf32>
    %118 = vector.shape_cast %117 : vector<1x288x288xf32> to vector<288x288xf32>
    %cst_106 = arith.constant dense<0.000000e+00> : vector<16x288xf32>
    %119 = tpu.matmul %116, %118, %cst_106 {dimension_numbers = #tpu.dot_dimension_numbers<[1], [0], [0], [1], [0, 0, 1, 1], [], []>} : vector<16x288xf32>, vector<288x288xf32>, vector<16x288xf32> -> vector<16x288xf32>
    %120 = arith.addf %115, %119 : vector<16x288xf32>
    %121 = vector.broadcast %104 : vector<1x288xf32> to vector<16x288xf32>
    %122 = arith.addf %120, %121 : vector<16x288xf32>
    %cst_107 = arith.constant 0.000000e+00 : f32
    %123 = vector.broadcast %cst_107 : f32 to vector<16x288xf32>
    %124 = arith.cmpf oge, %122, %123 : vector<16x288xf32>
    %cst_108 = arith.constant 0.00999999977 : f32
    %125 = vector.broadcast %cst_108 : f32 to vector<16x288xf32>
    %126 = arith.mulf %125, %122 : vector<16x288xf32>
    %127 = arith.select %124, %122, %126 : vector<16x288xi1>, vector<16x288xf32>
    %c1_109 = arith.constant 1 : index
    %c0_110 = arith.constant 0 : index
    %128 = vector.load %arg12[%c1_109, %c0_110] : memref<36x288xf32, #tpu.memory_space<vmem>>, vector<16x288xf32>
    tpu.vector_store %arg12[%c1_109, %c0_110], %127 {strides = array<i32>} : memref<36x288xf32, #tpu.memory_space<vmem>>, vector<16x288xf32>,
    %c0_111 = arith.constant 0 : index
    %c0_112 = arith.constant 0 : index
    %129 = vector.load %arg8[%c0_111, %c0_112] : memref<1x288xf32, #tpu.memory_space<vmem>>, vector<1x288xf32>
    %cst_113 = arith.constant 0.000000e+00 : f32
    %130 = vector.broadcast %cst_113 : f32 to vector<16x288xf32>
    %c18_114 = arith.constant 18 : index
    %c0_115 = arith.constant 0 : index
    %131 = vector.load %arg12[%c18_114, %c0_115] : memref<36x288xf32, #tpu.memory_space<vmem>>, vector<16x288xf32>
    %c0_116 = arith.constant 0 : index
    %c0_117 = arith.constant 0 : index
    %c0_118 = arith.constant 0 : index
    %132 = vector.load %arg7[%c0_116, %c0_117, %c0_118] : memref<3x288x288xf32, #tpu.memory_space<vmem>>, vector<1x288x288xf32>
    %133 = vector.shape_cast %132 : vector<1x288x288xf32> to vector<288x288xf32>
    %cst_119 = arith.constant dense<0.000000e+00> : vector<16x288xf32>
    %134 = tpu.matmul %131, %133, %cst_119 {dimension_numbers = #tpu.dot_dimension_numbers<[1], [0], [0], [1], [0, 0, 1, 1], [], []>} : vector<16x288xf32>, vector<288x288xf32>, vector<16x288xf32> -> vector<16x288xf32>
    %135 = arith.addf %130, %134 : vector<16x288xf32>
    %c19_120 = arith.constant 19 : index
    %c0_121 = arith.constant 0 : index
    %136 = vector.load %arg12[%c19_120, %c0_121] : memref<36x288xf32, #tpu.memory_space<vmem>>, vector<16x288xf32>
    %c1_122 = arith.constant 1 : index
    %c0_123 = arith.constant 0 : index
    %c0_124 = arith.constant 0 : index
    %137 = vector.load %arg7[%c1_122, %c0_123, %c0_124] : memref<3x288x288xf32, #tpu.memory_space<vmem>>, vector<1x288x288xf32>
    %138 = vector.shape_cast %137 : vector<1x288x288xf32> to vector<288x288xf32>
    %cst_125 = arith.constant dense<0.000000e+00> : vector<16x288xf32>
    %139 = tpu.matmul %136, %138, %cst_125 {dimension_numbers = #tpu.dot_dimension_numbers<[1], [0], [0], [1], [0, 0, 1, 1], [], []>} : vector<16x288xf32>, vector<288x288xf32>, vector<16x288xf32> -> vector<16x288xf32>
    %140 = arith.addf %135, %139 : vector<16x288xf32>
    %c20_126 = arith.constant 20 : index
    %c0_127 = arith.constant 0 : index
    %141 = vector.load %arg12[%c20_126, %c0_127] : memref<36x288xf32, #tpu.memory_space<vmem>>, vector<16x288xf32>
    %c2_128 = arith.constant 2 : index
    %c0_129 = arith.constant 0 : index
    %c0_130 = arith.constant 0 : index
    %142 = vector.load %arg7[%c2_128, %c0_129, %c0_130] : memref<3x288x288xf32, #tpu.memory_space<vmem>>, vector<1x288x288xf32>
    %143 = vector.shape_cast %142 : vector<1x288x288xf32> to vector<288x288xf32>
    %cst_131 = arith.constant dense<0.000000e+00> : vector<16x288xf32>
    %144 = tpu.matmul %141, %143, %cst_131 {dimension_numbers = #tpu.dot_dimension_numbers<[1], [0], [0], [1], [0, 0, 1, 1], [], []>} : vector<16x288xf32>, vector<288x288xf32>, vector<16x288xf32> -> vector<16x288xf32>
    %145 = arith.addf %140, %144 : vector<16x288xf32>
    %146 = vector.broadcast %129 : vector<1x288xf32> to vector<16x288xf32>
    %147 = arith.addf %145, %146 : vector<16x288xf32>
    %cst_132 = arith.constant 0.000000e+00 : f32
    %148 = vector.broadcast %cst_132 : f32 to vector<16x288xf32>
    %149 = arith.cmpf oge, %147, %148 : vector<16x288xf32>
    %cst_133 = arith.constant 0.00999999977 : f32
    %150 = vector.broadcast %cst_133 : f32 to vector<16x288xf32>
    %151 = arith.mulf %150, %147 : vector<16x288xf32>
    %152 = arith.select %149, %147, %151 : vector<16x288xi1>, vector<16x288xf32>
    %c19_134 = arith.constant 19 : index
    %c0_135 = arith.constant 0 : index
    %153 = vector.load %arg12[%c19_134, %c0_135] : memref<36x288xf32, #tpu.memory_space<vmem>>, vector<16x288xf32>
    tpu.vector_store %arg12[%c19_134, %c0_135], %152 {strides = array<i32>} : memref<36x288xf32, #tpu.memory_space<vmem>>, vector<16x288xf32>,
    %c0_136 = arith.constant 0 : index
    %c0_137 = arith.constant 0 : index
    %154 = vector.load %arg10[%c0_136, %c0_137] : memref<1x256xf32, #tpu.memory_space<vmem>>, vector<1x256xf32>
    %cst_138 = arith.constant 0.000000e+00 : f32
    %155 = vector.broadcast %cst_138 : f32 to vector<16x256xf32>
    %c0_139 = arith.constant 0 : index
    %c0_140 = arith.constant 0 : index
    %156 = vector.load %arg12[%c0_139, %c0_140] : memref<36x288xf32, #tpu.memory_space<vmem>>, vector<16x288xf32>
    %c0_141 = arith.constant 0 : index
    %c0_142 = arith.constant 0 : index
    %c0_143 = arith.constant 0 : index
    %157 = vector.load %arg9[%c0_141, %c0_142, %c0_143] : memref<3x288x256xf32, #tpu.memory_space<vmem>>, vector<1x288x256xf32>
    %158 = vector.shape_cast %157 : vector<1x288x256xf32> to vector<288x256xf32>
    %cst_144 = arith.constant dense<0.000000e+00> : vector<16x256xf32>
    %159 = tpu.matmul %156, %158, %cst_144 {dimension_numbers = #tpu.dot_dimension_numbers<[1], [0], [0], [1], [0, 0, 1, 1], [], []>} : vector<16x288xf32>, vector<288x256xf32>, vector<16x256xf32> -> vector<16x256xf32>
    %160 = arith.addf %155, %159 : vector<16x256xf32>
    %c1_145 = arith.constant 1 : index
    %c0_146 = arith.constant 0 : index
    %161 = vector.load %arg12[%c1_145, %c0_146] : memref<36x288xf32, #tpu.memory_space<vmem>>, vector<16x288xf32>
    %c1_147 = arith.constant 1 : index
    %c0_148 = arith.constant 0 : index
    %c0_149 = arith.constant 0 : index
    %162 = vector.load %arg9[%c1_147, %c0_148, %c0_149] : memref<3x288x256xf32, #tpu.memory_space<vmem>>, vector<1x288x256xf32>
    %163 = vector.shape_cast %162 : vector<1x288x256xf32> to vector<288x256xf32>
    %cst_150 = arith.constant dense<0.000000e+00> : vector<16x256xf32>
    %164 = tpu.matmul %161, %163, %cst_150 {dimension_numbers = #tpu.dot_dimension_numbers<[1], [0], [0], [1], [0, 0, 1, 1], [], []>} : vector<16x288xf32>, vector<288x256xf32>, vector<16x256xf32> -> vector<16x256xf32>
    %165 = arith.addf %160, %164 : vector<16x256xf32>
    %c2_151 = arith.constant 2 : index
    %c0_152 = arith.constant 0 : index
    %166 = vector.load %arg12[%c2_151, %c0_152] : memref<36x288xf32, #tpu.memory_space<vmem>>, vector<16x288xf32>
    %c2_153 = arith.constant 2 : index
    %c0_154 = arith.constant 0 : index
    %c0_155 = arith.constant 0 : index
    %167 = vector.load %arg9[%c2_153, %c0_154, %c0_155] : memref<3x288x256xf32, #tpu.memory_space<vmem>>, vector<1x288x256xf32>
    %168 = vector.shape_cast %167 : vector<1x288x256xf32> to vector<288x256xf32>
    %cst_156 = arith.constant dense<0.000000e+00> : vector<16x256xf32>
    %169 = tpu.matmul %166, %168, %cst_156 {dimension_numbers = #tpu.dot_dimension_numbers<[1], [0], [0], [1], [0, 0, 1, 1], [], []>} : vector<16x288xf32>, vector<288x256xf32>, vector<16x256xf32> -> vector<16x256xf32>
    %170 = arith.addf %165, %169 : vector<16x256xf32>
    %171 = vector.broadcast %154 : vector<1x256xf32> to vector<16x256xf32>
    %172 = arith.addf %170, %171 : vector<16x256xf32>
    %cst_157 = arith.constant 0.000000e+00 : f32
    %173 = vector.broadcast %cst_157 : f32 to vector<16x256xf32>
    %174 = arith.cmpf oge, %172, %173 : vector<16x256xf32>
    %cst_158 = arith.constant 0.00999999977 : f32
    %175 = vector.broadcast %cst_158 : f32 to vector<16x256xf32>
    %176 = arith.mulf %175, %172 : vector<16x256xf32>
    %177 = arith.select %174, %172, %176 : vector<16x256xi1>, vector<16x256xf32>
    %c0_159 = arith.constant 0 : index
    %c0_160 = arith.constant 0 : index
    %178 = vector.load %arg11[%c0_159, %c0_160] : memref<32x256xf32, #tpu.memory_space<vmem>>, vector<16x256xf32>
    tpu.vector_store %arg11[%c0_159, %c0_160], %177 {strides = array<i32>} : memref<32x256xf32, #tpu.memory_space<vmem>>, vector<16x256xf32>,
    %c0_161 = arith.constant 0 : index
    %c0_162 = arith.constant 0 : index
    %179 = vector.load %arg10[%c0_161, %c0_162] : memref<1x256xf32, #tpu.memory_space<vmem>>, vector<1x256xf32>
    %cst_163 = arith.constant 0.000000e+00 : f32
    %180 = vector.broadcast %cst_163 : f32 to vector<16x256xf32>
    %c18_164 = arith.constant 18 : index
    %c0_165 = arith.constant 0 : index
    %181 = vector.load %arg12[%c18_164, %c0_165] : memref<36x288xf32, #tpu.memory_space<vmem>>, vector<16x288xf32>
    %c0_166 = arith.constant 0 : index
    %c0_167 = arith.constant 0 : index
    %c0_168 = arith.constant 0 : index
    %182 = vector.load %arg9[%c0_166, %c0_167, %c0_168] : memref<3x288x256xf32, #tpu.memory_space<vmem>>, vector<1x288x256xf32>
    %183 = vector.shape_cast %182 : vector<1x288x256xf32> to vector<288x256xf32>
    %cst_169 = arith.constant dense<0.000000e+00> : vector<16x256xf32>
    %184 = tpu.matmul %181, %183, %cst_169 {dimension_numbers = #tpu.dot_dimension_numbers<[1], [0], [0], [1], [0, 0, 1, 1], [], []>} : vector<16x288xf32>, vector<288x256xf32>, vector<16x256xf32> -> vector<16x256xf32>
    %185 = arith.addf %180, %184 : vector<16x256xf32>
    %c19_170 = arith.constant 19 : index
    %c0_171 = arith.constant 0 : index
    %186 = vector.load %arg12[%c19_170, %c0_171] : memref<36x288xf32, #tpu.memory_space<vmem>>, vector<16x288xf32>
    %c1_172 = arith.constant 1 : index
    %c0_173 = arith.constant 0 : index
    %c0_174 = arith.constant 0 : index
    %187 = vector.load %arg9[%c1_172, %c0_173, %c0_174] : memref<3x288x256xf32, #tpu.memory_space<vmem>>, vector<1x288x256xf32>
    %188 = vector.shape_cast %187 : vector<1x288x256xf32> to vector<288x256xf32>
    %cst_175 = arith.constant dense<0.000000e+00> : vector<16x256xf32>
    %189 = tpu.matmul %186, %188, %cst_175 {dimension_numbers = #tpu.dot_dimension_numbers<[1], [0], [0], [1], [0, 0, 1, 1], [], []>} : vector<16x288xf32>, vector<288x256xf32>, vector<16x256xf32> -> vector<16x256xf32>
    %190 = arith.addf %185, %189 : vector<16x256xf32>
    %c20_176 = arith.constant 20 : index
    %c0_177 = arith.constant 0 : index
    %191 = vector.load %arg12[%c20_176, %c0_177] : memref<36x288xf32, #tpu.memory_space<vmem>>, vector<16x288xf32>
    %c2_178 = arith.constant 2 : index
    %c0_179 = arith.constant 0 : index
    %c0_180 = arith.constant 0 : index
    %192 = vector.load %arg9[%c2_178, %c0_179, %c0_180] : memref<3x288x256xf32, #tpu.memory_space<vmem>>, vector<1x288x256xf32>
    %193 = vector.shape_cast %192 : vector<1x288x256xf32> to vector<288x256xf32>
    %cst_181 = arith.constant dense<0.000000e+00> : vector<16x256xf32>
    %194 = tpu.matmul %191, %193, %cst_181 {dimension_numbers = #tpu.dot_dimension_numbers<[1], [0], [0], [1], [0, 0, 1, 1], [], []>} : vector<16x288xf32>, vector<288x256xf32>, vector<16x256xf32> -> vector<16x256xf32>
    %195 = arith.addf %190, %194 : vector<16x256xf32>
    %196 = vector.broadcast %179 : vector<1x256xf32> to vector<16x256xf32>
    %197 = arith.addf %195, %196 : vector<16x256xf32>
    %cst_182 = arith.constant 0.000000e+00 : f32
    %198 = vector.broadcast %cst_182 : f32 to vector<16x256xf32>
    %199 = arith.cmpf oge, %197, %198 : vector<16x256xf32>
    %cst_183 = arith.constant 0.00999999977 : f32
    %200 = vector.broadcast %cst_183 : f32 to vector<16x256xf32>
    %201 = arith.mulf %200, %197 : vector<16x256xf32>
    %202 = arith.select %199, %197, %201 : vector<16x256xi1>, vector<16x256xf32>
    %c16 = arith.constant 16 : index
    %c0_184 = arith.constant 0 : index
    %203 = vector.load %arg11[%c16, %c0_184] : memref<32x256xf32, #tpu.memory_space<vmem>>, vector<16x256xf32>
    tpu.vector_store %arg11[%c16, %c0_184], %202 {strides = array<i32>} : memref<32x256xf32, #tpu.memory_space<vmem>>, vector<16x256xf32>,
    return
  }
}

</mosaic_0001>

<bundles_post_ra>
// kernel: tpu_custom_call.1
= control target key start
LH: loop header
LB: loop body
LE: loop exit
PB: predicated region body
PF: predicated region fallthrough
CT: control target
= control target key end

     0   :  { %16 = vsyncpa [#allocation4], 0  ;;  %s9488_s0 = inlined_call_operand.vmem [shape: f32[36,18], index: 0, kind: input, shape index: {}]   ;;  %s9489_s1 = inlined_call_operand.hbm [shape: f32[3,18,288], index: 1, kind: input, shape index: {}]   ;;  %s9490_s2 = inlined_call_operand.hbm [shape: f32[1,288], index: 2, kind: input, shape index: {}]   ;;  %s9491_s3 = inlined_call_operand.vmem [shape: f32[288,16], index: 3, kind: input, shape index: {}]   ;;  %s9492_s4 = inlined_call_operand.hbm [shape: f32[16,288], index: 4, kind: input, shape index: {}]   ;;  %s9493_s5 = inlined_call_operand.hbm [shape: f32[1,16], index: 5, kind: input, shape index: {}]   ;;  %s9494_s6 = inlined_call_operand.hbm [shape: f32[1,16], index: 6, kind: input, shape index: {}]   ;;  %s9495_s7 = inlined_call_operand.hbm [shape: f32[3,288,288], index: 7, kind: input, shape index: {}]   ;;  %s9496_s8 = inlined_call_operand.hbm [shape: f32[1,288], index: 8, kind: input, shape index: {}]   ;;  %s9497_s9 = inlined_call_operand.hbm [shape: f32[3,288,256], index: 9, kind: input, shape index: {}]   ;;  %s9498_s10 = inlined_call_operand.hbm [shape: f32[1,256], index: 10, kind: input, shape index: {}]   ;;  %s9499_s11 = inlined_call_operand.hbm [shape: f32[32,256], index: 11, kind: output, shape index: {}]  }
   0x1   :  { %17 = vsyncpa [#allocation7], 0 }
   0x2   :  { %18 = vsyncpa [#allocation10], 0 }
   0x3   :  { %19 = vsyncpa [#allocation13], 0 }
   0x4   :  { %20 = vsyncpa [#allocation16], 0 }
   0x5   :  { %21 = vsyncpa [#allocation5], 0  ;;  %s7841_s17 = smov [#allocation6]   ;;  %s7842_s19 = smov [#allocation9]  }
   0x6   :  { %s42_s18 = sshll.u32 %s7841_s17, 4  ;;  %s66_s20 = sshll.u32 %s7842_s19, 4  ;;  %s43_s18 = int_to_ptr.vmem [resolvable:$true] %s42_s18  ;;  %s67_s20 = int_to_ptr.vmem [resolvable:$true] %s66_s20 }
   0x7   :  { %s7637_s21 = scalar_lea.vmem %s43_s18, 48  ;;  %s7641_s22 = scalar_lea.vmem %s43_s18, 64 }
   0x8   :  { %p7638_p0 = scmp.ne.s32.totalorder %s43_s18, %s7637_s21  ;;  %p7642_p1 = scmp.lt.s32.totalorder %s43_s18, %s43_s18 }
   0x9   :  { %p7643_p2 = scmp.lt.s32.totalorder %s7641_s22, %s7637_s21 }
   0xb   :  { %p7644_p3 = por %p7643_p2, %p7642_p1 }
   0xd   :  { %p7645_p4 = pnand %p7644_p3, %p7638_p0 }
   0xf   :  { %7648 = shalt.err (!%p7645_p4)
}
  0x10   :  { %45 = dma.hbm_to_vmem [thread:$0]  %s9490_s2, 48, %s43_s18, [#allocation7]  }
  0x11   :  { %s7657_s25 = scalar_lea.vmem %s67_s20, 16  ;;  %s7661_s26 = scalar_lea.vmem %s67_s20, 32 }
  0x12   :  { %p7658_p5 = scmp.ne.s32.totalorder %s67_s20, %s7657_s25  ;;  %p7662_p6 = scmp.lt.s32.totalorder %s67_s20, %s67_s20 }
  0x13   :  { %p7663_p7 = scmp.lt.s32.totalorder %s7661_s26, %s7657_s25 }
  0x15   :  { %p7664_p8 = por %p7663_p7, %p7662_p6 }
  0x17   :  { %p7665_p9 = pnand %p7664_p8, %p7658_p5 }
  0x19   :  { %7668 = shalt.err (!%p7665_p9)
}
  0x1a   :  { %69 = dma.hbm_to_vmem [thread:$0]  %s9493_s5, 16, %s67_s20, [#allocation10]  }
  0x1b   :  { %s7843_s29 = smov [#allocation12]   ;;  %s7844_s12 = smov [#allocation15]  }
  0x1c   :  { %s85_s30 = sshll.u32 %s7843_s29, 4  ;;  %s107_s13 = sshll.u32 %s7844_s12, 4  ;;  %s86_s30 = int_to_ptr.vmem [resolvable:$true] %s85_s30  ;;  %s108_s13 = int_to_ptr.vmem [resolvable:$true] %s107_s13 }
  0x1d   :  { %s7677_s14 = scalar_lea.vmem %s86_s30, 41472  ;;  %p7682_p11 = scmp.lt.s32.totalorder %s86_s30, %s86_s30 }
  0x1e   :  { %p7678_p10 = scmp.ne.s32.totalorder %s86_s30, %s7677_s14  ;;  %p7683_p12 = scmp.lt.s32.totalorder %s7677_s14, %s7677_s14 }
  0x20   :  { %p7684_p13 = por %p7683_p12, %p7682_p11 }
  0x22   :  { %p7685_p0 = pnand %p7684_p13, %p7678_p10 }
  0x24   :  { %7688 = shalt.err (!%p7685_p0)
}
  0x25   :  { %s7845_s2 = smov 384   ;;  %s7846_s15 = smov 24  }
  0x26   :  { %91 = dma.hbm_to_vmem [thread:$0]  %s9495_s7, 41472, %s86_s30, [#allocation13], %s7845_s2, %s7845_s2, %s7846_s15  }
  0x27   :  { %s7697_s17 = scalar_lea.vmem %s108_s13, 27648  ;;  %p7702_p2 = scmp.lt.s32.totalorder %s108_s13, %s108_s13 }
  0x28   :  { %p7698_p1 = scmp.ne.s32.totalorder %s108_s13, %s7697_s17  ;;  %p7703_p3 = scmp.lt.s32.totalorder %s7697_s17, %s7697_s17 }
  0x2a   :  { %p7704_p4 = por %p7703_p3, %p7702_p2 }
  0x2c   :  { %p7705_p5 = pnand %p7704_p4, %p7698_p1 }
  0x2e   :  { %7708 = shalt.err (!%p7705_p5)
}
  0x2f   :  { %s7847_s18 = smov 256   ;;  %s7848_s19 = smov 16  }
  0x30   :  { %113 = dma.hbm_to_vmem [thread:$0]  %s9497_s9, 27648, %s108_s13, [#allocation16], %s7847_s18, %s7847_s18, %s7848_s19  }
  0x31   :  { %s7849_s22 = smov [#allocation3]   ;;  %s7850_s24 = smov [#allocation8]  }
  0x32   :  { %s29_s23 = sshll.u32 %s7849_s22, 4  ;;  %s53_s7 = sshll.u32 %s7850_s24, 4  ;;  %s30_s23 = int_to_ptr.vmem [resolvable:$true] %s29_s23  ;;  %s54_s7 = int_to_ptr.vmem [resolvable:$true] %s53_s7 }
  0x33   :  { %s7717_s25 = scalar_lea.vmem %s30_s23, 3456  ;;  %p7722_p7 = scmp.lt.s32.totalorder %s30_s23, %s30_s23 }
  0x34   :  { %p7718_p6 = scmp.ne.s32.totalorder %s30_s23, %s7717_s25  ;;  %p7723_p8 = scmp.lt.s32.totalorder %s7717_s25, %s7717_s25 }
  0x36   :  { %p7724_p9 = por %p7723_p8, %p7722_p7 }
  0x38   :  { %p7725_p10 = pnand %p7724_p9, %p7718_p6 }
  0x3a   :  { %7728 = shalt.err (!%p7725_p10)
}
  0x3b   :  { %35 = dma.hbm_to_vmem [thread:$0]  %s9489_s1, 3456, %s30_s23, [#allocation4], %s7845_s2, %s7845_s2, %s7846_s15  }
  0x3c   :  { %s7737_s9 = scalar_lea.vmem %s54_s7, 768  ;;  %p7742_p12 = scmp.lt.s32.totalorder %s54_s7, %s54_s7 }
  0x3d   :  { %p7738_p11 = scmp.ne.s32.totalorder %s54_s7, %s7737_s9  ;;  %p7743_p13 = scmp.lt.s32.totalorder %s7737_s9, %s7737_s9 }
  0x3f   :  { %p7744_p0 = por %p7743_p13, %p7742_p12 }
  0x41   :  { %p7745_p1 = pnand %p7744_p0, %p7738_p11 }
  0x43   :  { %7748 = shalt.err (!%p7745_p1)
}
  0x44   :  { %59 = dma.hbm_to_vmem [thread:$0]  %s9492_s4, 768, %s54_s7, [#allocation7], %s7845_s2, %s7845_s2, %s7846_s15  }
  0x45   :  { %s7851_s30 = smov [#allocation11]   ;;  %s7852_s13 = smov [#allocation14]  }
  0x46   :  { %s76_s12 = sshll.u32 %s7851_s30, 4  ;;  %s98_s14 = sshll.u32 %s7852_s13, 4  ;;  %s77_s12 = int_to_ptr.vmem [resolvable:$true] %s76_s12  ;;  %s99_s14 = int_to_ptr.vmem [resolvable:$true] %s98_s14 }
  0x47   :  { %s7757_s1 = scalar_lea.vmem %s77_s12, 16  ;;  %s7761_s16 = scalar_lea.vmem %s77_s12, 32 }
  0x48   :  { %p7758_p2 = scmp.ne.s32.totalorder %s77_s12, %s7757_s1  ;;  %p7762_p3 = scmp.lt.s32.totalorder %s77_s12, %s77_s12 }
  0x49   :  { %p7763_p4 = scmp.lt.s32.totalorder %s7761_s16, %s7757_s1 }
  0x4b   :  { %p7764_p5 = por %p7763_p4, %p7762_p3 }
  0x4d   :  { %p7765_p6 = pnand %p7764_p5, %p7758_p2 }
  0x4f   :  { %7768 = shalt.err (!%p7765_p6)
}
  0x50   :  { %79 = dma.hbm_to_vmem [thread:$0]  %s9494_s6, 16, %s77_s12, [#allocation10]  }
  0x51   :  { %s7777_s20 = scalar_lea.vmem %s99_s14, 48  ;;  %s7781_s4 = scalar_lea.vmem %s99_s14, 64 }
  0x52   :  { %p7778_p7 = scmp.ne.s32.totalorder %s99_s14, %s7777_s20  ;;  %p7782_p8 = scmp.lt.s32.totalorder %s99_s14, %s99_s14 }
  0x53   :  { %p7783_p9 = scmp.lt.s32.totalorder %s7781_s4, %s7777_s20 }
  0x55   :  { %p7784_p10 = por %p7783_p9, %p7782_p8 }
  0x57   :  { %p7785_p11 = pnand %p7784_p10, %p7778_p7 }
  0x59   :  { %7788 = shalt.err (!%p7785_p11)
}
  0x5a   :  { %101 = dma.hbm_to_vmem [thread:$0]  %s9496_s8, 48, %s99_s14, [#allocation13]  }
  0x5b   :  { %s7853_s21 = smov [#allocation17]  }
  0x5c   :  { %s120_s22 = sshll.u32 %s7853_s21, 4  ;;  %s121_s22 = int_to_ptr.vmem [resolvable:$true] %s120_s22 }
  0x5d   :  { %s7797_s23 = scalar_lea.vmem %s121_s22, 32  ;;  %p7802_p13 = scmp.lt.s32.totalorder %s121_s22, %s121_s22 }
  0x5e   :  { %p7798_p12 = scmp.ne.s32.totalorder %s121_s22, %s7797_s23  ;;  %p7803_p0 = scmp.lt.s32.totalorder %s7797_s23, %s7797_s23 }
  0x60   :  { %p7804_p1 = por %p7803_p0, %p7802_p13 }
  0x62   :  { %p7805_p2 = pnand %p7804_p1, %p7798_p12 }
  0x64   :  { %7808 = shalt.err (!%p7805_p2)
}
  0x65   :  { %123 = dma.hbm_to_vmem [thread:$0]  %s9498_s10, 32, %s121_s22, [#allocation16]  }
  0x66   :  { %7829 = dma.done.wait [#allocation4], 3456  }
  0x67   :  { %7830 = vsyncadd [#allocation4], 4294963840 }
  0x68   :  { %7831 = dma.done.wait [#allocation7], 816  }
  0x69   :  { %7832 = vsyncadd [#allocation7], 4294966480 }
  0x6a   :  { %7833 = dma.done.wait [#allocation10], 32  }
  0x6b   :  { %7834 = vsyncadd [#allocation10], 4294967264 }
  0x6c   :  { %7835 = dma.done.wait [#allocation13], 41520  }
  0x6d   :  { %7836 = vsyncadd [#allocation13], 4294925776 }
  0x6e   :  { %7837 = dma.done.wait [#allocation16], 27680  }
  0x6f   :  { %7838 = vsyncadd [#allocation16], 4294939616  ;;  %v9500_v0 = vmov 0.0   ;;  %vm199_vm0 = vcmask 1041408   ;;  %v190_v1 = vld [vmem:[#allocation3 + $0x80] sm:$0x3] }
  0x70   :  { %273 = vmatprep.mubr.f32.mxu0 %v9500_v0  ;;  %151 = vst [vmem:[#allocation2] sm:$0xff] %v9500_v0  ;;  %152 = vst [vmem:[#allocation2 + $0x8] sm:$0xff] %v9500_v0  ;;  %v191_v2 = vld [vmem:[#allocation3 + $0x88] sm:$0x3]  ;;  %v189_v3 = vld [vmem:[#allocation3 + $0x78] sm:$0x3]  ;;  %6969 = vmatprep.subr.msk.mxu0 %vm199_vm0, %v190_v1 }
  0x71   :  { %158 = vst [vmem:[#allocation2 + $0x30] sm:$0xff] %v9500_v0  ;;  %159 = vst [vmem:[#allocation2 + $0x38] sm:$0xff] %v9500_v0  ;;  %7438 = vmatprep.subr.msk.mxu1 %vm199_vm0, %v191_v2  ;;  %v7965_v4 = vld [vmem:[#allocation3 + $0x68] sm:$0xff]  ;;  %v7967_v5 = vld [vmem:[#allocation3 + $0x70] sm:$0xff]  ;;  %6970 = vmatpush1.msk.msra.mxu0 %vm199_vm0, %v189_v3  ;;  %vm192_vm1 = vcmask 146432   ;;  %vm153_vm2 = vcmask 261120  }
  0x72   :  { %164 = vst [vmem:[#allocation2 + $0x60] sm:$0xf] %v9500_v0  ;;  %165 = vst [vmem:[#allocation2 + $0x68] sm:$0xf] %v9500_v0  ;;  %v7969_v6 = vld [vmem:[#allocation3 + $0x60] sm:$0xff]  ;;  %7439 = vmatpush3.msk.msra.mxu1 %vm199_vm0, %v191_v2  ;;  %v7973_v7 = vld [vmem:[#allocation3 + $0x50] sm:$0xff]  ;;  %237 = vmatprep.subr.mxu0 %v7965_v4 }
  0x73   :  { %v7975_v8 = vld [vmem:[#allocation3 + $0x58] sm:$0xff]  ;;  %7440 = vmatprep.subr.mxu1 %v7967_v5  ;;  %v7979_v9 = vld [vmem:[#allocation3 + $0x48] sm:$0xff]  ;;  %238 = vmatpush1.msra.mxu0 %v7969_v6  ;;  %v177_v13 = vld [vmem:[#allocation3 + $0x30] sm:$0x3]  ;;  %160 = vst.msk [vmem:[#allocation2 + $0x40] sm:$0xff] %vm153_vm2, %v9500_v0  ;;  %vm166_vm3 = vcmask 257024  }
  0x74   :  { %7441 = vmatpush3.msra.mxu1 %v7967_v5  ;;  %v180_v10 = vld [vmem:[%s9488_s0 + $0x1] sm:$0xff]  ;;  %239 = vmatprep.subr.mxu0 %v7973_v7  ;;  %v181_v11 = vld [vmem:[%s9488_s0 + $0x9] sm:$0xff]  ;;  %v179_v14 = vld [vmem:[#allocation3 + $0x40] sm:$0x3]  ;;  %154 = vst.msk [vmem:[#allocation2 + $0x10] sm:$0xff] %vm153_vm2, %v9500_v0  ;;  %vm7855_vm4 = vmmov 0  }
  0x75   :  { %7442 = vmatprep.subr.mxu1 %v7975_v8  ;;  %v178_v12 = vld [vmem:[#allocation3 + $0x38] sm:$0x3]  ;;  %240 = vmatpush1.msra.mxu0 %v7979_v9  ;;  %v7995_v15 = vld [vmem:[#allocation3 + $0x20] sm:$0xff]  ;;  %v8003_v17 = vld [vmem:[#allocation3 + $0x28] sm:$0xff]  ;;  %157 = vst.msk [vmem:[#allocation2 + $0x28] sm:$0xff] %vm153_vm2, %v9500_v0  ;;  %vm787_vm6 = vcmask 253952  }
  0x76   :  { %7443 = vmatpush3.msra.mxu1 %v7975_v8  ;;  %7444 = vmatprep.mubr.msk.f32.mxu1 %vm192_vm1, %v180_v10  ;;  %v7999_v16 = vld [vmem:[#allocation3 + $0x18] sm:$0xff]  ;;  %v8007_v18 = vld [vmem:[#allocation3 + $0x8] sm:$0xff]  ;;  %v8011_v19 = vld [vmem:[#allocation3] sm:$0xff]  ;;  %163 = vst.msk [vmem:[#allocation2 + $0x58] sm:$0xff] %vm153_vm2, %v9500_v0  ;;  %vm759_vm10 = vcmask 1040384   ;;  %vm780_vm11 = vcmask 261121  }
  0x77   :  { %6971 = vmatmul.mubr.msk.f32.vlgmr.msra.gmra.mxu0 %vm192_vm1, %v180_v10  ;;  %7445 = vmatmul.mubr.msk.f32.vlgmr.msra.gmra.mxu1 %vm192_vm1, %v181_v11  ;;  %v8015_v20 = vld [vmem:[#allocation3 + $0x10] sm:$0xff]  ;;  %v169_v21 = vld [vmem:[%s9488_s0] sm:$0xff]  ;;  %v537_v25 = vld [vmem:[#allocation3 + $0xc0] sm:$0x3]  ;;  %167 = vst.msk [vmem:[#allocation2 + $0x70] sm:$0xf] %vm166_vm3, %v9500_v0 }
  0x78   :  { %6976 = vmatprep.subr.msk.mxu1 %vm199_vm0, %v178_v12  ;;  %7447 = vmatprep.subr.msk.mxu0 %vm199_vm0, %v179_v14  ;;  %v539_v22 = vld [vmem:[#allocation3 + $0xd0] sm:$0x3]  ;;  %v538_v23 = vld [vmem:[#allocation3 + $0xc8] sm:$0x3]  ;;  %v8035_v27 = vld [vmem:[#allocation3 + $0xb8] sm:$0xff] }
  0x79   :  { %6977 = vmatpush1.msk.msra.mxu1 %vm199_vm0, %v177_v13  ;;  %7448 = vmatpush3.msk.msra.mxu0 %vm199_vm0, %v179_v14  ;;  %v170_v24 = vld [vmem:[%s9488_s0 + $0x8] sm:$0xff]  ;;  %v8039_v28 = vld [vmem:[#allocation3 + $0xa8] sm:$0xff]  ;;  %v8043_v29 = vld [vmem:[#allocation3 + $0x98] sm:$0xff] }
  0x7a   :  { %404 = vmatprep.subr.mxu1 %v7995_v15  ;;  %279 = vmatprep.mubr.f32.mxu0 %v9500_v0  ;;  %v8033_v26 = vld [vmem:[#allocation3 + $0xb0] sm:$0xff]  ;;  %v8047_v30 = vld [vmem:[#allocation3 + $0xa0] sm:$0xff]  ;;  %v809_v35 = vld [vmem:[#allocation3 + $0x78] sm:$0x3] }
  0x7b   :  { %405 = vmatpush1.msra.mxu1 %v7999_v16  ;;  %7449 = vmatprep.subr.mxu0 %v8003_v17  ;;  %v8049_v31 = vld [vmem:[#allocation3 + $0x90] sm:$0xff]  ;;  %v810_v33 = vld [vmem:[#allocation3 + $0x80] sm:$0x3]  ;;  %v811_v36 = vld [vmem:[#allocation3 + $0x88] sm:$0x3] }
  0x7c   :  { %6972 = vmatmul.mubr.msk.f32.gmra.mxu0 %vm192_vm1, %v181_v11  ;;  %406 = vmatprep.subr.mxu1 %v8007_v18  ;;  %v528_v32 = vld [vmem:[%s9488_s0 + $0x2] sm:$0xff]  ;;  %v529_v34 = vld [vmem:[%s9488_s0 + $0xa] sm:$0xff]  ;;  %v801_v37 = vld [vmem:[%s9488_s0 + $0x13] sm:$0xff] }
  0x7d   :  { %7450 = vmatpush3.msra.mxu0 %v8003_v17  ;;  %407 = vmatpush1.msra.mxu1 %v8011_v19  ;;  %v800_v38 = vld [vmem:[#allocation3 + $0x40] sm:$0x3]  ;;  %v799_v39 = vld [vmem:[#allocation3 + $0x38] sm:$0x3]  ;;  %v802_v40 = vld [vmem:[%s9488_s0 + $0x1b] sm:$0xff] }
  0x7e   :  { %440 = vmatprep.mubr.f32.mxu1 %v9500_v0  ;;  %7451 = vmatprep.subr.mxu0 %v8015_v20  ;;  %v798_v41 = vld [vmem:[#allocation3 + $0x30] sm:$0x3]  ;;  %v790_v42 = vld [vmem:[%s9488_s0 + $0x12] sm:$0xff]  ;;  %v1155_v43 = vld [vmem:[#allocation3 + $0xc8] sm:$0x3] }
  0x7f   :  { %6978 = vmatmul.mubr.msk.f32.vlgmr.msra.gmra.mxu1 %vm192_vm1, %v169_v21  ;;  %7452 = vmatpush3.msra.mxu0 %v8015_v20  ;;  %v791_v44 = vld [vmem:[%s9488_s0 + $0x1a] sm:$0xff]  ;;  %v1154_v45 = vld [vmem:[#allocation3 + $0xc0] sm:$0x3]  ;;  %v1156_v46 = vld [vmem:[#allocation3 + $0xd0] sm:$0x3] }
  0x80   :  { %7456 = vmatprep.subr.msk.mxu1 %vm199_vm0, %v539_v22  ;;  %7453 = vmatprep.mubr.msk.f32.mxu0 %vm192_vm1, %v169_v21  ;;  %v1146_v47 = vld [vmem:[%s9488_s0 + $0x14] sm:$0xff]  ;;  %v1147_v48 = vld [vmem:[%s9488_s0 + $0x1c] sm:$0xff]  ;;  %v8180_v53 = vld [vmem:[%s9491_s3 + $0xe8] sm:$0xff] }
  0x81   :  { %6983 = vmatprep.subr.msk.mxu0 %vm199_vm0, %v538_v23  ;;  %7457 = vmatpush3.msk.msra.mxu1 %vm199_vm0, %v539_v22  ;;  %v8154_v49 = vld [vmem:[%s9491_s3 + $0xf8] sm:$0xff]  ;;  %v8168_v51 = vld [vmem:[%s9491_s3 + $0xf0] sm:$0xff]  ;;  %v8186_v54 = vld [vmem:[%s9491_s3 + $0x68] sm:$0xff] }
  0x82   :  { %7454 = vmatmul.mubr.msk.f32.vlgmr.msra.gmra.mxu0 %vm192_vm1, %v170_v24  ;;  %446 = vmatprep.mubr.f32.mxu1 %v9500_v0  ;;  %v8160_v50 = vld [vmem:[%s9491_s3 + $0x78] sm:$0xff]  ;;  %v8174_v52 = vld [vmem:[%s9491_s3 + $0x70] sm:$0xff]  ;;  %v8192_v55 = vld [vmem:[%s9491_s3 + $0xe0] sm:$0xff] }
  0x83   :  { %6984 = vmatpush1.msk.msra.mxu0 %vm199_vm0, %v537_v25  ;;  %7458 = vmatprep.subr.mxu1 %v8035_v27  ;;  %v8198_v56 = vld [vmem:[%s9491_s3 + $0x60] sm:$0xff]  ;;  %v8204_v57 = vld [vmem:[%s9491_s3 + $0xd8] sm:$0xff]  ;;  %v8215_v59 = vld [vmem:[%s9491_s3 + $0xd0] sm:$0xff] }
  0x84   :  { %583 = vmatprep.subr.mxu0 %v8033_v26  ;;  %6979 = vmatmul.mubr.msk.f32.gmra.mxu1 %vm192_vm1, %v170_v24  ;;  %v8210_v58 = vld [vmem:[%s9491_s3 + $0x58] sm:$0xff]  ;;  %v8220_v60 = vld [vmem:[%s9491_s3 + $0x50] sm:$0xff]  ;;  %v8226_v61 = vld [vmem:[%s9491_s3 + $0xc8] sm:$0xff] }
  0x85   :  { %584 = vmatpush1.msra.mxu0 %v8039_v28  ;;  %7459 = vmatpush3.msra.mxu1 %v8035_v27  ;;  %v8234_v62 = vld [vmem:[%s9491_s3 + $0x48] sm:$0xff]  ;;  %v8240_v63 = vld [vmem:[%s9491_s3 + $0xc0] sm:$0xff]  ;;  %v8252_v2 = vld [vmem:[%s9491_s3 + $0xb8] sm:$0xff] }
  0x86   :  { %585 = vmatprep.subr.mxu0 %v8043_v29  ;;  %7460 = vmatprep.subr.mxu1 %v8047_v30  ;;  %v8246_v1 = vld [vmem:[%s9491_s3 + $0x40] sm:$0xff]  ;;  %v8257_v3 = vld [vmem:[%s9491_s3 + $0x118] sm:$0xff]  ;;  %v8306_v11 = vld [vmem:[%s9491_s3 + $0x28] sm:$0xff] }
  0x87   :  { %586 = vmatpush1.msra.mxu0 %v8049_v31  ;;  %619 = vmatprep.mubr.f32.mxu0 %v9500_v0  ;;  %v8300_v10 = vld [vmem:[%s9491_s3 + $0x100] sm:$0xff]  ;;  %v8327_v14 = vld [vmem:[%s9491_s3 + $0x98] sm:$0xff] }
  0x88   :  { %7461 = vmatpush3.msra.mxu1 %v8047_v30  ;;  %6985 = vmatmul.mubr.msk.f32.vlgmr.msra.gmra.mxu0 %vm192_vm1, %v528_v32  ;;  %v8313_v12 = vld [vmem:[%s9491_s3 + $0xa0] sm:$0xff]  ;;  %9564 = vst [vmem:[#allocation27_spill] sm:$0xff] %v8327_v14 }
  0x89   :  { %7462 = vmatprep.mubr.msk.f32.mxu1 %vm192_vm1, %v528_v32  ;;  %6990 = vmatprep.subr.msk.mxu1 %vm199_vm0, %v810_v33  ;;  %9562 = vst [vmem:[#allocation25_spill] sm:$0xff] %v8313_v12  ;;  %v8320_v13 = vld [vmem:[%s9491_s3 + $0x20] sm:$0xff] }
  0x8a   :  { %7463 = vmatmul.mubr.msk.f32.vlgmr.msra.gmra.mxu1 %vm192_vm1, %v529_v34  ;;  %7465 = vmatprep.subr.msk.mxu0 %vm199_vm0, %v811_v36  ;;  %9563 = vst [vmem:[#allocation26_spill] sm:$0xff] %v8320_v13  ;;  %v8369_v21 = vld [vmem:[%s9491_s3] sm:$0xff] }
  0x8b   :  { %6991 = vmatpush1.msk.msra.mxu1 %vm199_vm0, %v809_v35  ;;  %7466 = vmatpush3.msk.msra.mxu0 %vm199_vm0, %v811_v36  ;;  %9571 = vst [vmem:[#allocation34_spill] sm:$0xff] %v8369_v21  ;;  %v168_v36 = vld [vmem:[#allocation6] sm:$0x7] }
  0x8c   :  { %855 = vmatprep.subr.mxu1 %v7965_v4  ;;  %625 = vmatprep.mubr.f32.mxu0 %v9500_v0  ;;  %v8263_v4 = vld [vmem:[%s9491_s3 + $0x38] sm:$0xff] }
  0x8d   :  { %856 = vmatpush1.msra.mxu1 %v7969_v6  ;;  %7467 = vmatprep.subr.mxu0 %v7967_v5  ;;  %v8275_v6 = vld [vmem:[%s9491_s3 + $0xb0] sm:$0xff] }
  0x8e   :  { %6986 = vmatmul.mubr.msk.f32.gmra.mxu0 %vm192_vm1, %v529_v34  ;;  %857 = vmatprep.subr.mxu1 %v7973_v7  ;;  %v8281_v7 = vld [vmem:[%s9491_s3 + $0x108] sm:$0xff] }
  0x8f   :  { %7468 = vmatpush3.msra.mxu0 %v7967_v5  ;;  %858 = vmatpush1.msra.mxu1 %v7979_v9  ;;  %v8269_v5 = vld [vmem:[%s9491_s3 + $0x110] sm:$0xff]  ;;  %v8294_v9 = vld [vmem:[%s9491_s3 + $0xa8] sm:$0xff] }
  0x90   :  { %891 = vmatprep.mubr.f32.mxu1 %v9500_v0  ;;  %7469 = vmatprep.subr.mxu0 %v7975_v8 }
  0x91   :  { %6992 = vmatmul.mubr.msk.f32.vlgmr.msra.gmra.mxu1 %vm192_vm1, %v801_v37  ;;  %7470 = vmatpush3.msra.mxu0 %v7975_v8  ;;  %v8287_v8 = vld [vmem:[%s9491_s3 + $0x30] sm:$0xff] }
  0x92   :  { %7474 = vmatprep.subr.msk.mxu1 %vm199_vm0, %v800_v38  ;;  %7471 = vmatprep.mubr.msk.f32.mxu0 %vm192_vm1, %v801_v37 }
  0x93   :  { %6997 = vmatprep.subr.msk.mxu0 %vm199_vm0, %v799_v39  ;;  %7475 = vmatpush3.msk.msra.mxu1 %vm199_vm0, %v800_v38 }
  0x94   :  { %7472 = vmatmul.mubr.msk.f32.vlgmr.msra.gmra.mxu0 %vm192_vm1, %v802_v40  ;;  %897 = vmatprep.mubr.f32.mxu1 %v9500_v0 }
  0x95   :  { %6998 = vmatpush1.msk.msra.mxu0 %vm199_vm0, %v798_v41  ;;  %7476 = vmatprep.subr.mxu1 %v8003_v17 }
  0x96   :  { %1022 = vmatprep.subr.mxu0 %v7995_v15  ;;  %6993 = vmatmul.mubr.msk.f32.gmra.mxu1 %vm192_vm1, %v802_v40  ;;  %v8333_v15 = vld [vmem:[%s9491_s3 + $0x18] sm:$0xff] }
  0x97   :  { %1023 = vmatpush1.msra.mxu0 %v7999_v16  ;;  %7477 = vmatpush3.msra.mxu1 %v8003_v17  ;;  %9565 = vst [vmem:[#allocation28_spill] sm:$0xff] %v8333_v15  ;;  %v8339_v16 = vld [vmem:[%s9491_s3 + $0x90] sm:$0xff] }
  0x98   :  { %1024 = vmatprep.subr.mxu0 %v8007_v18  ;;  %7478 = vmatprep.subr.mxu1 %v8015_v20  ;;  %9566 = vst [vmem:[#allocation29_spill] sm:$0xff] %v8339_v16  ;;  %v8345_v17 = vld [vmem:[%s9491_s3 + $0x10] sm:$0xff]  ;;  %v8351_v18 = vld [vmem:[%s9491_s3 + $0x88] sm:$0xff] }
  0x99   :  { %1025 = vmatpush1.msra.mxu0 %v8011_v19  ;;  %1058 = vmatprep.mubr.f32.mxu0 %v9500_v0  ;;  %9567 = vst [vmem:[#allocation30_spill] sm:$0xff] %v8345_v17  ;;  %9568 = vst [vmem:[#allocation31_spill] sm:$0xff] %v8351_v18  ;;  %v8357_v19 = vld [vmem:[%s9491_s3 + $0x8] sm:$0xff] }
  0x9a   :  { %7479 = vmatpush3.msra.mxu1 %v8015_v20  ;;  %6999 = vmatmul.mubr.msk.f32.vlgmr.msra.gmra.mxu0 %vm192_vm1, %v790_v42  ;;  %9569 = vst [vmem:[#allocation32_spill] sm:$0xff] %v8357_v19  ;;  %v8363_v20 = vld [vmem:[%s9491_s3 + $0x80] sm:$0xff]  ;;  %s7856_s3 = smov [#allocation18]  }
  0x9b   :  { %7480 = vmatprep.mubr.msk.f32.mxu1 %vm192_vm1, %v790_v42  ;;  %7004 = vmatprep.subr.msk.mxu1 %vm199_vm0, %v1155_v43  ;;  %9570 = vst [vmem:[#allocation33_spill] sm:$0xff] %v8363_v20  ;;  %s6953_s5 = sshll.u32 %s7856_s3, 4  ;;  %s6954_s5 = int_to_ptr.vmem [resolvable:$true] %s6953_s5 }
  0x9c   :  { %7481 = vmatmul.mubr.msk.f32.vlgmr.msra.gmra.mxu1 %vm192_vm1, %v791_v44  ;;  %7483 = vmatprep.subr.msk.mxu0 %vm199_vm0, %v1156_v46  ;;  %s7809_s17 = scalar_lea.vmem %s6954_s5, 1024  ;;  %p7814_p4 = scmp.lt.s32.totalorder %s6954_s5, %s6954_s5 }
  0x9d   :  { %7005 = vmatpush1.msk.msra.mxu1 %vm199_vm0, %v1154_v45  ;;  %1064 = vmatprep.mubr.f32.mxu0 %v9500_v0  ;;  %p7810_p3 = scmp.ne.s32.totalorder %s6954_s5, %s7809_s17  ;;  %p7815_p5 = scmp.lt.s32.totalorder %s7809_s17, %s7809_s17 }
  0x9e   :  { %1200 = vmatprep.subr.mxu1 %v8033_v26  ;;  %7484 = vmatpush3.msk.msra.mxu0 %vm199_vm0, %v1156_v46  ;;  %v714_v26 = vlaneseq }
  0x9f   :  { %1201 = vmatpush1.msra.mxu1 %v8039_v28  ;;  %7000 = vmatmul.mubr.msk.f32.gmra.mxu0 %vm192_vm1, %v791_v44  ;;  %p7816_p6 = por %p7815_p5, %p7814_p4 }
  0xa0   :  { %1202 = vmatprep.subr.mxu1 %v8043_v29  ;;  %7485 = vmatprep.subr.mxu0 %v8035_v27 }
  0xa1   :  { %1203 = vmatpush1.msra.mxu1 %v8049_v31  ;;  %1236 = vmatprep.mubr.f32.mxu1 %v9500_v0  ;;  %p7817_p7 = pnand %p7816_p6, %p7810_p3 }
  0xa2   :  { %7486 = vmatpush3.msra.mxu0 %v8035_v27  ;;  %7006 = vmatmul.mubr.msk.f32.vlgmr.msra.gmra.mxu1 %vm192_vm1, %v1146_v47 }
  0xa3   :  { %7487 = vmatprep.subr.mxu0 %v8047_v30  ;;  %7489 = vmatprep.mubr.msk.f32.mxu0 %vm192_vm1, %v1146_v47 }
  0xa4   :  { %7488 = vmatpush3.msra.mxu0 %v8047_v30  ;;  %1242 = vmatprep.mubr.f32.mxu1 %v9500_v0  ;;  %v715_v30 = vshrl.u32 %v714_v26, 7 }
  0xa5   :  { %7490 = vmatmul.mubr.msk.f32.vlgmr.msra.gmra.mxu0 %vm192_vm1, %v1147_v48  ;;  %7492 = vmatprep.subr.mxu0 %v9500_v0 }
  0xa6   :  { %7007 = vmatmul.mubr.msk.f32.gmra.mxu1 %vm192_vm1, %v1147_v48  ;;  %7085 = vmatprep.subr.mxu1 %v8154_v49  ;;  %v8375_v33 = vsub.s32 0, %v715_v30  ;;  %v8377_v37 = vsub.s32 2, %v715_v30  ;;  %v8379_v38 = vsub.s32 1, %v715_v30  ;;  %vm1404_vm1 = vcmask 256000  }
  0xa7   :  { %7086 = vmatpush3.msra.mxu1 %v8160_v50  ;;  %7500 = vmatprep.mubr.msk.f32.mxu0 %vm7855_vm4, %v9500_v0 }
  0xa8   :  { %7087 = vmatprep.subr.mxu1 %v8168_v51  ;;  %7493 = vmatpush3.msra.mxu0 %v8257_v3  ;;  %9572 = vst [vmem:[#allocation35_spill] sm:$0xff] %v8375_v33  ;;  %9573 = vst [vmem:[#allocation36_spill] sm:$0xff] %v8379_v38  ;;  %v717_v41 = vrot.slane %v168_v36, %v8375_v33  ;;  %v725_v44 = vrot.slane %v168_v36, %v8377_v37 }
  0xa9   :  { %7088 = vmatpush3.msra.mxu1 %v8174_v52  ;;  %7494 = vmatprep.subr.mxu0 %v9500_v0  ;;  %v721_v48 = vrot.slane %v168_v36, %v8379_v38 }
  0xaa   :  { %7089 = vmatprep.subr.mxu1 %v8180_v53  ;;  %7495 = vmatpush3.msra.mxu0 %v8269_v5 }
  0xab   :  { %7090 = vmatpush3.msra.mxu1 %v8186_v54  ;;  %7496 = vmatprep.subr.mxu0 %v9500_v0 }
  0xac   :  { %7091 = vmatprep.subr.mxu1 %v8192_v55  ;;  %7497 = vmatpush3.msra.mxu0 %v8281_v7 }
  0xad   :  { %7092 = vmatpush3.msra.mxu1 %v8198_v56  ;;  %7498 = vmatprep.subr.mxu0 %v9500_v0 }
  0xae   :  { %7093 = vmatprep.subr.mxu1 %v8204_v57  ;;  %7499 = vmatpush3.msra.mxu0 %v8300_v10 }
  0xaf   :  { %7094 = vmatpush3.msra.mxu1 %v8210_v58 }
  0xb0   :  { %7095 = vmatprep.subr.mxu1 %v8215_v59 }
  0xb1   :  { %7096 = vmatpush3.msra.mxu1 %v8220_v60 }
  0xb2   :  { %7097 = vmatprep.subr.mxu1 %v8226_v61 }
  0xb3   :  { %7098 = vmatpush3.msra.mxu1 %v8234_v62 }
  0xb4   :  { %7099 = vmatprep.subr.mxu1 %v8240_v63 }
  0xb5   :  { %7100 = vmatpush3.msra.mxu1 %v8246_v1 }
  0xb6   :  { %7101 = vmatprep.subr.mxu1 %v8252_v2 }
  0xb7   :  { %7102 = vmatpush3.msra.mxu1 %v8263_v4 }
  0xb8   :  { %7103 = vmatprep.subr.mxu1 %v8275_v6 }
  0xb9   :  { %7104 = vmatpush3.msra.mxu1 %v8287_v8 }
  0xba   :  { %7105 = vmatprep.subr.mxu1 %v8294_v9 }
  0xbb   :  { %7106 = vmatpush3.msra.mxu1 %v8306_v11 }
  0xbc   :  { %7107 = vmatprep.subr.mxu1 %v8313_v12 }
  0xbd   :  { %7108 = vmatpush3.msra.mxu1 %v8320_v13 }
  0xbe   :  { %7109 = vmatprep.subr.mxu1 %v8327_v14 }
  0xbf   :  { %7110 = vmatpush3.msra.mxu1 %v8333_v15 }
  0xc0   :  { %7111 = vmatprep.subr.mxu1 %v8339_v16 }
  0xc1   :  { %7112 = vmatpush3.msra.mxu1 %v8345_v17 }
  0xc2   :  { %7113 = vmatprep.subr.mxu1 %v8351_v18 }
  0xc3   :  { %7114 = vmatpush3.msra.mxu1 %v8357_v19 }
  0xc4   :  { %7115 = vmatprep.subr.mxu1 %v8363_v20 }
  0xc5   :  { %7116 = vmatpush3.msra.mxu1 %v8369_v21 }
  0xc6   :  { %7510 = vmatprep.subr.mxu1 %v9500_v0 }
 0x137   :  { %v275_v22 = vpop.f32.mrf.mxu0  ;;  %v7446_v23 = vpop.f32.mrf.mxu1 }
 0x139   :  { %v277_v24 = vpop.f32.mrf.mxu0  ;;  %v352_v27 = vpop.f32.mrf.mxu1 }
 0x13c   :  { %v281_v25 = vpop.f32.mrf.mxu0 }
 0x13e   :  { %v283_v28 = vpop.f32.mrf.mxu0 }
 0x13f   :  { %v442_v29 = vpop.f32.mrf.mxu1 }
 0x140   :  { %v443_v40 = vadd.f32 %v442_v29, %v275_v22 }
 0x141   :  { %v444_v31 = vpop.f32.mrf.mxu1 }
 0x142   :  { %v7455_v32 = vpop.f32.mrf.mxu0  ;;  %v445_v45 = vadd.f32 %v444_v31, %v277_v24 }
 0x143   :  { %v525_v42 = vadd.f32 %v7455_v32, %v7446_v23 }
 0x144   :  { %v448_v34 = vpop.f32.mrf.mxu1  ;;  %v519_v35 = vpop.f32.mrf.mxu0 }
 0x145   :  { %v520_v26 = vadd.f32 %v519_v35, %v352_v27  ;;  %v449_v18 = vadd.f32 %v448_v34, %v281_v25 }
 0x146   :  { %v450_v39 = vpop.f32.mrf.mxu1 }
 0x148   :  { %v621_v43 = vpop.f32.mrf.mxu0 }
 0x149   :  { %v707_v46 = vadd.f32 %v621_v43, %v443_v40  ;;  %v451_v43 = vadd.f32 %v450_v39, %v283_v28 }
 0x14a   :  { %v7464_v47 = vpop.f32.mrf.mxu1  ;;  %v623_v21 = vpop.f32.mrf.mxu0 }
 0x14b   :  { %v712_v0 = vadd.f32 %v7464_v47, %v525_v42  ;;  %v729_v20 = vadd.f32 %v717_v41, %v707_v46  ;;  %v708_v19 = vadd.f32 %v623_v21, %v445_v45 }
 0x14c   :  { %v698_v30 = vpop.f32.mrf.mxu1 }
 0x14d   :  { %v734_v17 = vadd.f32 %v725_v44, %v712_v0  ;;  %v709_v22 = vadd.f32 %v698_v30, %v520_v26  ;;  %vm735_vm5 = vcmp.ge.f32.partialorder %v729_v20, 0.0  ;;  %v741_v29 = vmul.f32 0.01, %v729_v20 }
 0x14e   :  { %v730_v23 = vadd.f32 %v721_v48, %v708_v19  ;;  %v627_v32 = vpop.f32.mrf.mxu0 }
 0x14f   :  { %vm740_vm7 = vcmp.ge.f32.partialorder %v734_v17, 0.0  ;;  %v746_v24 = vmul.f32 0.01, %v734_v17  ;;  %v731_v31 = vadd.f32 %v725_v44, %v709_v22  ;;  %v710_v40 = vadd.f32 %v627_v32, %v449_v18 }
 0x150   :  { %v8384_v36 = vsel %vm735_vm5, %v729_v20, %v741_v29  ;;  %vm736_vm8 = vcmp.ge.f32.partialorder %v730_v23, 0.0  ;;  %v742_v27 = vmul.f32 0.01, %v730_v23  ;;  %v629_v35 = vpop.f32.mrf.mxu0 }
 0x151   :  { %v9509_v21 = vrot.slane %v8384_v36, 7  ;;  %v752_v25 = vsel %vm740_vm7, %v734_v17, %v746_v24  ;;  %vm737_vm9 = vcmp.ge.f32.partialorder %v731_v31, 0.0  ;;  %v743_v0 = vmul.f32 0.01, %v731_v31  ;;  %v893_v34 = vpop.f32.mrf.mxu1 }
 0x152   :  { %v767_v42 = vrot.slane %v752_v25, 7  ;;  %v8387_v45 = vsel %vm736_vm8, %v730_v23, %v742_v27  ;;  %v732_v19 = vadd.f32 %v717_v41, %v710_v40  ;;  %v711_v46 = vadd.f32 %v629_v35, %v451_v43  ;;  %v789_v35 = vld [vmem:[#allocation6] sm:$0x7] }
 0x153   :  { %778 = vst [vmem:[#allocation2] sm:$0xfe] %v9509_v21  ;;  %v9507_v18 = vrot.slane %v8387_v45, 7  ;;  %v749_v20 = vsel %vm737_vm9, %v731_v31, %v743_v0  ;;  %v895_v28 = vpop.f32.mrf.mxu1  ;;  %vm1376_vm8 = vcmask 1042432   ;;  %vm1397_vm9 = vcmask 261123  }
 0x154   :  { %788 = vst.msk [vmem:[#allocation2 + $0x40] sm:$0x1] %vm787_vm6, %v767_v42  ;;  %v762_v17 = vrot.slane %v749_v20, 7  ;;  %vm738_vm12 = vcmp.ge.f32.partialorder %v732_v19, 0.0  ;;  %v744_v39 = vmul.f32 0.01, %v732_v19  ;;  %v733_v44 = vadd.f32 %v721_v48, %v711_v46  ;;  %v7473_v47 = vpop.f32.mrf.mxu0 }
 0x155   :  { %779 = vst [vmem:[#allocation2 + $0x8] sm:$0xfe] %v9507_v18  ;;  %v1338_v20 = vrot.slane %v789_v35, %v8379_v38 }
 0x156   :  { %v768_v41 = vsel %vm759_vm10, %v762_v17, %v767_v42  ;;  %781 = vst.msk [vmem:[#allocation2 + $0x10] sm:$0xfe] %vm780_vm11, %v762_v17  ;;  %v8397_v26 = vsel %vm738_vm12, %v732_v19, %v744_v39  ;;  %vm739_vm13 = vcmp.ge.f32.partialorder %v733_v44, 0.0  ;;  %v745_v30 = vmul.f32 0.01, %v733_v44  ;;  %v899_v29 = vpop.f32.mrf.mxu1  ;;  %v970_v23 = vpop.f32.mrf.mxu0 }
 0x157   :  { %784 = vst.msk [vmem:[#allocation2 + $0x28] sm:$0xff] %vm153_vm2, %v768_v41  ;;  %v9510_v22 = vrot.slane %v8397_v26, 7  ;;  %v1334_v19 = vrot.slane %v789_v35, %v8375_v33  ;;  %v1342_v41 = vrot.slane %v789_v35, %v8377_v37 }
 0x158   :  { %v8401_v32 = vsel %vm739_vm13, %v733_v44, %v745_v30  ;;  %v901_v24 = vpop.f32.mrf.mxu1  ;;  %vm1424_vm13 = vcmask 1043456  }
 0x159   :  { %785 = vst [vmem:[#allocation2 + $0x30] sm:$0x1] %v9510_v22  ;;  %v9508_v48 = vrot.slane %v8401_v32, 7 }
 0x15a   :  { %v1060_v31 = vpop.f32.mrf.mxu0 }
 0x15b   :  { %786 = vst [vmem:[#allocation2 + $0x38] sm:$0x1] %v9508_v48  ;;  %v1061_v0 = vadd.f32 %v1060_v31, %v893_v34 }
 0x15c   :  { %v7482_v40 = vpop.f32.mrf.mxu1  ;;  %v1062_v43 = vpop.f32.mrf.mxu0 }
 0x15d   :  { %v1143_v17 = vadd.f32 %v7482_v40, %v7473_v47  ;;  %v1063_v39 = vadd.f32 %v1062_v43, %v895_v28 }
 0x15e   :  { %v1137_v27 = vpop.f32.mrf.mxu1 }
 0x15f   :  { %v1066_v25 = vpop.f32.mrf.mxu0  ;;  %v1138_v16 = vadd.f32 %v1137_v27, %v970_v23 }
 0x160   :  { %v1067_v15 = vadd.f32 %v1066_v25, %v899_v29 }
 0x161   :  { %v1068_v42 = vpop.f32.mrf.mxu0 }
 0x162   :  { %v1238_v46 = vpop.f32.mrf.mxu1  ;;  %v1069_v12 = vadd.f32 %v1068_v42, %v901_v24  ;;  %v9575_v42 = vrot.slane %v8384_v36, 7  ;;  %v1408_v36 = vld [vmem:[#allocation2 + $0x10] sm:$0xff] }
 0x163   :  { %v1324_v44 = vadd.f32 %v1238_v46, %v1061_v0 }
 0x164   :  { %v1240_v30 = vpop.f32.mrf.mxu1 }
 0x165   :  { %v7491_v18 = vpop.f32.mrf.mxu0  ;;  %v1346_v48 = vadd.f32 %v1334_v19, %v1324_v44  ;;  %v1325_v21 = vadd.f32 %v1240_v30, %v1063_v39  ;;  %v9576_v30 = vrot.slane %v8401_v32, 7 }
 0x166   :  { %v1329_v22 = vadd.f32 %v7491_v18, %v1143_v17  ;;  %v1244_v14 = vpop.f32.mrf.mxu1  ;;  %v1407_v17 = vld [vmem:[#allocation2 + $0x8] sm:$0xff] }
 0x167   :  { %v1315_v34 = vpop.f32.mrf.mxu0  ;;  %vm1352_vm14 = vcmp.ge.f32.partialorder %v1346_v48, 0.0  ;;  %v1358_v31 = vmul.f32 0.01, %v1346_v48  ;;  %v1347_v33 = vadd.f32 %v1338_v20, %v1325_v21  ;;  %v1327_v38 = vadd.f32 %v1244_v14, %v1067_v15 }
 0x168   :  { %v1351_v13 = vadd.f32 %v1342_v41, %v1329_v22  ;;  %v1326_v47 = vadd.f32 %v1315_v34, %v1138_v16  ;;  %v1246_v28 = vpop.f32.mrf.mxu1  ;;  %v9577_v34 = vrot.slane %v8387_v45, 7  ;;  %v1444_v45 = vsel %vm153_vm2, %v1408_v36, 0.0 }
 0x169   :  { %v1364_v40 = vsel %vm1352_vm14, %v1346_v48, %v1358_v31  ;;  %vm1353_vm15 = vcmp.ge.f32.partialorder %v1347_v33, 0.0  ;;  %v1359_v43 = vmul.f32 0.01, %v1347_v33  ;;  %v1349_v46 = vadd.f32 %v1334_v19, %v1327_v38  ;;  %v8430_v31 = vld [vmem:[#allocation2 + $0x28] sm:$0xff] }
 0x16a   :  { %vm1357_vm0 = vcmp.ge.f32.partialorder %v1351_v13, 0.0  ;;  %v1377_v35 = vrot.slane %v1364_v40, 5  ;;  %v1363_v0 = vmul.f32 0.01, %v1351_v13  ;;  %v1348_v18 = vadd.f32 %v1342_v41, %v1326_v47 }
 0x16b   :  { %v1365_v23 = vsel %vm1353_vm15, %v1347_v33, %v1359_v43  ;;  %v1328_v29 = vadd.f32 %v1246_v28, %v1069_v12  ;;  %vm1355_vm5 = vcmp.ge.f32.partialorder %v1349_v46, 0.0  ;;  %v1361_v21 = vmul.f32 0.01, %v1349_v46  ;;  %v1406_v12 = vld [vmem:[#allocation2] sm:$0xff] }
 0x16c   :  { %1395 = vst [vmem:[#allocation2 + $0x30] sm:$0xf8] %v1377_v35  ;;  %v1378_v27 = vrot.slane %v1365_v23, 5  ;;  %v1369_v25 = vsel %vm1357_vm0, %v1351_v13, %v1363_v0  ;;  %vm1354_vm7 = vcmp.ge.f32.partialorder %v1348_v18, 0.0  ;;  %v1360_v14 = vmul.f32 0.01, %v1348_v18 }
 0x16d   :  { %v1384_v22 = vrot.slane %v1369_v25, 5  ;;  %v1350_v15 = vadd.f32 %v1338_v20, %v1328_v29  ;;  %v1367_v16 = vsel %vm1355_vm5, %v1349_v46, %v1361_v21  ;;  %v9574_v13 = vrot.slane %v8397_v26, 7 }
 0x16e   :  { %1396 = vst [vmem:[#allocation2 + $0x38] sm:$0xf8] %v1378_v27  ;;  %v1380_v38 = vrot.slane %v1367_v16, 5  ;;  %v1366_v48 = vsel %vm1354_vm7, %v1348_v18, %v1360_v14  ;;  %v8427_v26 = vsel %vm759_vm10, %v9577_v34, %v9576_v30  ;;  %v1445_v46 = vsel %vm153_vm2, %v8430_v31, 0.0 }
 0x16f   :  { %1405 = vst.msk [vmem:[#allocation2 + $0x70] sm:$0x7] %vm1404_vm1, %v1384_v22  ;;  %vm1356_vm12 = vcmp.ge.f32.partialorder %v1350_v15, 0.0  ;;  %v1362_v33 = vmul.f32 0.01, %v1350_v15  ;;  %v1379_v24 = vrot.slane %v1366_v48, 5  ;;  %v8417_v19 = vsel %vm759_vm10, %v9575_v42, %v9574_v13 }
 0x170   :  { %1402 = vst [vmem:[#allocation2 + $0x60] sm:$0x7] %v1380_v38  ;;  %v1421_v41 = vadd.f32 %v1406_v12, %v8417_v19  ;;  %v1433_v28 = vadd.f32 %v1407_v17, %v8427_v26  ;;  %v8434_v43 = vsel %vm1376_vm8, %v1377_v35, %v1380_v38  ;;  %vm1838_vm14 = vcmask 1046528  }
 0x171   :  { %v1368_v20 = vsel %vm1356_vm12, %v1350_v15, %v1362_v33  ;;  %v1385_v39 = vsel %vm1376_vm8, %v1379_v24, %v1384_v22  ;;  %1398 = vst.msk [vmem:[#allocation2 + $0x40] sm:$0xf8] %vm1397_vm9, %v1379_v24  ;;  %v1446_v22 = vadd.f32 %v1445_v46, %v1444_v45  ;;  %vm1919_vm15 = vcmask 1044480  }
 0x172   :  { %v1382_v44 = vrot.slane %v1368_v20, 5  ;;  %1401 = vst.msk [vmem:[#allocation2 + $0x58] sm:$0xff] %vm153_vm2, %v1385_v39 }
 0x173   :  { %v1412_v47 = vld [vmem:[#allocation2 + $0x30] sm:$0xff] }
 0x174   :  { %1403 = vst [vmem:[#allocation2 + $0x68] sm:$0x7] %v1382_v44  ;;  %v1422_v40 = vadd.f32 %v1421_v41, %v1412_v47  ;;  %v8441_v23 = vsel %vm1376_vm8, %v1378_v27, %v1382_v44 }
 0x175   :  { %v1413_v0 = vld [vmem:[#allocation2 + $0x38] sm:$0xff] }
 0x176   :  { %v1434_v32 = vadd.f32 %v1433_v28, %v1413_v0  ;;  %v1423_v18 = vadd.f32 %v1422_v40, %v8434_v43  ;;  %v1420_v48 = vld [vmem:[#allocation2 + $0x70] sm:$0xf] }
 0x177   :  { %v1418_v29 = vld [vmem:[#allocation2 + $0x60] sm:$0xf]  ;;  %v1451_v20 = vsel %vm166_vm3, %v1420_v48, 0.0  ;;  %vm1645_vm3 = vcmask 130048  }
 0x178   :  { %v1435_v25 = vadd.f32 %v1434_v32, %v8441_v23  ;;  %v1414_v21 = vld [vmem:[#allocation2 + $0x40] sm:$0xff]  ;;  %v1425_v35 = vsel %vm1424_vm13, %v1418_v29, 0.0 }
 0x179   :  { %v8445_v14 = vld [vmem:[#allocation2 + $0x58] sm:$0xff]  ;;  %v1447_v15 = vsel %vm153_vm2, %v1414_v21, 0.0  ;;  %v1426_v16 = vadd.f32 %v1425_v35, %v1423_v18 }
 0x17a   :  { %v1448_v33 = vadd.f32 %v1447_v15, %v1446_v22  ;;  %v1449_v12 = vsel %vm153_vm2, %v8445_v14, 0.0  ;;  %v9578_v22 = vmov 0.0   ;;  %v8463_v35 = vld [vmem:[#allocation8 + $0x20] sm:$0xff] }
 0x17b   :  { %v1419_v38 = vld [vmem:[#allocation2 + $0x68] sm:$0xf]  ;;  %v1427_v24 = vrot.slane %v1426_v16, 4  ;;  %1677 = vmatprep.subr.mxu0 %v8463_v35  ;;  %v8473_v15 = vld [vmem:[#allocation8] sm:$0xff] }
 0x17c   :  { %v1436_v27 = vsel %vm1424_vm13, %v1419_v38, 0.0  ;;  %v1450_v42 = vadd.f32 %v1449_v12, %v1448_v33 }
 0x17d   :  { %v1437_v13 = vadd.f32 %v1436_v27, %v1435_v25  ;;  %v1428_v17 = vadd.f32 %v1427_v24, %v1426_v16  ;;  %v8479_v27 = vld [vmem:[#allocation8 + $0x28] sm:$0xff]  ;;  %v8483_v24 = vld [vmem:[#allocation8 + $0x10] sm:$0xff] }
 0x17e   :  { %v1452_v44 = vadd.f32 %v1451_v20, %v1450_v42 }
 0x17f   :  { %v1438_v39 = vrot.slane %v1437_v13, 4  ;;  %v1429_v41 = vrot.slane %v1428_v17, 2 }
 0x180   :  { %v1453_v34 = vrot.slane %v1452_v44, 4 }
 0x181   :  { %v1439_v30 = vadd.f32 %v1438_v39, %v1437_v13  ;;  %v1430_v36 = vadd.f32 %v1429_v41, %v1428_v17 }
 0x182   :  { %v1454_v28 = vadd.f32 %v1453_v34, %v1452_v44  ;;  %v8535_v34 = vld [vmem:[#allocation2 + $0x8] sm:$0xfe] }
 0x183   :  { %v1440_v47 = vrot.slane %v1439_v30, 2  ;;  %v1431_v32 = vrot.slane %v1430_v36, 1 }
 0x184   :  { %v1455_v0 = vrot.slane %v1454_v28, 2 }
 0x185   :  { %v1441_v40 = vadd.f32 %v1440_v47, %v1439_v30  ;;  %v1432_v25 = vadd.f32 %v1431_v32, %v1430_v36 }
 0x186   :  { %v1456_v46 = vadd.f32 %v1455_v0, %v1454_v28  ;;  %v8537_v28 = vld [vmem:[#allocation2 + $0x40] sm:$0x1] }
 0x187   :  { %v1442_v45 = vrot.slane %v1441_v40, 1 }
 0x188   :  { %v1457_v29 = vrot.slane %v1456_v46, 1 }
 0x189   :  { %v1443_v18 = vadd.f32 %v1442_v45, %v1441_v40 }
 0x18a   :  { %v1458_v21 = vadd.f32 %v1457_v29, %v1456_v46 }
 0x18b   :  { %1562 = vmatprep.mubr.f32.mxu1 %v1443_v18 }
 0x18c   :  { %1563 = vmatmul.mubr.f32.vlgmr.msra.gmra.mxu1 %v1432_v25  ;;  %7501 = vmatmul.mubr.msk.f32.vlgmr.msra.gmra.mxu0 %vm153_vm2, %v1458_v21  ;;  %v8541_v25 = vld [vmem:[#allocation2 + $0x10] sm:$0xfe] }
 0x18d   :  { %7511 = vmatpush3.msra.mxu1 %v8257_v3  ;;  %1713 = vmatprep.mubr.f32.mxu0 %v9578_v22  ;;  %v8466_v3 = vld [vmem:[#allocation8 + $0x18] sm:$0xff] }
 0x18e   :  { %7512 = vmatprep.subr.mxu1 %v9578_v22  ;;  %7518 = vmatprep.mubr.msk.f32.mxu1 %vm7855_vm4, %v9578_v22 }
 0x18f   :  { %7513 = vmatpush3.msra.mxu1 %v8269_v5  ;;  %1678 = vmatpush1.msra.mxu0 %v8466_v3  ;;  %v8470_v5 = vld [vmem:[#allocation8 + $0x8] sm:$0xff] }
 0x190   :  { %7514 = vmatprep.subr.mxu1 %v9578_v22  ;;  %1679 = vmatprep.subr.mxu0 %v8470_v5 }
 0x191   :  { %7515 = vmatpush3.msra.mxu1 %v8281_v7  ;;  %1680 = vmatpush1.msra.mxu0 %v8473_v15 }
 0x192   :  { %7516 = vmatprep.subr.mxu1 %v9578_v22  ;;  %7503 = vmatprep.subr.mxu0 %v9578_v22 }
 0x193   :  { %7517 = vmatpush3.msra.mxu1 %v8300_v10 }
 0x194   :  { %2149 = vmatprep.subr.mxu1 %v8463_v35 }
 0x24c   :  { %v7117_v7 = vpop.f32.mrf.mxu1  ;;  %v1634_v10 = vpop.f32.mrf.mxu0 }
 0x24e   :  { %v7118_v16 = vpop.f32.mrf.mxu1  ;;  %v7502_v38 = vpop.f32.mrf.mxu0 }
 0x24f   :  { %v7119_v48 = vadd.f32 %v7118_v16, %v7117_v7  ;;  %v1888_v38 = vld [vmem:[#allocation2 + $0x40] sm:$0xf8] }
 0x251   :  { %v1635_v33 = vadd.f32 %v7119_v48, %v1634_v10  ;;  %v1891_v48 = vld [vmem:[#allocation2 + $0x70] sm:$0x7] }
 0x253   :  { %v8477_v12 = vmul.f32 0.001953125, %v1635_v33 }
 0x255   :  { %7012 = vmatmul.mubr.msk.f32.vlgmr.msra.gmra.mxu0 %vm1645_vm3, %v8477_v12 }
 0x256   :  { %7504 = vmatpush3.msra.mxu0 %v8479_v27  ;;  %7507 = vmatprep.mubr.msk.f32.mxu0 %vm7855_vm4, %v9578_v22 }
 0x257   :  { %7505 = vmatprep.subr.mxu0 %v9578_v22 }
 0x258   :  { %7506 = vmatpush3.msra.mxu0 %v8483_v24 }
 0x259   :  { %7508 = vmatmul.mubr.msk.f32.vlgmr.msra.gmra.mxu0 %vm1645_vm3, %v8477_v12  ;;  %7128 = vmatprep.subr.mxu0 %v8154_v49  ;;  %v9579_v49 = vld [vmem:[#allocation25_spill] sm:$0xff] }
 0x25a   :  { %7129 = vmatpush3.msra.mxu0 %v8160_v50  ;;  %v9580_v50 = vld [vmem:[#allocation26_spill] sm:$0xff] }
 0x25b   :  { %7130 = vmatprep.subr.mxu0 %v8168_v51  ;;  %v9581_v51 = vld [vmem:[#allocation27_spill] sm:$0xff] }
 0x25c   :  { %7131 = vmatpush3.msra.mxu0 %v8174_v52  ;;  %v9582_v52 = vld [vmem:[#allocation28_spill] sm:$0xff] }
 0x25d   :  { %7132 = vmatprep.subr.mxu0 %v8180_v53  ;;  %v9583_v53 = vld [vmem:[#allocation29_spill] sm:$0xff] }
 0x25e   :  { %7133 = vmatpush3.msra.mxu0 %v8186_v54  ;;  %v9584_v54 = vld [vmem:[#allocation30_spill] sm:$0xff] }
 0x25f   :  { %7134 = vmatprep.subr.mxu0 %v8192_v55  ;;  %v9585_v55 = vld [vmem:[#allocation31_spill] sm:$0xff] }
 0x260   :  { %7135 = vmatpush3.msra.mxu0 %v8198_v56  ;;  %v9586_v56 = vld [vmem:[#allocation32_spill] sm:$0xff] }
 0x261   :  { %7136 = vmatprep.subr.mxu0 %v8204_v57  ;;  %v9587_v57 = vld [vmem:[#allocation33_spill] sm:$0xff] }
 0x262   :  { %7137 = vmatpush3.msra.mxu0 %v8210_v58  ;;  %v9588_v58 = vld [vmem:[#allocation34_spill] sm:$0xff] }
 0x263   :  { %7138 = vmatprep.subr.mxu0 %v8215_v59 }
 0x264   :  { %7139 = vmatpush3.msra.mxu0 %v8220_v60  ;;  %v9589_v60 = vld [vmem:[#allocation35_spill] sm:$0xff] }
 0x265   :  { %7140 = vmatprep.subr.mxu0 %v8226_v61 }
 0x266   :  { %7141 = vmatpush3.msra.mxu0 %v8234_v62  ;;  %v8526_v62 = vld [vmem:[#allocation2] sm:$0xfe] }
 0x267   :  { %7142 = vmatprep.subr.mxu0 %v8240_v63  ;;  %v8528_v63 = vld [vmem:[#allocation2 + $0x30] sm:$0x1] }
 0x268   :  { %7143 = vmatpush3.msra.mxu0 %v8246_v1  ;;  %v1886_v1 = vld [vmem:[#allocation2 + $0x30] sm:$0xf8] }
 0x269   :  { %7144 = vmatprep.subr.mxu0 %v8252_v2 }
 0x26a   :  { %7145 = vmatpush3.msra.mxu0 %v8263_v4 }
 0x26b   :  { %7146 = vmatprep.subr.mxu0 %v8275_v6 }
 0x26c   :  { %7147 = vmatpush3.msra.mxu0 %v8287_v8 }
 0x26d   :  { %7148 = vmatprep.subr.mxu0 %v8294_v9  ;;  %v1889_v9 = vld [vmem:[#allocation2 + $0x60] sm:$0x7] }
 0x26e   :  { %7149 = vmatpush3.msra.mxu0 %v8306_v11 }
 0x26f   :  { %7150 = vmatprep.subr.mxu0 %v9579_v49 }
 0x270   :  { %7151 = vmatpush3.msra.mxu0 %v9580_v50 }
 0x271   :  { %7152 = vmatprep.subr.mxu0 %v9581_v51 }
 0x272   :  { %7153 = vmatpush3.msra.mxu0 %v9582_v52  ;;  %v8547_v52 = vld [vmem:[#allocation2 + $0x38] sm:$0x1] }
 0x273   :  { %7154 = vmatprep.subr.mxu0 %v9583_v53 }
 0x274   :  { %7155 = vmatpush3.msra.mxu0 %v9584_v54 }
 0x275   :  { %7156 = vmatprep.subr.mxu0 %v9585_v55 }
 0x276   :  { %7157 = vmatpush3.msra.mxu0 %v9586_v56 }
 0x277   :  { %7158 = vmatprep.subr.mxu0 %v9587_v57 }
 0x278   :  { %7159 = vmatpush3.msra.mxu0 %v9588_v58 }
 0x279   :  { %7528 = vmatprep.subr.mxu0 %v9578_v22 }
 0x315   :  { %v1715_v59 = vpop.f32.mrf.mxu0 }
 0x316   :  { %v1802_v61 = vrot.slane %v1715_v59, %v9589_v60 }
 0x317   :  { %v1717_v2 = vpop.f32.mrf.mxu0 }
 0x318   :  { %v1811_v4 = vsub.f32 %v8526_v62, %v1802_v61  ;;  %v1814_v6 = vsub.f32 %v8417_v19, %v1802_v61  ;;  %v1817_v8 = vsub.f32 %v8528_v63, %v1802_v61  ;;  %v1892_v11 = vsub.f32 %v1886_v1, %v1802_v61 }
 0x319   :  { %v1895_v13 = vsub.f32 %v8434_v43, %v1802_v61  ;;  %v1898_v42 = vsub.f32 %v1889_v9, %v1802_v61  ;;  %v1806_v20 = vrot.slane %v1717_v2, %v9589_v60  ;;  %v1786_v17 = vpop.f32.mrf.mxu0 }
 0x31a   :  { %v1820_v39 = vmul.f32 %v1811_v4, %v1811_v4  ;;  %v1823_v44 = vmul.f32 %v1814_v6, %v1814_v6  ;;  %v1826_v41 = vmul.f32 %v1817_v8, %v1817_v8  ;;  %v1901_v30 = vmul.f32 %v1892_v11, %v1892_v11 }
 0x31b   :  { %v1904_v36 = vmul.f32 %v1895_v13, %v1895_v13  ;;  %v1907_v47 = vmul.f32 %v1898_v42, %v1898_v42  ;;  %v1810_v40 = vrot.slane %v1786_v17, %v9589_v60  ;;  %v7509_v0 = vpop.f32.mrf.mxu0  ;;  %v1812_v32 = vsub.f32 %v8535_v34, %v1806_v20  ;;  %v1887_v42 = vld [vmem:[#allocation2 + $0x38] sm:$0xf8] }
 0x31c   :  { %v1839_v45 = vrot.slane %v1820_v39, 1  ;;  %v1840_v46 = vrot.slane %v1823_v44, 1  ;;  %v1848_v18 = vrot.slane %v1826_v41, 1  ;;  %v1920_v29 = vrot.slane %v1901_v30, 3  ;;  %v1890_v41 = vld [vmem:[#allocation2 + $0x68] sm:$0x7] }
 0x31d   :  { %v1921_v21 = vrot.slane %v1904_v36, 3  ;;  %v1929_v7 = vrot.slane %v1907_v47, 3  ;;  %v1813_v10 = vsub.f32 %v8541_v25, %v1810_v40  ;;  %v1816_v16 = vsub.f32 %v8430_v31, %v1810_v40 }
 0x31e   :  { %v1819_v33 = vsub.f32 %v8537_v28, %v1810_v40  ;;  %v1894_v49 = vsub.f32 %v1888_v38, %v1810_v40  ;;  %v1897_v50 = vsub.f32 %v8445_v14, %v1810_v40  ;;  %v1900_v51 = vsub.f32 %v1891_v48, %v1810_v40 }
 0x31f   :  { %v1822_v53 = vmul.f32 %v1813_v10, %v1813_v10  ;;  %v1825_v54 = vmul.f32 %v1816_v16, %v1816_v16  ;;  %v1815_v55 = vsub.f32 %v8427_v26, %v1806_v20  ;;  %v1818_v56 = vsub.f32 %v8547_v52, %v1806_v20 }
 0x320   :  { %v1828_v57 = vmul.f32 %v1819_v33, %v1819_v33  ;;  %v1903_v58 = vmul.f32 %v1894_v49, %v1894_v49  ;;  %v1906_v59 = vmul.f32 %v1897_v50, %v1897_v50  ;;  %v1909_v61 = vmul.f32 %v1900_v51, %v1900_v51 }
 0x321   :  { %v1845_v1 = vrot.slane %v1822_v53, 1  ;;  %v1846_v2 = vrot.slane %v1825_v54, 1  ;;  %v1821_v4 = vmul.f32 %v1812_v32, %v1812_v32  ;;  %v1824_v6 = vmul.f32 %v1815_v55, %v1815_v55 }
 0x322   :  { %v1852_v8 = vrot.slane %v1828_v57, 1  ;;  %v1926_v9 = vrot.slane %v1903_v58, 3  ;;  %v1927_v11 = vrot.slane %v1906_v59, 3  ;;  %v1933_v13 = vrot.slane %v1909_v61, 3 }
 0x323   :  { %v1827_v17 = vmul.f32 %v1818_v56, %v1818_v56  ;;  %v1842_v39 = vrot.slane %v1821_v4, 1  ;;  %v1843_v44 = vrot.slane %v1824_v6, 1  ;;  %v1893_v30 = vsub.f32 %v1887_v42, %v1806_v20 }
 0x324   :  { %v1896_v36 = vsub.f32 %v8441_v23, %v1806_v20  ;;  %v1899_v47 = vsub.f32 %v1890_v41, %v1806_v20  ;;  %v1841_v40 = vsel %vm1838_vm14, %v1839_v45, %v1840_v46  ;;  %v1849_v0 = vsel %vm1838_vm14, %v1840_v46, %v1848_v18 }
 0x325   :  { %v1844_v32 = vsel %vm1838_vm14, %v1842_v39, %v1843_v44  ;;  %v1850_v10 = vrot.slane %v1827_v17, 1  ;;  %v1902_v16 = vmul.f32 %v1893_v30, %v1893_v30  ;;  %v1860_v38 = vadd.f32 %v1849_v0, %v1841_v40 }
 0x326   :  { %v1905_v48 = vmul.f32 %v1896_v36, %v1896_v36  ;;  %v1908_v33 = vmul.f32 %v1899_v47, %v1899_v47  ;;  %v1922_v49 = vsel %vm1919_vm15, %v1920_v29, %v1921_v21  ;;  %v1930_v50 = vsel %vm1919_vm15, %v1921_v21, %v1929_v7 }
 0x327   :  { %v1851_v51 = vsel %vm1838_vm14, %v1843_v44, %v1850_v10  ;;  %v1923_v53 = vrot.slane %v1902_v16, 3  ;;  %v1861_v54 = vrot.slane %v1860_v38, 4  ;;  %v1941_v20 = vadd.f32 %v1930_v50, %v1922_v49 }
 0x328   :  { %v1867_v55 = vadd.f32 %v1851_v51, %v1844_v32  ;;  %v1924_v45 = vrot.slane %v1905_v48, 3  ;;  %v1931_v56 = vrot.slane %v1908_v33, 3  ;;  %v1847_v46 = vsel %vm1838_vm14, %v1845_v1, %v1846_v2 }
 0x329   :  { %v1862_v18 = vadd.f32 %v1861_v54, %v1860_v38  ;;  %v1942_v57 = vrot.slane %v1941_v20, 4  ;;  %v1853_v58 = vsel %vm1838_vm14, %v1846_v2, %v1852_v8  ;;  %v1874_v59 = vsel %vm153_vm2, %v1847_v46, 0.0 }
 0x32a   :  { %v1868_v61 = vrot.slane %v1867_v55, 4  ;;  %v1925_v29 = vsel %vm1919_vm15, %v1923_v53, %v1924_v45  ;;  %v1932_v21 = vsel %vm1919_vm15, %v1924_v45, %v1931_v56  ;;  %v1875_v7 = vsel %vm153_vm2, %v1853_v58, 0.0 }
 0x32b   :  { %v1948_v4 = vadd.f32 %v1932_v21, %v1925_v29  ;;  %v1863_v6 = vrot.slane %v1862_v18, 2  ;;  %v1943_v42 = vadd.f32 %v1942_v57, %v1941_v20  ;;  %v1876_v17 = vadd.f32 %v1875_v7, %v1874_v59 }
 0x32c   :  { %v1869_v39 = vadd.f32 %v1868_v61, %v1867_v55  ;;  %v1928_v1 = vsel %vm1919_vm15, %v1926_v9, %v1927_v11  ;;  %v1934_v44 = vsel %vm1919_vm15, %v1927_v11, %v1933_v13 }
 0x32d   :  { %v1949_v41 = vrot.slane %v1948_v4, 4  ;;  %v1944_v2 = vrot.slane %v1943_v42, 2  ;;  %v1877_v8 = vrot.slane %v1876_v17, 4  ;;  %v1864_v36 = vadd.f32 %v1863_v6, %v1862_v18 }
 0x32e   :  { %v1870_v30 = vrot.slane %v1869_v39, 2  ;;  %v1955_v47 = vsel %vm153_vm2, %v1928_v1, 0.0  ;;  %v1956_v40 = vsel %vm153_vm2, %v1934_v44, 0.0 }
 0x32f   :  { %v1950_v0 = vadd.f32 %v1949_v41, %v1948_v4  ;;  %v1945_v32 = vadd.f32 %v1944_v2, %v1943_v42  ;;  %v1878_v10 = vadd.f32 %v1877_v8, %v1876_v17  ;;  %v1957_v38 = vadd.f32 %v1956_v40, %v1955_v47  ;;  %v2111_v2 = vld [vmem:[#allocation9] sm:$0x1] }
 0x330   :  { %v1871_v16 = vadd.f32 %v1870_v30, %v1869_v39  ;;  %v1865_v9 = vrot.slane %v1864_v36, 1 }
 0x331   :  { %v1951_v48 = vrot.slane %v1950_v0, 2  ;;  %v1879_v33 = vrot.slane %v1878_v10, 2  ;;  %v1946_v50 = vrot.slane %v1945_v32, 1  ;;  %v1958_v11 = vrot.slane %v1957_v38, 4 }
 0x332   :  { %v1872_v49 = vrot.slane %v1871_v16, 1  ;;  %v1866_v55 = vadd.f32 %v1865_v9, %v1864_v36  ;;  %v2115_v36 = vld [vmem:[#allocation11] sm:$0x1]  ;;  %v2639_v9 = vld [vmem:[#allocation12 + $0x420] sm:$0xff] }
 0x333   :  { %v1952_v13 = vadd.f32 %v1951_v48, %v1950_v0  ;;  %v1880_v51 = vadd.f32 %v1879_v33, %v1878_v10  ;;  %v1959_v53 = vadd.f32 %v1958_v11, %v1957_v38  ;;  %v1947_v45 = vadd.f32 %v1946_v50, %v1945_v32  ;;  %v2661_v0 = vld [vmem:[#allocation12 + $0x4d0] sm:$0xff]  ;;  %v2654_v32 = vld [vmem:[#allocation12 + $0x498] sm:$0xff]  ;;  %v2643_v48 = vld [vmem:[#allocation12 + $0x440] sm:$0xff] }
 0x334   :  { %v1873_v54 = vadd.f32 %v1872_v49, %v1871_v16  ;;  %v2649_v10 = vld [vmem:[#allocation12 + $0x470] sm:$0xff]  ;;  %v2648_v16 = vld [vmem:[#allocation12 + $0x468] sm:$0xff]  ;;  %v2642_v33 = vld [vmem:[#allocation12 + $0x438] sm:$0xff] }
 0x335   :  { %v1953_v20 = vrot.slane %v1952_v13, 1  ;;  %v1881_v56 = vrot.slane %v1880_v51, 1  ;;  %v1960_v46 = vrot.slane %v1959_v53, 2  ;;  %v1964_v59 = vadd.f32 %v1947_v45, %v1866_v55  ;;  %v2645_v38 = vld [vmem:[#allocation12 + $0x450] sm:$0xff]  ;;  %v2640_v49 = vld [vmem:[#allocation12 + $0x428] sm:$0xff]  ;;  %v2627_v55 = vld [vmem:[#allocation12 + $0x3c0] sm:$0xff] }
 0x336   :  { %v2637_v50 = vld [vmem:[#allocation12 + $0x410] sm:$0xff]  ;;  %v2636_v11 = vld [vmem:[#allocation12 + $0x408] sm:$0xff] }
 0x337   :  { %v1954_v18 = vadd.f32 %v1953_v20, %v1952_v13  ;;  %v1961_v57 = vadd.f32 %v1960_v46, %v1959_v53  ;;  %v1882_v61 = vadd.f32 %v1881_v56, %v1880_v51  ;;  %v2634_v13 = vld [vmem:[#allocation12 + $0x3f8] sm:$0xff]  ;;  %v2633_v51 = vld [vmem:[#allocation12 + $0x3f0] sm:$0xff]  ;;  %v2631_v53 = vld [vmem:[#allocation12 + $0x3e0] sm:$0xff] }
 0x338   :  { %v2628_v20 = vld [vmem:[#allocation12 + $0x3c8] sm:$0xff]  ;;  %v2625_v45 = vld [vmem:[#allocation12 + $0x3b0] sm:$0xff]  ;;  %v2622_v46 = vld [vmem:[#allocation12 + $0x398] sm:$0xff] }
 0x339   :  { %v1965_v58 = vadd.f32 %v1954_v18, %v1873_v54  ;;  %v1962_v29 = vrot.slane %v1961_v57, 1  ;;  %v2630_v54 = vld [vmem:[#allocation12 + $0x3d8] sm:$0xff]  ;;  %v2624_v56 = vld [vmem:[#allocation12 + $0x3a8] sm:$0xff]  ;;  %v2621_v18 = vld [vmem:[#allocation12 + $0x390] sm:$0xff] }
 0x33b   :  { %2034 = vmatprep.mubr.f32.mxu0 %v1965_v58  ;;  %v1963_v21 = vadd.f32 %v1962_v29, %v1961_v57  ;;  %v2619_v57 = vld [vmem:[#allocation12 + $0x380] sm:$0xff]  ;;  %v2618_v58 = vld [vmem:[#allocation12 + $0x378] sm:$0xff]  ;;  %v2709_v29 = vld [vmem:[#allocation12 + $0x650] sm:$0xff] }
 0x33c   :  { %2035 = vmatmul.mubr.f32.vlgmr.msra.gmra.mxu0 %v1964_v59  ;;  %v2616_v59 = vld [vmem:[#allocation12 + $0x368] sm:$0xff] }
 0x33d   :  { %7529 = vmatpush3.msra.mxu0 %v8479_v27  ;;  %7532 = vmatprep.mubr.msk.f32.mxu0 %vm7855_vm4, %v9578_v22  ;;  %v1966_v7 = vadd.f32 %v1963_v21, %v1882_v61  ;;  %v2615_v61 = vld [vmem:[#allocation12 + $0x360] sm:$0xff]  ;;  %v2708_v21 = vld [vmem:[#allocation12 + $0x648] sm:$0xff] }
 0x33e   :  { %7530 = vmatprep.subr.mxu0 %v9578_v22 }
 0x33f   :  { %7531 = vmatpush3.msra.mxu0 %v8483_v24  ;;  %7519 = vmatmul.mubr.msk.f32.vlgmr.msra.gmra.mxu1 %vm153_vm2, %v1966_v7  ;;  %v2706_v7 = vld [vmem:[#allocation12 + $0x638] sm:$0xff] }
 0x340   :  { %2150 = vmatpush1.msra.mxu1 %v8466_v3  ;;  %2185 = vmatprep.mubr.f32.mxu1 %v9578_v22 }
 0x341   :  { %2151 = vmatprep.subr.mxu1 %v8470_v5 }
 0x342   :  { %2152 = vmatpush1.msra.mxu1 %v8473_v15 }
 0x343   :  { %7521 = vmatprep.subr.mxu1 %v9578_v22 }
 0x3fc   :  { %v7160_v4 = vpop.f32.mrf.mxu0 }
 0x3fe   :  { %v7161_v6 = vpop.f32.mrf.mxu0 }
 0x3ff   :  { %v7162_v42 = vadd.f32 %v7161_v6, %v7160_v4  ;;  %v2106_v17 = vpop.f32.mrf.mxu1  ;;  %v2705_v4 = vld [vmem:[#allocation12 + $0x630] sm:$0xff]  ;;  %v2703_v6 = vld [vmem:[#allocation12 + $0x620] sm:$0xff] }
 0x401   :  { %v2107_v39 = vadd.f32 %v7162_v42, %v2106_v17  ;;  %v7520_v1 = vpop.f32.mrf.mxu1  ;;  %v2702_v42 = vld [vmem:[#allocation12 + $0x618] sm:$0xff]  ;;  %v2700_v17 = vld [vmem:[#allocation12 + $0x608] sm:$0xff] }
 0x402   :  { %v2697_v1 = vld [vmem:[#allocation12 + $0x5f0] sm:$0xff] }
 0x403   :  { %v2110_v44 = vmul.f32 0.001953125, %v2107_v39  ;;  %v2699_v39 = vld [vmem:[#allocation12 + $0x600] sm:$0xff] }
 0x405   :  { %v2112_v41 = vadd.f32 1e-05, %v2110_v44  ;;  %v2696_v44 = vld [vmem:[#allocation12 + $0x5e8] sm:$0xff] }
 0x407   :  { %7617 = vrsqrt.f32 %v2112_v41  ;;  %v2694_v41 = vld [vmem:[#allocation12 + $0x5d8] sm:$0xff] }
 0x414   :  { %v7618_v8 = vpop.eup %7617 }
 0x415   :  { %v2114_v30 = vmul.f32 %v7618_v8, %v2111_v2  ;;  %v2693_v2 = vld [vmem:[#allocation12 + $0x5d0] sm:$0xff]  ;;  %v2691_v8 = vld [vmem:[#allocation12 + $0x5c0] sm:$0xff] }
 0x417   :  { %7015 = vmatmul.mubr.msk.f32.vlgmr.msra.gmra.mxu1 %vm1645_vm3, %v2114_v30  ;;  %v2116_v47 = vmul.f32 %v2114_v30, %v8477_v12  ;;  %v2660_v12 = vld [vmem:[#allocation12 + $0x4c8] sm:$0xff] }
 0x418   :  { %7522 = vmatpush3.msra.mxu1 %v8479_v27  ;;  %7525 = vmatprep.mubr.msk.f32.mxu1 %vm7855_vm4, %v9578_v22  ;;  %v2658_v27 = vld [vmem:[#allocation12 + $0x4b8] sm:$0xff]  ;;  %vm3489_vm4 = vcmask 1045504  }
 0x419   :  { %7523 = vmatprep.subr.mxu1 %v9578_v22  ;;  %v2117_v40 = vsub.f32 %v2115_v36, %v2116_v47  ;;  %v2688_v36 = vld [vmem:[#allocation12 + $0x5a8] sm:$0xff]  ;;  %v2687_v47 = vld [vmem:[#allocation12 + $0x5a0] sm:$0xff] }
 0x41a   :  { %7524 = vmatpush3.msra.mxu1 %v8483_v24  ;;  %v2657_v24 = vld [vmem:[#allocation12 + $0x4b0] sm:$0xff] }
 0x41b   :  { %7526 = vmatmul.mubr.msk.f32.vlgmr.msra.gmra.mxu1 %vm1645_vm3, %v2114_v30  ;;  %2293 = vmatprep.subr.mxu1 %v8463_v35  ;;  %v2655_v35 = vld [vmem:[#allocation12 + $0x4a0] sm:$0xff]  ;;  %v2690_v30 = vld [vmem:[#allocation12 + $0x5b8] sm:$0xff] }
 0x41c   :  { %7533 = vmatmul.mubr.msk.f32.vlgmr.msra.gmra.mxu0 %vm1645_vm3, %v2117_v40  ;;  %2294 = vmatpush1.msra.mxu1 %v8466_v3  ;;  %v2652_v3 = vld [vmem:[#allocation12 + $0x488] sm:$0xff] }
 0x41d   :  { %2295 = vmatprep.subr.mxu1 %v8470_v5  ;;  %2329 = vmatprep.mubr.f32.mxu1 %v9578_v22  ;;  %v2651_v5 = vld [vmem:[#allocation12 + $0x480] sm:$0xff] }
 0x41e   :  { %2296 = vmatpush1.msra.mxu1 %v8473_v15  ;;  %2896 = vmatprep.mubr.f32.mxu0 %v9578_v22  ;;  %v2646_v15 = vld [vmem:[#allocation12 + $0x458] sm:$0xff] }
 0x41f   :  { %7017 = vmatmul.mubr.msk.f32.vlgmr.msra.gmra.mxu1 %vm1645_vm3, %v2117_v40  ;;  %2755 = vmatprep.subr.mxu1 %v2661_v0  ;;  %v2685_v40 = vld [vmem:[#allocation12 + $0x590] sm:$0xff]  ;;  %v2684_v0 = vld [vmem:[#allocation12 + $0x588] sm:$0xff] }
 0x420   :  { %2756 = vmatpush1.msra.mxu1 %v2660_v12  ;;  %v2682_v12 = vld [vmem:[#allocation12 + $0x578] sm:$0xff] }
 0x421   :  { %2757 = vmatprep.subr.mxu1 %v2658_v27  ;;  %v2681_v27 = vld [vmem:[#allocation12 + $0x570] sm:$0xff] }
 0x422   :  { %2758 = vmatpush1.msra.mxu1 %v2657_v24  ;;  %v2721_v24 = vld [vmem:[#allocation12 + $0x6b0] sm:$0xff] }
 0x423   :  { %2759 = vmatprep.subr.mxu1 %v2655_v35  ;;  %2856 = vmatprep.subr.mxu0 %v2721_v24  ;;  %v2679_v35 = vld [vmem:[#allocation12 + $0x560] sm:$0xff] }
 0x424   :  { %2760 = vmatpush1.msra.mxu1 %v2654_v32  ;;  %v2720_v32 = vld [vmem:[#allocation12 + $0x6a8] sm:$0xff] }
 0x425   :  { %2761 = vmatprep.subr.mxu1 %v2652_v3  ;;  %2857 = vmatpush1.msra.mxu0 %v2720_v32  ;;  %v2678_v3 = vld [vmem:[#allocation12 + $0x558] sm:$0xff]  ;;  %v2458_v32 = vld [vmem:[#allocation2 + $0x38] sm:$0xf8] }
 0x426   :  { %2762 = vmatpush1.msra.mxu1 %v2651_v5  ;;  %v2718_v5 = vld [vmem:[#allocation12 + $0x698] sm:$0xff] }
 0x427   :  { %2763 = vmatprep.subr.mxu1 %v2649_v10  ;;  %2858 = vmatprep.subr.mxu0 %v2718_v5  ;;  %v2676_v10 = vld [vmem:[#allocation12 + $0x548] sm:$0xff] }
 0x428   :  { %2764 = vmatpush1.msra.mxu1 %v2648_v16  ;;  %v2717_v16 = vld [vmem:[#allocation12 + $0x690] sm:$0xff] }
 0x429   :  { %2765 = vmatprep.subr.mxu1 %v2646_v15  ;;  %v2675_v15 = vld [vmem:[#allocation12 + $0x540] sm:$0xff]  ;;  %2859 = vmatpush1.msra.mxu0 %v2717_v16 }
 0x42a   :  { %2766 = vmatpush1.msra.mxu1 %v2645_v38  ;;  %v2715_v38 = vld [vmem:[#allocation12 + $0x680] sm:$0xff] }
 0x42b   :  { %2767 = vmatprep.subr.mxu1 %v2643_v48  ;;  %v2673_v48 = vld [vmem:[#allocation12 + $0x530] sm:$0xff]  ;;  %2860 = vmatprep.subr.mxu0 %v2715_v38  ;;  %v2464_v38 = vld [vmem:[#allocation2 + $0x68] sm:$0x7] }
 0x42c   :  { %2768 = vmatpush1.msra.mxu1 %v2642_v33  ;;  %v2714_v33 = vld [vmem:[#allocation12 + $0x678] sm:$0xff] }
 0x42d   :  { %2769 = vmatprep.subr.mxu1 %v2640_v49  ;;  %v2672_v49 = vld [vmem:[#allocation12 + $0x528] sm:$0xff]  ;;  %2861 = vmatpush1.msra.mxu0 %v2714_v33 }
 0x42e   :  { %2770 = vmatpush1.msra.mxu1 %v2639_v9  ;;  %v2712_v9 = vld [vmem:[#allocation12 + $0x668] sm:$0xff] }
 0x42f   :  { %2771 = vmatprep.subr.mxu1 %v2637_v50  ;;  %v2670_v50 = vld [vmem:[#allocation12 + $0x518] sm:$0xff]  ;;  %2862 = vmatprep.subr.mxu0 %v2712_v9 }
 0x430   :  { %2772 = vmatpush1.msra.mxu1 %v2636_v11  ;;  %v2711_v11 = vld [vmem:[#allocation12 + $0x660] sm:$0xff] }
 0x431   :  { %2773 = vmatprep.subr.mxu1 %v2634_v13  ;;  %v2669_v13 = vld [vmem:[#allocation12 + $0x510] sm:$0xff]  ;;  %2863 = vmatpush1.msra.mxu0 %v2711_v11 }
 0x432   :  { %2774 = vmatpush1.msra.mxu1 %v2633_v51  ;;  %v2710_v51 = vld [vmem:[#allocation12 + $0x658] sm:$0xff] }
 0x433   :  { %2775 = vmatprep.subr.mxu1 %v2631_v53  ;;  %v2667_v53 = vld [vmem:[#allocation12 + $0x500] sm:$0xff]  ;;  %7174 = vmatprep.subr.mxu0 %v2710_v51 }
 0x434   :  { %2776 = vmatpush1.msra.mxu1 %v2630_v54  ;;  %v2666_v54 = vld [vmem:[#allocation12 + $0x4f8] sm:$0xff] }
 0x435   :  { %2777 = vmatprep.subr.mxu1 %v2628_v20  ;;  %v2664_v20 = vld [vmem:[#allocation12 + $0x4e8] sm:$0xff] }
 0x436   :  { %2778 = vmatpush1.msra.mxu1 %v2627_v55  ;;  %v2663_v55 = vld [vmem:[#allocation12 + $0x4e0] sm:$0xff] }
 0x437   :  { %2779 = vmatprep.subr.mxu1 %v2625_v45  ;;  %v2606_v45 = vld [vmem:[#allocation12 + $0x350] sm:$0xff] }
 0x438   :  { %2780 = vmatpush1.msra.mxu1 %v2624_v56 }
 0x439   :  { %2781 = vmatprep.subr.mxu1 %v2622_v46 }
 0x43a   :  { %2782 = vmatpush1.msra.mxu1 %v2621_v18 }
 0x43b   :  { %2783 = vmatprep.subr.mxu1 %v2619_v57 }
 0x43c   :  { %2784 = vmatpush1.msra.mxu1 %v2618_v58 }
 0x43d   :  { %2785 = vmatprep.subr.mxu1 %v2616_v59 }
 0x43e   :  { %2786 = vmatpush1.msra.mxu1 %v2615_v61 }
 0x43f   :  { %2787 = vmatprep.subr.mxu1 %v2709_v29 }
 0x440   :  { %2788 = vmatpush2.msra.mxu1 %v2708_v21 }
 0x441   :  { %2789 = vmatprep.subr.mxu1 %v2706_v7  ;;  %v2459_v7 = vld [vmem:[#allocation2 + $0x40] sm:$0xf8] }
 0x442   :  { %2790 = vmatpush2.msra.mxu1 %v2705_v4  ;;  %v2465_v4 = vld [vmem:[#allocation2 + $0x70] sm:$0x7] }
 0x443   :  { %2791 = vmatprep.subr.mxu1 %v2703_v6 }
 0x444   :  { %2792 = vmatpush2.msra.mxu1 %v2702_v42 }
 0x445   :  { %2793 = vmatprep.subr.mxu1 %v2700_v17 }
 0x446   :  { %2794 = vmatpush2.msra.mxu1 %v2699_v39 }
 0x447   :  { %2795 = vmatprep.subr.mxu1 %v2697_v1 }
 0x448   :  { %2796 = vmatpush2.msra.mxu1 %v2696_v44 }
 0x449   :  { %2797 = vmatprep.subr.mxu1 %v2694_v41 }
 0x44a   :  { %2798 = vmatpush2.msra.mxu1 %v2693_v2 }
 0x44b   :  { %2799 = vmatprep.subr.mxu1 %v2691_v8  ;;  %v2457_v8 = vld [vmem:[#allocation2 + $0x30] sm:$0xf8] }
 0x44c   :  { %2800 = vmatpush2.msra.mxu1 %v2690_v30 }
 0x44d   :  { %2801 = vmatprep.subr.mxu1 %v2688_v36 }
 0x44e   :  { %2802 = vmatpush2.msra.mxu1 %v2687_v47 }
 0x44f   :  { %2803 = vmatprep.subr.mxu1 %v2685_v40 }
 0x450   :  { %2804 = vmatpush2.msra.mxu1 %v2684_v0 }
 0x451   :  { %2805 = vmatprep.subr.mxu1 %v2682_v12 }
 0x452   :  { %2806 = vmatpush2.msra.mxu1 %v2681_v27 }
 0x453   :  { %2807 = vmatprep.subr.mxu1 %v2679_v35 }
 0x454   :  { %2808 = vmatpush2.msra.mxu1 %v2678_v3 }
 0x455   :  { %2809 = vmatprep.subr.mxu1 %v2676_v10 }
 0x456   :  { %2810 = vmatpush2.msra.mxu1 %v2675_v15 }
 0x457   :  { %2811 = vmatprep.subr.mxu1 %v2673_v48 }
 0x458   :  { %2812 = vmatpush2.msra.mxu1 %v2672_v49 }
 0x459   :  { %2813 = vmatprep.subr.mxu1 %v2670_v50 }
 0x45a   :  { %2814 = vmatpush2.msra.mxu1 %v2669_v13 }
 0x45b   :  { %2815 = vmatprep.subr.mxu1 %v2667_v53 }
 0x45c   :  { %2816 = vmatpush2.msra.mxu1 %v2666_v54 }
 0x45d   :  { %2817 = vmatprep.subr.mxu1 %v2664_v20 }
 0x45e   :  { %2818 = vmatpush2.msra.mxu1 %v2663_v55 }
 0x45f   :  { %3165 = vmatprep.subr.mxu1 %v2606_v45 }
 0x4d7   :  { %v2187_v56 = vpop.f32.mrf.mxu1 }
 0x4d8   :  { %v8596_v57 = vrot.slane %v2187_v56, %v9589_v60 }
 0x4d9   :  { %v2189_v46 = vpop.f32.mrf.mxu1 }
 0x4da   :  { %v2418_v41 = vmul.f32 %v8596_v57, %v8526_v62  ;;  %v2424_v2 = vmul.f32 %v8596_v57, %v8528_v63  ;;  %v2466_v36 = vmul.f32 %v2457_v8, %v8596_v57  ;;  %v2413_v47 = vrot.slane %v2189_v46, %v9589_v60  ;;  %v2662_v46 = vld [vmem:[#allocation12 + $0x4d8] sm:$0xff]  ;;  %v2605_v8 = vld [vmem:[#allocation12 + $0x348] sm:$0xff] }
 0x4db   :  { %v2258_v18 = vpop.f32.mrf.mxu1  ;;  %v2421_v20 = vmul.f32 %v8596_v57, %v8417_v19  ;;  %v2704_v19 = vld [vmem:[#allocation12 + $0x628] sm:$0xff] }
 0x4dc   :  { %v2417_v58 = vrot.slane %v2258_v18, %v9589_v60  ;;  %v2402_v59 = vpop.f32.mrf.mxu0  ;;  %v2419_v16 = vmul.f32 %v2413_v47, %v8535_v34  ;;  %v2425_v15 = vmul.f32 %v2413_v47, %v8547_v52  ;;  %v2467_v48 = vmul.f32 %v2458_v32, %v2413_v47  ;;  %v2596_v32 = vld [vmem:[#allocation12 + $0x300] sm:$0xff] }
 0x4dd   :  { %v7527_v61 = vpop.f32.mrf.mxu1  ;;  %v2470_v49 = vmul.f32 %v2413_v47, %v8441_v23  ;;  %v2473_v9 = vmul.f32 %v2464_v38, %v2413_v47  ;;  %v2422_v51 = vmul.f32 %v2413_v47, %v8427_v26  ;;  %v2707_v26 = vld [vmem:[#allocation12 + $0x640] sm:$0xff]  ;;  %v2602_v47 = vld [vmem:[#allocation12 + $0x330] sm:$0xff] }
 0x4de   :  { %v2420_v29 = vmul.f32 %v2417_v58, %v8541_v25  ;;  %v2423_v21 = vmul.f32 %v2417_v58, %v8430_v31  ;;  %v7534_v6 = vpop.f32.mrf.mxu0  ;;  %v2426_v42 = vmul.f32 %v2417_v58, %v8537_v28  ;;  %v2468_v17 = vmul.f32 %v2459_v7, %v2417_v58  ;;  %v2463_v25 = vld [vmem:[#allocation2 + $0x60] sm:$0x7] }
 0x4df   :  { %v2471_v39 = vmul.f32 %v2417_v58, %v8445_v14  ;;  %v2474_v1 = vmul.f32 %v2465_v4, %v2417_v58  ;;  %v2331_v44 = vpop.f32.mrf.mxu1  ;;  %v2438_v31 = vrot.slane %v2402_v59, %v9589_v60  ;;  %v2469_v28 = vmul.f32 %v8596_v57, %v8434_v43 }
 0x4e0   :  { %v2430_v30 = vrot.slane %v2331_v44, %v9589_v60  ;;  %v2472_v14 = vmul.f32 %v2463_v25, %v8596_v57 }
 0x4e1   :  { %v2441_v40 = vadd.f32 %v2438_v31, %v2420_v29  ;;  %v2444_v62 = vadd.f32 %v2438_v31, %v2423_v21  ;;  %v2447_v0 = vadd.f32 %v2438_v31, %v2426_v42  ;;  %v2477_v12 = vadd.f32 %v2468_v17, %v2438_v31  ;;  %v2333_v63 = vpop.f32.mrf.mxu1  ;;  %v2659_v29 = vld [vmem:[#allocation12 + $0x4c0] sm:$0xff]  ;;  %v2656_v42 = vld [vmem:[#allocation12 + $0x4a8] sm:$0xff] }
 0x4e2   :  { %v2480_v27 = vadd.f32 %v2471_v39, %v2438_v31  ;;  %v2483_v24 = vadd.f32 %v2474_v1, %v2438_v31  ;;  %v2439_v35 = vadd.f32 %v2430_v30, %v2418_v41  ;;  %v2445_v43 = vadd.f32 %v2430_v30, %v2424_v2  ;;  %v2701_v1 = vld [vmem:[#allocation12 + $0x610] sm:$0xff] }
 0x4e3   :  { %2450 = vst.msk [vmem:[#allocation2 + $0x10] sm:$0xfe] %vm780_vm11, %v2441_v40  ;;  %v2475_v3 = vadd.f32 %v2466_v36, %v2430_v30  ;;  %v2478_v5 = vadd.f32 %v2469_v28, %v2430_v30  ;;  %v2481_v10 = vadd.f32 %v2472_v14, %v2430_v30  ;;  %v2434_v33 = vrot.slane %v2333_v63, %v9589_v60  ;;  %v2653_v31 = vld [vmem:[#allocation12 + $0x490] sm:$0xff]  ;;  %v2698_v36 = vld [vmem:[#allocation12 + $0x5f8] sm:$0xff] }
 0x4e4   :  { %2453 = vst.msk [vmem:[#allocation2 + $0x28] sm:$0xff] %vm153_vm2, %v2444_v62  ;;  %2489 = vst.msk [vmem:[#allocation2 + $0x58] sm:$0xff] %vm153_vm2, %v2480_v27  ;;  %v8632_v58 = vadd.f32 %v2430_v30, %v2421_v20  ;;  %v2603_v30 = vld [vmem:[#allocation12 + $0x338] sm:$0xff]  ;;  %v2600_v62 = vld [vmem:[#allocation12 + $0x320] sm:$0xff] }
 0x4e5   :  { %2456 = vst.msk [vmem:[#allocation2 + $0x40] sm:$0x1] %vm787_vm6, %v2447_v0  ;;  %2448 = vst [vmem:[#allocation2] sm:$0xfe] %v2439_v35  ;;  %v2440_v50 = vadd.f32 %v2434_v33, %v2419_v16  ;;  %v2446_v34 = vadd.f32 %v2434_v33, %v2425_v15  ;;  %v2476_v11 = vadd.f32 %v2467_v48, %v2434_v33  ;;  %v2650_v40 = vld [vmem:[#allocation12 + $0x478] sm:$0xff]  ;;  %v2695_v0 = vld [vmem:[#allocation12 + $0x5e0] sm:$0xff] }
 0x4e6   :  { %2486 = vst.msk [vmem:[#allocation2 + $0x40] sm:$0xf8] %vm1397_vm9, %v2477_v12  ;;  %2454 = vst [vmem:[#allocation2 + $0x30] sm:$0x1] %v2445_v43  ;;  %v2479_v52 = vadd.f32 %v2470_v49, %v2434_v33  ;;  %v2482_v13 = vadd.f32 %v2473_v9, %v2434_v33  ;;  %v8630_v56 = vadd.f32 %v2434_v33, %v2422_v51  ;;  %v2733_v39 = vrot.slane %v8632_v58, 1  ;;  %v2599_v12 = vld [vmem:[#allocation12 + $0x318] sm:$0xff] }
 0x4e7   :  { %2492 = vst.msk [vmem:[#allocation2 + $0x70] sm:$0x7] %vm1404_vm1, %v2483_v24  ;;  %2484 = vst [vmem:[#allocation2 + $0x30] sm:$0xf8] %v2475_v3  ;;  %v2647_v27 = vld [vmem:[#allocation12 + $0x460] sm:$0xff]  ;;  %v2597_v24 = vld [vmem:[#allocation12 + $0x308] sm:$0xff] }
 0x4e8   :  { %2487 = vst [vmem:[#allocation2 + $0x48] sm:$0xff] %v2478_v5  ;;  %2490 = vst [vmem:[#allocation2 + $0x60] sm:$0x7] %v2481_v10  ;;  %v2736_v6 = vrot.slane %v8630_v56, 1  ;;  %v2692_v35 = vld [vmem:[#allocation12 + $0x5c8] sm:$0xff]  ;;  %v2595_v3 = vld [vmem:[#allocation12 + $0x2f8] sm:$0xff] }
 0x4e9   :  { %2449 = vst [vmem:[#allocation2 + $0x8] sm:$0xfe] %v2440_v50  ;;  %2455 = vst [vmem:[#allocation2 + $0x38] sm:$0x1] %v2446_v34  ;;  %v2644_v43 = vld [vmem:[#allocation12 + $0x448] sm:$0xff]  ;;  %v2689_v5 = vld [vmem:[#allocation12 + $0x5b0] sm:$0xff] }
 0x4ea   :  { %2485 = vst [vmem:[#allocation2 + $0x38] sm:$0xf8] %v2476_v11  ;;  %2488 = vst [vmem:[#allocation2 + $0x50] sm:$0xff] %v2479_v52  ;;  %v2610_v23 = vld [vmem:[#allocation2 + $0x10] sm:$0xfe]  ;;  %v2641_v10 = vld [vmem:[#allocation12 + $0x430] sm:$0xff] }
 0x4eb   :  { %2491 = vst [vmem:[#allocation2 + $0x68] sm:$0x7] %v2482_v13  ;;  %v8625_v53 = vld [vmem:[#allocation2 + $0x28] sm:$0xff]  ;;  %v2738_v55 = vrot.slane %v2610_v23, 1  ;;  %v2547_v16 = vld [vmem:[#allocation12 + $0x178] sm:$0xff]  ;;  %v8661_v38 = vld [vmem:[#allocation2 + $0x10] sm:$0xff] }
 0x4ec   :  { %v2613_v54 = vld [vmem:[#allocation2 + $0x40] sm:$0x1]  ;;  %v2739_v45 = vrot.slane %v8625_v53, 1  ;;  %v2608_v18 = vld [vmem:[#allocation2] sm:$0xfe]  ;;  %v2592_v48 = vld [vmem:[#allocation12 + $0x2e0] sm:$0xff] }
 0x4ed   :  { %v2745_v61 = vrot.slane %v2613_v54, 1  ;;  %v2732_v21 = vrot.slane %v2608_v18, 1  ;;  %v2611_v41 = vld [vmem:[#allocation2 + $0x30] sm:$0x1]  ;;  %v2686_v15 = vld [vmem:[#allocation12 + $0x598] sm:$0xff]  ;;  %v2544_v49 = vld [vmem:[#allocation12 + $0x160] sm:$0xff] }
 0x4ee   :  { %v8635_v59 = vsel %vm1838_vm14, %v2738_v55, %v2739_v45  ;;  %v2741_v28 = vrot.slane %v2611_v41, 1  ;;  %v2638_v33 = vld [vmem:[#allocation12 + $0x418] sm:$0xff]  ;;  %v2589_v9 = vld [vmem:[#allocation12 + $0x2c8] sm:$0xff]  ;;  %v2683_v50 = vld [vmem:[#allocation12 + $0x580] sm:$0xff] }
 0x4ef   :  { %7019 = vmatmul.mubr.msk.f32.vlgmr.msra.gmra.mxu0 %vm153_vm2, %v8635_v59  ;;  %v8642_v17 = vsel %vm1838_vm14, %v2739_v45, %v2745_v61  ;;  %v8649_v25 = vsel %vm1838_vm14, %v2732_v21, %v2733_v39  ;;  %v2635_v34 = vld [vmem:[#allocation12 + $0x400] sm:$0xff]  ;;  %v2541_v11 = vld [vmem:[#allocation12 + $0x148] sm:$0xff]  ;;  %v2586_v52 = vld [vmem:[#allocation12 + $0x2b0] sm:$0xff] }
 0x4f0   :  { %7175 = vmatpush3.msra.mxu0 %v2662_v46  ;;  %2902 = vmatprep.mubr.f32.mxu0 %v9578_v22  ;;  %v2609_v57 = vld [vmem:[#allocation2 + $0x8] sm:$0xfe]  ;;  %v2612_v7 = vld [vmem:[#allocation2 + $0x38] sm:$0x1]  ;;  %v8657_v63 = vsel %vm1838_vm14, %v2733_v39, %v2741_v28  ;;  %v2680_v13 = vld [vmem:[#allocation12 + $0x568] sm:$0xff] }
 0x4f1   :  { %7176 = vmatprep.subr.mxu0 %v2707_v26  ;;  %v2735_v4 = vrot.slane %v2609_v57, 1  ;;  %v2743_v44 = vrot.slane %v2612_v7, 1  ;;  %v8668_v51 = vld [vmem:[#allocation2 + $0x8] sm:$0xff]  ;;  %v2538_v23 = vld [vmem:[#allocation12 + $0x130] sm:$0xff]  ;;  %v2632_v54 = vld [vmem:[#allocation12 + $0x3e8] sm:$0xff] }
 0x4f2   :  { %7177 = vmatpush3.msra.mxu0 %v2659_v29  ;;  %v2583_v20 = vld [vmem:[#allocation12 + $0x298] sm:$0xff]  ;;  %v2677_v55 = vld [vmem:[#allocation12 + $0x550] sm:$0xff]  ;;  %v2580_v18 = vld [vmem:[#allocation12 + $0x280] sm:$0xff] }
 0x4f3   :  { %7178 = vmatprep.subr.mxu0 %v2704_v19  ;;  %v2737_v2 = vsel %vm1838_vm14, %v2735_v4, %v2736_v6  ;;  %7020 = vmatmul.mubr.msk.f32.gmra.mxu0 %vm153_vm2, %v8642_v17  ;;  %v8653_v14 = vsel %vm1838_vm14, %v2736_v6, %v2743_v44  ;;  %v2535_v45 = vld [vmem:[#allocation12 + $0x118] sm:$0xff]  ;;  %v2629_v46 = vld [vmem:[#allocation12 + $0x3d0] sm:$0xff]  ;;  %v2532_v61 = vld [vmem:[#allocation12 + $0x100] sm:$0xff] }
 0x4f4   :  { %2819 = vmatprep.mubr.f32.mxu1 %v2737_v2  ;;  %7179 = vmatpush3.msra.mxu0 %v2656_v42  ;;  %v2674_v26 = vld [vmem:[#allocation12 + $0x538] sm:$0xff]  ;;  %v2577_v19 = vld [vmem:[#allocation12 + $0x268] sm:$0xff]  ;;  %v2671_v57 = vld [vmem:[#allocation12 + $0x520] sm:$0xff] }
 0x4f5   :  { %2820 = vmatmul.mubr.f32.vlgmr.msra.gmra.mxu1 %v8649_v25  ;;  %7180 = vmatprep.subr.mxu0 %v2701_v1  ;;  %v2626_v29 = vld [vmem:[#allocation12 + $0x3b8] sm:$0xff]  ;;  %v2529_v21 = vld [vmem:[#allocation12 + $0xe8] sm:$0xff]  ;;  %v2623_v7 = vld [vmem:[#allocation12 + $0x3a0] sm:$0xff] }
 0x4f6   :  { %2973 = vmatprep.mubr.f32.mxu0 %v2737_v2  ;;  %3166 = vmatpush1.msra.mxu1 %v2605_v8  ;;  %v2574_v4 = vld [vmem:[#allocation12 + $0x250] sm:$0xff]  ;;  %v2668_v6 = vld [vmem:[#allocation12 + $0x508] sm:$0xff]  ;;  %v2571_v1 = vld [vmem:[#allocation12 + $0x238] sm:$0xff] }
 0x4f7   :  { %2825 = vmatprep.mubr.f32.mxu1 %v8653_v14  ;;  %7181 = vmatpush3.msra.mxu0 %v2653_v31  ;;  %v2526_v42 = vld [vmem:[#allocation12 + $0xd0] sm:$0xff]  ;;  %v2620_v39 = vld [vmem:[#allocation12 + $0x388] sm:$0xff]  ;;  %v2523_v41 = vld [vmem:[#allocation12 + $0xb8] sm:$0xff] }
 0x4f8   :  { %3167 = vmatprep.subr.mxu1 %v2603_v30  ;;  %7182 = vmatprep.subr.mxu0 %v2698_v36  ;;  %v2665_v44 = vld [vmem:[#allocation12 + $0x4f0] sm:$0xff]  ;;  %v2568_v8 = vld [vmem:[#allocation12 + $0x220] sm:$0xff]  ;;  %v2722_v31 = vld [vmem:[#allocation12 + $0x6b8] sm:$0xff] }
 0x4f9   :  { %3168 = vmatpush1.msra.mxu1 %v2602_v47  ;;  %7183 = vmatpush3.msra.mxu0 %v2650_v40  ;;  %v2617_v2 = vld [vmem:[#allocation12 + $0x370] sm:$0xff]  ;;  %v2520_v30 = vld [vmem:[#allocation12 + $0xa0] sm:$0xff]  ;;  %v2565_v36 = vld [vmem:[#allocation12 + $0x208] sm:$0xff] }
 0x4fa   :  { %3169 = vmatprep.subr.mxu1 %v2600_v62  ;;  %2826 = vmatmul.mubr.f32.gmra.mxu1 %v8657_v63  ;;  %v2719_v28 = vld [vmem:[#allocation12 + $0x6a0] sm:$0xff]  ;;  %v2517_v47 = vld [vmem:[#allocation12 + $0x88] sm:$0xff]  ;;  %v2562_v40 = vld [vmem:[#allocation12 + $0x1f0] sm:$0xff] }
 0x4fb   :  { %7184 = vmatprep.subr.mxu0 %v2695_v0  ;;  %3170 = vmatpush1.msra.mxu1 %v2599_v12  ;;  %v2716_v62 = vld [vmem:[#allocation12 + $0x688] sm:$0xff]  ;;  %v2514_v0 = vld [vmem:[#allocation12 + $0x70] sm:$0xff]  ;;  %v2559_v12 = vld [vmem:[#allocation12 + $0x1d8] sm:$0xff] }
 0x4fc   :  { %7185 = vmatpush3.msra.mxu0 %v2647_v27  ;;  %3171 = vmatprep.subr.mxu1 %v2597_v24  ;;  %v2511_v27 = vld [vmem:[#allocation12 + $0x58] sm:$0xff]  ;;  %v2546_v24 = vld [vmem:[#allocation12 + $0x170] sm:$0xff] }
 0x4fd   :  { %7186 = vmatprep.subr.mxu0 %v2692_v35  ;;  %3172 = vmatpush1.msra.mxu1 %v2596_v32  ;;  %v2508_v35 = vld [vmem:[#allocation12 + $0x40] sm:$0xff]  ;;  %v2545_v32 = vld [vmem:[#allocation12 + $0x168] sm:$0xff] }
 0x4fe   :  { %7187 = vmatpush3.msra.mxu0 %v2644_v43  ;;  %3205 = vmatprep.mubr.f32.mxu1 %v9578_v22  ;;  %v2543_v43 = vld [vmem:[#allocation12 + $0x158] sm:$0xff] }
 0x4ff   :  { %7218 = vmatprep.subr.mxu1 %v2595_v3  ;;  %7188 = vmatprep.subr.mxu0 %v2689_v5  ;;  %v2505_v3 = vld [vmem:[#allocation12 + $0x28] sm:$0xff]  ;;  %v2542_v5 = vld [vmem:[#allocation12 + $0x150] sm:$0xff] }
 0x500   :  { %7023 = vmatmul.mubr.msk.f32.vlgmr.msra.gmra.mxu1 %vm153_vm2, %v8661_v38  ;;  %7189 = vmatpush3.msra.mxu0 %v2641_v10  ;;  %v2540_v10 = vld [vmem:[#allocation12 + $0x140] sm:$0xff] }
 0x501   :  { %7219 = vmatpush3.msra.mxu1 %v2547_v16  ;;  %7190 = vmatprep.subr.mxu0 %v2686_v15  ;;  %v2502_v16 = vld [vmem:[#allocation12 + $0x10] sm:$0xff]  ;;  %v2539_v15 = vld [vmem:[#allocation12 + $0x138] sm:$0xff] }
 0x502   :  { %7220 = vmatprep.subr.mxu1 %v2592_v48  ;;  %7191 = vmatpush3.msra.mxu0 %v2638_v33  ;;  %v2607_v48 = vld [vmem:[#allocation12 + $0x358] sm:$0xff] }
 0x503   :  { %7221 = vmatpush3.msra.mxu1 %v2544_v49  ;;  %3211 = vmatprep.mubr.f32.mxu1 %v9578_v22  ;;  %v8679_v33 = vld [vmem:[#allocation2] sm:$0xff]  ;;  %v2536_v49 = vld [vmem:[#allocation12 + $0x120] sm:$0xff] }
 0x504   :  { %7222 = vmatprep.subr.mxu1 %v2589_v9  ;;  %7192 = vmatprep.subr.mxu0 %v2683_v50  ;;  %v2604_v9 = vld [vmem:[#allocation12 + $0x340] sm:$0xff]  ;;  %v2534_v50 = vld [vmem:[#allocation12 + $0x110] sm:$0xff] }
 0x505   :  { %7024 = vmatmul.mubr.msk.f32.gmra.mxu1 %vm153_vm2, %v8625_v53  ;;  %7193 = vmatpush3.msra.mxu0 %v2635_v34  ;;  %v2533_v34 = vld [vmem:[#allocation12 + $0x108] sm:$0xff] }
 0x506   :  { %7223 = vmatpush3.msra.mxu1 %v2541_v11  ;;  %3282 = vmatprep.mubr.f32.mxu1 %v8668_v51  ;;  %v2601_v11 = vld [vmem:[#allocation12 + $0x328] sm:$0xff] }
 0x507   :  { %7224 = vmatprep.subr.mxu1 %v2586_v52  ;;  %7194 = vmatprep.subr.mxu0 %v2680_v13  ;;  %v2531_v52 = vld [vmem:[#allocation12 + $0xf8] sm:$0xff]  ;;  %v2530_v13 = vld [vmem:[#allocation12 + $0xf0] sm:$0xff] }
 0x508   :  { %7225 = vmatpush3.msra.mxu1 %v2538_v23  ;;  %7195 = vmatpush3.msra.mxu0 %v2632_v54  ;;  %v2598_v23 = vld [vmem:[#allocation12 + $0x310] sm:$0xff]  ;;  %v2528_v54 = vld [vmem:[#allocation12 + $0xe0] sm:$0xff] }
 0x509   :  { %7226 = vmatprep.subr.mxu1 %v2583_v20  ;;  %7196 = vmatprep.subr.mxu0 %v2677_v55  ;;  %v2527_v20 = vld [vmem:[#allocation12 + $0xd8] sm:$0xff]  ;;  %v3421_v55 = vld [vmem:[#allocation12 + $0x830] sm:$0xff] }
 0x50a   :  { %7227 = vmatpush3.msra.mxu1 %v2535_v45  ;;  %7197 = vmatpush3.msra.mxu0 %v2629_v46  ;;  %v2525_v46 = vld [vmem:[#allocation12 + $0xc8] sm:$0xff] }
 0x50b   :  { %7228 = vmatprep.subr.mxu1 %v2580_v18  ;;  %7198 = vmatprep.subr.mxu0 %v2674_v26  ;;  %v3420_v18 = vld [vmem:[#allocation12 + $0x828] sm:$0xff]  ;;  %v3494_v26 = vrot.slane %v8630_v56, 2 }
 0x50c   :  { %7229 = vmatpush3.msra.mxu1 %v2532_v61  ;;  %7199 = vmatpush3.msra.mxu0 %v2626_v29  ;;  %v2524_v61 = vld [vmem:[#allocation12 + $0xc0] sm:$0xff]  ;;  %v3418_v29 = vld [vmem:[#allocation12 + $0x818] sm:$0xff] }
 0x50d   :  { %7230 = vmatprep.subr.mxu1 %v2577_v19  ;;  %7200 = vmatprep.subr.mxu0 %v2671_v57  ;;  %v2522_v19 = vld [vmem:[#allocation12 + $0xb0] sm:$0xff] }
 0x50e   :  { %7231 = vmatpush3.msra.mxu1 %v2529_v21  ;;  %7201 = vmatpush3.msra.mxu0 %v2623_v7  ;;  %v3417_v57 = vld [vmem:[#allocation12 + $0x810] sm:$0xff]  ;;  %v2521_v21 = vld [vmem:[#allocation12 + $0xa8] sm:$0xff]  ;;  %v3415_v7 = vld [vmem:[#allocation12 + $0x800] sm:$0xff] }
 0x50f   :  { %7232 = vmatprep.subr.mxu1 %v2574_v4  ;;  %7202 = vmatprep.subr.mxu0 %v2668_v6  ;;  %v2519_v4 = vld [vmem:[#allocation12 + $0x98] sm:$0xff] }
 0x510   :  { %7233 = vmatpush3.msra.mxu1 %v2526_v42  ;;  %7203 = vmatpush3.msra.mxu0 %v2620_v39  ;;  %v3414_v6 = vld [vmem:[#allocation12 + $0x7f8] sm:$0xff]  ;;  %v2518_v42 = vld [vmem:[#allocation12 + $0x90] sm:$0xff]  ;;  %v3412_v39 = vld [vmem:[#allocation12 + $0x7e8] sm:$0xff] }
 0x511   :  { %7234 = vmatprep.subr.mxu1 %v2571_v1  ;;  %7204 = vmatprep.subr.mxu0 %v2665_v44  ;;  %v2516_v1 = vld [vmem:[#allocation12 + $0x80] sm:$0xff] }
 0x512   :  { %7235 = vmatpush3.msra.mxu1 %v2523_v41  ;;  %7205 = vmatpush3.msra.mxu0 %v2617_v2  ;;  %v3411_v44 = vld [vmem:[#allocation12 + $0x7e0] sm:$0xff]  ;;  %v2515_v41 = vld [vmem:[#allocation12 + $0x78] sm:$0xff]  ;;  %v3409_v2 = vld [vmem:[#allocation12 + $0x7d0] sm:$0xff] }
 0x513   :  { %7236 = vmatprep.subr.mxu1 %v2568_v8  ;;  %2974 = vmatmul.mubr.f32.vlgmr.msra.gmra.mxu0 %v8649_v25  ;;  %v2713_v25 = vld [vmem:[#allocation12 + $0x670] sm:$0xff]  ;;  %v2513_v8 = vld [vmem:[#allocation12 + $0x68] sm:$0xff] }
 0x514   :  { %7535 = vmatprep.subr.mxu0 %v2722_v31  ;;  %7237 = vmatpush3.msra.mxu1 %v2520_v30  ;;  %v2512_v30 = vld [vmem:[#allocation12 + $0x60] sm:$0xff] }
 0x515   :  { %2978 = vmatprep.mubr.f32.mxu0 %v8653_v14  ;;  %7536 = vmatpush3.msra.mxu0 %v2722_v31  ;;  %v2556_v14 = vld [vmem:[#allocation12 + $0x1c0] sm:$0xff]  ;;  %v3408_v31 = vld [vmem:[#allocation12 + $0x7c8] sm:$0xff] }
 0x516   :  { %7238 = vmatprep.subr.mxu1 %v2565_v36  ;;  %7537 = vmatprep.subr.mxu0 %v2719_v28  ;;  %v3406_v36 = vld [vmem:[#allocation12 + $0x7b8] sm:$0xff] }
 0x517   :  { %7239 = vmatpush3.msra.mxu1 %v2517_v47  ;;  %7538 = vmatpush3.msra.mxu0 %v2719_v28  ;;  %v2510_v28 = vld [vmem:[#allocation12 + $0x50] sm:$0xff] }
 0x518   :  { %7240 = vmatprep.subr.mxu1 %v2562_v40  ;;  %2979 = vmatmul.mubr.f32.gmra.mxu0 %v8657_v63  ;;  %v2553_v63 = vld [vmem:[#allocation12 + $0x1a8] sm:$0xff]  ;;  %v3405_v47 = vld [vmem:[#allocation12 + $0x7b0] sm:$0xff] }
 0x519   :  { %7539 = vmatprep.subr.mxu0 %v2716_v62  ;;  %7241 = vmatpush3.msra.mxu1 %v2514_v0  ;;  %v2509_v40 = vld [vmem:[#allocation12 + $0x48] sm:$0xff]  ;;  %v2507_v0 = vld [vmem:[#allocation12 + $0x38] sm:$0xff] }
 0x51a   :  { %7540 = vmatpush3.msra.mxu0 %v2716_v62  ;;  %7543 = vmatprep.mubr.msk.f32.mxu0 %vm153_vm2, %v8635_v59  ;;  %v2550_v59 = vld [vmem:[#allocation12 + $0x190] sm:$0xff]  ;;  %v3403_v62 = vld [vmem:[#allocation12 + $0x7a0] sm:$0xff] }
 0x51b   :  { %7242 = vmatprep.subr.mxu1 %v2559_v12  ;;  %7541 = vmatprep.subr.mxu0 %v2713_v25  ;;  %v3402_v12 = vld [vmem:[#allocation12 + $0x798] sm:$0xff] }
 0x51c   :  { %7243 = vmatpush3.msra.mxu1 %v2511_v27  ;;  %7542 = vmatpush3.msra.mxu0 %v2713_v25  ;;  %v2506_v25 = vld [vmem:[#allocation12 + $0x30] sm:$0xff]  ;;  %v3400_v27 = vld [vmem:[#allocation12 + $0x788] sm:$0xff] }
 0x51d   :  { %7244 = vmatprep.subr.mxu1 %v2556_v14  ;;  %7544 = vmatmul.mubr.msk.f32.vlgmr.msra.gmra.mxu0 %vm153_vm2, %v8642_v17  ;;  %v2537_v17 = vld [vmem:[#allocation12 + $0x128] sm:$0xff]  ;;  %v2504_v14 = vld [vmem:[#allocation12 + $0x20] sm:$0xff] }
 0x51e   :  { %3064 = vmatprep.subr.mxu0 %v2546_v24  ;;  %7245 = vmatpush3.msra.mxu1 %v2508_v35  ;;  %v3399_v24 = vld [vmem:[#allocation12 + $0x780] sm:$0xff]  ;;  %v2503_v35 = vld [vmem:[#allocation12 + $0x18] sm:$0xff] }
 0x51f   :  { %3065 = vmatpush1.msra.mxu0 %v2545_v32  ;;  %3128 = vmatprep.mubr.f32.mxu0 %v8668_v51  ;;  %v3369_v51 = vld [vmem:[#allocation2 + $0x8] sm:$0xfc]  ;;  %v3397_v32 = vld [vmem:[#allocation12 + $0x770] sm:$0xff] }
 0x520   :  { %7246 = vmatprep.subr.mxu1 %v2553_v63  ;;  %3066 = vmatprep.subr.mxu0 %v2543_v43  ;;  %v3493_v45 = vrot.slane %v3369_v51, 2  ;;  %v2501_v63 = vld [vmem:[#allocation12 + $0x8] sm:$0xff] }
 0x521   :  { %7247 = vmatpush3.msra.mxu1 %v2505_v3  ;;  %3067 = vmatpush1.msra.mxu0 %v2542_v5  ;;  %v3396_v43 = vld [vmem:[#allocation12 + $0x768] sm:$0xff]  ;;  %v2500_v3 = vld [vmem:[#allocation12] sm:$0xff]  ;;  %v3394_v5 = vld [vmem:[#allocation12 + $0x758] sm:$0xff] }
 0x522   :  { %7248 = vmatprep.subr.mxu1 %v2550_v59  ;;  %3068 = vmatprep.subr.mxu0 %v2540_v10  ;;  %v2594_v59 = vld [vmem:[#allocation12 + $0x2f0] sm:$0xff]  ;;  %v3384_v51 = vld [vmem:[#allocation12 + $0x708] sm:$0xff] }
 0x523   :  { %7249 = vmatpush3.msra.mxu1 %v2502_v16  ;;  %3069 = vmatpush1.msra.mxu0 %v2539_v15  ;;  %v3393_v10 = vld [vmem:[#allocation12 + $0x750] sm:$0xff]  ;;  %v2593_v16 = vld [vmem:[#allocation12 + $0x2e8] sm:$0xff]  ;;  %v3391_v15 = vld [vmem:[#allocation12 + $0x740] sm:$0xff] }
 0x524   :  { %3283 = vmatmul.mubr.f32.vlgmr.msra.gmra.mxu1 %v8679_v33  ;;  %7546 = vmatprep.subr.mxu1 %v2607_v48 }
 0x525   :  { %3070 = vmatprep.subr.mxu0 %v2537_v17  ;;  %3287 = vmatprep.mubr.f32.mxu1 %v8630_v56  ;;  %v3390_v17 = vld [vmem:[#allocation12 + $0x738] sm:$0xff] }
 0x526   :  { %7547 = vmatpush3.msra.mxu1 %v2607_v48  ;;  %3071 = vmatpush1.msra.mxu0 %v2536_v49  ;;  %v2591_v48 = vld [vmem:[#allocation12 + $0x2d8] sm:$0xff]  ;;  %v2590_v49 = vld [vmem:[#allocation12 + $0x2d0] sm:$0xff] }
 0x527   :  { %7548 = vmatprep.subr.mxu1 %v2604_v9  ;;  %3072 = vmatprep.subr.mxu0 %v2534_v50  ;;  %v2588_v50 = vld [vmem:[#allocation12 + $0x2c0] sm:$0xff] }
 0x528   :  { %7549 = vmatpush3.msra.mxu1 %v2604_v9  ;;  %3073 = vmatpush1.msra.mxu0 %v2533_v34  ;;  %v3388_v9 = vld [vmem:[#allocation12 + $0x728] sm:$0xff]  ;;  %v3387_v34 = vld [vmem:[#allocation12 + $0x720] sm:$0xff] }
 0x529   :  { %3288 = vmatmul.mubr.f32.gmra.mxu1 %v8632_v58  ;;  %7550 = vmatprep.subr.mxu1 %v2601_v11 }
 0x52a   :  { %3074 = vmatprep.subr.mxu0 %v2531_v52  ;;  %7551 = vmatpush3.msra.mxu1 %v2601_v11  ;;  %v2587_v11 = vld [vmem:[#allocation12 + $0x2b8] sm:$0xff]  ;;  %v3385_v52 = vld [vmem:[#allocation12 + $0x710] sm:$0xff] }
 0x52b   :  { %7554 = vmatprep.mubr.msk.f32.mxu1 %vm153_vm2, %v8661_v38  ;;  %3075 = vmatpush1.msra.mxu0 %v2530_v13  ;;  %v8692_v38 = vsel %vm3489_vm4, %v3493_v45, %v3494_v26  ;;  %v2585_v13 = vld [vmem:[#allocation12 + $0x2a8] sm:$0xff] }
 0x52c   :  { %7552 = vmatprep.subr.mxu1 %v2598_v23  ;;  %3076 = vmatprep.subr.mxu0 %v2528_v54  ;;  %v3382_v54 = vld [vmem:[#allocation12 + $0x6f8] sm:$0xff]  ;;  %v2581_v45 = vld [vmem:[#allocation12 + $0x288] sm:$0xff] }
 0x52d   :  { %7553 = vmatpush3.msra.mxu1 %v2598_v23  ;;  %3077 = vmatpush1.msra.mxu0 %v2527_v20  ;;  %v2584_v23 = vld [vmem:[#allocation12 + $0x2a0] sm:$0xff]  ;;  %v2582_v20 = vld [vmem:[#allocation12 + $0x290] sm:$0xff] }
 0x52e   :  { %7555 = vmatmul.mubr.msk.f32.vlgmr.msra.gmra.mxu1 %vm153_vm2, %v8625_v53  ;;  %3513 = vmatprep.subr.mxu1 %v3421_v55  ;;  %v3381_v55 = vld [vmem:[#allocation12 + $0x6f0] sm:$0xff] }
 0x52f   :  { %3078 = vmatprep.subr.mxu0 %v2525_v46  ;;  %3514 = vmatpush1.msra.mxu1 %v3420_v18  ;;  %v3379_v46 = vld [vmem:[#allocation12 + $0x6e0] sm:$0xff]  ;;  %v2579_v18 = vld [vmem:[#allocation12 + $0x278] sm:$0xff] }
 0x530   :  { %3577 = vmatprep.mubr.f32.mxu1 %v8692_v38  ;;  %3079 = vmatpush1.msra.mxu0 %v2524_v61  ;;  %v3378_v61 = vld [vmem:[#allocation12 + $0x6d8] sm:$0xff] }
 0x531   :  { %3515 = vmatprep.subr.mxu1 %v3418_v29  ;;  %3080 = vmatprep.subr.mxu0 %v2522_v19  ;;  %v2578_v29 = vld [vmem:[#allocation12 + $0x270] sm:$0xff]  ;;  %v3376_v19 = vld [vmem:[#allocation12 + $0x6c8] sm:$0xff] }
 0x532   :  { %3516 = vmatpush1.msra.mxu1 %v3417_v57  ;;  %3081 = vmatpush1.msra.mxu0 %v2521_v21  ;;  %v2576_v57 = vld [vmem:[#allocation12 + $0x260] sm:$0xff] }
 0x533   :  { %3517 = vmatprep.subr.mxu1 %v3415_v7  ;;  %3082 = vmatprep.subr.mxu0 %v2519_v4  ;;  %v3375_v21 = vld [vmem:[#allocation12 + $0x6c0] sm:$0xff]  ;;  %v2575_v7 = vld [vmem:[#allocation12 + $0x258] sm:$0xff]  ;;  %v3469_v4 = vld [vmem:[#allocation12 + $0x9b0] sm:$0xff] }
 0x534   :  { %3518 = vmatpush1.msra.mxu1 %v3414_v6  ;;  %3083 = vmatpush1.msra.mxu0 %v2518_v42  ;;  %v2573_v6 = vld [vmem:[#allocation12 + $0x248] sm:$0xff] }
 0x535   :  { %3519 = vmatprep.subr.mxu1 %v3412_v39  ;;  %3084 = vmatprep.subr.mxu0 %v2516_v1  ;;  %v3468_v42 = vld [vmem:[#allocation12 + $0x9a8] sm:$0xff]  ;;  %v2572_v39 = vld [vmem:[#allocation12 + $0x240] sm:$0xff]  ;;  %v3466_v1 = vld [vmem:[#allocation12 + $0x998] sm:$0xff] }
 0x536   :  { %3520 = vmatpush1.msra.mxu1 %v3411_v44  ;;  %3085 = vmatpush1.msra.mxu0 %v2515_v41  ;;  %v2570_v44 = vld [vmem:[#allocation12 + $0x230] sm:$0xff] }
 0x537   :  { %3521 = vmatprep.subr.mxu1 %v3409_v2  ;;  %3086 = vmatprep.subr.mxu0 %v2513_v8  ;;  %v3465_v41 = vld [vmem:[#allocation12 + $0x990] sm:$0xff]  ;;  %v2569_v2 = vld [vmem:[#allocation12 + $0x228] sm:$0xff]  ;;  %v3463_v8 = vld [vmem:[#allocation12 + $0x980] sm:$0xff] }
 0x538   :  { %3522 = vmatpush1.msra.mxu1 %v3408_v31  ;;  %3087 = vmatpush1.msra.mxu0 %v2512_v30  ;;  %v2567_v31 = vld [vmem:[#allocation12 + $0x218] sm:$0xff] }
 0x539   :  { %3523 = vmatprep.subr.mxu1 %v3406_v36  ;;  %3088 = vmatprep.subr.mxu0 %v2510_v28  ;;  %v3462_v30 = vld [vmem:[#allocation12 + $0x978] sm:$0xff]  ;;  %v2566_v36 = vld [vmem:[#allocation12 + $0x210] sm:$0xff]  ;;  %v3460_v28 = vld [vmem:[#allocation12 + $0x968] sm:$0xff] }
 0x53a   :  { %3524 = vmatpush1.msra.mxu1 %v3405_v47  ;;  %3089 = vmatpush1.msra.mxu0 %v2509_v40  ;;  %v2564_v47 = vld [vmem:[#allocation12 + $0x200] sm:$0xff] }
 0x53b   :  { %3525 = vmatprep.subr.mxu1 %v3403_v62  ;;  %3090 = vmatprep.subr.mxu0 %v2507_v0  ;;  %v3459_v40 = vld [vmem:[#allocation12 + $0x960] sm:$0xff]  ;;  %v2563_v62 = vld [vmem:[#allocation12 + $0x1f8] sm:$0xff]  ;;  %v3457_v0 = vld [vmem:[#allocation12 + $0x950] sm:$0xff] }
 0x53c   :  { %3526 = vmatpush1.msra.mxu1 %v3402_v12  ;;  %3091 = vmatpush1.msra.mxu0 %v2506_v25  ;;  %v2561_v12 = vld [vmem:[#allocation12 + $0x1e8] sm:$0xff] }
 0x53d   :  { %3527 = vmatprep.subr.mxu1 %v3400_v27  ;;  %3092 = vmatprep.subr.mxu0 %v2504_v14  ;;  %v3456_v25 = vld [vmem:[#allocation12 + $0x948] sm:$0xff]  ;;  %v2560_v27 = vld [vmem:[#allocation12 + $0x1e0] sm:$0xff]  ;;  %v3454_v14 = vld [vmem:[#allocation12 + $0x938] sm:$0xff] }
 0x53e   :  { %3528 = vmatpush1.msra.mxu1 %v3399_v24  ;;  %3093 = vmatpush1.msra.mxu0 %v2503_v35  ;;  %v2558_v24 = vld [vmem:[#allocation12 + $0x1d0] sm:$0xff] }
 0x53f   :  { %3529 = vmatprep.subr.mxu1 %v3397_v32  ;;  %3094 = vmatprep.subr.mxu0 %v2501_v63  ;;  %v3453_v35 = vld [vmem:[#allocation12 + $0x930] sm:$0xff]  ;;  %v2557_v32 = vld [vmem:[#allocation12 + $0x1c8] sm:$0xff]  ;;  %v3451_v63 = vld [vmem:[#allocation12 + $0x920] sm:$0xff] }
 0x540   :  { %3530 = vmatpush1.msra.mxu1 %v3396_v43  ;;  %3095 = vmatpush1.msra.mxu0 %v2500_v3  ;;  %v2555_v43 = vld [vmem:[#allocation12 + $0x1b8] sm:$0xff] }
 0x541   :  { %3531 = vmatprep.subr.mxu1 %v3394_v5  ;;  %3096 = vmatprep.subr.mxu0 %v2594_v59  ;;  %v3450_v3 = vld [vmem:[#allocation12 + $0x918] sm:$0xff]  ;;  %v2554_v5 = vld [vmem:[#allocation12 + $0x1b0] sm:$0xff]  ;;  %v3448_v59 = vld [vmem:[#allocation12 + $0x908] sm:$0xff] }
 0x542   :  { %3532 = vmatpush1.msra.mxu1 %v3393_v10  ;;  %3097 = vmatpush2.msra.mxu0 %v2593_v16  ;;  %v2552_v10 = vld [vmem:[#allocation12 + $0x1a0] sm:$0xff] }
 0x543   :  { %3533 = vmatprep.subr.mxu1 %v3391_v15  ;;  %3098 = vmatprep.subr.mxu0 %v2591_v48  ;;  %v3447_v16 = vld [vmem:[#allocation12 + $0x900] sm:$0xff]  ;;  %v2551_v15 = vld [vmem:[#allocation12 + $0x198] sm:$0xff]  ;;  %v3445_v48 = vld [vmem:[#allocation12 + $0x8f0] sm:$0xff] }
 0x544   :  { %3534 = vmatpush1.msra.mxu1 %v3390_v17  ;;  %3099 = vmatpush2.msra.mxu0 %v2590_v49  ;;  %v2549_v17 = vld [vmem:[#allocation12 + $0x188] sm:$0xff] }
 0x545   :  { %3535 = vmatprep.subr.mxu1 %v3388_v9  ;;  %3100 = vmatprep.subr.mxu0 %v2588_v50  ;;  %v3444_v49 = vld [vmem:[#allocation12 + $0x8e8] sm:$0xff]  ;;  %v2548_v9 = vld [vmem:[#allocation12 + $0x180] sm:$0xff]  ;;  %v3442_v50 = vld [vmem:[#allocation12 + $0x8d8] sm:$0xff] }
 0x546   :  { %3536 = vmatpush1.msra.mxu1 %v3387_v34  ;;  %3101 = vmatpush2.msra.mxu0 %v2587_v11  ;;  %v3441_v34 = vld [vmem:[#allocation12 + $0x8d0] sm:$0xff] }
 0x547   :  { %3537 = vmatprep.subr.mxu1 %v3385_v52  ;;  %3102 = vmatprep.subr.mxu0 %v2585_v13  ;;  %v3481_v11 = vld [vmem:[#allocation12 + $0xa10] sm:$0xff]  ;;  %v3439_v52 = vld [vmem:[#allocation12 + $0x8c0] sm:$0xff]  ;;  %v3480_v13 = vld [vmem:[#allocation12 + $0xa08] sm:$0xff] }
 0x548   :  { %3538 = vmatpush1.msra.mxu1 %v3384_v51  ;;  %3103 = vmatpush2.msra.mxu0 %v2584_v23  ;;  %v3438_v51 = vld [vmem:[#allocation12 + $0x8b8] sm:$0xff] }
 0x549   :  { %3539 = vmatprep.subr.mxu1 %v3382_v54  ;;  %3104 = vmatprep.subr.mxu0 %v2582_v20  ;;  %v3478_v23 = vld [vmem:[#allocation12 + $0x9f8] sm:$0xff]  ;;  %v3436_v54 = vld [vmem:[#allocation12 + $0x8a8] sm:$0xff]  ;;  %v3477_v20 = vld [vmem:[#allocation12 + $0x9f0] sm:$0xff] }
 0x54a   :  { %3540 = vmatpush1.msra.mxu1 %v3381_v55  ;;  %3105 = vmatpush2.msra.mxu0 %v2581_v45  ;;  %v3435_v55 = vld [vmem:[#allocation12 + $0x8a0] sm:$0xff] }
 0x54b   :  { %3541 = vmatprep.subr.mxu1 %v3379_v46  ;;  %3106 = vmatprep.subr.mxu0 %v2579_v18  ;;  %v3475_v45 = vld [vmem:[#allocation12 + $0x9e0] sm:$0xff]  ;;  %v3370_v46 = vld [vmem:[#allocation2 + $0x10] sm:$0xfc]  ;;  %v3433_v18 = vld [vmem:[#allocation12 + $0x890] sm:$0xff] }
 0x54c   :  { %3542 = vmatpush1.msra.mxu1 %v3378_v61  ;;  %3107 = vmatpush2.msra.mxu0 %v2578_v29  ;;  %v3474_v61 = vld [vmem:[#allocation12 + $0x9d8] sm:$0xff]  ;;  %v3472_v29 = vld [vmem:[#allocation12 + $0x9c8] sm:$0xff] }
 0x54d   :  { %3543 = vmatprep.subr.mxu1 %v3376_v19  ;;  %3108 = vmatprep.subr.mxu0 %v2576_v57  ;;  %v3430_v19 = vld [vmem:[#allocation12 + $0x878] sm:$0xff]  ;;  %v3471_v57 = vld [vmem:[#allocation12 + $0x9c0] sm:$0xff] }
 0x54e   :  { %3544 = vmatpush1.msra.mxu1 %v3375_v21  ;;  %3109 = vmatpush2.msra.mxu0 %v2575_v7  ;;  %v3496_v21 = vrot.slane %v3370_v46, 2  ;;  %v3497_v7 = vrot.slane %v8625_v53, 2  ;;  %v3467_v53 = vld [vmem:[#allocation12 + $0x9a0] sm:$0xff] }
 0x54f   :  { %3545 = vmatprep.subr.mxu1 %v3469_v4  ;;  %3110 = vmatprep.subr.mxu0 %v2573_v6  ;;  %v3429_v4 = vld [vmem:[#allocation12 + $0x870] sm:$0xff]  ;;  %v3470_v6 = vld [vmem:[#allocation12 + $0x9b8] sm:$0xff]  ;;  %v4112_v46 = vld [vmem:[#allocation12 + $0x640] sm:$0xff] }
 0x550   :  { %3546 = vmatpush2.msra.mxu1 %v3468_v42  ;;  %3111 = vmatpush2.msra.mxu0 %v2572_v39  ;;  %v3373_v42 = vld [vmem:[#allocation2 + $0x40] sm:$0x3]  ;;  %v3427_v39 = vld [vmem:[#allocation12 + $0x860] sm:$0xff] }
 0x551   :  { %3547 = vmatprep.subr.mxu1 %v3466_v1  ;;  %3112 = vmatprep.subr.mxu0 %v2570_v44  ;;  %v3422_v1 = vld [vmem:[#allocation12 + $0x838] sm:$0xff] }
 0x552   :  { %3548 = vmatpush2.msra.mxu1 %v3465_v41  ;;  %3113 = vmatpush2.msra.mxu0 %v2569_v2  ;;  %v3368_v44 = vld [vmem:[#allocation2] sm:$0xfc]  ;;  %v8701_v41 = vsel %vm3489_vm4, %v3496_v21, %v3497_v7 }
 0x553   :  { %3549 = vmatprep.subr.mxu1 %v3463_v8  ;;  %3114 = vmatprep.subr.mxu0 %v2567_v31  ;;  %v3426_v2 = vld [vmem:[#allocation12 + $0x858] sm:$0xff]  ;;  %v3424_v8 = vld [vmem:[#allocation12 + $0x848] sm:$0xff]  ;;  %v3503_v31 = vrot.slane %v3373_v42, 2 }
 0x554   :  { %3550 = vmatpush2.msra.mxu1 %v3462_v30  ;;  %3115 = vmatpush2.msra.mxu0 %v2566_v36  ;;  %v3372_v30 = vld [vmem:[#allocation2 + $0x38] sm:$0x3]  ;;  %v3419_v36 = vld [vmem:[#allocation12 + $0x820] sm:$0xff] }
 0x555   :  { %3551 = vmatprep.subr.mxu1 %v3460_v28  ;;  %3116 = vmatprep.subr.mxu0 %v2564_v47  ;;  %v3423_v28 = vld [vmem:[#allocation12 + $0x840] sm:$0xff]  ;;  %v3490_v47 = vrot.slane %v3368_v44, 2  ;;  %v3440_v44 = vld [vmem:[#allocation12 + $0x8c8] sm:$0xff] }
 0x556   :  { %3552 = vmatpush2.msra.mxu1 %v3459_v40  ;;  %3117 = vmatpush2.msra.mxu0 %v2563_v62  ;;  %v3464_v40 = vld [vmem:[#allocation12 + $0x988] sm:$0xff]  ;;  %v3491_v62 = vrot.slane %v8632_v58, 2 }
 0x557   :  { %3553 = vmatprep.subr.mxu1 %v3457_v0  ;;  %3118 = vmatprep.subr.mxu0 %v2561_v12  ;;  %v3416_v0 = vld [vmem:[#allocation12 + $0x808] sm:$0xff]  ;;  %v3501_v12 = vrot.slane %v3372_v30, 2  ;;  %v3437_v30 = vld [vmem:[#allocation12 + $0x8b0] sm:$0xff] }
 0x558   :  { %3554 = vmatpush2.msra.mxu1 %v3456_v25  ;;  %3119 = vmatpush2.msra.mxu0 %v2560_v27  ;;  %v8708_v25 = vsel %vm3489_vm4, %v3497_v7, %v3503_v31  ;;  %v4126_v27 = vld [vmem:[#allocation12 + $0x6b0] sm:$0xff]  ;;  %v4103_v31 = vld [vmem:[#allocation12 + $0x5f8] sm:$0xff] }
 0x559   :  { %3555 = vmatprep.subr.mxu1 %v3454_v14  ;;  %3120 = vmatprep.subr.mxu0 %v2558_v24  ;;  %v3371_v14 = vld [vmem:[#allocation2 + $0x30] sm:$0x3]  ;;  %v8713_v24 = vsel %vm3489_vm4, %v3490_v47, %v3491_v62  ;;  %v4100_v47 = vld [vmem:[#allocation12 + $0x5e0] sm:$0xff] }
 0x55a   :  { %3556 = vmatpush2.msra.mxu1 %v3453_v35  ;;  %3121 = vmatpush2.msra.mxu0 %v2557_v32  ;;  %v3461_v35 = vld [vmem:[#allocation12 + $0x970] sm:$0xff] }
 0x55b   :  { %3557 = vmatprep.subr.mxu1 %v3451_v63  ;;  %3122 = vmatprep.subr.mxu0 %v2555_v43  ;;  %v3413_v32 = vld [vmem:[#allocation12 + $0x7f0] sm:$0xff]  ;;  %v8720_v63 = vsel %vm3489_vm4, %v3494_v26, %v3501_v12  ;;  %v4123_v43 = vld [vmem:[#allocation12 + $0x698] sm:$0xff]  ;;  %v4097_v12 = vld [vmem:[#allocation12 + $0x5c8] sm:$0xff] }
 0x55c   :  { %3558 = vmatpush2.msra.mxu1 %v3450_v3  ;;  %3123 = vmatpush2.msra.mxu0 %v2554_v5  ;;  %v3458_v3 = vld [vmem:[#allocation12 + $0x958] sm:$0xff]  ;;  %v3499_v5 = vrot.slane %v3371_v14, 2  ;;  %v4049_v14 = vld [vmem:[#allocation12 + $0x448] sm:$0xff] }
 0x55d   :  { %3559 = vmatprep.subr.mxu1 %v3448_v59  ;;  %3124 = vmatprep.subr.mxu0 %v2552_v10  ;;  %v4122_v59 = vld [vmem:[#allocation12 + $0x690] sm:$0xff]  ;;  %v3410_v10 = vld [vmem:[#allocation12 + $0x7d8] sm:$0xff] }
 0x55e   :  { %3560 = vmatpush2.msra.mxu1 %v3447_v16  ;;  %3125 = vmatpush2.msra.mxu0 %v2551_v15  ;;  %v4120_v16 = vld [vmem:[#allocation12 + $0x680] sm:$0xff]  ;;  %v8723_v15 = vld [vmem:[#allocation2 + $0x58] sm:$0xff]  ;;  %v8726_v26 = vsel %vm3489_vm4, %v3491_v62, %v3499_v5  ;;  %v4091_v5 = vld [vmem:[#allocation12 + $0x598] sm:$0xff] }
 0x55f   :  { %3561 = vmatprep.subr.mxu1 %v3445_v48  ;;  %3126 = vmatprep.subr.mxu0 %v2549_v17  ;;  %v4119_v48 = vld [vmem:[#allocation12 + $0x678] sm:$0xff]  ;;  %v3407_v17 = vld [vmem:[#allocation12 + $0x7c0] sm:$0xff] }
 0x560   :  { %3562 = vmatpush2.msra.mxu1 %v3444_v49  ;;  %3127 = vmatpush2.msra.mxu0 %v2548_v9  ;;  %v4117_v49 = vld [vmem:[#allocation12 + $0x668] sm:$0xff]  ;;  %v4052_v62 = vld [vmem:[#allocation12 + $0x460] sm:$0xff] }
 0x561   :  { %3563 = vmatprep.subr.mxu1 %v3442_v50  ;;  %3129 = vmatmul.mubr.f32.vlgmr.msra.gmra.mxu0 %v8679_v33  ;;  %v3432_v33 = vld [vmem:[#allocation12 + $0x888] sm:$0xff]  ;;  %v4116_v50 = vld [vmem:[#allocation12 + $0x660] sm:$0xff] }
 0x562   :  { %3564 = vmatpush2.msra.mxu1 %v3441_v34  ;;  %3614 = vmatprep.subr.mxu0 %v3481_v11  ;;  %v3452_v9 = vld [vmem:[#allocation12 + $0x928] sm:$0xff]  ;;  %v4144_v11 = vrot.slane %v8723_v15, 3 }
 0x563   :  { %3134 = vmatprep.mubr.f32.mxu0 %v8630_v56  ;;  %3565 = vmatprep.subr.mxu1 %v3439_v52  ;;  %v3455_v56 = vld [vmem:[#allocation12 + $0x940] sm:$0xff]  ;;  %v3404_v52 = vld [vmem:[#allocation12 + $0x7a8] sm:$0xff] }
 0x564   :  { %3615 = vmatpush1.msra.mxu0 %v3480_v13  ;;  %3566 = vmatpush2.msra.mxu1 %v3438_v51  ;;  %v4115_v13 = vld [vmem:[#allocation12 + $0x658] sm:$0xff]  ;;  %v4019_v51 = vld [vmem:[#allocation2 + $0x70] sm:$0x7] }
 0x565   :  { %3616 = vmatprep.subr.mxu0 %v3478_v23  ;;  %3567 = vmatprep.subr.mxu1 %v3436_v54  ;;  %v3449_v23 = vld [vmem:[#allocation12 + $0x910] sm:$0xff]  ;;  %v4067_v54 = vld [vmem:[#allocation12 + $0x4d8] sm:$0xff] }
 0x566   :  { %3617 = vmatpush1.msra.mxu0 %v3477_v20  ;;  %3568 = vmatpush2.msra.mxu1 %v3435_v55  ;;  %v8730_v20 = vld [vmem:[#allocation2 + $0x50] sm:$0xff] }
 0x567   :  { %3135 = vmatmul.mubr.f32.gmra.mxu0 %v8632_v58  ;;  %3618 = vmatprep.subr.mxu0 %v3475_v45  ;;  %v4125_v58 = vld [vmem:[#allocation12 + $0x6a8] sm:$0xff]  ;;  %v3401_v45 = vld [vmem:[#allocation12 + $0x790] sm:$0xff]  ;;  %v4141_v7 = vrot.slane %v8730_v20, 3 }
 0x568   :  { %3569 = vmatprep.subr.mxu1 %v3433_v18  ;;  %3619 = vmatpush1.msra.mxu0 %v3474_v61  ;;  %v4015_v18 = vld [vmem:[#allocation2 + $0x38] sm:$0xf8]  ;;  %v3446_v61 = vld [vmem:[#allocation12 + $0x8f8] sm:$0xff] }
 0x569   :  { %3570 = vmatpush2.msra.mxu1 %v3432_v33  ;;  %3620 = vmatprep.subr.mxu0 %v3472_v29  ;;  %v4150_v33 = vrot.slane %v4019_v51, 3  ;;  %v4064_v29 = vld [vmem:[#allocation12 + $0x4c0] sm:$0xff]  ;;  %v4140_v21 = vrot.slane %v4015_v18, 3  ;;  %v4066_v51 = vld [vmem:[#allocation12 + $0x4d0] sm:$0xff]  ;;  %v4063_v18 = vld [vmem:[#allocation12 + $0x4b8] sm:$0xff] }
 0x56a   :  { %3571 = vmatprep.subr.mxu1 %v3430_v19  ;;  %3621 = vmatpush1.msra.mxu0 %v3471_v57  ;;  %v3398_v19 = vld [vmem:[#allocation12 + $0x778] sm:$0xff]  ;;  %v4109_v57 = vld [vmem:[#allocation12 + $0x628] sm:$0xff] }
 0x56b   :  { %3654 = vmatprep.mubr.f32.mxu0 %v9578_v22  ;;  %3572 = vmatpush2.msra.mxu1 %v3429_v4  ;;  %v3443_v4 = vld [vmem:[#allocation12 + $0x8e0] sm:$0xff]  ;;  %v8741_v42 = vsel %vm1919_vm15, %v4144_v11, %v4150_v33  ;;  %v4062_v33 = vld [vmem:[#allocation12 + $0x4b0] sm:$0xff] }
 0x56c   :  { %7027 = vmatmul.mubr.msk.f32.vlgmr.msra.gmra.mxu0 %vm153_vm2, %v8701_v41  ;;  %7262 = vmatprep.subr.mxu0 %v3470_v6  ;;  %v4061_v6 = vld [vmem:[#allocation12 + $0x4a8] sm:$0xff] }
 0x56d   :  { %3573 = vmatprep.subr.mxu1 %v3427_v39  ;;  %7263 = vmatpush3.msra.mxu0 %v3422_v1  ;;  %v3395_v39 = vld [vmem:[#allocation12 + $0x760] sm:$0xff]  ;;  %v4106_v1 = vld [vmem:[#allocation12 + $0x610] sm:$0xff] }
 0x56e   :  { %3574 = vmatpush2.msra.mxu1 %v3426_v2  ;;  %7264 = vmatprep.subr.mxu0 %v3467_v53  ;;  %v8748_v2 = vsel %vm1919_vm15, %v4140_v21, %v4141_v7  ;;  %v4058_v53 = vld [vmem:[#allocation12 + $0x490] sm:$0xff] }
 0x56f   :  { %3575 = vmatprep.subr.mxu1 %v3424_v8  ;;  %3660 = vmatprep.mubr.f32.mxu0 %v9578_v22  ;;  %v3392_v8 = vld [vmem:[#allocation12 + $0x748] sm:$0xff] }
 0x570   :  { %7265 = vmatpush3.msra.mxu0 %v3419_v36  ;;  %3576 = vmatpush2.msra.mxu1 %v3423_v28  ;;  %v4055_v36 = vld [vmem:[#allocation12 + $0x478] sm:$0xff]  ;;  %v3389_v28 = vld [vmem:[#allocation12 + $0x730] sm:$0xff] }
 0x571   :  { %7028 = vmatmul.mubr.msk.f32.gmra.mxu0 %vm153_vm2, %v8708_v25  ;;  %7266 = vmatprep.subr.mxu0 %v3464_v40  ;;  %v3434_v40 = vld [vmem:[#allocation12 + $0x898] sm:$0xff] }
 0x572   :  { %3578 = vmatmul.mubr.f32.vlgmr.msra.gmra.mxu1 %v8713_v24  ;;  %7267 = vmatpush3.msra.mxu0 %v3416_v0  ;;  %v3386_v0 = vld [vmem:[#allocation12 + $0x718] sm:$0xff] }
 0x573   :  { %3731 = vmatprep.mubr.f32.mxu0 %v8692_v38  ;;  %4261 = vmatprep.subr.mxu1 %v4126_v27  ;;  %v4016_v38 = vld [vmem:[#allocation2 + $0x40] sm:$0xf8]  ;;  %v3431_v27 = vld [vmem:[#allocation12 + $0x880] sm:$0xff] }
 0x574   :  { %3583 = vmatprep.mubr.f32.mxu1 %v8720_v63  ;;  %7268 = vmatprep.subr.mxu0 %v3461_v35  ;;  %v4143_v34 = vrot.slane %v4016_v38, 3  ;;  %v3383_v35 = vld [vmem:[#allocation12 + $0x700] sm:$0xff] }
 0x575   :  { %4262 = vmatpush1.msra.mxu1 %v4125_v58  ;;  %7269 = vmatpush3.msra.mxu0 %v3413_v32  ;;  %v4094_v58 = vld [vmem:[#allocation12 + $0x5b0] sm:$0xff]  ;;  %v3428_v32 = vld [vmem:[#allocation12 + $0x868] sm:$0xff]  ;;  %v4088_v38 = vld [vmem:[#allocation12 + $0x580] sm:$0xff] }
 0x576   :  { %4263 = vmatprep.subr.mxu1 %v4123_v43  ;;  %7270 = vmatprep.subr.mxu0 %v3458_v3  ;;  %v8734_v55 = vsel %vm1919_vm15, %v4143_v34, %v4144_v11  ;;  %v4046_v43 = vld [vmem:[#allocation12 + $0x430] sm:$0xff]  ;;  %v3380_v3 = vld [vmem:[#allocation12 + $0x6e8] sm:$0xff] }
 0x577   :  { %4264 = vmatpush1.msra.mxu1 %v4122_v59  ;;  %7271 = vmatpush3.msra.mxu0 %v3410_v10  ;;  %v3425_v59 = vld [vmem:[#allocation12 + $0x850] sm:$0xff]  ;;  %v4043_v10 = vld [vmem:[#allocation12 + $0x418] sm:$0xff]  ;;  %v3476_v34 = vld [vmem:[#allocation12 + $0x9e8] sm:$0xff] }
 0x578   :  { %3584 = vmatmul.mubr.f32.gmra.mxu1 %v8726_v26  ;;  %4265 = vmatprep.subr.mxu1 %v4120_v16  ;;  %v3377_v16 = vld [vmem:[#allocation12 + $0x6d0] sm:$0xff] }
 0x579   :  { %7272 = vmatprep.subr.mxu0 %v3455_v56  ;;  %4266 = vmatpush1.msra.mxu1 %v4119_v48  ;;  %v3482_v56 = vld [vmem:[#allocation12 + $0xa18] sm:$0xff]  ;;  %v4040_v48 = vld [vmem:[#allocation12 + $0x400] sm:$0xff]  ;;  %v4034_v11 = vld [vmem:[#allocation12 + $0x3d0] sm:$0xff] }
 0x57a   :  { %7273 = vmatpush3.msra.mxu0 %v3407_v17  ;;  %4267 = vmatprep.subr.mxu1 %v4117_v49  ;;  %v4085_v17 = vld [vmem:[#allocation12 + $0x568] sm:$0xff]  ;;  %v3479_v49 = vld [vmem:[#allocation12 + $0xa00] sm:$0xff] }
 0x57b   :  { %7274 = vmatprep.subr.mxu0 %v3452_v9  ;;  %4268 = vmatpush1.msra.mxu1 %v4116_v50  ;;  %v4037_v9 = vld [vmem:[#allocation12 + $0x3e8] sm:$0xff]  ;;  %v4082_v50 = vld [vmem:[#allocation12 + $0x550] sm:$0xff] }
 0x57c   :  { %4301 = vmatprep.mubr.f32.mxu1 %v9578_v22  ;;  %7275 = vmatpush3.msra.mxu0 %v3404_v52  ;;  %v4079_v52 = vld [vmem:[#allocation12 + $0x538] sm:$0xff] }
 0x57d   :  { %7031 = vmatmul.mubr.msk.f32.vlgmr.msra.gmra.mxu1 %vm153_vm2, %v8734_v55  ;;  %7306 = vmatprep.subr.mxu1 %v4115_v13  ;;  %v4031_v13 = vld [vmem:[#allocation12 + $0x3b8] sm:$0xff] }
 0x57e   :  { %7276 = vmatprep.subr.mxu0 %v3449_v23  ;;  %7307 = vmatpush3.msra.mxu1 %v4067_v54  ;;  %v4028_v23 = vld [vmem:[#allocation12 + $0x3a0] sm:$0xff]  ;;  %v4065_v54 = vld [vmem:[#allocation12 + $0x4c8] sm:$0xff] }
 0x57f   :  { %7277 = vmatpush3.msra.mxu0 %v3401_v45  ;;  %7308 = vmatprep.subr.mxu1 %v4112_v46  ;;  %v8756_v45 = vld [vmem:[#allocation2 + $0x48] sm:$0xff]  ;;  %v4073_v46 = vld [vmem:[#allocation12 + $0x508] sm:$0xff] }
 0x580   :  { %7278 = vmatprep.subr.mxu0 %v3446_v61  ;;  %4307 = vmatprep.mubr.f32.mxu1 %v9578_v22  ;;  %v4018_v61 = vld [vmem:[#allocation2 + $0x68] sm:$0x7]  ;;  %v4138_v21 = vrot.slane %v8756_v45, 3 }
 0x581   :  { %7309 = vmatpush3.msra.mxu1 %v4064_v29  ;;  %7279 = vmatpush3.msra.mxu0 %v3398_v19  ;;  %v4070_v29 = vld [vmem:[#allocation12 + $0x4f0] sm:$0xff]  ;;  %v4060_v19 = vld [vmem:[#allocation12 + $0x4a0] sm:$0xff] }
 0x582   :  { %7032 = vmatmul.mubr.msk.f32.gmra.mxu1 %vm153_vm2, %v8741_v42  ;;  %7310 = vmatprep.subr.mxu1 %v4109_v57 }
 0x583   :  { %7280 = vmatprep.subr.mxu0 %v3443_v4  ;;  %7311 = vmatpush3.msra.mxu1 %v4061_v6  ;;  %v4022_v4 = vld [vmem:[#allocation12 + $0x370] sm:$0xff]  ;;  %v4059_v6 = vld [vmem:[#allocation12 + $0x498] sm:$0xff] }
 0x584   :  { %4378 = vmatprep.mubr.f32.mxu1 %v8748_v2  ;;  %7281 = vmatpush3.msra.mxu0 %v3395_v39  ;;  %v4127_v39 = vld [vmem:[#allocation12 + $0x6b8] sm:$0xff] }
 0x585   :  { %7312 = vmatprep.subr.mxu1 %v4106_v1  ;;  %7282 = vmatprep.subr.mxu0 %v3440_v44  ;;  %v4017_v1 = vld [vmem:[#allocation2 + $0x60] sm:$0x7]  ;;  %v4057_v44 = vld [vmem:[#allocation12 + $0x488] sm:$0xff] }
 0x586   :  { %7313 = vmatpush3.msra.mxu1 %v4058_v53  ;;  %7283 = vmatpush3.msra.mxu0 %v3392_v8  ;;  %v4056_v53 = vld [vmem:[#allocation12 + $0x480] sm:$0xff] }
 0x587   :  { %7314 = vmatprep.subr.mxu1 %v4103_v31  ;;  %7284 = vmatprep.subr.mxu0 %v3437_v30  ;;  %v4124_v31 = vld [vmem:[#allocation12 + $0x6a0] sm:$0xff]  ;;  %v4054_v30 = vld [vmem:[#allocation12 + $0x470] sm:$0xff] }
 0x588   :  { %7315 = vmatpush3.msra.mxu1 %v4055_v36  ;;  %7285 = vmatpush3.msra.mxu0 %v3389_v28  ;;  %v4146_v36 = vrot.slane %v4017_v1, 3  ;;  %v4053_v28 = vld [vmem:[#allocation12 + $0x468] sm:$0xff]  ;;  %v3924_v1 = vld [vmem:[#allocation12 + $0x90] sm:$0xff] }
 0x589   :  { %7316 = vmatprep.subr.mxu1 %v4100_v47  ;;  %7286 = vmatprep.subr.mxu0 %v3434_v40  ;;  %v4121_v47 = vld [vmem:[#allocation12 + $0x688] sm:$0xff]  ;;  %v4051_v40 = vld [vmem:[#allocation12 + $0x458] sm:$0xff] }
 0x58a   :  { %7317 = vmatpush3.msra.mxu1 %v4052_v62  ;;  %7287 = vmatpush3.msra.mxu0 %v3386_v0  ;;  %v8773_v62 = vsel %vm1919_vm15, %v4138_v21, %v4146_v36  ;;  %v3898_v0 = vld [vmem:[#allocation2 + $0x38] sm:$0xfc] }
 0x58b   :  { %7318 = vmatprep.subr.mxu1 %v4097_v12  ;;  %7288 = vmatprep.subr.mxu0 %v3431_v27  ;;  %v4118_v12 = vld [vmem:[#allocation12 + $0x670] sm:$0xff]  ;;  %v4048_v27 = vld [vmem:[#allocation12 + $0x440] sm:$0xff] }
 0x58c   :  { %7319 = vmatpush3.msra.mxu1 %v4049_v14  ;;  %7289 = vmatpush3.msra.mxu0 %v3383_v35  ;;  %v4047_v14 = vld [vmem:[#allocation12 + $0x438] sm:$0xff]  ;;  %v3952_v35 = vld [vmem:[#allocation12 + $0x170] sm:$0xff] }
 0x58d   :  { %7320 = vmatprep.subr.mxu1 %v4094_v58  ;;  %7290 = vmatprep.subr.mxu0 %v3428_v32  ;;  %v4473_v58 = vrot.slane %v3898_v0, 2  ;;  %v4474_v32 = vrot.slane %v8730_v20, 2  ;;  %v4110_v36 = vld [vmem:[#allocation12 + $0x630] sm:$0xff] }
 0x58e   :  { %7321 = vmatpush3.msra.mxu1 %v4046_v43  ;;  %7291 = vmatpush3.msra.mxu0 %v3380_v3  ;;  %v4045_v43 = vld [vmem:[#allocation12 + $0x428] sm:$0xff]  ;;  %v3916_v0 = vld [vmem:[#allocation12 + $0x50] sm:$0xff] }
 0x58f   :  { %7322 = vmatprep.subr.mxu1 %v4091_v5  ;;  %7292 = vmatprep.subr.mxu0 %v3425_v59  ;;  %v3951_v3 = vld [vmem:[#allocation12 + $0x168] sm:$0xff]  ;;  %v4044_v5 = vld [vmem:[#allocation12 + $0x420] sm:$0xff]  ;;  %v3949_v59 = vld [vmem:[#allocation12 + $0x158] sm:$0xff] }
 0x590   :  { %7323 = vmatpush3.msra.mxu1 %v4043_v10  ;;  %7293 = vmatpush3.msra.mxu0 %v3377_v16  ;;  %v4042_v10 = vld [vmem:[#allocation12 + $0x410] sm:$0xff] }
 0x591   :  { %7324 = vmatprep.subr.mxu1 %v4088_v38  ;;  %3732 = vmatmul.mubr.f32.vlgmr.msra.gmra.mxu0 %v8713_v24  ;;  %v3473_v24 = vld [vmem:[#allocation12 + $0x9d0] sm:$0xff]  ;;  %v4041_v38 = vld [vmem:[#allocation12 + $0x408] sm:$0xff] }
 0x592   :  { %7557 = vmatprep.subr.mxu0 %v3482_v56  ;;  %7325 = vmatpush3.msra.mxu1 %v4040_v48  ;;  %v3948_v16 = vld [vmem:[#allocation12 + $0x150] sm:$0xff]  ;;  %v4039_v48 = vld [vmem:[#allocation12 + $0x3f8] sm:$0xff] }
 0x593   :  { %3736 = vmatprep.mubr.f32.mxu0 %v8720_v63  ;;  %7558 = vmatpush3.msra.mxu0 %v3482_v56  ;;  %v4076_v63 = vld [vmem:[#allocation12 + $0x520] sm:$0xff] }
 0x594   :  { %7326 = vmatprep.subr.mxu1 %v4085_v17  ;;  %7559 = vmatprep.subr.mxu0 %v3479_v49  ;;  %v3946_v56 = vld [vmem:[#allocation12 + $0x140] sm:$0xff]  ;;  %v4038_v17 = vld [vmem:[#allocation12 + $0x3f0] sm:$0xff] }
 0x595   :  { %7327 = vmatpush3.msra.mxu1 %v4037_v9  ;;  %7560 = vmatpush3.msra.mxu0 %v3479_v49  ;;  %v3943_v49 = vld [vmem:[#allocation12 + $0x128] sm:$0xff]  ;;  %v4036_v9 = vld [vmem:[#allocation12 + $0x3e0] sm:$0xff] }
 0x596   :  { %7328 = vmatprep.subr.mxu1 %v4082_v50  ;;  %3737 = vmatmul.mubr.f32.gmra.mxu0 %v8726_v26  ;;  %v4014_v26 = vld [vmem:[#allocation2 + $0x30] sm:$0xf8]  ;;  %v3942_v50 = vld [vmem:[#allocation12 + $0x120] sm:$0xff] }
 0x597   :  { %7561 = vmatprep.subr.mxu0 %v3476_v34  ;;  %7329 = vmatpush3.msra.mxu1 %v4034_v11  ;;  %v4137_v57 = vrot.slane %v4014_v26, 3  ;;  %v3940_v11 = vld [vmem:[#allocation12 + $0x110] sm:$0xff]  ;;  %v3934_v26 = vld [vmem:[#allocation12 + $0xe0] sm:$0xff] }
 0x598   :  { %7562 = vmatpush3.msra.mxu0 %v3476_v34  ;;  %7565 = vmatprep.mubr.msk.f32.mxu0 %vm153_vm2, %v8701_v41  ;;  %v4025_v41 = vld [vmem:[#allocation12 + $0x388] sm:$0xff]  ;;  %v4035_v34 = vld [vmem:[#allocation12 + $0x3d8] sm:$0xff] }
 0x599   :  { %7330 = vmatprep.subr.mxu1 %v4079_v52  ;;  %7563 = vmatprep.subr.mxu0 %v3473_v24  ;;  %v4033_v52 = vld [vmem:[#allocation12 + $0x3c8] sm:$0xff] }
 0x59a   :  { %7331 = vmatpush3.msra.mxu1 %v4031_v13  ;;  %7564 = vmatpush3.msra.mxu0 %v3473_v24  ;;  %v3939_v24 = vld [vmem:[#allocation12 + $0x108] sm:$0xff]  ;;  %v4032_v13 = vld [vmem:[#allocation12 + $0x3c0] sm:$0xff] }
 0x59b   :  { %7332 = vmatprep.subr.mxu1 %v4076_v63  ;;  %7566 = vmatmul.mubr.msk.f32.vlgmr.msra.gmra.mxu0 %vm153_vm2, %v8708_v25  ;;  %v4148_v25 = vrot.slane %v4018_v61, 3  ;;  %v3937_v63 = vld [vmem:[#allocation12 + $0xf8] sm:$0xff]  ;;  %v4026_v61 = vld [vmem:[#allocation12 + $0x390] sm:$0xff] }
 0x59c   :  { %4160 = vmatprep.subr.mxu0 %v4066_v51  ;;  %7333 = vmatpush3.msra.mxu1 %v4028_v23  ;;  %v4030_v51 = vld [vmem:[#allocation12 + $0x3b0] sm:$0xff] }
 0x59d   :  { %4161 = vmatpush1.msra.mxu0 %v4065_v54  ;;  %4224 = vmatprep.mubr.f32.mxu0 %v8748_v2  ;;  %v8763_v2 = vsel %vm1919_vm15, %v4137_v57, %v4138_v21  ;;  %v8769_v8 = vsel %vm1919_vm15, %v4141_v7, %v4148_v25  ;;  %v4050_v7 = vld [vmem:[#allocation12 + $0x450] sm:$0xff]  ;;  %v4029_v54 = vld [vmem:[#allocation12 + $0x3a8] sm:$0xff]  ;;  %v3925_v25 = vld [vmem:[#allocation12 + $0x98] sm:$0xff] }
 0x59e   :  { %7334 = vmatprep.subr.mxu1 %v4073_v46  ;;  %4162 = vmatprep.subr.mxu0 %v4063_v18  ;;  %v3936_v23 = vld [vmem:[#allocation12 + $0xf0] sm:$0xff]  ;;  %v4027_v46 = vld [vmem:[#allocation12 + $0x398] sm:$0xff]  ;;  %v4021_v21 = vld [vmem:[#allocation12 + $0x368] sm:$0xff] }
 0x59f   :  { %7335 = vmatpush3.msra.mxu1 %v4025_v41  ;;  %4163 = vmatpush1.msra.mxu0 %v4062_v33  ;;  %v3933_v18 = vld [vmem:[#allocation12 + $0xd8] sm:$0xff]  ;;  %v3931_v41 = vld [vmem:[#allocation12 + $0xc8] sm:$0xff]  ;;  %v4024_v33 = vld [vmem:[#allocation12 + $0x380] sm:$0xff] }
 0x5a0   :  { %7336 = vmatprep.subr.mxu1 %v4070_v29  ;;  %4164 = vmatprep.subr.mxu0 %v4060_v19  ;;  %v3930_v29 = vld [vmem:[#allocation12 + $0xc0] sm:$0xff]  ;;  %v4023_v19 = vld [vmem:[#allocation12 + $0x378] sm:$0xff]  ;;  %v3928_v57 = vld [vmem:[#allocation12 + $0xb0] sm:$0xff] }
 0x5a1   :  { %7337 = vmatpush3.msra.mxu1 %v4022_v4  ;;  %4165 = vmatpush1.msra.mxu0 %v4059_v6  ;;  %v3927_v4 = vld [vmem:[#allocation12 + $0xa8] sm:$0xff]  ;;  %v4020_v6 = vld [vmem:[#allocation12 + $0x360] sm:$0xff] }
 0x5a2   :  { %4379 = vmatmul.mubr.f32.vlgmr.msra.gmra.mxu1 %v8763_v2  ;;  %7568 = vmatprep.subr.mxu1 %v4127_v39 }
 0x5a3   :  { %4166 = vmatprep.subr.mxu0 %v4057_v44  ;;  %4383 = vmatprep.mubr.f32.mxu1 %v8769_v8  ;;  %v4113_v44 = vld [vmem:[#allocation12 + $0x648] sm:$0xff] }
 0x5a4   :  { %7569 = vmatpush3.msra.mxu1 %v4127_v39  ;;  %4167 = vmatpush1.msra.mxu0 %v4056_v53  ;;  %v4114_v39 = vld [vmem:[#allocation12 + $0x650] sm:$0xff]  ;;  %v3922_v53 = vld [vmem:[#allocation12 + $0x80] sm:$0xff] }
 0x5a5   :  { %7570 = vmatprep.subr.mxu1 %v4124_v31  ;;  %4168 = vmatprep.subr.mxu0 %v4054_v30  ;;  %v3921_v30 = vld [vmem:[#allocation12 + $0x78] sm:$0xff] }
 0x5a6   :  { %7571 = vmatpush3.msra.mxu1 %v4124_v31  ;;  %4169 = vmatpush1.msra.mxu0 %v4053_v28  ;;  %v4111_v31 = vld [vmem:[#allocation12 + $0x638] sm:$0xff]  ;;  %v3919_v28 = vld [vmem:[#allocation12 + $0x68] sm:$0xff] }
 0x5a7   :  { %4384 = vmatmul.mubr.f32.gmra.mxu1 %v8773_v62  ;;  %7572 = vmatprep.subr.mxu1 %v4121_v47 }
 0x5a8   :  { %4170 = vmatprep.subr.mxu0 %v4051_v40  ;;  %7573 = vmatpush3.msra.mxu1 %v4121_v47  ;;  %v4108_v47 = vld [vmem:[#allocation12 + $0x620] sm:$0xff] }
 0x5a9   :  { %7576 = vmatprep.mubr.msk.f32.mxu1 %vm153_vm2, %v8734_v55  ;;  %4171 = vmatpush1.msra.mxu0 %v4050_v7  ;;  %v8784_v55 = vsel %vm3489_vm4, %v4473_v58, %v4474_v32  ;;  %v3918_v40 = vld [vmem:[#allocation12 + $0x60] sm:$0xff]  ;;  %v4107_v7 = vld [vmem:[#allocation12 + $0x618] sm:$0xff]  ;;  %v4102_v58 = vld [vmem:[#allocation12 + $0x5f0] sm:$0xff] }
 0x5aa   :  { %7574 = vmatprep.subr.mxu1 %v4118_v12  ;;  %4172 = vmatprep.subr.mxu0 %v4048_v27  ;;  %v3915_v27 = vld [vmem:[#allocation12 + $0x48] sm:$0xff] }
 0x5ab   :  { %7575 = vmatpush3.msra.mxu1 %v4118_v12  ;;  %4173 = vmatpush1.msra.mxu0 %v4047_v14  ;;  %v4105_v12 = vld [vmem:[#allocation12 + $0x608] sm:$0xff]  ;;  %v4104_v14 = vld [vmem:[#allocation12 + $0x600] sm:$0xff] }
 0x5ac   :  { %7577 = vmatmul.mubr.msk.f32.vlgmr.msra.gmra.mxu1 %vm153_vm2, %v8741_v42  ;;  %4493 = vmatprep.subr.mxu1 %v3952_v35  ;;  %v3945_v42 = vld [vmem:[#allocation12 + $0x138] sm:$0xff] }
 0x5ad   :  { %4174 = vmatprep.subr.mxu0 %v4045_v43  ;;  %4494 = vmatpush1.msra.mxu1 %v3951_v3  ;;  %v3913_v35 = vld [vmem:[#allocation12 + $0x38] sm:$0xff]  ;;  %v3912_v43 = vld [vmem:[#allocation12 + $0x30] sm:$0xff]  ;;  %v4101_v3 = vld [vmem:[#allocation12 + $0x5e8] sm:$0xff] }
 0x5ae   :  { %4557 = vmatprep.mubr.f32.mxu1 %v8784_v55  ;;  %4175 = vmatpush1.msra.mxu0 %v4044_v5  ;;  %v3910_v5 = vld [vmem:[#allocation12 + $0x20] sm:$0xff] }
 0x5af   :  { %4495 = vmatprep.subr.mxu1 %v3949_v59  ;;  %4176 = vmatprep.subr.mxu0 %v4042_v10  ;;  %v4099_v59 = vld [vmem:[#allocation12 + $0x5d8] sm:$0xff] }
 0x5b0   :  { %4496 = vmatpush1.msra.mxu1 %v3948_v16  ;;  %4177 = vmatpush1.msra.mxu0 %v4041_v38  ;;  %v3909_v10 = vld [vmem:[#allocation12 + $0x18] sm:$0xff]  ;;  %v4098_v16 = vld [vmem:[#allocation12 + $0x5d0] sm:$0xff]  ;;  %v3907_v38 = vld [vmem:[#allocation12 + $0x8] sm:$0xff] }
 0x5b1   :  { %4497 = vmatprep.subr.mxu1 %v3946_v56  ;;  %4178 = vmatprep.subr.mxu0 %v4039_v48  ;;  %v4096_v56 = vld [vmem:[#allocation12 + $0x5c0] sm:$0xff] }
 0x5b2   :  { %4498 = vmatpush1.msra.mxu1 %v3945_v42  ;;  %4179 = vmatpush1.msra.mxu0 %v4038_v17  ;;  %v3906_v48 = vld [vmem:[#allocation12] sm:$0xff]  ;;  %v4095_v42 = vld [vmem:[#allocation12 + $0x5b8] sm:$0xff]  ;;  %v4000_v17 = vld [vmem:[#allocation12 + $0x2f0] sm:$0xff] }
 0x5b3   :  { %4499 = vmatprep.subr.mxu1 %v3943_v49  ;;  %4180 = vmatprep.subr.mxu0 %v4036_v9  ;;  %v4093_v49 = vld [vmem:[#allocation12 + $0x5a8] sm:$0xff] }
 0x5b4   :  { %4500 = vmatpush1.msra.mxu1 %v3942_v50  ;;  %4181 = vmatpush1.msra.mxu0 %v4035_v34  ;;  %v3999_v9 = vld [vmem:[#allocation12 + $0x2e8] sm:$0xff]  ;;  %v4092_v50 = vld [vmem:[#allocation12 + $0x5a0] sm:$0xff]  ;;  %v3997_v34 = vld [vmem:[#allocation12 + $0x2d8] sm:$0xff] }
 0x5b5   :  { %4501 = vmatprep.subr.mxu1 %v3940_v11  ;;  %4182 = vmatprep.subr.mxu0 %v4033_v52  ;;  %v4090_v11 = vld [vmem:[#allocation12 + $0x590] sm:$0xff] }
 0x5b6   :  { %4502 = vmatpush1.msra.mxu1 %v3939_v24  ;;  %4183 = vmatpush1.msra.mxu0 %v4032_v13  ;;  %v3996_v52 = vld [vmem:[#allocation12 + $0x2d0] sm:$0xff]  ;;  %v4089_v24 = vld [vmem:[#allocation12 + $0x588] sm:$0xff]  ;;  %v3994_v13 = vld [vmem:[#allocation12 + $0x2c0] sm:$0xff] }
 0x5b7   :  { %4503 = vmatprep.subr.mxu1 %v3937_v63  ;;  %4184 = vmatprep.subr.mxu0 %v4030_v51  ;;  %v4087_v63 = vld [vmem:[#allocation12 + $0x578] sm:$0xff] }
 0x5b8   :  { %4504 = vmatpush1.msra.mxu1 %v3936_v23  ;;  %4185 = vmatpush1.msra.mxu0 %v4029_v54  ;;  %v3993_v51 = vld [vmem:[#allocation12 + $0x2b8] sm:$0xff]  ;;  %v4086_v23 = vld [vmem:[#allocation12 + $0x570] sm:$0xff]  ;;  %v3991_v54 = vld [vmem:[#allocation12 + $0x2a8] sm:$0xff] }
 0x5b9   :  { %4505 = vmatprep.subr.mxu1 %v3934_v26  ;;  %4186 = vmatprep.subr.mxu0 %v4027_v46  ;;  %v4084_v26 = vld [vmem:[#allocation12 + $0x560] sm:$0xff] }
 0x5ba   :  { %4506 = vmatpush1.msra.mxu1 %v3933_v18  ;;  %4187 = vmatpush1.msra.mxu0 %v4026_v61  ;;  %v3990_v46 = vld [vmem:[#allocation12 + $0x2a0] sm:$0xff]  ;;  %v4083_v18 = vld [vmem:[#allocation12 + $0x558] sm:$0xff]  ;;  %v3988_v61 = vld [vmem:[#allocation12 + $0x290] sm:$0xff] }
 0x5bb   :  { %4507 = vmatprep.subr.mxu1 %v3931_v41  ;;  %4188 = vmatprep.subr.mxu0 %v4024_v33  ;;  %v4081_v41 = vld [vmem:[#allocation12 + $0x548] sm:$0xff] }
 0x5bc   :  { %4508 = vmatpush1.msra.mxu1 %v3930_v29  ;;  %4189 = vmatpush1.msra.mxu0 %v4023_v19  ;;  %v3987_v33 = vld [vmem:[#allocation12 + $0x288] sm:$0xff]  ;;  %v4080_v29 = vld [vmem:[#allocation12 + $0x540] sm:$0xff]  ;;  %v3985_v19 = vld [vmem:[#allocation12 + $0x278] sm:$0xff] }
 0x5bd   :  { %4509 = vmatprep.subr.mxu1 %v3928_v57  ;;  %4190 = vmatprep.subr.mxu0 %v4021_v21  ;;  %v4078_v57 = vld [vmem:[#allocation12 + $0x530] sm:$0xff] }
 0x5be   :  { %4510 = vmatpush1.msra.mxu1 %v3927_v4  ;;  %4191 = vmatpush1.msra.mxu0 %v4020_v6  ;;  %v3984_v21 = vld [vmem:[#allocation12 + $0x270] sm:$0xff]  ;;  %v4077_v4 = vld [vmem:[#allocation12 + $0x528] sm:$0xff]  ;;  %v3982_v6 = vld [vmem:[#allocation12 + $0x260] sm:$0xff] }
 0x5bf   :  { %4511 = vmatprep.subr.mxu1 %v3925_v25  ;;  %4192 = vmatprep.subr.mxu0 %v4114_v39  ;;  %v4075_v25 = vld [vmem:[#allocation12 + $0x518] sm:$0xff] }
 0x5c0   :  { %4512 = vmatpush1.msra.mxu1 %v3924_v1  ;;  %4193 = vmatpush2.msra.mxu0 %v4113_v44  ;;  %v3981_v39 = vld [vmem:[#allocation12 + $0x258] sm:$0xff]  ;;  %v4074_v1 = vld [vmem:[#allocation12 + $0x510] sm:$0xff]  ;;  %v3979_v44 = vld [vmem:[#allocation12 + $0x248] sm:$0xff] }
 0x5c1   :  { %4513 = vmatprep.subr.mxu1 %v3922_v53  ;;  %4194 = vmatprep.subr.mxu0 %v4111_v31  ;;  %v4072_v53 = vld [vmem:[#allocation12 + $0x500] sm:$0xff] }
 0x5c2   :  { %4514 = vmatpush1.msra.mxu1 %v3921_v30  ;;  %4195 = vmatpush2.msra.mxu0 %v4110_v36  ;;  %v3978_v31 = vld [vmem:[#allocation12 + $0x240] sm:$0xff]  ;;  %v4071_v30 = vld [vmem:[#allocation12 + $0x4f8] sm:$0xff]  ;;  %v3976_v36 = vld [vmem:[#allocation12 + $0x230] sm:$0xff] }
 0x5c3   :  { %4515 = vmatprep.subr.mxu1 %v3919_v28  ;;  %4196 = vmatprep.subr.mxu0 %v4108_v47  ;;  %v4069_v28 = vld [vmem:[#allocation12 + $0x4e8] sm:$0xff] }
 0x5c4   :  { %4516 = vmatpush1.msra.mxu1 %v3918_v40  ;;  %4197 = vmatpush2.msra.mxu0 %v4107_v7  ;;  %v3975_v47 = vld [vmem:[#allocation12 + $0x228] sm:$0xff]  ;;  %v4068_v40 = vld [vmem:[#allocation12 + $0x4e0] sm:$0xff]  ;;  %v3973_v7 = vld [vmem:[#allocation12 + $0x218] sm:$0xff] }
 0x5c5   :  { %4517 = vmatprep.subr.mxu1 %v3916_v0  ;;  %4198 = vmatprep.subr.mxu0 %v4105_v12  ;;  %v3972_v0 = vld [vmem:[#allocation12 + $0x210] sm:$0xff] }
 0x5c6   :  { %4518 = vmatpush1.msra.mxu1 %v3915_v27  ;;  %4199 = vmatpush2.msra.mxu0 %v4104_v14  ;;  %v4012_v12 = vld [vmem:[#allocation12 + $0x350] sm:$0xff]  ;;  %v3970_v27 = vld [vmem:[#allocation12 + $0x200] sm:$0xff]  ;;  %v4011_v14 = vld [vmem:[#allocation12 + $0x348] sm:$0xff] }
 0x5c7   :  { %4519 = vmatprep.subr.mxu1 %v3913_v35  ;;  %4200 = vmatprep.subr.mxu0 %v4102_v58  ;;  %v3969_v35 = vld [vmem:[#allocation12 + $0x1f8] sm:$0xff] }
 0x5c8   :  { %4520 = vmatpush1.msra.mxu1 %v3912_v43  ;;  %4201 = vmatpush2.msra.mxu0 %v4101_v3  ;;  %v4009_v58 = vld [vmem:[#allocation12 + $0x338] sm:$0xff]  ;;  %v3967_v43 = vld [vmem:[#allocation12 + $0x1e8] sm:$0xff]  ;;  %v4008_v3 = vld [vmem:[#allocation12 + $0x330] sm:$0xff] }
 0x5c9   :  { %4521 = vmatprep.subr.mxu1 %v3910_v5  ;;  %4202 = vmatprep.subr.mxu0 %v4099_v59  ;;  %v3966_v5 = vld [vmem:[#allocation12 + $0x1e0] sm:$0xff] }
 0x5ca   :  { %4522 = vmatpush1.msra.mxu1 %v3909_v10  ;;  %4203 = vmatpush2.msra.mxu0 %v4098_v16  ;;  %v4006_v59 = vld [vmem:[#allocation12 + $0x320] sm:$0xff]  ;;  %v3899_v10 = vld [vmem:[#allocation2 + $0x40] sm:$0xfc]  ;;  %v3964_v16 = vld [vmem:[#allocation12 + $0x1d0] sm:$0xff] }
 0x5cb   :  { %4523 = vmatprep.subr.mxu1 %v3907_v38  ;;  %4204 = vmatprep.subr.mxu0 %v4096_v56  ;;  %v4005_v38 = vld [vmem:[#allocation12 + $0x318] sm:$0xff]  ;;  %v4003_v56 = vld [vmem:[#allocation12 + $0x308] sm:$0xff] }
 0x5cc   :  { %4524 = vmatpush1.msra.mxu1 %v3906_v48  ;;  %4205 = vmatpush2.msra.mxu0 %v4095_v42  ;;  %v3961_v48 = vld [vmem:[#allocation12 + $0x1b8] sm:$0xff]  ;;  %v4476_v42 = vrot.slane %v3899_v10, 2  ;;  %v4798_v10 = vld [vmem:[#allocation2 + $0x38] sm:$0xf0] }
 0x5cd   :  { %4525 = vmatprep.subr.mxu1 %v4000_v17  ;;  %4206 = vmatprep.subr.mxu0 %v4093_v49  ;;  %v4477_v17 = vrot.slane %v8723_v15, 2  ;;  %v3960_v49 = vld [vmem:[#allocation12 + $0x1b0] sm:$0xff]  ;;  %v3998_v15 = vld [vmem:[#allocation12 + $0x2e0] sm:$0xff] }
 0x5ce   :  { %4526 = vmatpush2.msra.mxu1 %v3999_v9  ;;  %4207 = vmatpush2.msra.mxu0 %v4092_v50  ;;  %v4001_v9 = vld [vmem:[#allocation12 + $0x2f8] sm:$0xff]  ;;  %v3905_v50 = vld [vmem:[#allocation2 + $0x70] sm:$0x3] }
 0x5cf   :  { %4527 = vmatprep.subr.mxu1 %v3997_v34  ;;  %4208 = vmatprep.subr.mxu0 %v4090_v11  ;;  %v3958_v34 = vld [vmem:[#allocation12 + $0x1a0] sm:$0xff]  ;;  %v3953_v11 = vld [vmem:[#allocation12 + $0x178] sm:$0xff] }
 0x5d0   :  { %4528 = vmatpush2.msra.mxu1 %v3996_v52  ;;  %4209 = vmatpush2.msra.mxu0 %v4089_v24  ;;  %v3897_v52 = vld [vmem:[#allocation2 + $0x30] sm:$0xfc]  ;;  %v3957_v24 = vld [vmem:[#allocation12 + $0x198] sm:$0xff] }
 0x5d1   :  { %4529 = vmatprep.subr.mxu1 %v3994_v13  ;;  %4210 = vmatprep.subr.mxu0 %v4087_v63  ;;  %v3955_v13 = vld [vmem:[#allocation12 + $0x188] sm:$0xff]  ;;  %v4483_v63 = vrot.slane %v3905_v50, 2  ;;  %v3974_v50 = vld [vmem:[#allocation12 + $0x220] sm:$0xff] }
 0x5d2   :  { %4530 = vmatpush2.msra.mxu1 %v3993_v51  ;;  %4211 = vmatpush2.msra.mxu0 %v4086_v23  ;;  %v3904_v51 = vld [vmem:[#allocation2 + $0x68] sm:$0x3] }
 0x5d3   :  { %4531 = vmatprep.subr.mxu1 %v3991_v54  ;;  %4212 = vmatprep.subr.mxu0 %v4084_v26  ;;  %v3950_v23 = vld [vmem:[#allocation12 + $0x160] sm:$0xff]  ;;  %v4470_v26 = vrot.slane %v3897_v52, 2 }
 0x5d4   :  { %4532 = vmatpush2.msra.mxu1 %v3990_v46  ;;  %4213 = vmatpush2.msra.mxu0 %v4083_v18  ;;  %v3954_v54 = vld [vmem:[#allocation12 + $0x180] sm:$0xff]  ;;  %v4471_v46 = vrot.slane %v8756_v45, 2  ;;  %v3995_v18 = vld [vmem:[#allocation12 + $0x2c8] sm:$0xff] }
 0x5d5   :  { %4533 = vmatprep.subr.mxu1 %v3988_v61  ;;  %4214 = vmatprep.subr.mxu0 %v4081_v41  ;;  %v3947_v61 = vld [vmem:[#allocation12 + $0x148] sm:$0xff]  ;;  %v4481_v41 = vrot.slane %v3904_v51, 2  ;;  %v3926_v52 = vld [vmem:[#allocation12 + $0xa0] sm:$0xff]  ;;  %v4841_v51 = vld [vmem:[#allocation12 + $0x7f0] sm:$0xff] }
 0x5d6   :  { %4534 = vmatpush2.msra.mxu1 %v3987_v33  ;;  %4215 = vmatpush2.msra.mxu0 %v4080_v29  ;;  %v8800_v33 = vsel %vm3489_vm4, %v4477_v17, %v4483_v63  ;;  %v4909_v29 = vld [vmem:[#allocation12 + $0xa10] sm:$0xff]  ;;  %v8805_v45 = vsel %vm3489_vm4, %v4470_v26, %v4471_v46  ;;  %v4886_v26 = vld [vmem:[#allocation12 + $0x958] sm:$0xff] }
 0x5d7   :  { %4535 = vmatprep.subr.mxu1 %v3985_v19  ;;  %4216 = vmatprep.subr.mxu0 %v4078_v57  ;;  %v3903_v19 = vld [vmem:[#allocation2 + $0x60] sm:$0x3]  ;;  %v3992_v57 = vld [vmem:[#allocation12 + $0x2b0] sm:$0xff] }
 0x5d8   :  { %4536 = vmatpush2.msra.mxu1 %v3984_v21  ;;  %4217 = vmatpush2.msra.mxu0 %v4077_v4  ;;  %v4908_v21 = vld [vmem:[#allocation12 + $0xa08] sm:$0xff]  ;;  %v3944_v4 = vld [vmem:[#allocation12 + $0x130] sm:$0xff] }
 0x5d9   :  { %4537 = vmatprep.subr.mxu1 %v3982_v6  ;;  %4218 = vmatprep.subr.mxu0 %v4075_v25  ;;  %v8812_v6 = vsel %vm3489_vm4, %v4474_v32, %v4481_v41  ;;  %v4906_v25 = vld [vmem:[#allocation12 + $0x9f8] sm:$0xff]  ;;  %v3938_v32 = vld [vmem:[#allocation12 + $0x100] sm:$0xff] }
 0x5da   :  { %4538 = vmatpush2.msra.mxu1 %v3981_v39  ;;  %4219 = vmatpush2.msra.mxu0 %v4074_v1  ;;  %v3989_v39 = vld [vmem:[#allocation12 + $0x298] sm:$0xff]  ;;  %v4479_v1 = vrot.slane %v3903_v19, 2  ;;  %v4883_v41 = vld [vmem:[#allocation12 + $0x940] sm:$0xff] }
 0x5db   :  { %4539 = vmatprep.subr.mxu1 %v3979_v44  ;;  %4220 = vmatprep.subr.mxu0 %v4072_v53  ;;  %v4905_v44 = vld [vmem:[#allocation12 + $0x9f0] sm:$0xff]  ;;  %v3941_v53 = vld [vmem:[#allocation12 + $0x118] sm:$0xff] }
 0x5dc   :  { %4540 = vmatpush2.msra.mxu1 %v3978_v31  ;;  %4221 = vmatpush2.msra.mxu0 %v4071_v30  ;;  %v4903_v31 = vld [vmem:[#allocation12 + $0x9e0] sm:$0xff]  ;;  %v4799_v30 = vld [vmem:[#allocation2 + $0x40] sm:$0xf0]  ;;  %v8816_v20 = vsel %vm3489_vm4, %v4471_v46, %v4479_v1  ;;  %v3968_v46 = vld [vmem:[#allocation12 + $0x1f0] sm:$0xff] }
 0x5dd   :  { %4541 = vmatprep.subr.mxu1 %v3976_v36  ;;  %4222 = vmatprep.subr.mxu0 %v4069_v28  ;;  %v4902_v36 = vld [vmem:[#allocation12 + $0x9d8] sm:$0xff]  ;;  %v4900_v28 = vld [vmem:[#allocation12 + $0x9c8] sm:$0xff] }
 0x5de   :  { %4542 = vmatpush2.msra.mxu1 %v3975_v47  ;;  %4223 = vmatpush2.msra.mxu0 %v4068_v40  ;;  %v3983_v47 = vld [vmem:[#allocation12 + $0x268] sm:$0xff]  ;;  %v4899_v40 = vld [vmem:[#allocation12 + $0x9c0] sm:$0xff] }
 0x5df   :  { %4543 = vmatprep.subr.mxu1 %v3973_v7  ;;  %4225 = vmatmul.mubr.f32.vlgmr.msra.gmra.mxu0 %v8763_v2  ;;  %v3963_v2 = vld [vmem:[#allocation12 + $0x1c8] sm:$0xff]  ;;  %v4923_v7 = vrot.slane %v4799_v30, 4 }
 0x5e0   :  { %4544 = vmatpush2.msra.mxu1 %v3972_v0  ;;  %4594 = vmatprep.subr.mxu0 %v4012_v12  ;;  %v7619_v0 = vld [vmem:[#allocation2 + $0x58] sm:$0xff]  ;;  %v4832_v1 = vld [vmem:[#allocation12 + $0x7a8] sm:$0xff] }
 0x5e1   :  { %4230 = vmatprep.mubr.f32.mxu0 %v8769_v8  ;;  %4545 = vmatprep.subr.mxu1 %v3970_v27  ;;  %v4002_v8 = vld [vmem:[#allocation12 + $0x300] sm:$0xff]  ;;  %v4924_v12 = vrot.slane %v7619_v0, 4  ;;  %v3935_v27 = vld [vmem:[#allocation12 + $0xe8] sm:$0xff]  ;;  %v3908_v0 = vld [vmem:[#allocation12 + $0x10] sm:$0xff] }
 0x5e2   :  { %4595 = vmatpush1.msra.mxu0 %v4011_v14  ;;  %4546 = vmatpush2.msra.mxu1 %v3969_v35  ;;  %v4898_v14 = vld [vmem:[#allocation12 + $0x9b8] sm:$0xff]  ;;  %v4802_v35 = vld [vmem:[#allocation2 + $0x70] sm:$0xf] }
 0x5e3   :  { %4596 = vmatprep.subr.mxu0 %v4009_v58  ;;  %4547 = vmatprep.subr.mxu1 %v3967_v43  ;;  %v3980_v58 = vld [vmem:[#allocation12 + $0x250] sm:$0xff]  ;;  %v4850_v43 = vld [vmem:[#allocation12 + $0x838] sm:$0xff] }
 0x5e4   :  { %4597 = vmatpush1.msra.mxu0 %v4008_v3  ;;  %4548 = vmatpush2.msra.mxu1 %v3966_v5  ;;  %v8821_v3 = vsel %vm1424_vm13, %v4923_v7, %v4924_v12  ;;  %v3932_v5 = vld [vmem:[#allocation12 + $0xd0] sm:$0xff]  ;;  %v4826_v7 = vld [vmem:[#allocation12 + $0x778] sm:$0xff] }
 0x5e5   :  { %4231 = vmatmul.mubr.f32.gmra.mxu0 %v8773_v62  ;;  %4598 = vmatprep.subr.mxu0 %v4006_v59  ;;  %v8793_v62 = vsel %vm3489_vm4, %v4476_v42, %v4477_v17  ;;  %v4895_v59 = vld [vmem:[#allocation12 + $0x9a0] sm:$0xff]  ;;  %v4920_v42 = vrot.slane %v4798_v10, 4  ;;  %v8827_v17 = vld [vmem:[#allocation2 + $0x50] sm:$0xff]  ;;  %v4865_v10 = vld [vmem:[#allocation12 + $0x8b0] sm:$0xff] }
 0x5e6   :  { %4549 = vmatprep.subr.mxu1 %v3964_v16  ;;  %4599 = vmatpush1.msra.mxu0 %v4005_v38  ;;  %v3977_v16 = vld [vmem:[#allocation12 + $0x238] sm:$0xff]  ;;  %v4930_v38 = vrot.slane %v4802_v35, 4 }
 0x5e7   :  { %4550 = vmatpush2.msra.mxu1 %v3963_v2  ;;  %4600 = vmatprep.subr.mxu0 %v4003_v56  ;;  %v4847_v2 = vld [vmem:[#allocation12 + $0x820] sm:$0xff]  ;;  %v3929_v56 = vld [vmem:[#allocation12 + $0xb8] sm:$0xff] }
 0x5e8   :  { %4551 = vmatprep.subr.mxu1 %v3961_v48  ;;  %4601 = vmatpush1.msra.mxu0 %v4002_v8  ;;  %v8825_v48 = vpop.f32.mrf.mxu0  ;;  %v4892_v8 = vld [vmem:[#allocation12 + $0x988] sm:$0xff] }
 0x5e9   :  { %4634 = vmatprep.mubr.f32.mxu0 %v9578_v22  ;;  %4552 = vmatpush2.msra.mxu1 %v3960_v49  ;;  %v4921_v49 = vrot.slane %v8827_v17, 4 }
 0x5ea   :  { %7035 = vmatmul.mubr.msk.f32.vlgmr.msra.gmra.mxu0 %vm153_vm2, %v8793_v62  ;;  %7350 = vmatprep.subr.mxu0 %v4001_v9  ;;  %v8830_v9 = vpop.f32.mrf.mxu1 }
 0x5eb   :  { %4553 = vmatprep.subr.mxu1 %v3958_v34  ;;  %7351 = vmatpush3.msra.mxu0 %v3953_v11  ;;  %v4844_v34 = vld [vmem:[#allocation12 + $0x808] sm:$0xff]  ;;  %v8834_v11 = vsel %vm1424_vm13, %v4924_v12, %v4930_v38  ;;  %v8843_v63 = vsel %vm1424_vm13, %v4920_v42, %v4921_v49  ;;  %v4871_v12 = vld [vmem:[#allocation12 + $0x8e0] sm:$0xff] }
 0x5ec   :  { %4554 = vmatpush2.msra.mxu1 %v3957_v24  ;;  %7352 = vmatprep.subr.mxu0 %v3998_v15  ;;  %v4889_v24 = vld [vmem:[#allocation12 + $0x970] sm:$0xff]  ;;  %v3971_v15 = vld [vmem:[#allocation12 + $0x208] sm:$0xff] }
 0x5ed   :  { %4555 = vmatprep.subr.mxu1 %v3955_v13  ;;  %4640 = vmatprep.mubr.f32.mxu0 %v9578_v22  ;;  %v8838_v13 = vpop.f32.mrf.mxu0  ;;  %v4007_v38 = vld [vmem:[#allocation12 + $0x328] sm:$0xff] }
 0x5ee   :  { %7353 = vmatpush3.msra.mxu0 %v3950_v23  ;;  %4556 = vmatpush2.msra.mxu1 %v3954_v54  ;;  %v3923_v23 = vld [vmem:[#allocation12 + $0x88] sm:$0xff]  ;;  %v8845_v54 = vpop.f32.mrf.mxu1 }
 0x5ef   :  { %7036 = vmatmul.mubr.msk.f32.gmra.mxu0 %vm153_vm2, %v8800_v33  ;;  %7354 = vmatprep.subr.mxu0 %v3995_v18  ;;  %v4838_v18 = vld [vmem:[#allocation12 + $0x7d8] sm:$0xff]  ;;  %v8848_v19 = vpop.f32.mrf.mxu0 }
 0x5f0   :  { %4558 = vmatmul.mubr.f32.vlgmr.msra.gmra.mxu1 %v8805_v45  ;;  %7355 = vmatpush3.msra.mxu0 %v3947_v61  ;;  %v3920_v61 = vld [vmem:[#allocation12 + $0x70] sm:$0xff] }
 0x5f1   :  { %4711 = vmatprep.mubr.f32.mxu0 %v8784_v55  ;;  %5041 = vmatprep.subr.mxu1 %v4909_v29  ;;  %v3986_v55 = vld [vmem:[#allocation12 + $0x280] sm:$0xff]  ;;  %v3965_v29 = vld [vmem:[#allocation12 + $0x1d8] sm:$0xff]  ;;  %v8852_v30 = vpop.f32.mrf.mxu0 }
 0x5f2   :  { %4563 = vmatprep.mubr.f32.mxu1 %v8812_v6  ;;  %7356 = vmatprep.subr.mxu0 %v3992_v57  ;;  %v4835_v57 = vld [vmem:[#allocation12 + $0x7c0] sm:$0xff] }
 0x5f3   :  { %5042 = vmatpush1.msra.mxu1 %v4908_v21  ;;  %7357 = vmatpush3.msra.mxu0 %v3944_v4  ;;  %v3917_v21 = vld [vmem:[#allocation12 + $0x58] sm:$0xff]  ;;  %v8850_v4 = vpop.f32.mrf.mxu1 }
 0x5f4   :  { %5043 = vmatprep.subr.mxu1 %v4906_v25  ;;  %7358 = vmatprep.subr.mxu0 %v3989_v39  ;;  %v4880_v25 = vld [vmem:[#allocation12 + $0x928] sm:$0xff]  ;;  %v3962_v39 = vld [vmem:[#allocation12 + $0x1c0] sm:$0xff] }
 0x5f5   :  { %5044 = vmatpush1.msra.mxu1 %v4905_v44  ;;  %7359 = vmatpush3.msra.mxu0 %v3941_v53  ;;  %v3914_v44 = vld [vmem:[#allocation12 + $0x40] sm:$0xff]  ;;  %v4877_v53 = vld [vmem:[#allocation12 + $0x910] sm:$0xff] }
 0x5f6   :  { %4564 = vmatmul.mubr.f32.gmra.mxu1 %v8816_v20  ;;  %5045 = vmatprep.subr.mxu1 %v4903_v31  ;;  %v3959_v31 = vld [vmem:[#allocation12 + $0x1a8] sm:$0xff] }
 0x5f7   :  { %7360 = vmatprep.subr.mxu0 %v3986_v55  ;;  %5046 = vmatpush1.msra.mxu1 %v4902_v36  ;;  %v4829_v55 = vld [vmem:[#allocation12 + $0x790] sm:$0xff]  ;;  %v3911_v36 = vld [vmem:[#allocation12 + $0x28] sm:$0xff] }
 0x5f8   :  { %7361 = vmatpush3.msra.mxu0 %v3938_v32  ;;  %5047 = vmatprep.subr.mxu1 %v4900_v28  ;;  %v8854_v32 = vpop.f32.mrf.mxu1  ;;  %v4874_v28 = vld [vmem:[#allocation12 + $0x8f8] sm:$0xff] }
 0x5f9   :  { %7362 = vmatprep.subr.mxu0 %v3983_v47  ;;  %5048 = vmatpush1.msra.mxu1 %v4899_v40  ;;  %v3956_v47 = vld [vmem:[#allocation12 + $0x190] sm:$0xff]  ;;  %v8856_v40 = vpop.f32.mrf.mxu0 }
 0x5fa   :  { %5081 = vmatprep.mubr.f32.mxu1 %v9578_v22  ;;  %7363 = vmatpush3.msra.mxu0 %v3935_v27  ;;  %v4013_v27 = vld [vmem:[#allocation12 + $0x358] sm:$0xff]  ;;  %v8858_v35 = vpop.f32.mrf.mxu1 }
 0x5fb   :  { %7039 = vmatmul.mubr.msk.f32.vlgmr.msra.gmra.mxu1 %vm153_vm2, %v8821_v3  ;;  %7394 = vmatprep.subr.mxu1 %v4898_v14  ;;  %v4823_v14 = vld [vmem:[#allocation12 + $0x760] sm:$0xff] }
 0x5fc   :  { %7364 = vmatprep.subr.mxu0 %v3980_v58  ;;  %7395 = vmatpush3.msra.mxu1 %v4850_v43  ;;  %v8860_v58 = vpop.f32.mrf.mxu0  ;;  %v4868_v43 = vld [vmem:[#allocation12 + $0x8c8] sm:$0xff] }
 0x5fd   :  { %7365 = vmatpush3.msra.mxu0 %v3932_v5  ;;  %7396 = vmatprep.subr.mxu1 %v4895_v59  ;;  %v4010_v5 = vld [vmem:[#allocation12 + $0x340] sm:$0xff]  ;;  %v4820_v59 = vld [vmem:[#allocation12 + $0x748] sm:$0xff] }
 0x5fe   :  { %7366 = vmatprep.subr.mxu0 %v3977_v16  ;;  %5087 = vmatprep.mubr.f32.mxu1 %v9578_v22  ;;  %v8864_v16 = vpop.f32.mrf.mxu1 }
 0x5ff   :  { %7397 = vmatpush3.msra.mxu1 %v4847_v2  ;;  %7367 = vmatpush3.msra.mxu0 %v3929_v56  ;;  %v4817_v2 = vld [vmem:[#allocation12 + $0x730] sm:$0xff]  ;;  %v8866_v56 = vpop.f32.mrf.mxu0 }
 0x600   :  { %7040 = vmatmul.mubr.msk.f32.gmra.mxu1 %vm153_vm2, %v8834_v11  ;;  %7398 = vmatprep.subr.mxu1 %v4892_v8  ;;  %v4004_v8 = vld [vmem:[#allocation12 + $0x310] sm:$0xff]  ;;  %v8869_v42 = vpop.f32.mrf.mxu1 }
 0x601   :  { %7368 = vmatprep.subr.mxu0 %v3974_v50  ;;  %7399 = vmatpush3.msra.mxu1 %v4844_v34  ;;  %v4859_v50 = vld [vmem:[#allocation12 + $0x880] sm:$0xff]  ;;  %v8873_v34 = vpop.f32.mrf.mxu0 }
 0x602   :  { %5158 = vmatprep.mubr.f32.mxu1 %v8843_v63  ;;  %7369 = vmatpush3.msra.mxu0 %v3926_v52  ;;  %v4849_v52 = vld [vmem:[#allocation12 + $0x830] sm:$0xff] }
 0x603   :  { %7400 = vmatprep.subr.mxu1 %v4889_v24  ;;  %7370 = vmatprep.subr.mxu0 %v3971_v15  ;;  %v4811_v24 = vld [vmem:[#allocation12 + $0x700] sm:$0xff]  ;;  %v4797_v15 = vld [vmem:[#allocation2 + $0x30] sm:$0xf0] }
 0x604   :  { %7401 = vmatpush3.msra.mxu1 %v4841_v51  ;;  %7371 = vmatpush3.msra.mxu0 %v3923_v23  ;;  %v4856_v51 = vld [vmem:[#allocation12 + $0x868] sm:$0xff]  ;;  %v4846_v23 = vld [vmem:[#allocation12 + $0x818] sm:$0xff] }
 0x605   :  { %7402 = vmatprep.subr.mxu1 %v4886_v26  ;;  %7372 = vmatprep.subr.mxu0 %v3968_v46  ;;  %v4801_v26 = vld [vmem:[#allocation2 + $0x68] sm:$0xf]  ;;  %v8877_v46 = vpop.f32.mrf.mxu1 }
 0x606   :  { %7403 = vmatpush3.msra.mxu1 %v4838_v18  ;;  %7373 = vmatpush3.msra.mxu0 %v3920_v61  ;;  %v4845_v18 = vld [vmem:[#allocation12 + $0x810] sm:$0xff]  ;;  %v8879_v61 = vpop.f32.mrf.mxu0 }
 0x607   :  { %7404 = vmatprep.subr.mxu1 %v4883_v41  ;;  %7374 = vmatprep.subr.mxu0 %v3965_v29  ;;  %v4853_v41 = vld [vmem:[#allocation12 + $0x850] sm:$0xff]  ;;  %v4843_v29 = vld [vmem:[#allocation12 + $0x800] sm:$0xff] }
 0x608   :  { %7405 = vmatpush3.msra.mxu1 %v4835_v57  ;;  %7375 = vmatpush3.msra.mxu0 %v3917_v21  ;;  %v4917_v57 = vrot.slane %v4797_v15, 4  ;;  %v7621_v21 = vld [vmem:[#allocation2 + $0x48] sm:$0xff] }
 0x609   :  { %7406 = vmatprep.subr.mxu1 %v4880_v25  ;;  %7376 = vmatprep.subr.mxu0 %v3962_v39  ;;  %v4918_v25 = vrot.slane %v7621_v21, 4  ;;  %v4805_v39 = vld [vmem:[#allocation12 + $0x6d0] sm:$0xff]  ;;  %v4827_v15 = vld [vmem:[#allocation12 + $0x780] sm:$0xff]  ;;  %v2899_v21 = vadd.f32 %v8825_v48, %v8830_v9  ;;  %v4816_v48 = vld [vmem:[#allocation12 + $0x728] sm:$0xff] }
 0x60a   :  { %7407 = vmatpush3.msra.mxu1 %v4832_v1  ;;  %7377 = vmatpush3.msra.mxu0 %v3914_v44  ;;  %v4842_v1 = vld [vmem:[#allocation12 + $0x7f8] sm:$0xff]  ;;  %v4928_v44 = vrot.slane %v4801_v26, 4  ;;  %v4824_v26 = vld [vmem:[#allocation12 + $0x768] sm:$0xff] }
 0x60b   :  { %7408 = vmatprep.subr.mxu1 %v4877_v53  ;;  %7378 = vmatprep.subr.mxu0 %v3959_v31  ;;  %v4910_v53 = vld [vmem:[#allocation12 + $0xa18] sm:$0xff] }
 0x60c   :  { %7409 = vmatpush3.msra.mxu1 %v4829_v55  ;;  %7379 = vmatpush3.msra.mxu0 %v3911_v36  ;;  %v4800_v31 = vld [vmem:[#allocation2 + $0x60] sm:$0xf]  ;;  %v4840_v55 = vld [vmem:[#allocation12 + $0x7e8] sm:$0xff]  ;;  %v8887_v36 = vsel %vm1424_vm13, %v4917_v57, %v4918_v25 }
 0x60d   :  { %7410 = vmatprep.subr.mxu1 %v4874_v28  ;;  %7380 = vmatprep.subr.mxu0 %v3956_v47  ;;  %v4839_v28 = vld [vmem:[#allocation12 + $0x7e0] sm:$0xff]  ;;  %v5435_v57 = vld [vmem:[#allocation15 + $0x310] sm:$0xff] }
 0x60e   :  { %7411 = vmatpush3.msra.mxu1 %v4826_v7  ;;  %7381 = vmatpush3.msra.mxu0 %v3908_v0  ;;  %v8895_v7 = vsel %vm1424_vm13, %v4921_v49, %v4928_v44  ;;  %v4907_v0 = vld [vmem:[#allocation12 + $0xa00] sm:$0xff]  ;;  %v2901_v44 = vadd.f32 %v8838_v13, %v8845_v54  ;;  %v5431_v9 = vld [vmem:[#allocation15 + $0x2f0] sm:$0xff]  ;;  %v2905_v54 = vadd.f32 %v8848_v19, %v8850_v4 }
 0x60f   :  { %7412 = vmatprep.subr.mxu1 %v4871_v12  ;;  %4712 = vmatmul.mubr.f32.vlgmr.msra.gmra.mxu0 %v8805_v45  ;;  %v4862_v45 = vld [vmem:[#allocation12 + $0x898] sm:$0xff]  ;;  %v4837_v12 = vld [vmem:[#allocation12 + $0x7d0] sm:$0xff] }
 0x610   :  { %7579 = vmatprep.subr.mxu0 %v4013_v27  ;;  %7413 = vmatpush3.msra.mxu1 %v4823_v14  ;;  %v4836_v14 = vld [vmem:[#allocation12 + $0x7c8] sm:$0xff]  ;;  %v4810_v19 = vld [vmem:[#allocation12 + $0x6f8] sm:$0xff] }
 0x611   :  { %4716 = vmatprep.mubr.f32.mxu0 %v8812_v6  ;;  %7580 = vmatpush3.msra.mxu0 %v4013_v27  ;;  %v4814_v6 = vld [vmem:[#allocation12 + $0x718] sm:$0xff]  ;;  %v4926_v27 = vrot.slane %v4800_v31, 4 }
 0x612   :  { %7414 = vmatprep.subr.mxu1 %v4868_v43  ;;  %7581 = vmatprep.subr.mxu0 %v4010_v5  ;;  %v5432_v31 = vld [vmem:[#allocation15 + $0x2f8] sm:$0xff]  ;;  %v5427_v4 = vld [vmem:[#allocation15 + $0x2d0] sm:$0xff] }
 0x613   :  { %7415 = vmatpush3.msra.mxu1 %v4820_v59  ;;  %7582 = vmatpush3.msra.mxu0 %v4010_v5  ;;  %v4904_v5 = vld [vmem:[#allocation12 + $0x9e8] sm:$0xff]  ;;  %v4834_v59 = vld [vmem:[#allocation12 + $0x7b8] sm:$0xff]  ;;  %v8903_v49 = vsel %vm1424_vm13, %v4918_v25, %v4926_v27  ;;  %v4815_v27 = vld [vmem:[#allocation12 + $0x720] sm:$0xff] }
 0x614   :  { %7416 = vmatprep.subr.mxu1 %v4865_v10  ;;  %4717 = vmatmul.mubr.f32.gmra.mxu0 %v8816_v20  ;;  %v4848_v20 = vld [vmem:[#allocation12 + $0x828] sm:$0xff] }
 0x615   :  { %7583 = vmatprep.subr.mxu0 %v4007_v38  ;;  %7417 = vmatpush3.msra.mxu1 %v4817_v2  ;;  %v4901_v2 = vld [vmem:[#allocation12 + $0x9d0] sm:$0xff] }
 0x616   :  { %7584 = vmatpush3.msra.mxu0 %v4007_v38  ;;  %7587 = vmatprep.mubr.msk.f32.mxu0 %vm153_vm2, %v8793_v62  ;;  %v4808_v62 = vld [vmem:[#allocation12 + $0x6e8] sm:$0xff]  ;;  %v4833_v38 = vld [vmem:[#allocation12 + $0x7b0] sm:$0xff] }
 0x617   :  { %7418 = vmatprep.subr.mxu1 %v4862_v45  ;;  %7585 = vmatprep.subr.mxu0 %v4004_v8  ;;  %v4831_v45 = vld [vmem:[#allocation12 + $0x7a0] sm:$0xff]  ;;  %v5434_v25 = vld [vmem:[#allocation15 + $0x308] sm:$0xff] }
 0x618   :  { %7419 = vmatpush3.msra.mxu1 %v4814_v6  ;;  %7586 = vmatpush3.msra.mxu0 %v4004_v8  ;;  %v4830_v8 = vld [vmem:[#allocation12 + $0x798] sm:$0xff] }
 0x619   :  { %7420 = vmatprep.subr.mxu1 %v4859_v50  ;;  %7588 = vmatmul.mubr.msk.f32.vlgmr.msra.gmra.mxu0 %vm153_vm2, %v8800_v33  ;;  %v8882_v33 = vpop.f32.mrf.mxu1  ;;  %v5440_v6 = vld [vmem:[#allocation15 + $0x338] sm:$0xff] }
 0x61a   :  { %4940 = vmatprep.subr.mxu0 %v4849_v52  ;;  %7421 = vmatpush3.msra.mxu1 %v4811_v24  ;;  %v4828_v24 = vld [vmem:[#allocation12 + $0x788] sm:$0xff] }
 0x61b   :  { %4941 = vmatpush1.msra.mxu0 %v4848_v20  ;;  %5004 = vmatprep.mubr.f32.mxu0 %v8843_v63  ;;  %v8884_v63 = vpop.f32.mrf.mxu0  ;;  %v8889_v47 = vpop.f32.mrf.mxu1  ;;  %v5439_v20 = vld [vmem:[#allocation15 + $0x330] sm:$0xff] }
 0x61c   :  { %7422 = vmatprep.subr.mxu1 %v4856_v51  ;;  %4942 = vmatprep.subr.mxu0 %v4846_v23  ;;  %v5438_v51 = vld [vmem:[#allocation15 + $0x328] sm:$0xff] }
 0x61d   :  { %7423 = vmatpush3.msra.mxu1 %v4808_v62  ;;  %4943 = vmatpush1.msra.mxu0 %v4845_v18  ;;  %v8900_v17 = vpop.f32.mrf.mxu1  ;;  %v4825_v23 = vld [vmem:[#allocation12 + $0x770] sm:$0xff]  ;;  %v5436_v62 = vld [vmem:[#allocation15 + $0x318] sm:$0xff] }
 0x61e   :  { %7424 = vmatprep.subr.mxu1 %v4853_v41  ;;  %4944 = vmatprep.subr.mxu0 %v4843_v29  ;;  %v4822_v29 = vld [vmem:[#allocation12 + $0x758] sm:$0xff] }
 0x61f   :  { %7425 = vmatpush3.msra.mxu1 %v4805_v39  ;;  %4945 = vmatpush1.msra.mxu0 %v4842_v1  ;;  %v8910_v52 = vpop.f32.mrf.mxu1  ;;  %v4819_v39 = vld [vmem:[#allocation12 + $0x740] sm:$0xff] }
 0x620   :  { %5159 = vmatmul.mubr.f32.vlgmr.msra.gmra.mxu1 %v8887_v36  ;;  %7590 = vmatprep.subr.mxu1 %v4910_v53  ;;  %v5433_v1 = vld [vmem:[#allocation15 + $0x300] sm:$0xff] }
 0x621   :  { %4946 = vmatprep.subr.mxu0 %v4840_v55  ;;  %5163 = vmatprep.mubr.f32.mxu1 %v8895_v7  ;;  %v3130_v43 = vpop.f32.mrf.mxu0  ;;  %v8916_v41 = vpop.f32.mrf.mxu1 }
 0x622   :  { %7591 = vmatpush3.msra.mxu1 %v4910_v53  ;;  %4947 = vmatpush1.msra.mxu0 %v4839_v28  ;;  %v4818_v53 = vld [vmem:[#allocation12 + $0x738] sm:$0xff]  ;;  %v3131_v55 = vadd.f32 %v3130_v43, %v2899_v21  ;;  %v4813_v43 = vld [vmem:[#allocation12 + $0x710] sm:$0xff] }
 0x623   :  { %7592 = vmatprep.subr.mxu1 %v4907_v0  ;;  %4948 = vmatprep.subr.mxu0 %v4837_v12  ;;  %v8898_v10 = vpop.f32.mrf.mxu0  ;;  %v8924_v12 = vld [vmem:[#allocation14] sm:$0x7]  ;;  %v4806_v21 = vld [vmem:[#allocation12 + $0x6d8] sm:$0xff] }
 0x624   :  { %7593 = vmatpush3.msra.mxu1 %v4907_v0  ;;  %4949 = vmatpush1.msra.mxu0 %v4836_v14  ;;  %v8922_v0 = vpop.f32.mrf.mxu1  ;;  %v5430_v14 = vld [vmem:[#allocation15 + $0x2e8] sm:$0xff]  ;;  %v3133_v13 = vadd.f32 %v8898_v10, %v2901_v44  ;;  %v5423_v44 = vld [vmem:[#allocation15 + $0x2b0] sm:$0xff] }
 0x625   :  { %5164 = vmatmul.mubr.f32.gmra.mxu1 %v8903_v49  ;;  %7594 = vmatprep.subr.mxu1 %v4904_v5 }
 0x626   :  { %4950 = vmatprep.subr.mxu0 %v4834_v59  ;;  %7595 = vmatpush3.msra.mxu1 %v4904_v5  ;;  %v5429_v5 = vld [vmem:[#allocation15 + $0x2e0] sm:$0xff] }
 0x627   :  { %7598 = vmatprep.mubr.msk.f32.mxu1 %vm153_vm2, %v8821_v3  ;;  %4951 = vmatpush1.msra.mxu0 %v4833_v38  ;;  %v8908_v50 = vpop.f32.mrf.mxu0  ;;  %v5437_v3 = vld [vmem:[#allocation15 + $0x320] sm:$0xff] }
 0x628   :  { %7596 = vmatprep.subr.mxu1 %v4901_v2  ;;  %4952 = vmatprep.subr.mxu0 %v4831_v45  ;;  %v4812_v38 = vld [vmem:[#allocation12 + $0x708] sm:$0xff]  ;;  %v3208_v45 = vadd.f32 %v8858_v35, %v3131_v55  ;;  %v3137_v10 = vadd.f32 %v8908_v50, %v2905_v54  ;;  %v4809_v35 = vld [vmem:[#allocation12 + $0x6f0] sm:$0xff]  ;;  %v5420_v54 = vld [vmem:[#allocation15 + $0x298] sm:$0xff] }
 0x629   :  { %7597 = vmatpush3.msra.mxu1 %v4901_v2  ;;  %4953 = vmatpush1.msra.mxu0 %v4830_v8  ;;  %v8914_v18 = vpop.f32.mrf.mxu0  ;;  %v5428_v2 = vld [vmem:[#allocation15 + $0x2d8] sm:$0xff]  ;;  %v5425_v50 = vld [vmem:[#allocation15 + $0x2c0] sm:$0xff]  ;;  %v5422_v55 = vld [vmem:[#allocation15 + $0x2a8] sm:$0xff] }
 0x62a   :  { %7599 = vmatmul.mubr.msk.f32.vlgmr.msra.gmra.mxu1 %vm153_vm2, %v8834_v11  ;;  %5513 = vmatprep.subr.mxu1 %v5440_v6  ;;  %v4821_v11 = vld [vmem:[#allocation12 + $0x750] sm:$0xff] }
 0x62b   :  { %4954 = vmatprep.subr.mxu0 %v4828_v24  ;;  %5514 = vmatpush1.msra.mxu1 %v5439_v20  ;;  %v8932_v24 = vrot.slane %v8924_v12, %v9589_v60 }
 0x62c   :  { %4955 = vmatpush1.msra.mxu0 %v4827_v15  ;;  %5515 = vmatprep.subr.mxu1 %v5438_v51  ;;  %v3656_v28 = vpop.f32.mrf.mxu0  ;;  %v9590_v15 = vld [vmem:[#allocation36_spill] sm:$0xff] }
 0x62d   :  { %4956 = vmatprep.subr.mxu0 %v4825_v23  ;;  %5516 = vmatpush1.msra.mxu1 %v5437_v3  ;;  %v8937_v51 = vrot.slane %v8924_v12, %v9590_v15  ;;  %v5426_v23 = vld [vmem:[#allocation15 + $0x2c8] sm:$0xff]  ;;  %v3210_v3 = vadd.f32 %v8864_v16, %v3133_v13 }
 0x62e   :  { %4957 = vmatpush1.msra.mxu0 %v4824_v26  ;;  %5517 = vmatprep.subr.mxu1 %v5436_v62  ;;  %v3658_v8 = vpop.f32.mrf.mxu0  ;;  %v4804_v16 = vld [vmem:[#allocation12 + $0x6c8] sm:$0xff] }
 0x62f   :  { %4958 = vmatprep.subr.mxu0 %v4822_v29  ;;  %5518 = vmatpush1.msra.mxu1 %v5435_v57  ;;  %v2907_v29 = vadd.f32 %v8852_v30, %v8854_v32  ;;  %v4807_v57 = vld [vmem:[#allocation12 + $0x6e0] sm:$0xff] }
 0x630   :  { %4959 = vmatpush1.msra.mxu0 %v4821_v11  ;;  %5519 = vmatprep.subr.mxu1 %v5434_v25  ;;  %v5424_v11 = vld [vmem:[#allocation15 + $0x2b8] sm:$0xff] }
 0x631   :  { %4960 = vmatprep.subr.mxu0 %v4819_v39  ;;  %5520 = vmatpush1.msra.mxu1 %v5433_v1  ;;  %v3662_v25 = vpop.f32.mrf.mxu0  ;;  %v3139_v30 = vadd.f32 %v8914_v18, %v2907_v29 }
 0x632   :  { %4961 = vmatpush1.msra.mxu0 %v4818_v53  ;;  %5521 = vmatprep.subr.mxu1 %v5432_v31  ;;  %v3579_v59 = vpop.f32.mrf.mxu1  ;;  %v3214_v53 = vadd.f32 %v8869_v42, %v3137_v10  ;;  %v4803_v31 = vld [vmem:[#allocation12 + $0x6c0] sm:$0xff]  ;;  %v4896_v42 = vld [vmem:[#allocation12 + $0x9a8] sm:$0xff] }
 0x633   :  { %4962 = vmatprep.subr.mxu0 %v4816_v48  ;;  %5522 = vmatpush1.msra.mxu1 %v5431_v9  ;;  %v3657_v6 = vadd.f32 %v3656_v28, %v3579_v59 }
 0x634   :  { %4963 = vmatpush1.msra.mxu0 %v4815_v27  ;;  %5523 = vmatprep.subr.mxu1 %v5430_v14  ;;  %v3581_v20 = vpop.f32.mrf.mxu1  ;;  %v4897_v27 = vld [vmem:[#allocation12 + $0x9b0] sm:$0xff]  ;;  %v5421_v14 = vld [vmem:[#allocation15 + $0x2a0] sm:$0xff] }
 0x635   :  { %4964 = vmatprep.subr.mxu0 %v4813_v43  ;;  %5524 = vmatpush1.msra.mxu1 %v5429_v5  ;;  %v3817_v26 = vadd.f32 %v3657_v6, %v3208_v45  ;;  %v3659_v62 = vadd.f32 %v3658_v8, %v3581_v20  ;;  %v3664_v43 = vpop.f32.mrf.mxu0  ;;  %v3216_v45 = vadd.f32 %v8877_v46, %v3139_v30  ;;  %v5416_v46 = vld [vmem:[#allocation15 + $0x278] sm:$0xff] }
 0x636   :  { %4965 = vmatpush1.msra.mxu0 %v4812_v38  ;;  %5525 = vmatprep.subr.mxu1 %v5428_v2  ;;  %v4894_v38 = vld [vmem:[#allocation12 + $0x998] sm:$0xff] }
 0x637   :  { %4966 = vmatprep.subr.mxu0 %v4810_v19  ;;  %5526 = vmatpush1.msra.mxu1 %v5427_v4  ;;  %v3839_v39 = vadd.f32 %v8932_v24, %v3817_v26  ;;  %v3818_v1 = vadd.f32 %v3659_v62, %v3210_v3  ;;  %v5419_v2 = vld [vmem:[#allocation15 + $0x290] sm:$0xff]  ;;  %v5418_v4 = vld [vmem:[#allocation15 + $0x288] sm:$0xff]  ;;  %v5412_v30 = vld [vmem:[#allocation15 + $0x258] sm:$0xff] }
 0x638   :  { %4967 = vmatpush1.msra.mxu0 %v4809_v35  ;;  %5527 = vmatprep.subr.mxu1 %v5426_v23  ;;  %v3585_v32 = vpop.f32.mrf.mxu1  ;;  %v4893_v19 = vld [vmem:[#allocation12 + $0x990] sm:$0xff]  ;;  %v4891_v35 = vld [vmem:[#allocation12 + $0x980] sm:$0xff]  ;;  %v4890_v62 = vld [vmem:[#allocation12 + $0x978] sm:$0xff] }
 0x639   :  { %4968 = vmatprep.subr.mxu0 %v4807_v57  ;;  %5528 = vmatpush1.msra.mxu1 %v5425_v50  ;;  %vm3845_vm0 = vcmp.ge.f32.partialorder %v3839_v39, 0.0  ;;  %v3851_v28 = vmul.f32 0.01, %v3839_v39  ;;  %v3840_v48 = vadd.f32 %v8937_v51, %v3818_v1  ;;  %v3663_v9 = vadd.f32 %v3662_v25, %v3585_v32  ;;  %v5417_v23 = vld [vmem:[#allocation15 + $0x280] sm:$0xff]  ;;  %v5415_v50 = vld [vmem:[#allocation15 + $0x270] sm:$0xff] }
 0x63a   :  { %4969 = vmatpush1.msra.mxu0 %v4806_v21  ;;  %5529 = vmatprep.subr.mxu1 %v5424_v11  ;;  %v3587_v13 = vpop.f32.mrf.mxu1  ;;  %v4888_v57 = vld [vmem:[#allocation12 + $0x968] sm:$0xff]  ;;  %v4887_v21 = vld [vmem:[#allocation12 + $0x960] sm:$0xff]  ;;  %v4882_v32 = vld [vmem:[#allocation12 + $0x938] sm:$0xff] }
 0x63b   :  { %4970 = vmatprep.subr.mxu0 %v4804_v16  ;;  %5530 = vmatpush1.msra.mxu1 %v5423_v44  ;;  %v3857_v18 = vsel %vm3845_vm0, %v3839_v39, %v3851_v28  ;;  %vm3846_vm5 = vcmp.ge.f32.partialorder %v3840_v48, 0.0  ;;  %v3852_v5 = vmul.f32 0.01, %v3840_v48  ;;  %v3820_v59 = vadd.f32 %v3663_v9, %v3214_v53  ;;  %v5414_v11 = vld [vmem:[#allocation15 + $0x268] sm:$0xff]  ;;  %v5413_v1 = vld [vmem:[#allocation15 + $0x260] sm:$0xff] }
 0x63c   :  { %4971 = vmatpush1.msra.mxu0 %v4803_v31  ;;  %5531 = vmatprep.subr.mxu1 %v5422_v55  ;;  %v3869_v8 = vrot.slane %v3857_v18, 7  ;;  %v3665_v6 = vadd.f32 %v3664_v43, %v3587_v13  ;;  %v4885_v39 = vld [vmem:[#allocation12 + $0x950] sm:$0xff]  ;;  %v4884_v53 = vld [vmem:[#allocation12 + $0x948] sm:$0xff]  ;;  %v4878_v13 = vld [vmem:[#allocation12 + $0x918] sm:$0xff] }
 0x63d   :  { %4972 = vmatprep.subr.mxu0 %v4897_v27  ;;  %5532 = vmatpush1.msra.mxu1 %v5421_v14  ;;  %v3858_v10 = vsel %vm3846_vm5, %v3840_v48, %v3852_v5  ;;  %v3842_v20 = vadd.f32 %v8932_v24, %v3820_v59  ;;  %v4881_v28 = vld [vmem:[#allocation12 + $0x930] sm:$0xff]  ;;  %v4879_v27 = vld [vmem:[#allocation12 + $0x920] sm:$0xff]  ;;  %v4876_v18 = vld [vmem:[#allocation12 + $0x908] sm:$0xff] }
 0x63e   :  { %4973 = vmatpush2.msra.mxu0 %v4896_v42  ;;  %5533 = vmatprep.subr.mxu1 %v5420_v54  ;;  %3887 = vst [vmem:[#allocation2] sm:$0xfe] %v3869_v8  ;;  %v3870_v3 = vrot.slane %v3858_v10, 7  ;;  %v3821_v26 = vadd.f32 %v3665_v6, %v3216_v45  ;;  %v5410_v48 = vld [vmem:[#allocation15 + $0x248] sm:$0xff]  ;;  %v5409_v14 = vld [vmem:[#allocation15 + $0x240] sm:$0xff]  ;;  %v5472_v42 = vld [vmem:[#allocation15 + $0x438] sm:$0xff] }
 0x63f   :  { %4974 = vmatprep.subr.mxu0 %v4894_v38  ;;  %5534 = vmatpush1.msra.mxu1 %v5419_v2  ;;  %vm3848_vm7 = vcmp.ge.f32.partialorder %v3842_v20, 0.0  ;;  %v3854_v29 = vmul.f32 0.01, %v3842_v20  ;;  %v5471_v43 = vld [vmem:[#allocation15 + $0x430] sm:$0xff]  ;;  %v4875_v5 = vld [vmem:[#allocation12 + $0x900] sm:$0xff]  ;;  %v5470_v59 = vld [vmem:[#allocation15 + $0x428] sm:$0xff] }
 0x640   :  { %4975 = vmatpush2.msra.mxu0 %v4893_v19  ;;  %5535 = vmatprep.subr.mxu1 %v5418_v4  ;;  %3888 = vst [vmem:[#allocation2 + $0x8] sm:$0xfe] %v3870_v3  ;;  %v3843_v24 = vadd.f32 %v8937_v51, %v3821_v26  ;;  %v5411_v51 = vld [vmem:[#allocation15 + $0x250] sm:$0xff]  ;;  %v5469_v2 = vld [vmem:[#allocation15 + $0x420] sm:$0xff]  ;;  %v5466_v10 = vld [vmem:[#allocation15 + $0x408] sm:$0xff] }
 0x641   :  { %4976 = vmatprep.subr.mxu0 %v4891_v35  ;;  %5536 = vmatpush1.msra.mxu1 %v5417_v23  ;;  %v3860_v25 = vsel %vm3848_vm7, %v3842_v20, %v3854_v29  ;;  %v4873_v38 = vld [vmem:[#allocation12 + $0x8f0] sm:$0xff]  ;;  %v4872_v45 = vld [vmem:[#allocation12 + $0x8e8] sm:$0xff]  ;;  %v4870_v6 = vld [vmem:[#allocation12 + $0x8d8] sm:$0xff] }
 0x642   :  { %4977 = vmatpush2.msra.mxu0 %v4890_v62  ;;  %5537 = vmatprep.subr.mxu1 %v5416_v46  ;;  %v3872_v16 = vrot.slane %v3860_v25, 7  ;;  %vm3849_vm12 = vcmp.ge.f32.partialorder %v3843_v24, 0.0  ;;  %v3855_v44 = vmul.f32 0.01, %v3843_v24  ;;  %v5467_v19 = vld [vmem:[#allocation15 + $0x410] sm:$0xff]  ;;  %v4867_v20 = vld [vmem:[#allocation12 + $0x8c0] sm:$0xff]  ;;  %v7211_v46 = vadd.f32 %v8873_v34, %v8866_v56 }
 0x643   :  { %4978 = vmatprep.subr.mxu0 %v4888_v57  ;;  %5538 = vmatpush1.msra.mxu1 %v5415_v50  ;;  %v4869_v4 = vld [vmem:[#allocation12 + $0x8d0] sm:$0xff]  ;;  %v5465_v35 = vld [vmem:[#allocation15 + $0x400] sm:$0xff]  ;;  %v4866_v23 = vld [vmem:[#allocation12 + $0x8b8] sm:$0xff] }
 0x644   :  { %4979 = vmatpush2.msra.mxu0 %v4887_v21  ;;  %5539 = vmatprep.subr.mxu1 %v5414_v11  ;;  %v8950_v31 = vsel %vm759_vm10, %v3869_v8, %v3872_v16  ;;  %3893 = vst [vmem:[#allocation2 + $0x30] sm:$0x1] %v3872_v16  ;;  %v3861_v55 = vsel %vm3849_vm12, %v3843_v24, %v3855_v44  ;;  %v5468_v8 = vld [vmem:[#allocation15 + $0x418] sm:$0xff]  ;;  %v4864_v26 = vld [vmem:[#allocation12 + $0x8a8] sm:$0xff]  ;;  %v5463_v62 = vld [vmem:[#allocation15 + $0x3f0] sm:$0xff] }
 0x645   :  { %4980 = vmatprep.subr.mxu0 %v4885_v39  ;;  %5540 = vmatpush1.msra.mxu1 %v5413_v1  ;;  %3890 = vst [vmem:[#allocation2 + $0x18] sm:$0xff] %v8950_v31  ;;  %v3874_v9 = vrot.slane %v3861_v55, 7  ;;  %v4863_v29 = vld [vmem:[#allocation12 + $0x8a0] sm:$0xff]  ;;  %v5462_v57 = vld [vmem:[#allocation15 + $0x3e8] sm:$0xff]  ;;  %v7255_v11 = vadd.f32 %v8910_v52, %v8900_v17  ;;  %v4858_v56 = vld [vmem:[#allocation12 + $0x878] sm:$0xff]  ;;  %v3056_v16 = vadd.f32 %v8879_v61, %v7211_v46 }
 0x646   :  { %4981 = vmatpush2.msra.mxu0 %v4884_v53  ;;  %5541 = vmatprep.subr.mxu1 %v5412_v30  ;;  %v4861_v24 = vld [vmem:[#allocation12 + $0x890] sm:$0xff]  ;;  %v5461_v21 = vld [vmem:[#allocation15 + $0x3e0] sm:$0xff]  ;;  %v5460_v39 = vld [vmem:[#allocation15 + $0x3d8] sm:$0xff]  ;;  %v7252_v55 = vadd.f32 %v8889_v47, %v8882_v33 }
 0x647   :  { %4982 = vmatprep.subr.mxu0 %v4882_v32  ;;  %5542 = vmatpush1.msra.mxu1 %v5411_v51  ;;  %v8954_v54 = vsel %vm759_vm10, %v3870_v3, %v3874_v9  ;;  %3894 = vst [vmem:[#allocation2 + $0x38] sm:$0x1] %v3874_v9  ;;  %v5464_v3 = vld [vmem:[#allocation15 + $0x3f8] sm:$0xff]  ;;  %v4860_v25 = vld [vmem:[#allocation12 + $0x888] sm:$0xff]  ;;  %v5459_v34 = vld [vmem:[#allocation15 + $0x3d0] sm:$0xff]  ;;  %v7208_v51 = vadd.f32 %v8860_v58, %v8856_v40 }
 0x648   :  { %4983 = vmatpush2.msra.mxu0 %v4881_v28  ;;  %5543 = vmatprep.subr.mxu1 %v5410_v48  ;;  %3891 = vst [vmem:[#allocation2 + $0x20] sm:$0xff] %v8954_v54  ;;  %v4857_v44 = vld [vmem:[#allocation12 + $0x870] sm:$0xff]  ;;  %v5403_v30 = vld [vmem:[#allocation2 + $0x8] sm:$0xfe]  ;;  %v3290_v28 = vadd.f32 %v7255_v11, %v3056_v16  ;;  %v4854_v61 = vld [vmem:[#allocation12 + $0x858] sm:$0xff]  ;;  %v5494_v47 = vrot.slane %v8954_v54, 1 }
 0x649   :  { %4984 = vmatprep.subr.mxu0 %v4879_v27  ;;  %5544 = vmatpush1.msra.mxu1 %v5409_v14  ;;  %v5458_v53 = vld [vmem:[#allocation15 + $0x3c8] sm:$0xff]  ;;  %v4855_v32 = vld [vmem:[#allocation12 + $0x860] sm:$0xff]  ;;  %v5455_v27 = vld [vmem:[#allocation15 + $0x3b0] sm:$0xff]  ;;  %v5493_v14 = vrot.slane %v5403_v30, 1 }
 0x64a   :  { %4985 = vmatpush2.msra.mxu0 %v4878_v13  ;;  %5545 = vmatprep.subr.mxu1 %v5472_v42  ;;  %v5457_v17 = vld [vmem:[#allocation15 + $0x3c0] sm:$0xff]  ;;  %v5456_v48 = vld [vmem:[#allocation15 + $0x3b8] sm:$0xff]  ;;  %v3051_v42 = vadd.f32 %v7208_v51, %v8884_v63  ;;  %v5454_v40 = vld [vmem:[#allocation15 + $0x3a8] sm:$0xff]  ;;  %v3835_v63 = vrot.slane %v8924_v12, %v8377_v37 }
 0x64b   :  { %4986 = vmatprep.subr.mxu0 %v4876_v18  ;;  %5546 = vmatpush2.msra.mxu1 %v5471_v43  ;;  %v4852_v9 = vld [vmem:[#allocation12 + $0x848] sm:$0xff]  ;;  %v4851_v18 = vld [vmem:[#allocation12 + $0x840] sm:$0xff]  ;;  %v3365_v43 = vadd.f32 %v8916_v41, %v3290_v28 }
 0x64c   :  { %4987 = vmatpush2.msra.mxu0 %v4875_v5  ;;  %5547 = vmatprep.subr.mxu1 %v5470_v59  ;;  %v5453_v33 = vld [vmem:[#allocation15 + $0x3a0] sm:$0xff]  ;;  %v3285_v5 = vadd.f32 %v7252_v55, %v3051_v42  ;;  %v5452_v59 = vld [vmem:[#allocation15 + $0x398] sm:$0xff]  ;;  %v5450_v41 = vld [vmem:[#allocation15 + $0x388] sm:$0xff]  ;;  %v5491_v55 = vrot.slane %v8950_v31, 1 }
 0x64d   :  { %4988 = vmatprep.subr.mxu0 %v4873_v38  ;;  %5548 = vmatpush2.msra.mxu1 %v5469_v2  ;;  %v5451_v2 = vld [vmem:[#allocation15 + $0x390] sm:$0xff]  ;;  %v5449_v12 = vld [vmem:[#allocation15 + $0x380] sm:$0xff]  ;;  %v8982_v46 = vld [vmem:[#allocation15 + $0x468] sm:$0xff] }
 0x64e   :  { %4989 = vmatpush2.msra.mxu0 %v4872_v45  ;;  %5549 = vmatprep.subr.mxu1 %v5468_v8  ;;  %v5495_v8 = vsel %vm1838_vm14, %v5493_v14, %v5494_v47  ;;  %v5444_v11 = vld [vmem:[#allocation15 + $0x358] sm:$0xff]  ;;  %v5442_v16 = vld [vmem:[#allocation15 + $0x348] sm:$0xff]  ;;  %v8997_v30 = vld [vmem:[#allocation15 + $0x440] sm:$0xff] }
 0x64f   :  { %4990 = vmatprep.subr.mxu0 %v4870_v6  ;;  %5550 = vmatpush2.msra.mxu1 %v5467_v19  ;;  %v9008_v42 = vld [vmem:[#allocation15 + $0xf8] sm:$0xff]  ;;  %v5830_v15 = vld [vmem:[#allocation2 + $0x38] sm:$0x3] }
 0x650   :  { %4991 = vmatpush2.msra.mxu0 %v4869_v4  ;;  %5551 = vmatprep.subr.mxu1 %v5466_v10  ;;  %v8975_v4 = vld [vmem:[#allocation15 + $0x478] sm:$0xff]  ;;  %v3360_v10 = vadd.f32 %v8922_v0, %v3285_v5  ;;  %v5445_v0 = vld [vmem:[#allocation15 + $0x360] sm:$0xff]  ;;  %v5395_v5 = vld [vmem:[#allocation15 + $0x208] sm:$0xff] }
 0x651   :  { %4992 = vmatprep.subr.mxu0 %v4867_v20  ;;  %5552 = vmatpush2.msra.mxu1 %v5465_v35  ;;  %v7294_v50 = vpop.f32.mrf.mxu0 }
 0x652   :  { %4993 = vmatpush2.msra.mxu0 %v4866_v23  ;;  %5553 = vmatprep.subr.mxu1 %v5464_v3  ;;  %v5448_v23 = vld [vmem:[#allocation15 + $0x378] sm:$0xff]  ;;  %v8979_v3 = vld [vmem:[#allocation15 + $0x470] sm:$0xff] }
 0x653   :  { %4994 = vmatprep.subr.mxu0 %v4864_v26  ;;  %5554 = vmatpush2.msra.mxu1 %v5463_v62  ;;  %v7295_v1 = vpop.f32.mrf.mxu0 }
 0x654   :  { %4995 = vmatpush2.msra.mxu0 %v4863_v29  ;;  %5555 = vmatprep.subr.mxu1 %v5462_v57  ;;  %v7296_v45 = vadd.f32 %v7295_v1, %v7294_v50  ;;  %v8985_v29 = vld [vmem:[#allocation15 + $0x460] sm:$0xff]  ;;  %v5402_v57 = vld [vmem:[#allocation2] sm:$0xfe] }
 0x655   :  { %4996 = vmatprep.subr.mxu0 %v4861_v24  ;;  %5556 = vmatpush2.msra.mxu1 %v5461_v21  ;;  %v8988_v21 = vld [vmem:[#allocation15 + $0x458] sm:$0xff] }
 0x656   :  { %4997 = vmatpush2.msra.mxu0 %v4860_v25  ;;  %5557 = vmatprep.subr.mxu1 %v5460_v39  ;;  %v7297_v52 = vpop.f32.mrf.mxu0  ;;  %v5406_v25 = vld [vmem:[#allocation2 + $0x38] sm:$0x1]  ;;  %v5443_v39 = vld [vmem:[#allocation15 + $0x350] sm:$0xff] }
 0x657   :  { %4998 = vmatprep.subr.mxu0 %v4858_v56  ;;  %5558 = vmatpush2.msra.mxu1 %v5459_v34  ;;  %v8994_v34 = vld [vmem:[#allocation15 + $0x448] sm:$0xff] }
 0x658   :  { %4999 = vmatpush2.msra.mxu0 %v4857_v44  ;;  %5559 = vmatprep.subr.mxu1 %v5458_v53  ;;  %v7298_v13 = vpop.f32.mrf.mxu0  ;;  %v5490_v44 = vrot.slane %v5402_v57, 1 }
 0x659   :  { %5000 = vmatprep.subr.mxu0 %v4855_v32  ;;  %5560 = vmatpush2.msra.mxu1 %v5457_v17  ;;  %v7299_v58 = vadd.f32 %v7298_v13, %v7297_v52  ;;  %v5441_v32 = vld [vmem:[#allocation15 + $0x340] sm:$0xff]  ;;  %v5501_v17 = vrot.slane %v5406_v25, 1  ;;  %v5399_v13 = vld [vmem:[#allocation15 + $0x228] sm:$0xff]  ;;  %v5856_v25 = vld [vmem:[#allocation15 + $0x538] sm:$0xff] }
 0x65a   :  { %5001 = vmatpush2.msra.mxu0 %v4854_v61  ;;  %5561 = vmatprep.subr.mxu1 %v5456_v48  ;;  %v5405_v52 = vld [vmem:[#allocation2 + $0x30] sm:$0x1]  ;;  %v5401_v61 = vld [vmem:[#allocation15 + $0x238] sm:$0xff]  ;;  %v5400_v48 = vld [vmem:[#allocation15 + $0x230] sm:$0xff] }
 0x65b   :  { %5002 = vmatprep.subr.mxu0 %v4852_v9  ;;  %5562 = vmatpush2.msra.mxu1 %v5455_v27  ;;  %v7567_v38 = vpop.f32.mrf.mxu0  ;;  %v5492_v9 = vsel %vm1838_vm14, %v5490_v44, %v5491_v55  ;;  %v5499_v27 = vrot.slane %v5405_v52, 1  ;;  %v9032_v44 = vld [vmem:[#allocation15 + $0xc8] sm:$0xff]  ;;  %v5853_v52 = vld [vmem:[#allocation15 + $0x520] sm:$0xff] }
 0x65c   :  { %5003 = vmatpush2.msra.mxu0 %v4851_v18  ;;  %5563 = vmatprep.subr.mxu1 %v5454_v40  ;;  %v3814_v6 = vadd.f32 %v7567_v38, %v7299_v58  ;;  %v5502_v18 = vsel %vm1838_vm14, %v5494_v47, %v5501_v17  ;;  %v5398_v40 = vld [vmem:[#allocation15 + $0x220] sm:$0xff]  ;;  %v5397_v58 = vld [vmem:[#allocation15 + $0x218] sm:$0xff]  ;;  %v5863_v38 = vld [vmem:[#allocation15 + $0x570] sm:$0xff] }
 0x65d   :  { %5005 = vmatmul.mubr.f32.vlgmr.msra.gmra.mxu0 %v8887_v36  ;;  %5564 = vmatpush2.msra.mxu1 %v5453_v33  ;;  %v3808_v19 = vpop.f32.mrf.mxu0  ;;  %v5447_v36 = vld [vmem:[#allocation15 + $0x370] sm:$0xff]  ;;  %v5864_v47 = vld [vmem:[#allocation15 + $0x578] sm:$0xff]  ;;  %v9035_v17 = vld [vmem:[#allocation15 + $0xc0] sm:$0xff] }
 0x65e   :  { %5010 = vmatprep.mubr.f32.mxu0 %v8895_v7  ;;  %5565 = vmatprep.subr.mxu1 %v5452_v59  ;;  %v3822_v20 = vadd.f32 %v3814_v6, %v3365_v43  ;;  %v3809_v35 = vadd.f32 %v7296_v45, %v3808_v19  ;;  %v5446_v7 = vld [vmem:[#allocation15 + $0x368] sm:$0xff]  ;;  %v5396_v33 = vld [vmem:[#allocation15 + $0x210] sm:$0xff]  ;;  %v5500_v43 = vsel %vm1838_vm14, %v5491_v55, %v5499_v27  ;;  %v5394_v59 = vld [vmem:[#allocation15 + $0x200] sm:$0xff] }
 0x65f   :  { %5566 = vmatpush2.msra.mxu1 %v5451_v2  ;;  %5577 = vmatprep.mubr.f32.mxu1 %v5495_v8  ;;  %v5827_v45 = vld [vmem:[#allocation2 + $0x8] sm:$0xfc]  ;;  %v5862_v8 = vld [vmem:[#allocation15 + $0x568] sm:$0xff] }
 0x660   :  { %5567 = vmatprep.subr.mxu1 %v5450_v41  ;;  %v3844_v26 = vadd.f32 %v3835_v63, %v3822_v20  ;;  %v3819_v62 = vadd.f32 %v3809_v35, %v3360_v10  ;;  %5614 = vmatprep.subr.mxu0 %v8975_v4  ;;  %v5861_v19 = vld [vmem:[#allocation15 + $0x560] sm:$0xff]  ;;  %v5360_v20 = vld [vmem:[#allocation15 + $0xf0] sm:$0xff]  ;;  %v5914_v35 = vrot.slane %v5827_v45, 2  ;;  %v5852_v55 = vld [vmem:[#allocation15 + $0x518] sm:$0xff] }
 0x661   :  { %5011 = vmatmul.mubr.f32.gmra.mxu0 %v8903_v49  ;;  %5568 = vmatpush2.msra.mxu1 %v5449_v12  ;;  %v8991_v49 = vld [vmem:[#allocation15 + $0x450] sm:$0xff]  ;;  %v5860_v12 = vld [vmem:[#allocation15 + $0x558] sm:$0xff]  ;;  %v9046_v27 = vld [vmem:[#allocation15 + $0xa0] sm:$0xff] }
 0x662   :  { %5569 = vmatprep.subr.mxu1 %v5448_v23  ;;  %vm3850_vm3 = vcmp.ge.f32.partialorder %v3844_v26, 0.0  ;;  %v3856_v50 = vmul.f32 0.01, %v3844_v26  ;;  %v3841_v24 = vadd.f32 %v3835_v63, %v3819_v62  ;;  %5615 = vmatpush1.msra.mxu0 %v8979_v3  ;;  %v9520_v62 = vrot.slane %v8954_v54, 2  ;;  %v9067_v45 = vld [vmem:[#allocation15 + $0x68] sm:$0xff] }
 0x663   :  { %5570 = vmatpush2.msra.mxu1 %v5447_v36  ;;  %5616 = vmatprep.subr.mxu0 %v8982_v46  ;;  %v5359_v36 = vld [vmem:[#allocation15 + $0xe8] sm:$0xff] }
 0x664   :  { %5571 = vmatprep.subr.mxu1 %v5446_v7  ;;  %v3862_v1 = vsel %vm3850_vm3, %v3844_v26, %v3856_v50  ;;  %vm3847_vm0 = vcmp.ge.f32.partialorder %v3841_v24, 0.0  ;;  %v3853_v56 = vmul.f32 0.01, %v3841_v24  ;;  %5617 = vmatpush1.msra.mxu0 %v8985_v29  ;;  %v5859_v26 = vld [vmem:[#allocation15 + $0x550] sm:$0xff]  ;;  %v5858_v7 = vld [vmem:[#allocation15 + $0x548] sm:$0xff]  ;;  %v5916_v50 = vsel %vm3489_vm4, %v5914_v35, %v9520_v62 }
 0x665   :  { %5572 = vmatpush2.msra.mxu1 %v5445_v0  ;;  %v3876_v53 = vrot.slane %v3862_v1, 7  ;;  %5618 = vmatprep.subr.mxu0 %v8988_v21  ;;  %v5358_v0 = vld [vmem:[#allocation15 + $0xe0] sm:$0xff]  ;;  %v5855_v1 = vld [vmem:[#allocation15 + $0x530] sm:$0xff] }
 0x666   :  { %5573 = vmatprep.subr.mxu1 %v5444_v11  ;;  %v3859_v51 = vsel %vm3847_vm0, %v3841_v24, %v3853_v56  ;;  %5619 = vmatpush1.msra.mxu0 %v8991_v49  ;;  %v5857_v24 = vld [vmem:[#allocation15 + $0x540] sm:$0xff]  ;;  %v5357_v11 = vld [vmem:[#allocation15 + $0xd8] sm:$0xff]  ;;  %v5356_v56 = vld [vmem:[#allocation15 + $0xd0] sm:$0xff] }
 0x667   :  { %5574 = vmatpush2.msra.mxu1 %v5443_v39  ;;  %3895 = vst.msk [vmem:[#allocation2 + $0x40] sm:$0x1] %vm787_vm6, %v3876_v53  ;;  %v3871_v28 = vrot.slane %v3859_v51, 7  ;;  %5620 = vmatprep.subr.mxu0 %v8994_v34  ;;  %v9037_v51 = vld [vmem:[#allocation15 + $0xb8] sm:$0xff]  ;;  %v5839_v35 = vld [vmem:[#allocation15 + $0x4b0] sm:$0xff] }
 0x668   :  { %5575 = vmatprep.subr.mxu1 %v5442_v16  ;;  %5621 = vmatpush1.msra.mxu0 %v8997_v30  ;;  %v5883_v62 = vld [vmem:[#allocation15 + $0x610] sm:$0xff] }
 0x669   :  { %5576 = vmatpush2.msra.mxu1 %v5441_v32  ;;  %v3877_v14 = vsel %vm759_vm10, %v3871_v28, %v3876_v53  ;;  %3889 = vst.msk [vmem:[#allocation2 + $0x10] sm:$0xfe] %vm780_vm11, %v3871_v28  ;;  %5654 = vmatprep.mubr.f32.mxu0 %v9578_v22  ;;  %v5854_v53 = vld [vmem:[#allocation15 + $0x528] sm:$0xff]  ;;  %v5325_v32 = vld [vmem:[#allocation2 + $0x8] sm:$0xff]  ;;  %v9040_v28 = vld [vmem:[#allocation15 + $0xb0] sm:$0xff] }
 0x66a   :  { %5578 = vmatmul.mubr.f32.vlgmr.msra.gmra.mxu1 %v5492_v9  ;;  %3892 = vst.msk [vmem:[#allocation2 + $0x28] sm:$0xff] %vm153_vm2, %v3877_v14  ;;  %5773 = vmatprep.subr.mxu1 %v5401_v61  ;;  %v5851_v61 = vld [vmem:[#allocation15 + $0x510] sm:$0xff]  ;;  %v5850_v9 = vld [vmem:[#allocation15 + $0x508] sm:$0xff]  ;;  %v5849_v14 = vld [vmem:[#allocation15 + $0x500] sm:$0xff] }
 0x66b   :  { %5583 = vmatprep.mubr.f32.mxu1 %v5502_v18  ;;  %5774 = vmatpush1.msra.mxu1 %v5400_v48  ;;  %v9043_v48 = vld [vmem:[#allocation15 + $0xa8] sm:$0xff]  ;;  %v5848_v18 = vld [vmem:[#allocation15 + $0x4f8] sm:$0xff] }
 0x66c   :  { %5775 = vmatprep.subr.mxu1 %v5399_v13  ;;  %5672 = vmatprep.subr.mxu0 %v9008_v42  ;;  %v9049_v13 = vld [vmem:[#allocation15 + $0x98] sm:$0xff] }
 0x66d   :  { %5776 = vmatpush1.msra.mxu1 %v5398_v40  ;;  %v9052_v40 = vld [vmem:[#allocation15 + $0x90] sm:$0xff] }
 0x66e   :  { %5584 = vmatmul.mubr.f32.gmra.mxu1 %v5500_v43  ;;  %5777 = vmatprep.subr.mxu1 %v5397_v58  ;;  %v5407_v57 = vld [vmem:[#allocation2 + $0x40] sm:$0x1]  ;;  %v5846_v43 = vld [vmem:[#allocation15 + $0x4e8] sm:$0xff] }
 0x66f   :  { %5778 = vmatpush1.msra.mxu1 %v5396_v33  ;;  %5813 = vmatprep.mubr.f32.mxu1 %v9578_v22  ;;  %v5503_v39 = vrot.slane %v5407_v57, 1  ;;  %v5847_v58 = vld [vmem:[#allocation15 + $0x4f0] sm:$0xff]  ;;  %v9055_v33 = vld [vmem:[#allocation15 + $0x88] sm:$0xff]  ;;  %v9087_v57 = vld [vmem:[#allocation15 + $0x38] sm:$0xff] }
 0x670   :  { %5779 = vmatprep.subr.mxu1 %v5395_v5  ;;  %v5326_v63 = vld [vmem:[#allocation2 + $0x10] sm:$0xff]  ;;  %9592 = vst [vmem:[#allocation26_spill] sm:$0xff] %v9087_v57 }
 0x671   :  { %v5404_v2 = vld [vmem:[#allocation2 + $0x10] sm:$0xfe]  ;;  %5780 = vmatpush1.msra.mxu1 %v5394_v59  ;;  %v9017_v6 = vld [vmem:[#allocation2 + $0x28] sm:$0xff] }
 0x672   :  { %v5496_v41 = vrot.slane %v5404_v2, 1  ;;  %5934 = vmatprep.subr.mxu1 %v5864_v47  ;;  %7045 = vmatmul.mubr.msk.f32.vlgmr.msra.gmra.mxu1 %vm153_vm2, %v5326_v63  ;;  %v5497_v10 = vrot.slane %v9017_v6, 1  ;;  %v9058_v5 = vld [vmem:[#allocation15 + $0x80] sm:$0xff]  ;;  %v9061_v47 = vld [vmem:[#allocation15 + $0x78] sm:$0xff]  ;;  %v9064_v63 = vld [vmem:[#allocation15 + $0x70] sm:$0xff] }
 0x673   :  { %5935 = vmatpush1.msra.mxu1 %v5863_v38  ;;  %5819 = vmatprep.mubr.f32.mxu1 %v9578_v22  ;;  %v5845_v59 = vld [vmem:[#allocation15 + $0x4e0] sm:$0xff]  ;;  %v5844_v38 = vld [vmem:[#allocation15 + $0x4d8] sm:$0xff]  ;;  %v5843_v2 = vld [vmem:[#allocation15 + $0x4d0] sm:$0xff] }
 0x674   :  { %5936 = vmatprep.subr.mxu1 %v5862_v8  ;;  %v5498_v23 = vsel %vm1838_vm14, %v5496_v41, %v5497_v10  ;;  %v5504_v16 = vsel %vm1838_vm14, %v5497_v10, %v5503_v39  ;;  %v5842_v8 = vld [vmem:[#allocation15 + $0x4c8] sm:$0xff]  ;;  %v9070_v41 = vld [vmem:[#allocation15 + $0x60] sm:$0xff]  ;;  %v9073_v10 = vld [vmem:[#allocation15 + $0x58] sm:$0xff] }
 0x675   :  { %5937 = vmatpush1.msra.mxu1 %v5861_v19  ;;  %7043 = vmatmul.mubr.msk.f32.vlgmr.msra.gmra.mxu0 %vm153_vm2, %v5498_v23  ;;  %v5841_v19 = vld [vmem:[#allocation15 + $0x4c0] sm:$0xff]  ;;  %v9079_v23 = vld [vmem:[#allocation15 + $0x48] sm:$0xff] }
 0x676   :  { %5938 = vmatprep.subr.mxu1 %v5860_v12  ;;  %5673 = vmatpush1.msra.mxu0 %v5360_v20  ;;  %v5840_v12 = vld [vmem:[#allocation15 + $0x4b8] sm:$0xff]  ;;  %v9076_v20 = vld [vmem:[#allocation15 + $0x50] sm:$0xff]  ;;  %v5834_v39 = vld [vmem:[#allocation15 + $0x488] sm:$0xff] }
 0x677   :  { %7046 = vmatmul.mubr.msk.f32.gmra.mxu1 %vm153_vm2, %v9017_v6  ;;  %5674 = vmatprep.subr.mxu0 %v5359_v36  ;;  %v5838_v36 = vld [vmem:[#allocation15 + $0x4a8] sm:$0xff] }
 0x678   :  { %5939 = vmatpush1.msra.mxu1 %v5859_v26  ;;  %5998 = vmatprep.mubr.f32.mxu1 %v5916_v50  ;;  %v9081_v26 = vpop.f32.mrf.mxu1  ;;  %v5836_v50 = vld [vmem:[#allocation15 + $0x498] sm:$0xff] }
 0x679   :  { %5940 = vmatprep.subr.mxu1 %v5858_v7  ;;  %5675 = vmatpush1.msra.mxu0 %v5358_v0  ;;  %v9084_v7 = vld [vmem:[#allocation15 + $0x40] sm:$0xff] }
 0x67a   :  { %5941 = vmatpush1.msra.mxu1 %v5857_v24  ;;  %5660 = vmatprep.mubr.f32.mxu0 %v9578_v22  ;;  %9591 = vst [vmem:[#allocation25_spill] sm:$0xff] %v9084_v7  ;;  %v5837_v0 = vld [vmem:[#allocation15 + $0x4a0] sm:$0xff]  ;;  %v9090_v24 = vld [vmem:[#allocation15 + $0x30] sm:$0xff] }
 0x67b   :  { %5676 = vmatprep.subr.mxu0 %v5357_v11  ;;  %5942 = vmatprep.subr.mxu1 %v5856_v25  ;;  %9593 = vst [vmem:[#allocation27_spill] sm:$0xff] %v9090_v24  ;;  %v5835_v11 = vld [vmem:[#allocation15 + $0x490] sm:$0xff]  ;;  %v9093_v25 = vld [vmem:[#allocation15 + $0x28] sm:$0xff] }
 0x67c   :  { %7044 = vmatmul.mubr.msk.f32.gmra.mxu0 %vm153_vm2, %v5504_v16  ;;  %5943 = vmatpush1.msra.mxu1 %v5855_v1  ;;  %9594 = vst [vmem:[#allocation28_spill] sm:$0xff] %v9093_v25  ;;  %v9095_v1 = vpop.f32.mrf.mxu1  ;;  %v5833_v16 = vld [vmem:[#allocation15 + $0x480] sm:$0xff] }
 0x67d   :  { %5677 = vmatpush1.msra.mxu0 %v5356_v56  ;;  %5736 = vmatprep.mubr.f32.mxu0 %v5325_v32  ;;  %v9098_v56 = vld [vmem:[#allocation15 + $0x20] sm:$0xff]  ;;  %v5896_v32 = vld [vmem:[#allocation15 + $0x678] sm:$0xff] }
 0x67e   :  { %5678 = vmatprep.subr.mxu0 %v9032_v44  ;;  %5944 = vmatprep.subr.mxu1 %v5854_v53  ;;  %9595 = vst [vmem:[#allocation29_spill] sm:$0xff] %v9098_v56  ;;  %v9101_v53 = vld [vmem:[#allocation15 + $0x18] sm:$0xff] }
 0x67f   :  { %5679 = vmatpush1.msra.mxu0 %v9035_v17  ;;  %5945 = vmatpush1.msra.mxu1 %v5853_v52  ;;  %9596 = vst [vmem:[#allocation30_spill] sm:$0xff] %v9101_v53  ;;  %v9104_v52 = vld [vmem:[#allocation15 + $0x10] sm:$0xff] }
 0x680   :  { %5680 = vmatprep.subr.mxu0 %v9037_v51  ;;  %5946 = vmatprep.subr.mxu1 %v5852_v55  ;;  %9597 = vst [vmem:[#allocation31_spill] sm:$0xff] %v9104_v52  ;;  %v5895_v55 = vld [vmem:[#allocation15 + $0x670] sm:$0xff] }
 0x681   :  { %5681 = vmatpush1.msra.mxu0 %v9040_v28  ;;  %5947 = vmatpush1.msra.mxu1 %v5851_v61  ;;  %v9107_v61 = vld [vmem:[#allocation15 + $0x8] sm:$0xff] }
 0x682   :  { %5682 = vmatprep.subr.mxu0 %v9043_v48  ;;  %5948 = vmatprep.subr.mxu1 %v5850_v9  ;;  %9598 = vst [vmem:[#allocation32_spill] sm:$0xff] %v9107_v61  ;;  %v5894_v9 = vld [vmem:[#allocation15 + $0x668] sm:$0xff] }
 0x683   :  { %5683 = vmatpush1.msra.mxu0 %v9046_v27  ;;  %5949 = vmatpush1.msra.mxu1 %v5849_v14  ;;  %v9109_v14 = vpop.f32.mrf.mxu1 }
 0x684   :  { %5684 = vmatprep.subr.mxu0 %v9049_v13  ;;  %5950 = vmatprep.subr.mxu1 %v5848_v18  ;;  %v9112_v18 = vld [vmem:[#allocation15] sm:$0xff] }
 0x685   :  { %5685 = vmatpush1.msra.mxu0 %v9052_v40  ;;  %5951 = vmatpush1.msra.mxu1 %v5847_v58  ;;  %9599 = vst [vmem:[#allocation33_spill] sm:$0xff] %v9112_v18  ;;  %v5893_v58 = vld [vmem:[#allocation15 + $0x660] sm:$0xff] }
 0x686   :  { %5686 = vmatprep.subr.mxu0 %v9055_v33  ;;  %5952 = vmatprep.subr.mxu1 %v5846_v43  ;;  %v9115_v43 = vld [vmem:[#allocation15 + $0x1f8] sm:$0xff] }
 0x687   :  { %5687 = vmatpush1.msra.mxu0 %v9058_v5  ;;  %5953 = vmatpush1.msra.mxu1 %v5845_v59  ;;  %9600 = vst [vmem:[#allocation34_spill] sm:$0xff] %v9115_v43  ;;  %v5892_v59 = vld [vmem:[#allocation15 + $0x658] sm:$0xff] }
 0x688   :  { %5688 = vmatprep.subr.mxu0 %v9061_v47  ;;  %5954 = vmatprep.subr.mxu1 %v5844_v38  ;;  %v9118_v38 = vld [vmem:[#allocation15 + $0x1f0] sm:$0xff] }
 0x689   :  { %5689 = vmatpush1.msra.mxu0 %v9064_v63  ;;  %5955 = vmatpush1.msra.mxu1 %v5843_v2  ;;  %9601 = vst [vmem:[#allocation37_spill] sm:$0xff] %v9118_v38  ;;  %v5891_v2 = vld [vmem:[#allocation15 + $0x650] sm:$0xff] }
 0x68a   :  { %5690 = vmatprep.subr.mxu0 %v9067_v45  ;;  %5956 = vmatprep.subr.mxu1 %v5842_v8  ;;  %v9121_v8 = vld [vmem:[#allocation15 + $0x1e8] sm:$0xff] }
 0x68b   :  { %5691 = vmatpush1.msra.mxu0 %v9070_v41  ;;  %5957 = vmatpush1.msra.mxu1 %v5841_v19  ;;  %9602 = vst [vmem:[#allocation38_spill] sm:$0xff] %v9121_v8  ;;  %v5890_v19 = vld [vmem:[#allocation15 + $0x648] sm:$0xff] }
 0x68c   :  { %5692 = vmatprep.subr.mxu0 %v9073_v10  ;;  %5958 = vmatprep.subr.mxu1 %v5840_v12  ;;  %v9123_v12 = vpop.f32.mrf.mxu1 }
 0x68d   :  { %5693 = vmatpush1.msra.mxu0 %v9076_v20  ;;  %5959 = vmatpush1.msra.mxu1 %v5839_v35  ;;  %v9126_v35 = vld [vmem:[#allocation15 + $0x1e0] sm:$0xff] }
 0x68e   :  { %5694 = vmatprep.subr.mxu0 %v9079_v23  ;;  %5960 = vmatprep.subr.mxu1 %v5838_v36  ;;  %9603 = vst [vmem:[#allocation39_spill] sm:$0xff] %v9126_v35  ;;  %v5889_v36 = vld [vmem:[#allocation15 + $0x640] sm:$0xff] }
 0x68f   :  { %5695 = vmatpush1.msra.mxu0 %v9084_v7  ;;  %5961 = vmatpush1.msra.mxu1 %v5837_v0  ;;  %v9129_v0 = vld [vmem:[#allocation15 + $0x1d8] sm:$0xff] }
 0x690   :  { %5696 = vmatprep.subr.mxu0 %v9087_v57  ;;  %5962 = vmatprep.subr.mxu1 %v5836_v50  ;;  %9604 = vst [vmem:[#allocation40_spill] sm:$0xff] %v9129_v0  ;;  %v5888_v50 = vld [vmem:[#allocation15 + $0x638] sm:$0xff]  ;;  %v5829_v57 = vld [vmem:[#allocation2 + $0x30] sm:$0x3] }
 0x691   :  { %5697 = vmatpush1.msra.mxu0 %v9090_v24  ;;  %5963 = vmatpush1.msra.mxu1 %v5835_v11  ;;  %v9131_v11 = vpop.f32.mrf.mxu1  ;;  %v9220_v24 = vld [vmem:[#allocation15 + $0x120] sm:$0xff] }
 0x692   :  { %5698 = vmatprep.subr.mxu0 %v9093_v25  ;;  %5964 = vmatprep.subr.mxu1 %v5834_v39  ;;  %v9134_v39 = vld [vmem:[#allocation15 + $0x1d0] sm:$0xff] }
 0x693   :  { %5699 = vmatpush1.msra.mxu0 %v9098_v56  ;;  %5965 = vmatpush1.msra.mxu1 %v5833_v16  ;;  %9605 = vst [vmem:[#allocation41_spill] sm:$0xff] %v9134_v39  ;;  %v5887_v16 = vld [vmem:[#allocation15 + $0x630] sm:$0xff] }
 0x694   :  { %5700 = vmatprep.subr.mxu0 %v9101_v53  ;;  %5966 = vmatprep.subr.mxu1 %v5896_v32  ;;  %v9137_v32 = vld [vmem:[#allocation15 + $0x1c8] sm:$0xff]  ;;  %v5826_v53 = vld [vmem:[#allocation2] sm:$0xfc] }
 0x695   :  { %5701 = vmatpush1.msra.mxu0 %v9104_v52  ;;  %5967 = vmatpush2.msra.mxu1 %v5895_v55  ;;  %9606 = vst [vmem:[#allocation42_spill] sm:$0xff] %v9137_v32  ;;  %v5886_v55 = vld [vmem:[#allocation15 + $0x628] sm:$0xff]  ;;  %v5911_v25 = vrot.slane %v5826_v53, 2  ;;  %v5912_v53 = vrot.slane %v8950_v31, 2  ;;  %v9625_v31 = vrot.slane %v8954_v54, 2 }
 0x696   :  { %5702 = vmatprep.subr.mxu0 %v9107_v61  ;;  %5968 = vmatprep.subr.mxu1 %v5894_v9  ;;  %v9140_v9 = vld [vmem:[#allocation15 + $0x1c0] sm:$0xff] }
 0x697   :  { %5703 = vmatpush1.msra.mxu0 %v9112_v18  ;;  %5969 = vmatpush2.msra.mxu1 %v5893_v58  ;;  %9607 = vst [vmem:[#allocation43_spill] sm:$0xff] %v9140_v9  ;;  %v5885_v58 = vld [vmem:[#allocation15 + $0x620] sm:$0xff] }
 0x698   :  { %5704 = vmatprep.subr.mxu0 %v9115_v43  ;;  %5970 = vmatprep.subr.mxu1 %v5892_v59  ;;  %v9143_v59 = vld [vmem:[#allocation15 + $0x1b8] sm:$0xff] }
 0x699   :  { %5705 = vmatpush2.msra.mxu0 %v9118_v38  ;;  %5971 = vmatpush2.msra.mxu1 %v5891_v2  ;;  %9608 = vst [vmem:[#allocation44_spill] sm:$0xff] %v9143_v59  ;;  %v5884_v2 = vld [vmem:[#allocation15 + $0x618] sm:$0xff] }
 0x69a   :  { %5706 = vmatprep.subr.mxu0 %v9121_v8  ;;  %5972 = vmatprep.subr.mxu1 %v5890_v19  ;;  %v9145_v19 = vpop.f32.mrf.mxu1 }
 0x69b   :  { %5707 = vmatpush2.msra.mxu0 %v9126_v35  ;;  %5973 = vmatpush2.msra.mxu1 %v5889_v36  ;;  %v9148_v36 = vld [vmem:[#allocation15 + $0x1b0] sm:$0xff] }
 0x69c   :  { %5708 = vmatprep.subr.mxu0 %v9129_v0  ;;  %5974 = vmatprep.subr.mxu1 %v5888_v50  ;;  %9609 = vst [vmem:[#allocation45_spill] sm:$0xff] %v9148_v36  ;;  %v9153_v50 = vld [vmem:[#allocation15 + $0x1a8] sm:$0xff]  ;;  %v5881_v0 = vld [vmem:[#allocation15 + $0x600] sm:$0xff]  ;;  %v9161_v8 = vpop.f32.mrf.mxu1 }
 0x69d   :  { %5709 = vmatpush2.msra.mxu0 %v9134_v39  ;;  %5975 = vmatpush2.msra.mxu1 %v5887_v16  ;;  %9610 = vst [vmem:[#allocation46_spill] sm:$0xff] %v9153_v50  ;;  %v5882_v39 = vld [vmem:[#allocation15 + $0x608] sm:$0xff]  ;;  %v9156_v16 = vld [vmem:[#allocation15 + $0x1a0] sm:$0xff] }
 0x69e   :  { %5710 = vmatprep.subr.mxu0 %v9137_v32  ;;  %5976 = vmatprep.subr.mxu1 %v5886_v55  ;;  %9611 = vst [vmem:[#allocation47_spill] sm:$0xff] %v9156_v16  ;;  %v9159_v55 = vld [vmem:[#allocation15 + $0x198] sm:$0xff]  ;;  %v9177_v43 = vpop.f32.mrf.mxu1 }
 0x69f   :  { %v9150_v35 = vpop.f32.mrf.mxu0  ;;  %5711 = vmatpush2.msra.mxu0 %v9140_v9  ;;  %5977 = vmatpush2.msra.mxu1 %v5885_v58  ;;  %9612 = vst [vmem:[#allocation48_spill] sm:$0xff] %v9159_v55  ;;  %v5880_v32 = vld [vmem:[#allocation15 + $0x5f8] sm:$0xff]  ;;  %v9166_v58 = vld [vmem:[#allocation15 + $0x190] sm:$0xff]  ;;  %v5877_v9 = vld [vmem:[#allocation15 + $0x5e0] sm:$0xff] }
 0x6a0   :  { %5712 = vmatprep.subr.mxu0 %v9143_v59  ;;  %5978 = vmatprep.subr.mxu1 %v5884_v2  ;;  %9613 = vst [vmem:[#allocation49_spill] sm:$0xff] %v9166_v58  ;;  %v5879_v59 = vld [vmem:[#allocation15 + $0x5f0] sm:$0xff]  ;;  %v9169_v2 = vld [vmem:[#allocation15 + $0x188] sm:$0xff]  ;;  %v9193_v61 = vpop.f32.mrf.mxu1 }
 0x6a1   :  { %5713 = vmatpush2.msra.mxu0 %v9148_v36  ;;  %5979 = vmatpush2.msra.mxu1 %v5883_v62  ;;  %v9163_v38 = vpop.f32.mrf.mxu0  ;;  %9614 = vst [vmem:[#allocation50_spill] sm:$0xff] %v9169_v2  ;;  %v5878_v36 = vld [vmem:[#allocation15 + $0x5e8] sm:$0xff]  ;;  %v9172_v62 = vld [vmem:[#allocation15 + $0x180] sm:$0xff] }
 0x6a2   :  { %5714 = vmatprep.subr.mxu0 %v9153_v50  ;;  %5980 = vmatprep.subr.mxu1 %v5882_v39  ;;  %9615 = vst [vmem:[#allocation51_spill] sm:$0xff] %v9172_v62  ;;  %v9175_v50 = vld [vmem:[#allocation15 + $0x178] sm:$0xff]  ;;  %v9209_v56 = vpop.f32.mrf.mxu1  ;;  %v4306_v7 = vadd.f32 %v9095_v1, %v9163_v38  ;;  %v9235_v1 = vld [vmem:[#allocation15 + $0x108] sm:$0xff]  ;;  %v5920_v38 = vrot.slane %v5829_v57, 2 }
 0x6a3   :  { %5715 = vmatpush2.msra.mxu0 %v9156_v16  ;;  %5981 = vmatpush2.msra.mxu1 %v5881_v0  ;;  %9616 = vst [vmem:[#allocation52_spill] sm:$0xff] %v9175_v50  ;;  %v5876_v39 = vld [vmem:[#allocation15 + $0x5d8] sm:$0xff]  ;;  %v9182_v0 = vld [vmem:[#allocation15 + $0x170] sm:$0xff]  ;;  %v5873_v16 = vld [vmem:[#allocation15 + $0x5c0] sm:$0xff] }
 0x6a4   :  { %5716 = vmatprep.subr.mxu0 %v9159_v55  ;;  %5982 = vmatprep.subr.mxu1 %v5880_v32  ;;  %9617 = vst [vmem:[#allocation53_spill] sm:$0xff] %v9182_v0  ;;  %v5875_v55 = vld [vmem:[#allocation15 + $0x5d0] sm:$0xff]  ;;  %v9185_v32 = vld [vmem:[#allocation15 + $0x168] sm:$0xff]  ;;  %v9249_v57 = vld [vmem:[#allocation15 + $0x6b8] sm:$0xff] }
 0x6a5   :  { %5717 = vmatpush2.msra.mxu0 %v9166_v58  ;;  %5983 = vmatpush2.msra.mxu1 %v5879_v59  ;;  %v9179_v18 = vpop.f32.mrf.mxu0  ;;  %9618 = vst [vmem:[#allocation54_spill] sm:$0xff] %v9185_v32  ;;  %v5874_v58 = vld [vmem:[#allocation15 + $0x5c8] sm:$0xff]  ;;  %v9188_v59 = vld [vmem:[#allocation15 + $0x160] sm:$0xff] }
 0x6a6   :  { %5718 = vmatprep.subr.mxu0 %v9169_v2  ;;  %5984 = vmatprep.subr.mxu1 %v5878_v36  ;;  %9619 = vst [vmem:[#allocation55_spill] sm:$0xff] %v9188_v59  ;;  %v9191_v2 = vld [vmem:[#allocation15 + $0x158] sm:$0xff] }
 0x6a7   :  { %5719 = vmatpush2.msra.mxu0 %v9172_v62  ;;  %5985 = vmatpush2.msra.mxu1 %v5877_v9  ;;  %9620 = vst [vmem:[#allocation56_spill] sm:$0xff] %v9191_v2  ;;  %v5872_v36 = vld [vmem:[#allocation15 + $0x5b8] sm:$0xff]  ;;  %v9195_v52 = vpop.f32.mrf.mxu0  ;;  %v9198_v9 = vld [vmem:[#allocation15 + $0x150] sm:$0xff]  ;;  %v5869_v62 = vld [vmem:[#allocation15 + $0x5a0] sm:$0xff] }
 0x6a8   :  { %5720 = vmatprep.subr.mxu0 %v9175_v50  ;;  %5986 = vmatprep.subr.mxu1 %v5876_v39  ;;  %9621 = vst [vmem:[#allocation57_spill] sm:$0xff] %v9198_v9  ;;  %v5871_v50 = vld [vmem:[#allocation15 + $0x5b0] sm:$0xff]  ;;  %v9201_v39 = vld [vmem:[#allocation15 + $0x148] sm:$0xff]  ;;  %v4312_v54 = vadd.f32 %v9123_v12, %v9195_v52  ;;  %v9264_v12 = vld [vmem:[#allocation15 + $0x6a0] sm:$0xff] }
 0x6a9   :  { %5721 = vmatpush2.msra.mxu0 %v9182_v0  ;;  %5987 = vmatpush2.msra.mxu1 %v5875_v55  ;;  %9622 = vst [vmem:[#allocation58_spill] sm:$0xff] %v9201_v39  ;;  %v5870_v0 = vld [vmem:[#allocation15 + $0x5a8] sm:$0xff]  ;;  %v9204_v55 = vld [vmem:[#allocation15 + $0x140] sm:$0xff]  ;;  %v7622_v52 = vld [vmem:[#allocation2 + $0x20] sm:$0xff] }
 0x6aa   :  { %5722 = vmatprep.subr.mxu0 %v9185_v32  ;;  %5988 = vmatprep.subr.mxu1 %v5874_v58  ;;  %9623 = vst [vmem:[#allocation59_spill] sm:$0xff] %v9204_v55  ;;  %v9207_v58 = vld [vmem:[#allocation15 + $0x138] sm:$0xff]  ;;  %9627 = vst [vmem:[#allocation62_spill] sm:$0xff] %v9264_v12 }
 0x6ab   :  { %5723 = vmatpush2.msra.mxu0 %v9188_v59  ;;  %5989 = vmatpush2.msra.mxu1 %v5873_v16  ;;  %9624 = vst [vmem:[#allocation60_spill] sm:$0xff] %v9207_v58  ;;  %v5868_v32 = vld [vmem:[#allocation15 + $0x598] sm:$0xff]  ;;  %v4636_v16 = vpop.f32.mrf.mxu0  ;;  %v9212_v59 = vld [vmem:[#allocation15 + $0x130] sm:$0xff] }
 0x6ac   :  { %5724 = vmatprep.subr.mxu0 %v9191_v2  ;;  %5990 = vmatprep.subr.mxu1 %v5872_v36  ;;  %v5867_v36 = vld [vmem:[#allocation15 + $0x590] sm:$0xff]  ;;  %v4304_v2 = vadd.f32 %v9081_v26, %v9150_v35  ;;  %v9225_v35 = vld [vmem:[#allocation15 + $0x118] sm:$0xff] }
 0x6ad   :  { %5725 = vmatpush2.msra.mxu0 %v9198_v9  ;;  %5991 = vmatpush2.msra.mxu1 %v5871_v50  ;;  %v9217_v50 = vld [vmem:[#allocation15 + $0x128] sm:$0xff] }
 0x6ae   :  { %5726 = vmatprep.subr.mxu0 %v9201_v39  ;;  %5992 = vmatprep.subr.mxu1 %v5870_v0  ;;  %v5866_v9 = vld [vmem:[#allocation15 + $0x588] sm:$0xff]  ;;  %v5865_v0 = vld [vmem:[#allocation15 + $0x580] sm:$0xff]  ;;  %v5922_v39 = vrot.slane %v5830_v15, 2 }
 0x6af   :  { %5727 = vmatpush2.msra.mxu0 %v9204_v55  ;;  %5993 = vmatpush2.msra.mxu1 %v5869_v62  ;;  %v4638_v62 = vpop.f32.mrf.mxu0 }
 0x6b0   :  { %v4559_v60 = vpop.f32.mrf.mxu1  ;;  %5728 = vmatprep.subr.mxu0 %v9207_v58  ;;  %5994 = vmatprep.subr.mxu1 %v5868_v32  ;;  %v9229_v32 = vld [vmem:[#allocation15 + $0x110] sm:$0xff] }
 0x6b1   :  { %v4560_v26 = vadd.f32 %v4559_v60, %v4304_v2  ;;  %5729 = vmatpush2.msra.mxu0 %v9212_v59  ;;  %5995 = vmatpush2.msra.mxu1 %v5867_v36  ;;  %v5913_v60 = vsel %vm3489_vm4, %v5911_v25, %v5912_v53  ;;  %v5923_v2 = vsel %vm3489_vm4, %v9625_v31, %v5922_v39  ;;  %v4642_v25 = vpop.f32.mrf.mxu0  ;;  %v9277_v31 = vld [vmem:[#allocation15 + $0x688] sm:$0xff] }
 0x6b2   :  { %v4561_v55 = vpop.f32.mrf.mxu1  ;;  %5730 = vmatprep.subr.mxu0 %v9217_v50  ;;  %5996 = vmatprep.subr.mxu1 %v5866_v9  ;;  %v9241_v9 = vld [vmem:[#allocation15 + $0x100] sm:$0xff]  ;;  %9630 = vst [vmem:[#allocation65_spill] sm:$0xff] %v9277_v31 }
 0x6b3   :  { %v9231_v15 = vadd.f32 %v4636_v16, %v4560_v26  ;;  %v4562_v58 = vadd.f32 %v4561_v55, %v4306_v7  ;;  %5731 = vmatpush2.msra.mxu0 %v9220_v24  ;;  %5997 = vmatpush2.msra.mxu1 %v5865_v0  ;;  %v4310_v7 = vadd.f32 %v9109_v14, %v9179_v18  ;;  %v5324_v14 = vld [vmem:[#allocation2] sm:$0xff]  ;;  %v9259_v0 = vld [vmem:[#allocation15 + $0x6a8] sm:$0xff] }
 0x6b4   :  { %5732 = vmatprep.subr.mxu0 %v9225_v35  ;;  %5999 = vmatmul.mubr.f32.vlgmr.msra.gmra.mxu1 %v5913_v60  ;;  %v5921_v18 = vsel %vm3489_vm4, %v5912_v53, %v5920_v38  ;;  %9626 = vst [vmem:[#allocation61_spill] sm:$0xff] %v9259_v0  ;;  %v4644_v53 = vpop.f32.mrf.mxu0  ;;  %v9267_v60 = vld [vmem:[#allocation15 + $0x698] sm:$0xff]  ;;  %v9273_v38 = vld [vmem:[#allocation15 + $0x690] sm:$0xff] }
 0x6b5   :  { %v9245_v55 = vadd.f32 %v4638_v62, %v4562_v58  ;;  %5733 = vmatpush2.msra.mxu0 %v9229_v32  ;;  %6004 = vmatprep.mubr.f32.mxu1 %v5923_v2  ;;  %v9256_v58 = vld [vmem:[#allocation15 + $0x6b0] sm:$0xff]  ;;  %v5828_v62 = vld [vmem:[#allocation2 + $0x10] sm:$0xfc]  ;;  %9628 = vst [vmem:[#allocation63_spill] sm:$0xff] %v9267_v60  ;;  %9629 = vst [vmem:[#allocation64_spill] sm:$0xff] %v9273_v38 }
 0x6b6   :  { %v4565_v16 = vpop.f32.mrf.mxu1  ;;  %5734 = vmatprep.subr.mxu0 %v9235_v1  ;;  %6416 = vmatprep.subr.mxu1 %v8975_v4  ;;  %v5917_v2 = vrot.slane %v5828_v62, 2  ;;  %v6233_v62 = vld [vmem:[#allocation15 + $0x2f0] sm:$0xff] }
 0x6b7   :  { %v4566_v39 = vadd.f32 %v4565_v16, %v4310_v7  ;;  %5735 = vmatpush2.msra.mxu0 %v9241_v9  ;;  %6417 = vmatpush1.msra.mxu1 %v8979_v3  ;;  %v5918_v7 = vrot.slane %v9017_v6, 2  ;;  %v5831_v16 = vld [vmem:[#allocation2 + $0x40] sm:$0x3]  ;;  %v6240_v6 = vld [vmem:[#allocation15 + $0x328] sm:$0xff] }
 0x6b8   :  { %v4567_v36 = vpop.f32.mrf.mxu1  ;;  %5737 = vmatmul.mubr.f32.vlgmr.msra.gmra.mxu0 %v5324_v14  ;;  %6005 = vmatmul.mubr.f32.gmra.mxu1 %v5921_v18  ;;  %v5924_v14 = vrot.slane %v5831_v16, 2  ;;  %v6238_v18 = vld [vmem:[#allocation15 + $0x318] sm:$0xff] }
 0x6b9   :  { %v9261_v26 = vadd.f32 %v4642_v25, %v4566_v39  ;;  %v4568_v4 = vadd.f32 %v4567_v36, %v4312_v54  ;;  %6035 = vmatprep.subr.mxu0 %v9249_v57  ;;  %5742 = vmatprep.mubr.f32.mxu0 %v7622_v52  ;;  %v7623_v25 = vld [vmem:[#allocation2 + $0x18] sm:$0xff]  ;;  %v6239_v39 = vld [vmem:[#allocation15 + $0x320] sm:$0xff]  ;;  %v6234_v52 = vld [vmem:[#allocation15 + $0x2f8] sm:$0xff] }
 0x6ba   :  { %6036 = vmatpush1.msra.mxu0 %v9256_v58  ;;  %6418 = vmatprep.subr.mxu1 %v8982_v46  ;;  %v9282_v46 = vld [vmem:[#allocation15 + $0x680] sm:$0xff]  ;;  %v6241_v54 = vld [vmem:[#allocation15 + $0x330] sm:$0xff]  ;;  %v6226_v16 = vld [vmem:[#allocation15 + $0x2b8] sm:$0xff] }
 0x6bb   :  { %v9270_v3 = vadd.f32 %v4644_v53, %v4568_v4  ;;  %6037 = vmatprep.subr.mxu0 %v9259_v0  ;;  %6419 = vmatpush1.msra.mxu1 %v8985_v29  ;;  %9631 = vst [vmem:[#allocation66_spill] sm:$0xff] %v9282_v46  ;;  %v6242_v29 = vld [vmem:[#allocation15 + $0x338] sm:$0xff]  ;;  %v6237_v36 = vld [vmem:[#allocation15 + $0x310] sm:$0xff]  ;;  %v6236_v4 = vld [vmem:[#allocation15 + $0x308] sm:$0xff] }
 0x6bc   :  { %6038 = vmatpush1.msra.mxu0 %v9264_v12  ;;  %6420 = vmatprep.subr.mxu1 %v8988_v21  ;;  %v5919_v21 = vsel %vm3489_vm4, %v5917_v2, %v5918_v7  ;;  %v6232_v53 = vld [vmem:[#allocation15 + $0x2e8] sm:$0xff]  ;;  %v6230_v2 = vld [vmem:[#allocation15 + $0x2d8] sm:$0xff] }
 0x6bd   :  { %5743 = vmatmul.mubr.f32.gmra.mxu0 %v7623_v25  ;;  %6039 = vmatprep.subr.mxu0 %v9267_v60  ;;  %v6228_v25 = vld [vmem:[#allocation15 + $0x2c8] sm:$0xff]  ;;  %v6266_v60 = vld [vmem:[#allocation15 + $0x3f8] sm:$0xff] }
 0x6be   :  { %6040 = vmatpush1.msra.mxu0 %v9273_v38  ;;  %6075 = vmatprep.mubr.f32.mxu0 %v9578_v22  ;;  %v6267_v38 = vld [vmem:[#allocation15 + $0x400] sm:$0xff]  ;;  %v9311_v12 = vld [vmem:[#allocation14] sm:$0x7] }
 0x6bf   :  { %6041 = vmatprep.subr.mxu0 %v9277_v31  ;;  %6421 = vmatpush1.msra.mxu1 %v8991_v49  ;;  %v5925_v49 = vsel %vm3489_vm4, %v5918_v7, %v5924_v14  ;;  %v6229_v7 = vld [vmem:[#allocation15 + $0x2d0] sm:$0xff] }
 0x6c0   :  { %6042 = vmatpush1.msra.mxu0 %v9282_v46  ;;  %6422 = vmatprep.subr.mxu1 %v8994_v34  ;;  %v6235_v34 = vld [vmem:[#allocation15 + $0x300] sm:$0xff]  ;;  %v6221_v14 = vld [vmem:[#allocation15 + $0x290] sm:$0xff] }
 0x6c1   :  { %7047 = vmatmul.mubr.msk.f32.vlgmr.msra.gmra.mxu0 %vm153_vm2, %v5919_v21  ;;  %6315 = vmatprep.subr.mxu0 %v6242_v29  ;;  %v6227_v29 = vld [vmem:[#allocation15 + $0x2c0] sm:$0xff]  ;;  %v6269_v46 = vld [vmem:[#allocation15 + $0x410] sm:$0xff] }
 0x6c2   :  { %6081 = vmatprep.mubr.f32.mxu0 %v9578_v22  ;;  %6316 = vmatpush1.msra.mxu0 %v6241_v54  ;;  %v6225_v54 = vld [vmem:[#allocation15 + $0x2b0] sm:$0xff]  ;;  %v6223_v21 = vld [vmem:[#allocation15 + $0x2a0] sm:$0xff] }
 0x6c3   :  { %6317 = vmatprep.subr.mxu0 %v6240_v6  ;;  %6423 = vmatpush1.msra.mxu1 %v8997_v30  ;;  %v6231_v30 = vld [vmem:[#allocation15 + $0x2e0] sm:$0xff]  ;;  %v9298_v6 = vpop.f32.mrf.mxu1 }
 0x6c4   :  { %6318 = vmatpush1.msra.mxu0 %v6239_v39  ;;  %6456 = vmatprep.mubr.f32.mxu1 %v9578_v22  ;;  %v6222_v39 = vld [vmem:[#allocation15 + $0x298] sm:$0xff] }
 0x6c5   :  { %7048 = vmatmul.mubr.msk.f32.gmra.mxu0 %vm153_vm2, %v5925_v49  ;;  %6319 = vmatprep.subr.mxu0 %v6238_v18  ;;  %v6219_v49 = vld [vmem:[#allocation15 + $0x280] sm:$0xff] }
 0x6c6   :  { %6320 = vmatpush1.msra.mxu0 %v6237_v36  ;;  %6498 = vmatprep.subr.mxu1 %v9008_v42  ;;  %v6224_v42 = vld [vmem:[#allocation15 + $0x2a8] sm:$0xff] }
 0x6c7   :  { %6321 = vmatprep.subr.mxu0 %v6236_v4  ;;  %v6220_v36 = vld [vmem:[#allocation15 + $0x288] sm:$0xff]  ;;  %v9300_v4 = vpop.f32.mrf.mxu1 }
 0x6c8   :  { %6322 = vmatpush1.msra.mxu0 %v6235_v34  ;;  %v6218_v34 = vld [vmem:[#allocation15 + $0x278] sm:$0xff] }
 0x6c9   :  { %6323 = vmatprep.subr.mxu0 %v6234_v52  ;;  %v6217_v52 = vld [vmem:[#allocation15 + $0x270] sm:$0xff] }
 0x6ca   :  { %6324 = vmatpush1.msra.mxu0 %v6233_v62 }
 0x6cb   :  { %6325 = vmatprep.subr.mxu0 %v6232_v53  ;;  %v6216_v53 = vld [vmem:[#allocation15 + $0x268] sm:$0xff] }
 0x6cc   :  { %6326 = vmatpush1.msra.mxu0 %v6231_v30  ;;  %v6215_v30 = vld [vmem:[#allocation15 + $0x260] sm:$0xff] }
 0x6cd   :  { %6327 = vmatprep.subr.mxu0 %v6230_v2  ;;  %v9302_v2 = vpop.f32.mrf.mxu1 }
 0x6ce   :  { %6328 = vmatpush1.msra.mxu0 %v6229_v7  ;;  %v6214_v7 = vld [vmem:[#allocation15 + $0x258] sm:$0xff] }
 0x6cf   :  { %6329 = vmatprep.subr.mxu0 %v6228_v25  ;;  %v7382_v18 = vpop.f32.mrf.mxu0  ;;  %v6213_v25 = vld [vmem:[#allocation15 + $0x250] sm:$0xff] }
 0x6d0   :  { %6330 = vmatpush1.msra.mxu0 %v6227_v29 }
 0x6d1   :  { %6331 = vmatprep.subr.mxu0 %v6226_v16  ;;  %v7383_v62 = vpop.f32.mrf.mxu0  ;;  %v6212_v16 = vld [vmem:[#allocation15 + $0x248] sm:$0xff] }
 0x6d2   :  { %6332 = vmatpush1.msra.mxu0 %v6225_v54  ;;  %v6211_v54 = vld [vmem:[#allocation15 + $0x240] sm:$0xff] }
 0x6d3   :  { %6333 = vmatprep.subr.mxu0 %v6224_v42  ;;  %v9304_v42 = vpop.f32.mrf.mxu1 }
 0x6d4   :  { %6334 = vmatpush1.msra.mxu0 %v6223_v21  ;;  %v7385_v29 = vpop.f32.mrf.mxu0  ;;  %v6274_v21 = vld [vmem:[#allocation15 + $0x438] sm:$0xff] }
 0x6d5   :  { %6335 = vmatprep.subr.mxu0 %v6222_v39  ;;  %v6273_v39 = vld [vmem:[#allocation15 + $0x430] sm:$0xff] }
 0x6d6   :  { %6336 = vmatpush1.msra.mxu0 %v6221_v14  ;;  %v7386_v14 = vpop.f32.mrf.mxu0 }
 0x6d7   :  { %6337 = vmatprep.subr.mxu0 %v6220_v36 }
 0x6d8   :  { %6338 = vmatpush1.msra.mxu0 %v6219_v49  ;;  %v6272_v49 = vld [vmem:[#allocation15 + $0x428] sm:$0xff] }
 0x6d9   :  { %6339 = vmatprep.subr.mxu0 %v6218_v34  ;;  %v7343_v34 = vadd.f32 %v9177_v43, %v9161_v8  ;;  %v7340_v43 = vadd.f32 %v9145_v19, %v9131_v11  ;;  %v7384_v8 = vadd.f32 %v7383_v62, %v7382_v18  ;;  %v6262_v11 = vld [vmem:[#allocation15 + $0x3d8] sm:$0xff] }
 0x6da   :  { %6340 = vmatpush1.msra.mxu0 %v6217_v52  ;;  %v6271_v52 = vld [vmem:[#allocation15 + $0x420] sm:$0xff] }
 0x6db   :  { %6341 = vmatprep.subr.mxu0 %v6216_v53 }
 0x6dc   :  { %6342 = vmatpush1.msra.mxu0 %v6215_v30  ;;  %v6270_v30 = vld [vmem:[#allocation15 + $0x418] sm:$0xff] }
 0x6dd   :  { %6343 = vmatprep.subr.mxu0 %v6214_v7  ;;  %v7387_v7 = vadd.f32 %v7386_v14, %v7385_v29  ;;  %v6265_v29 = vld [vmem:[#allocation15 + $0x3f0] sm:$0xff] }
 0x6de   :  { %6344 = vmatpush1.msra.mxu0 %v6213_v25  ;;  %v6268_v25 = vld [vmem:[#allocation15 + $0x408] sm:$0xff] }
 0x6df   :  { %6345 = vmatprep.subr.mxu0 %v6212_v16  ;;  %v4461_v16 = vadd.f32 %v9193_v61, %v7343_v34  ;;  %v4456_v61 = vadd.f32 %v7340_v43, %v9209_v56  ;;  %v6263_v34 = vld [vmem:[#allocation15 + $0x3e0] sm:$0xff] }
 0x6e0   :  { %v7426_v36 = vpop.f32.mrf.mxu1  ;;  %6346 = vmatpush1.msra.mxu0 %v6211_v54  ;;  %v7589_v54 = vpop.f32.mrf.mxu0  ;;  %v6259_v43 = vld [vmem:[#allocation15 + $0x3c0] sm:$0xff] }
 0x6e1   :  { %6347 = vmatprep.subr.mxu0 %v6274_v21  ;;  %v4719_v21 = vadd.f32 %v7387_v7, %v4461_v16  ;;  %v4714_v18 = vadd.f32 %v7384_v8, %v4456_v61  ;;  %v6255_v8 = vld [vmem:[#allocation15 + $0x3a0] sm:$0xff]  ;;  %v6253_v61 = vld [vmem:[#allocation15 + $0x390] sm:$0xff] }
 0x6e2   :  { %v7427_v53 = vpop.f32.mrf.mxu1  ;;  %6348 = vmatpush2.msra.mxu0 %v6273_v39 }
 0x6e3   :  { %6349 = vmatprep.subr.mxu0 %v6272_v49  ;;  %v6264_v49 = vld [vmem:[#allocation15 + $0x3e8] sm:$0xff]  ;;  %v4794_v19 = vadd.f32 %v7589_v54, %v4719_v21  ;;  %v7428_v62 = vadd.f32 %v7427_v53, %v7426_v36  ;;  %v6254_v21 = vld [vmem:[#allocation15 + $0x398] sm:$0xff] }
 0x6e4   :  { %6350 = vmatpush2.msra.mxu0 %v6271_v52  ;;  %v4788_v52 = vpop.f32.mrf.mxu0  ;;  %v6256_v54 = vld [vmem:[#allocation15 + $0x3a8] sm:$0xff] }
 0x6e5   :  { %v7429_v31 = vpop.f32.mrf.mxu1  ;;  %6351 = vmatprep.subr.mxu0 %v6270_v30  ;;  %v5262_v30 = vrot.slane %v9311_v12, %v8377_v37  ;;  %v4789_v16 = vadd.f32 %v4788_v52, %v4714_v18  ;;  %v6252_v52 = vld [vmem:[#allocation15 + $0x388] sm:$0xff]  ;;  %v6249_v18 = vld [vmem:[#allocation15 + $0x370] sm:$0xff] }
 0x6e6   :  { %6352 = vmatpush2.msra.mxu0 %v6269_v46 }
 0x6e7   :  { %v7430_v39 = vpop.f32.mrf.mxu1  ;;  %6353 = vmatprep.subr.mxu0 %v6268_v25  ;;  %v6261_v25 = vld [vmem:[#allocation15 + $0x3d0] sm:$0xff] }
 0x6e8   :  { %v7431_v14 = vadd.f32 %v7430_v39, %v7429_v31  ;;  %6354 = vmatpush2.msra.mxu0 %v6267_v38  ;;  %v6260_v38 = vld [vmem:[#allocation15 + $0x3c8] sm:$0xff]  ;;  %v6258_v39 = vld [vmem:[#allocation15 + $0x3b8] sm:$0xff] }
 0x6e9   :  { %6355 = vmatprep.subr.mxu0 %v6266_v60 }
 0x6ea   :  { %v7600_v46 = vpop.f32.mrf.mxu1  ;;  %6356 = vmatpush2.msra.mxu0 %v6265_v29  ;;  %v6257_v29 = vld [vmem:[#allocation15 + $0x3b0] sm:$0xff] }
 0x6eb   :  { %v5241_v7 = vadd.f32 %v7600_v46, %v7431_v14  ;;  %6357 = vmatprep.subr.mxu0 %v6264_v49 }
 0x6ec   :  { %v5235_v31 = vpop.f32.mrf.mxu1  ;;  %6358 = vmatpush2.msra.mxu0 %v6263_v34 }
 0x6ed   :  { %v5249_v56 = vadd.f32 %v5241_v7, %v4794_v19  ;;  %v5236_v60 = vadd.f32 %v7428_v62, %v5235_v31  ;;  %6359 = vmatprep.subr.mxu0 %v6262_v11  ;;  %v6251_v11 = vld [vmem:[#allocation15 + $0x380] sm:$0xff]  ;;  %v6245_v31 = vld [vmem:[#allocation15 + $0x350] sm:$0xff] }
 0x6ee   :  { %6360 = vmatpush2.msra.mxu0 %v6261_v25  ;;  %v6247_v7 = vld [vmem:[#allocation15 + $0x360] sm:$0xff]  ;;  %v6246_v25 = vld [vmem:[#allocation15 + $0x358] sm:$0xff] }
 0x6ef   :  { %v5271_v0 = vadd.f32 %v5262_v30, %v5249_v56  ;;  %v5246_v37 = vadd.f32 %v5236_v60, %v4789_v16  ;;  %6361 = vmatprep.subr.mxu0 %v6260_v38  ;;  %v6244_v38 = vld [vmem:[#allocation15 + $0x348] sm:$0xff]  ;;  %v6243_v16 = vld [vmem:[#allocation15 + $0x340] sm:$0xff]  ;;  %v6204_v56 = vld [vmem:[#allocation15 + $0x238] sm:$0xff] }
 0x6f0   :  { %6362 = vmatpush2.msra.mxu0 %v6259_v43 }
 0x6f1   :  { %vm5277_vm6 = vcmp.ge.f32.partialorder %v5271_v0, 0.0  ;;  %v5283_v36 = vmul.f32 0.01, %v5271_v0  ;;  %v5268_v53 = vadd.f32 %v5262_v30, %v5246_v37  ;;  %6363 = vmatprep.subr.mxu0 %v6258_v39  ;;  %v6250_v30 = vld [vmem:[#allocation15 + $0x378] sm:$0xff] }
 0x6f2   :  { %6364 = vmatpush2.msra.mxu0 %v6257_v29 }
 0x6f3   :  { %v5289_v14 = vsel %vm5277_vm6, %v5271_v0, %v5283_v36  ;;  %vm5274_vm10 = vcmp.ge.f32.partialorder %v5268_v53, 0.0  ;;  %v5280_v49 = vmul.f32 0.01, %v5268_v53  ;;  %6365 = vmatprep.subr.mxu0 %v6256_v54  ;;  %v6248_v0 = vld [vmem:[#allocation15 + $0x368] sm:$0xff]  ;;  %v7624_v36 = vld [vmem:[#allocation15 + $0xf0] sm:$0xff] }
 0x6f4   :  { %v5303_v34 = vrot.slane %v5289_v14, 5  ;;  %6366 = vmatpush2.msra.mxu0 %v6255_v8  ;;  %v7625_v8 = vld [vmem:[#allocation15 + $0xe8] sm:$0xff] }
 0x6f5   :  { %v5286_v46 = vsel %vm5274_vm10, %v5268_v53, %v5280_v49  ;;  %6367 = vmatprep.subr.mxu0 %v6254_v21  ;;  %v7626_v21 = vld [vmem:[#allocation15 + $0xe0] sm:$0xff]  ;;  %v7627_v49 = vld [vmem:[#allocation15 + $0xd8] sm:$0xff] }
 0x6f6   :  { %5322 = vst.msk [vmem:[#allocation2 + $0x70] sm:$0x7] %vm1404_vm1, %v5303_v34  ;;  %v5298_v19 = vrot.slane %v5286_v46, 5  ;;  %6368 = vmatpush2.msra.mxu0 %v6253_v61  ;;  %v7628_v61 = vld [vmem:[#allocation15 + $0xd0] sm:$0xff]  ;;  %v9641_v46 = vld [vmem:[#allocation32_spill] sm:$0xff] }
 0x6f7   :  { %6369 = vmatprep.subr.mxu0 %v6252_v52 }
 0x6f8   :  { %v5304_v62 = vsel %vm1376_vm8, %v5298_v19, %v5303_v34  ;;  %5316 = vst.msk [vmem:[#allocation2 + $0x40] sm:$0xf8] %vm1397_vm9, %v5298_v19  ;;  %6370 = vmatpush2.msra.mxu0 %v6251_v11  ;;  %v9642_v11 = vld [vmem:[#allocation33_spill] sm:$0xff] }
 0x6f9   :  { %5319 = vst.msk [vmem:[#allocation2 + $0x58] sm:$0xff] %vm153_vm2, %v5304_v62  ;;  %6371 = vmatprep.subr.mxu0 %v6250_v30  ;;  %v9643_v30 = vld [vmem:[#allocation34_spill] sm:$0xff]  ;;  %v9644_v62 = vld [vmem:[#allocation37_spill] sm:$0xff] }
 0x6fa   :  { %6372 = vmatpush2.msra.mxu0 %v6249_v18 }
 0x6fb   :  { %6373 = vmatprep.subr.mxu0 %v6248_v0 }
 0x6fc   :  { %6374 = vmatpush2.msra.mxu0 %v6247_v7  ;;  %v9645_v7 = vld [vmem:[#allocation38_spill] sm:$0xff] }
 0x6fd   :  { %6375 = vmatprep.subr.mxu0 %v6246_v25  ;;  %v6210_v29 = vld [vmem:[#allocation2 + $0x70] sm:$0x7] }
 0x6fe   :  { %6376 = vmatpush2.msra.mxu0 %v6245_v31  ;;  %v6305_v53 = vrot.slane %v6210_v29, 3  ;;  %v9649_v29 = vld [vmem:[#allocation42_spill] sm:$0xff] }
 0x6ff   :  { %v6207_v60 = vld [vmem:[#allocation2 + $0x40] sm:$0xf8]  ;;  %6377 = vmatprep.subr.mxu0 %v6244_v38 }
 0x700   :  { %v9320_v43 = vld [vmem:[#allocation2 + $0x58] sm:$0xff]  ;;  %v6298_v39 = vrot.slane %v6207_v60, 3  ;;  %6378 = vmatpush2.msra.mxu0 %v6243_v16 }
 0x701   :  { %v6299_v37 = vrot.slane %v9320_v43, 3  ;;  %6599 = vmatprep.subr.mxu0 %v6204_v56  ;;  %v9646_v38 = vld [vmem:[#allocation39_spill] sm:$0xff]  ;;  %v9647_v56 = vld [vmem:[#allocation40_spill] sm:$0xff] }
 0x703   :  { %v6300_v54 = vsel %vm1919_vm15, %v6298_v39, %v6299_v37  ;;  %v6306_v14 = vsel %vm1919_vm15, %v6299_v37, %v6305_v53  ;;  %v9648_v39 = vld [vmem:[#allocation41_spill] sm:$0xff]  ;;  %v9651_v53 = vld [vmem:[#allocation44_spill] sm:$0xff] }
 0x704   :  { %7049 = vmatmul.mubr.msk.f32.vlgmr.msra.gmra.mxu1 %vm153_vm2, %v6300_v54 }
 0x705   :  { %6499 = vmatpush1.msra.mxu1 %v7624_v36  ;;  %6462 = vmatprep.mubr.f32.mxu1 %v9578_v22 }
 0x706   :  { %6500 = vmatprep.subr.mxu1 %v7625_v8 }
 0x707   :  { %6501 = vmatpush1.msra.mxu1 %v7626_v21 }
 0x708   :  { %6502 = vmatprep.subr.mxu1 %v7627_v49  ;;  %7050 = vmatmul.mubr.msk.f32.gmra.mxu1 %vm153_vm2, %v6306_v14  ;;  %v9652_v14 = vld [vmem:[#allocation45_spill] sm:$0xff] }
 0x709   :  { %6503 = vmatpush1.msra.mxu1 %v7628_v61  ;;  %v9653_v61 = vld [vmem:[#allocation46_spill] sm:$0xff] }
 0x70a   :  { %6504 = vmatprep.subr.mxu1 %v9032_v44  ;;  %v9632_v44 = vld [vmem:[#allocation25_spill] sm:$0xff] }
 0x70b   :  { %6505 = vmatpush1.msra.mxu1 %v9035_v17  ;;  %v9633_v17 = vld [vmem:[#allocation26_spill] sm:$0xff] }
 0x70c   :  { %6506 = vmatprep.subr.mxu1 %v9037_v51  ;;  %v9634_v51 = vld [vmem:[#allocation27_spill] sm:$0xff] }
 0x70d   :  { %6507 = vmatpush1.msra.mxu1 %v9040_v28 }
 0x70e   :  { %6508 = vmatprep.subr.mxu1 %v9043_v48 }
 0x70f   :  { %6509 = vmatpush1.msra.mxu1 %v9046_v27  ;;  %v9635_v27 = vld [vmem:[#allocation35_spill] sm:$0xff] }
 0x710   :  { %6510 = vmatprep.subr.mxu1 %v9049_v13  ;;  %v5254_v13 = vrot.slane %v9311_v12, %v9635_v27 }
 0x711   :  { %6511 = vmatpush1.msra.mxu1 %v9052_v40  ;;  %v9636_v40 = vld [vmem:[#allocation28_spill] sm:$0xff] }
 0x712   :  { %6512 = vmatprep.subr.mxu1 %v9055_v33  ;;  %v9637_v33 = vld [vmem:[#allocation29_spill] sm:$0xff] }
 0x713   :  { %6513 = vmatpush1.msra.mxu1 %v9058_v5 }
 0x714   :  { %6514 = vmatprep.subr.mxu1 %v9061_v47 }
 0x715   :  { %6515 = vmatpush1.msra.mxu1 %v9064_v63 }
 0x716   :  { %6516 = vmatprep.subr.mxu1 %v9067_v45  ;;  %v9638_v45 = vld [vmem:[#allocation36_spill] sm:$0xff] }
 0x717   :  { %6517 = vmatpush1.msra.mxu1 %v9070_v41  ;;  %v5258_v41 = vrot.slane %v9311_v12, %v9638_v45 }
 0x718   :  { %6518 = vmatprep.subr.mxu1 %v9073_v10  ;;  %v9639_v10 = vld [vmem:[#allocation30_spill] sm:$0xff] }
 0x719   :  { %6519 = vmatpush1.msra.mxu1 %v9076_v20  ;;  %v9640_v20 = vld [vmem:[#allocation31_spill] sm:$0xff] }
 0x71a   :  { %6520 = vmatprep.subr.mxu1 %v9079_v23 }
 0x71b   :  { %6521 = vmatpush1.msra.mxu1 %v9632_v44  ;;  %v9654_v44 = vld [vmem:[#allocation47_spill] sm:$0xff] }
 0x71c   :  { %6522 = vmatprep.subr.mxu1 %v9633_v17 }
 0x71d   :  { %6523 = vmatpush1.msra.mxu1 %v9634_v51  ;;  %v5006_v28 = vpop.f32.mrf.mxu0  ;;  %v9655_v51 = vld [vmem:[#allocation48_spill] sm:$0xff] }
 0x71e   :  { %v5084_v48 = vadd.f32 %v9298_v6, %v5006_v28  ;;  %6524 = vmatprep.subr.mxu1 %v9636_v40 }
 0x71f   :  { %6525 = vmatpush1.msra.mxu1 %v9637_v33  ;;  %v5008_v5 = vpop.f32.mrf.mxu0 }
 0x720   :  { %v5244_v47 = vadd.f32 %v5084_v48, %v9231_v15  ;;  %v5086_v63 = vadd.f32 %v9300_v4, %v5008_v5  ;;  %6526 = vmatprep.subr.mxu1 %v9639_v10  ;;  %v9656_v48 = vld [vmem:[#allocation49_spill] sm:$0xff] }
 0x721   :  { %6527 = vmatpush1.msra.mxu1 %v9640_v20  ;;  %v5012_v23 = vpop.f32.mrf.mxu0 }
 0x722   :  { %v5266_v6 = vadd.f32 %v5254_v13, %v5244_v47  ;;  %v5245_v34 = vadd.f32 %v5086_v63, %v9245_v55  ;;  %v5090_v52 = vadd.f32 %v9302_v2, %v5012_v23  ;;  %6528 = vmatprep.subr.mxu1 %v9641_v46  ;;  %v9658_v47 = vld [vmem:[#allocation51_spill] sm:$0xff]  ;;  %v9659_v23 = vld [vmem:[#allocation52_spill] sm:$0xff] }
 0x723   :  { %6529 = vmatpush1.msra.mxu1 %v9642_v11  ;;  %v5014_v15 = vpop.f32.mrf.mxu0  ;;  %v9661_v11 = vld [vmem:[#allocation54_spill] sm:$0xff] }
 0x724   :  { %vm5272_vm11 = vcmp.ge.f32.partialorder %v5266_v6, 0.0  ;;  %v5278_v4 = vmul.f32 0.01, %v5266_v6  ;;  %v5267_v19 = vadd.f32 %v5258_v41, %v5245_v34  ;;  %v5247_v12 = vadd.f32 %v5090_v52, %v9261_v26  ;;  %6530 = vmatprep.subr.mxu1 %v9643_v30 }
 0x725   :  { %v5092_v18 = vadd.f32 %v9304_v42, %v5014_v15  ;;  %6531 = vmatpush2.msra.mxu1 %v9644_v62  ;;  %v6203_v15 = vld [vmem:[#allocation15 + $0x230] sm:$0xff]  ;;  %v9663_v62 = vld [vmem:[#allocation56_spill] sm:$0xff] }
 0x726   :  { %v5284_v0 = vsel %vm5272_vm11, %v5266_v6, %v5278_v4  ;;  %vm5273_vm1 = vcmp.ge.f32.partialorder %v5267_v19, 0.0  ;;  %v5279_v55 = vmul.f32 0.01, %v5267_v19  ;;  %v5269_v2 = vadd.f32 %v5254_v13, %v5247_v12  ;;  %6532 = vmatprep.subr.mxu1 %v9645_v7  ;;  %v9657_v13 = vld [vmem:[#allocation50_spill] sm:$0xff]  ;;  %v9660_v6 = vld [vmem:[#allocation53_spill] sm:$0xff] }
 0x727   :  { %v5296_v25 = vrot.slane %v5284_v0, 5  ;;  %v5248_v31 = vadd.f32 %v5092_v18, %v9270_v3  ;;  %6533 = vmatpush2.msra.mxu1 %v9646_v38  ;;  %v9650_v3 = vld [vmem:[#allocation43_spill] sm:$0xff]  ;;  %v6202_v18 = vld [vmem:[#allocation15 + $0x228] sm:$0xff] }
 0x728   :  { %v5285_v16 = vsel %vm5273_vm1, %v5267_v19, %v5279_v55  ;;  %vm5275_vm9 = vcmp.ge.f32.partialorder %v5269_v2, 0.0  ;;  %v5281_v26 = vmul.f32 0.01, %v5269_v2  ;;  %6534 = vmatprep.subr.mxu1 %v9647_v56  ;;  %v9662_v19 = vld [vmem:[#allocation55_spill] sm:$0xff]  ;;  %v9664_v55 = vld [vmem:[#allocation57_spill] sm:$0xff] }
 0x729   :  { %5314 = vst [vmem:[#allocation2 + $0x30] sm:$0xf8] %v5296_v25  ;;  %v5297_v42 = vrot.slane %v5285_v16, 5  ;;  %v5270_v60 = vadd.f32 %v5258_v41, %v5248_v31  ;;  %6535 = vmatpush2.msra.mxu1 %v9648_v39  ;;  %v6200_v38 = vld [vmem:[#allocation15 + $0x218] sm:$0xff]  ;;  %v6199_v56 = vld [vmem:[#allocation15 + $0x210] sm:$0xff]  ;;  %v6198_v39 = vld [vmem:[#allocation15 + $0x208] sm:$0xff] }
 0x72a   :  { %v5287_v37 = vsel %vm5275_vm9, %v5269_v2, %v5281_v26  ;;  %6536 = vmatprep.subr.mxu1 %v9649_v29  ;;  %v6201_v2 = vld [vmem:[#allocation15 + $0x220] sm:$0xff]  ;;  %v9666_v16 = vld [vmem:[#allocation59_spill] sm:$0xff] }
 0x72b   :  { %5315 = vst [vmem:[#allocation2 + $0x38] sm:$0xf8] %v5297_v42  ;;  %v5299_v54 = vrot.slane %v5287_v37, 5  ;;  %vm5276_vm14 = vcmp.ge.f32.partialorder %v5270_v60, 0.0  ;;  %v5282_v36 = vmul.f32 0.01, %v5270_v60  ;;  %6537 = vmatpush2.msra.mxu1 %v9650_v3 }
 0x72c   :  { %6538 = vmatprep.subr.mxu1 %v9651_v53  ;;  %v9667_v26 = vld [vmem:[#allocation60_spill] sm:$0xff] }
 0x72d   :  { %v9376_v8 = vsel %vm1376_vm8, %v5296_v25, %v5299_v54  ;;  %5320 = vst [vmem:[#allocation2 + $0x60] sm:$0x7] %v5299_v54  ;;  %v5288_v21 = vsel %vm5276_vm14, %v5270_v60, %v5282_v36  ;;  %6539 = vmatpush2.msra.mxu1 %v9652_v14  ;;  %v9665_v25 = vld [vmem:[#allocation58_spill] sm:$0xff]  ;;  %v6126_v29 = vld [vmem:[#allocation2 + $0x40] sm:$0xfc]  ;;  %v6197_v54 = vld [vmem:[#allocation15 + $0x200] sm:$0xff] }
 0x72e   :  { %5317 = vst [vmem:[#allocation2 + $0x48] sm:$0xff] %v9376_v8  ;;  %v5301_v49 = vrot.slane %v5288_v21, 5  ;;  %6540 = vmatprep.subr.mxu1 %v9653_v61  ;;  %v6293_v46 = vrot.slane %v9376_v8, 3  ;;  %v6689_v3 = vld [vmem:[#allocation15 + $0x578] sm:$0xff]  ;;  %v6482_v21 = vrot.slane %v9320_v43, 2  ;;  %v6476_v14 = vrot.slane %v9376_v8, 2 }
 0x72f   :  { %6541 = vmatpush2.msra.mxu1 %v9654_v44  ;;  %v6687_v61 = vld [vmem:[#allocation15 + $0x568] sm:$0xff] }
 0x730   :  { %v9383_v17 = vsel %vm1376_vm8, %v5297_v42, %v5301_v49  ;;  %5321 = vst [vmem:[#allocation2 + $0x68] sm:$0x7] %v5301_v49  ;;  %6542 = vmatprep.subr.mxu1 %v9655_v51  ;;  %v6205_v28 = vld [vmem:[#allocation2 + $0x30] sm:$0xf8]  ;;  %v6132_v51 = vld [vmem:[#allocation2 + $0x70] sm:$0x3] }
 0x731   :  { %5318 = vst [vmem:[#allocation2 + $0x50] sm:$0xff] %v9383_v17  ;;  %6543 = vmatpush2.msra.mxu1 %v9656_v48  ;;  %v6296_v33 = vrot.slane %v9383_v17, 3  ;;  %v6479_v10 = vrot.slane %v9383_v17, 2  ;;  %v6292_v20 = vrot.slane %v6205_v28, 3  ;;  %v6124_v42 = vld [vmem:[#allocation2 + $0x30] sm:$0xfc] }
 0x732   :  { %6544 = vmatprep.subr.mxu1 %v9657_v13  ;;  %v6206_v40 = vld [vmem:[#allocation2 + $0x38] sm:$0xf8]  ;;  %v6475_v36 = vrot.slane %v6124_v42, 2  ;;  %v9668_v28 = vld [vmem:[#allocation61_spill] sm:$0xff] }
 0x733   :  { %v6125_v5 = vld [vmem:[#allocation2 + $0x38] sm:$0xfc]  ;;  %6545 = vmatpush2.msra.mxu1 %v9658_v47  ;;  %v6295_v63 = vrot.slane %v6206_v40, 3  ;;  %v6294_v12 = vsel %vm1919_vm15, %v6292_v20, %v6293_v46  ;;  %v9671_v20 = vld [vmem:[#allocation64_spill] sm:$0xff] }
 0x734   :  { %v6478_v41 = vrot.slane %v6125_v5, 2  ;;  %6546 = vmatprep.subr.mxu1 %v9659_v23  ;;  %v6208_v4 = vld [vmem:[#allocation2 + $0x60] sm:$0x7]  ;;  %v9669_v13 = vld [vmem:[#allocation62_spill] sm:$0xff]  ;;  %v6654_v5 = vld [vmem:[#allocation2 + $0x40] sm:$0xf0] }
 0x735   :  { %6547 = vmatpush2.msra.mxu1 %v9660_v6  ;;  %v6297_v34 = vsel %vm1919_vm15, %v6295_v63, %v6296_v33  ;;  %v6301_v7 = vrot.slane %v6208_v4, 3  ;;  %v6684_v47 = vld [vmem:[#allocation15 + $0x550] sm:$0xff]  ;;  %v6740_v63 = vrot.slane %v9383_v17, 4  ;;  %v6682_v6 = vld [vmem:[#allocation15 + $0x540] sm:$0xff] }
 0x736   :  { %v6480_v52 = vsel %vm3489_vm4, %v6478_v41, %v6479_v10  ;;  %6548 = vmatprep.subr.mxu1 %v9661_v11  ;;  %6379 = vmatprep.mubr.f32.mxu0 %v6297_v34  ;;  %v6742_v34 = vrot.slane %v6654_v5, 4  ;;  %v9672_v11 = vld [vmem:[#allocation65_spill] sm:$0xff]  ;;  %v9673_v4 = vld [vmem:[#allocation66_spill] sm:$0xff]  ;;  %v6709_v5 = vld [vmem:[#allocation15 + $0x618] sm:$0xff] }
 0x737   :  { %6549 = vmatpush2.msra.mxu1 %v9662_v19  ;;  %6562 = vmatprep.mubr.f32.mxu1 %v6480_v52  ;;  %v6209_v30 = vld [vmem:[#allocation2 + $0x68] sm:$0x7]  ;;  %v6302_v60 = vsel %vm1919_vm15, %v6293_v46, %v6301_v7  ;;  %v6743_v52 = vrot.slane %v9320_v43, 4  ;;  %v6679_v19 = vld [vmem:[#allocation15 + $0x528] sm:$0xff]  ;;  %v6674_v7 = vld [vmem:[#allocation15 + $0x500] sm:$0xff] }
 0x738   :  { %6550 = vmatprep.subr.mxu1 %v9663_v62  ;;  %6380 = vmatmul.mubr.f32.vlgmr.msra.gmra.mxu0 %v6294_v12  ;;  %v6303_v0 = vrot.slane %v6209_v30, 3  ;;  %v6131_v37 = vld [vmem:[#allocation2 + $0x68] sm:$0x3]  ;;  %v6657_v12 = vld [vmem:[#allocation2 + $0x70] sm:$0xf] }
 0x739   :  { %6551 = vmatpush2.msra.mxu1 %v9664_v55  ;;  %6600 = vmatpush1.msra.mxu0 %v6203_v15  ;;  %v6486_v53 = vrot.slane %v6131_v37, 2  ;;  %v6681_v46 = vld [vmem:[#allocation15 + $0x538] sm:$0xff]  ;;  %v6680_v15 = vld [vmem:[#allocation15 + $0x530] sm:$0xff]  ;;  %v6744_v30 = vsel %vm1424_vm13, %v6742_v34, %v6743_v52  ;;  %v6749_v62 = vrot.slane %v6657_v12, 4  ;;  %v6675_v55 = vld [vmem:[#allocation15 + $0x508] sm:$0xff] }
 0x73a   :  { %6552 = vmatprep.subr.mxu1 %v9665_v25  ;;  %v6304_v31 = vsel %vm1919_vm15, %v6296_v33, %v6303_v0  ;;  %6601 = vmatprep.subr.mxu0 %v6202_v18  ;;  %v6488_v33 = vrot.slane %v6132_v51, 2  ;;  %v6678_v18 = vld [vmem:[#allocation15 + $0x520] sm:$0xff]  ;;  %v6677_v43 = vld [vmem:[#allocation15 + $0x518] sm:$0xff]  ;;  %v6676_v0 = vld [vmem:[#allocation15 + $0x510] sm:$0xff] }
 0x73b   :  { %6553 = vmatpush2.msra.mxu1 %v9666_v16  ;;  %6385 = vmatprep.mubr.f32.mxu0 %v6304_v31  ;;  %v6673_v25 = vld [vmem:[#allocation15 + $0x4f8] sm:$0xff]  ;;  %v6672_v31 = vld [vmem:[#allocation15 + $0x4f0] sm:$0xff]  ;;  %v6670_v16 = vld [vmem:[#allocation15 + $0x4e0] sm:$0xff] }
 0x73c   :  { %6554 = vmatprep.subr.mxu1 %v9667_v26  ;;  %6602 = vmatpush1.msra.mxu0 %v6201_v2  ;;  %v6489_v41 = vsel %vm3489_vm4, %v6482_v21, %v6488_v33  ;;  %v6750_v2 = vsel %vm1424_vm13, %v6743_v52, %v6749_v62  ;;  %v6668_v26 = vld [vmem:[#allocation15 + $0x4d0] sm:$0xff]  ;;  %v6666_v42 = vld [vmem:[#allocation15 + $0x4c0] sm:$0xff]  ;;  %v6663_v37 = vld [vmem:[#allocation15 + $0x4a8] sm:$0xff] }
 0x73d   :  { %6555 = vmatpush2.msra.mxu1 %v9212_v59  ;;  %6603 = vmatprep.subr.mxu0 %v6200_v38  ;;  %v6481_v59 = vrot.slane %v6126_v29, 2  ;;  %v6671_v38 = vld [vmem:[#allocation15 + $0x4e8] sm:$0xff]  ;;  %v6662_v29 = vld [vmem:[#allocation15 + $0x4a0] sm:$0xff] }
 0x73e   :  { %6556 = vmatprep.subr.mxu1 %v9217_v50  ;;  %6386 = vmatmul.mubr.f32.gmra.mxu0 %v6302_v60  ;;  %v6130_v50 = vld [vmem:[#allocation2 + $0x60] sm:$0x3]  ;;  %v6665_v60 = vld [vmem:[#allocation15 + $0x4b8] sm:$0xff]  ;;  %v6710_v33 = vld [vmem:[#allocation15 + $0x620] sm:$0xff] }
 0x73f   :  { %6557 = vmatpush2.msra.mxu1 %v9220_v24  ;;  %6604 = vmatpush1.msra.mxu0 %v6199_v56  ;;  %v6477_v24 = vsel %vm3489_vm4, %v6475_v36, %v6476_v14  ;;  %v6483_v49 = vsel %vm3489_vm4, %v6481_v59, %v6482_v21  ;;  %v6484_v44 = vrot.slane %v6130_v50, 2  ;;  %v6667_v56 = vld [vmem:[#allocation15 + $0x4c8] sm:$0xff]  ;;  %v6661_v36 = vld [vmem:[#allocation15 + $0x498] sm:$0xff]  ;;  %v6658_v59 = vld [vmem:[#allocation15 + $0x480] sm:$0xff] }
 0x740   :  { %6558 = vmatprep.subr.mxu1 %v9225_v35  ;;  %6605 = vmatprep.subr.mxu0 %v6198_v39  ;;  %v6688_v35 = vld [vmem:[#allocation15 + $0x570] sm:$0xff] }
 0x741   :  { %6559 = vmatpush2.msra.mxu1 %v9229_v32  ;;  %6606 = vmatpush1.msra.mxu0 %v6197_v54  ;;  %v6487_v32 = vsel %vm3489_vm4, %v6479_v10, %v6486_v53  ;;  %v6485_v40 = vsel %vm3489_vm4, %v6476_v14, %v6484_v44  ;;  %v6683_v10 = vld [vmem:[#allocation15 + $0x548] sm:$0xff]  ;;  %v6664_v39 = vld [vmem:[#allocation15 + $0x4b0] sm:$0xff]  ;;  %v9448_v54 = vpop.f32.mrf.mxu1  ;;  %v6721_v14 = vld [vmem:[#allocation15 + $0x678] sm:$0xff]  ;;  %v5656_v44 = vpop.f32.mrf.mxu0 }
 0x742   :  { %6560 = vmatprep.subr.mxu1 %v9235_v1  ;;  %6639 = vmatprep.mubr.f32.mxu0 %v9578_v22  ;;  %v6653_v1 = vld [vmem:[#allocation2 + $0x38] sm:$0xf0]  ;;  %v6659_v53 = vld [vmem:[#allocation15 + $0x488] sm:$0xff]  ;;  %v5657_v62 = vadd.f32 %v5656_v44, %v9448_v54 }
 0x743   :  { %6561 = vmatpush2.msra.mxu1 %v9241_v9  ;;  %6759 = vmatprep.subr.mxu0 %v6689_v3  ;;  %v6686_v9 = vld [vmem:[#allocation15 + $0x560] sm:$0xff]  ;;  %v6739_v48 = vrot.slane %v6653_v1, 4  ;;  %v6660_v3 = vld [vmem:[#allocation15 + $0x490] sm:$0xff]  ;;  %v9450_v21 = vpop.f32.mrf.mxu1  ;;  %v6715_v1 = vld [vmem:[#allocation15 + $0x648] sm:$0xff] }
 0x744   :  { %6563 = vmatmul.mubr.f32.vlgmr.msra.gmra.mxu1 %v6477_v24  ;;  %6860 = vmatprep.subr.mxu1 %v9249_v57  ;;  %v6685_v57 = vld [vmem:[#allocation15 + $0x558] sm:$0xff]  ;;  %v6720_v50 = vld [vmem:[#allocation15 + $0x670] sm:$0xff]  ;;  %v6719_v24 = vld [vmem:[#allocation15 + $0x668] sm:$0xff] }
 0x745   :  { %6568 = vmatprep.mubr.f32.mxu1 %v6487_v32  ;;  %7051 = vmatmul.mubr.msk.f32.vlgmr.msra.gmra.mxu0 %vm153_vm2, %v6483_v49  ;;  %v6741_v23 = vsel %vm1424_vm13, %v6739_v48, %v6740_v63  ;;  %v9452_v32 = vpop.f32.mrf.mxu1  ;;  %v6717_v49 = vld [vmem:[#allocation15 + $0x658] sm:$0xff]  ;;  %v6692_v54 = vld [vmem:[#allocation15 + $0x590] sm:$0xff] }
 0x746   :  { %6760 = vmatpush1.msra.mxu0 %v6688_v35  ;;  %6861 = vmatpush1.msra.mxu1 %v9256_v58  ;;  %v9670_v58 = vld [vmem:[#allocation63_spill] sm:$0xff]  ;;  %v6718_v35 = vld [vmem:[#allocation15 + $0x660] sm:$0xff] }
 0x747   :  { %6761 = vmatprep.subr.mxu0 %v6687_v61  ;;  %6862 = vmatprep.subr.mxu1 %v9668_v28  ;;  %v6716_v61 = vld [vmem:[#allocation15 + $0x650] sm:$0xff]  ;;  %v9454_v51 = vpop.f32.mrf.mxu1  ;;  %v6713_v28 = vld [vmem:[#allocation15 + $0x638] sm:$0xff] }
 0x748   :  { %6762 = vmatpush1.msra.mxu0 %v6686_v9  ;;  %6863 = vmatpush1.msra.mxu1 %v9669_v13  ;;  %v6714_v9 = vld [vmem:[#allocation15 + $0x640] sm:$0xff]  ;;  %v5658_v13 = vpop.f32.mrf.mxu0 }
 0x749   :  { %6569 = vmatmul.mubr.f32.gmra.mxu1 %v6485_v40  ;;  %6645 = vmatprep.mubr.f32.mxu0 %v9578_v22  ;;  %v9456_v48 = vpop.f32.mrf.mxu1  ;;  %v6711_v40 = vld [vmem:[#allocation15 + $0x628] sm:$0xff] }
 0x74a   :  { %6763 = vmatprep.subr.mxu0 %v6685_v57  ;;  %6864 = vmatprep.subr.mxu1 %v9670_v58  ;;  %v6712_v57 = vld [vmem:[#allocation15 + $0x630] sm:$0xff] }
 0x74b   :  { %7052 = vmatmul.mubr.msk.f32.gmra.mxu0 %vm153_vm2, %v6489_v41  ;;  %6865 = vmatpush1.msra.mxu1 %v9671_v20  ;;  %v9458_v58 = vpop.f32.mrf.mxu1  ;;  %v5662_v41 = vpop.f32.mrf.mxu0  ;;  %v6706_v20 = vld [vmem:[#allocation15 + $0x600] sm:$0xff] }
 0x74c   :  { %6764 = vmatpush1.msra.mxu0 %v6684_v47  ;;  %6823 = vmatprep.mubr.f32.mxu0 %v6741_v23  ;;  %v6708_v47 = vld [vmem:[#allocation15 + $0x610] sm:$0xff]  ;;  %v6705_v23 = vld [vmem:[#allocation15 + $0x5f8] sm:$0xff] }
 0x74d   :  { %6765 = vmatprep.subr.mxu0 %v6683_v10  ;;  %6866 = vmatprep.subr.mxu1 %v9672_v11  ;;  %v6707_v10 = vld [vmem:[#allocation15 + $0x608] sm:$0xff]  ;;  %v9460_v34 = vpop.f32.mrf.mxu1  ;;  %v5664_v52 = vpop.f32.mrf.mxu0  ;;  %v6702_v11 = vld [vmem:[#allocation15 + $0x5e0] sm:$0xff] }
 0x74e   :  { %6766 = vmatpush1.msra.mxu0 %v6682_v6  ;;  %6867 = vmatpush1.msra.mxu1 %v9673_v4  ;;  %v6704_v6 = vld [vmem:[#allocation15 + $0x5f0] sm:$0xff] }
 0x74f   :  { %6900 = vmatprep.mubr.f32.mxu1 %v9578_v22  ;;  %6767 = vmatprep.subr.mxu0 %v6681_v46  ;;  %v6703_v46 = vld [vmem:[#allocation15 + $0x5e8] sm:$0xff]  ;;  %v9462_v12 = vpop.f32.mrf.mxu1 }
 0x750   :  { %7053 = vmatmul.mubr.msk.f32.vlgmr.msra.gmra.mxu1 %vm153_vm2, %v6744_v30  ;;  %6768 = vmatpush1.msra.mxu0 %v6680_v15  ;;  %v6701_v15 = vld [vmem:[#allocation15 + $0x5d8] sm:$0xff]  ;;  %v6699_v30 = vld [vmem:[#allocation15 + $0x5c8] sm:$0xff] }
 0x751   :  { %6769 = vmatprep.subr.mxu0 %v6679_v19  ;;  %6906 = vmatprep.mubr.f32.mxu1 %v9578_v22  ;;  %v6669_v22 = vld [vmem:[#allocation15 + $0x4d8] sm:$0xff]  ;;  %v6700_v19 = vld [vmem:[#allocation15 + $0x5d0] sm:$0xff] }
 0x752   :  { %6770 = vmatpush1.msra.mxu0 %v6678_v18 }
 0x753   :  { %6771 = vmatprep.subr.mxu0 %v6677_v43  ;;  %v6698_v43 = vld [vmem:[#allocation15 + $0x5c0] sm:$0xff] }
 0x754   :  { %7054 = vmatmul.mubr.msk.f32.gmra.mxu1 %vm153_vm2, %v6750_v2  ;;  %6772 = vmatpush1.msra.mxu0 %v6676_v0  ;;  %v6697_v0 = vld [vmem:[#allocation15 + $0x5b8] sm:$0xff]  ;;  %v6696_v2 = vld [vmem:[#allocation15 + $0x5b0] sm:$0xff] }
 0x755   :  { %6773 = vmatprep.subr.mxu0 %v6675_v55 }
 0x756   :  { %6774 = vmatpush1.msra.mxu0 %v6674_v7 }
 0x757   :  { %6775 = vmatprep.subr.mxu0 %v6673_v25  ;;  %v5659_v25 = vadd.f32 %v5658_v13, %v9450_v21  ;;  %v6655_v21 = vld [vmem:[#allocation2 + $0x60] sm:$0xf] }
 0x758   :  { %6776 = vmatpush1.msra.mxu0 %v6672_v31  ;;  %v6695_v31 = vld [vmem:[#allocation15 + $0x5a8] sm:$0xff] }
 0x759   :  { %6777 = vmatprep.subr.mxu0 %v6671_v38  ;;  %v6652_v38 = vld [vmem:[#allocation2 + $0x30] sm:$0xf0] }
 0x75a   :  { %6778 = vmatpush1.msra.mxu0 %v6670_v16 }
 0x75b   :  { %6779 = vmatprep.subr.mxu0 %v6669_v22  ;;  %v6694_v22 = vld [vmem:[#allocation15 + $0x5a0] sm:$0xff] }
 0x75c   :  { %6780 = vmatpush1.msra.mxu0 %v6668_v26 }
 0x75d   :  { %6781 = vmatprep.subr.mxu0 %v6667_v56  ;;  %v5323_v56 = vld [vmem:[#allocation17] sm:$0x3] }
 0x75e   :  { %6782 = vmatpush1.msra.mxu0 %v6666_v42  ;;  %v5663_v42 = vadd.f32 %v5662_v41, %v9452_v32  ;;  %v6690_v32 = vld [vmem:[#allocation15 + $0x580] sm:$0xff] }
 0x75f   :  { %6783 = vmatprep.subr.mxu0 %v6665_v60  ;;  %v6693_v60 = vld [vmem:[#allocation15 + $0x598] sm:$0xff] }
 0x760   :  { %6784 = vmatpush1.msra.mxu0 %v6664_v39 }
 0x761   :  { %6785 = vmatprep.subr.mxu0 %v6663_v37  ;;  %v6656_v37 = vld [vmem:[#allocation2 + $0x68] sm:$0xf] }
 0x762   :  { %6786 = vmatpush1.msra.mxu0 %v6662_v29 }
 0x763   :  { %6787 = vmatprep.subr.mxu0 %v6661_v36  ;;  %v6736_v36 = vrot.slane %v6652_v38, 4 }
 0x764   :  { %6788 = vmatpush1.msra.mxu0 %v6660_v3 }
 0x765   :  { %6789 = vmatprep.subr.mxu0 %v6659_v53  ;;  %v6691_v53 = vld [vmem:[#allocation15 + $0x588] sm:$0xff] }
 0x766   :  { %6790 = vmatpush1.msra.mxu0 %v6658_v59 }
 0x767   :  { %6791 = vmatprep.subr.mxu0 %v6721_v14 }
 0x768   :  { %6792 = vmatpush2.msra.mxu0 %v6720_v50 }
 0x769   :  { %6793 = vmatprep.subr.mxu0 %v6719_v24  ;;  %v6096_v24 = vrot.slane %v5323_v56, %v9635_v27 }
 0x76a   :  { %6794 = vmatpush2.msra.mxu0 %v6718_v35  ;;  %v5665_v35 = vadd.f32 %v5664_v52, %v9454_v51 }
 0x76b   :  { %6795 = vmatprep.subr.mxu0 %v6717_v49  ;;  %v6737_v49 = vrot.slane %v9376_v8, 4 }
 0x76c   :  { %6796 = vmatpush2.msra.mxu0 %v6716_v61  ;;  %v6747_v61 = vrot.slane %v6656_v37, 4 }
 0x76d   :  { %6797 = vmatprep.subr.mxu0 %v6715_v1  ;;  %v6738_v13 = vsel %vm1424_vm13, %v6736_v36, %v6737_v49 }
 0x76e   :  { %6798 = vmatpush2.msra.mxu0 %v6714_v9 }
 0x76f   :  { %6799 = vmatprep.subr.mxu0 %v6713_v28 }
 0x770   :  { %6800 = vmatpush2.msra.mxu0 %v6712_v57 }
 0x771   :  { %6801 = vmatprep.subr.mxu0 %v6711_v40  ;;  %v6745_v40 = vrot.slane %v6655_v21, 4 }
 0x772   :  { %6802 = vmatpush2.msra.mxu0 %v6710_v33 }
 0x773   :  { %6803 = vmatprep.subr.mxu0 %v6709_v5 }
 0x774   :  { %6804 = vmatpush2.msra.mxu0 %v6708_v47  ;;  %v6000_v55 = vpop.f32.mrf.mxu1 }
 0x775   :  { %6805 = vmatprep.subr.mxu0 %v6707_v10 }
 0x776   :  { %6806 = vmatpush2.msra.mxu0 %v6706_v20  ;;  %v6002_v39 = vpop.f32.mrf.mxu1 }
 0x777   :  { %6807 = vmatprep.subr.mxu0 %v6705_v23 }
 0x778   :  { %6808 = vmatpush2.msra.mxu0 %v6704_v6  ;;  %v5738_v4 = vpop.f32.mrf.mxu0  ;;  %v6006_v1 = vpop.f32.mrf.mxu1 }
 0x779   :  { %6809 = vmatprep.subr.mxu0 %v6703_v46  ;;  %v5739_v16 = vadd.f32 %v5738_v4, %v5657_v62  ;;  %v6746_v46 = vsel %vm1424_vm13, %v6737_v49, %v6745_v40 }
 0x77a   :  { %6810 = vmatpush2.msra.mxu0 %v6702_v11  ;;  %v5740_v18 = vpop.f32.mrf.mxu0  ;;  %v6008_v20 = vpop.f32.mrf.mxu1 }
 0x77b   :  { %6811 = vmatprep.subr.mxu0 %v6701_v15  ;;  %v5741_v29 = vadd.f32 %v5740_v18, %v5659_v25  ;;  %v5816_v59 = vadd.f32 %v9456_v48, %v5739_v16  ;;  %v6100_v48 = vrot.slane %v5323_v56, %v9638_v45 }
 0x77c   :  { %6812 = vmatpush2.msra.mxu0 %v6700_v19 }
 0x77d   :  { %6813 = vmatprep.subr.mxu0 %v6699_v30  ;;  %v5744_v7 = vpop.f32.mrf.mxu0  ;;  %v5818_v9 = vadd.f32 %v9458_v58, %v5741_v29  ;;  %v6748_v58 = vsel %vm1424_vm13, %v6740_v63, %v6747_v61 }
 0x77e   :  { %6814 = vmatpush2.msra.mxu0 %v6698_v43  ;;  %v5745_v14 = vadd.f32 %v5744_v7, %v5663_v42 }
 0x77f   :  { %6815 = vmatprep.subr.mxu0 %v6697_v0  ;;  %v5746_v26 = vpop.f32.mrf.mxu0 }
 0x780   :  { %6816 = vmatpush2.msra.mxu0 %v6696_v2  ;;  %v5747_v33 = vadd.f32 %v5746_v26, %v5665_v35  ;;  %v5822_v5 = vadd.f32 %v9460_v34, %v5745_v14 }
 0x781   :  { %6817 = vmatprep.subr.mxu0 %v6695_v31  ;;  %v6077_v3 = vpop.f32.mrf.mxu0 }
 0x782   :  { %6818 = vmatpush2.msra.mxu0 %v6694_v22  ;;  %v6078_v50 = vadd.f32 %v6077_v3, %v6000_v55  ;;  %v5824_v11 = vadd.f32 %v9462_v12, %v5747_v33 }
 0x783   :  { %6819 = vmatprep.subr.mxu0 %v6693_v60  ;;  %v6079_v44 = vpop.f32.mrf.mxu0 }
 0x784   :  { %6820 = vmatpush2.msra.mxu0 %v6692_v54  ;;  %v6088_v28 = vadd.f32 %v6078_v50, %v5816_v59  ;;  %v6080_v57 = vadd.f32 %v6079_v44, %v6002_v39  ;;  %v6123_v59 = vld [vmem:[#allocation17] sm:$0x3] }
 0x785   :  { %6821 = vmatprep.subr.mxu0 %v6691_v53  ;;  %v6083_v51 = vpop.f32.mrf.mxu0  ;;  %v6921_v61 = vrot.slane %v6123_v59, %v9635_v27 }
 0x786   :  { %6822 = vmatpush2.msra.mxu0 %v6690_v32  ;;  %v6103_v8 = vadd.f32 %v6096_v24, %v6088_v28  ;;  %v6089_v47 = vadd.f32 %v6080_v57, %v5818_v9  ;;  %v6084_v41 = vadd.f32 %v6083_v51, %v6006_v1 }
 0x787   :  { %6824 = vmatmul.mubr.f32.vlgmr.msra.gmra.mxu0 %v6738_v13  ;;  %v6085_v10 = vpop.f32.mrf.mxu0  ;;  %v6925_v13 = vrot.slane %v6123_v59, %v9638_v45 }
 0x788   :  { %6829 = vmatprep.mubr.f32.mxu0 %v6748_v58  ;;  %vm6107_vm2 = vcmp.ge.f32.partialorder %v6103_v8, 0.0  ;;  %v6111_v23 = vmul.f32 0.01, %v6103_v8  ;;  %v6104_v6 = vadd.f32 %v6100_v48, %v6089_v47  ;;  %v6090_v52 = vadd.f32 %v6084_v41, %v5822_v5 }
 0x789   :  { %v6086_v34 = vadd.f32 %v6085_v10, %v6008_v20 }
 0x78a   :  { %v6115_v15 = vsel %vm6107_vm2, %v6103_v8, %v6111_v23  ;;  %vm6108_vm8 = vcmp.ge.f32.partialorder %v6104_v6, 0.0  ;;  %v6112_v4 = vmul.f32 0.01, %v6104_v6  ;;  %v6105_v19 = vadd.f32 %v6096_v24, %v6090_v52 }
 0x78b   :  { %6830 = vmatmul.mubr.f32.gmra.mxu0 %v6746_v46  ;;  %6119 = vst [vmem:[#allocation18] sm:$0xff] %v6115_v15  ;;  %v6091_v17 = vadd.f32 %v6086_v34, %v5824_v11 }
 0x78c   :  { %v6116_v63 = vsel %vm6108_vm8, %v6104_v6, %v6112_v4  ;;  %vm6109_vm15 = vcmp.ge.f32.partialorder %v6105_v19, 0.0  ;;  %v6113_v30 = vmul.f32 0.01, %v6105_v19 }
 0x78d   :  { %6120 = vst [vmem:[#allocation18 + $0x8] sm:$0xff] %v6116_v63  ;;  %v6106_v18 = vadd.f32 %v6100_v48, %v6091_v17 }
 0x78e   :  { %v6117_v43 = vsel %vm6109_vm15, %v6105_v19, %v6113_v30 }
 0x78f   :  { %6121 = vst [vmem:[#allocation18 + $0x10] sm:$0xff] %v6117_v43  ;;  %vm6110_vm4 = vcmp.ge.f32.partialorder %v6106_v18, 0.0  ;;  %v6114_v62 = vmul.f32 0.01, %v6106_v18 }
 0x791   :  { %v6118_v0 = vsel %vm6110_vm4, %v6106_v18, %v6114_v62 }
 0x792   :  { %6122 = vst [vmem:[#allocation18 + $0x18] sm:$0xff] %v6118_v0 }
 0x7c4   :  { %v6458_v12 = vpop.f32.mrf.mxu1 }
 0x7c6   :  { %v6460_v55 = vpop.f32.mrf.mxu1 }
 0x7c8   :  { %v6464_v7 = vpop.f32.mrf.mxu1 }
 0x7ca   :  { %v6466_v31 = vpop.f32.mrf.mxu1 }
 0x7f8   :  { %v6381_v2 = vpop.f32.mrf.mxu0 }
 0x7f9   :  { %v6459_v29 = vadd.f32 %v6458_v12, %v6381_v2 }
 0x7fa   :  { %v6383_v25 = vpop.f32.mrf.mxu0 }
 0x7fb   :  { %v6461_v36 = vadd.f32 %v6460_v55, %v6383_v25 }
 0x7fe   :  { %v6387_v38 = vpop.f32.mrf.mxu0 }
 0x7ff   :  { %v6465_v21 = vadd.f32 %v6464_v7, %v6387_v38 }
 0x800   :  { %v6389_v22 = vpop.f32.mrf.mxu0 }
 0x801   :  { %v6467_v44 = vadd.f32 %v6466_v31, %v6389_v22 }
 0x804   :  { %v6564_v16 = vpop.f32.mrf.mxu1 }
 0x805   :  { %v6641_v56 = vpop.f32.mrf.mxu0  ;;  %v6565_v3 = vadd.f32 %v6564_v16, %v6459_v29 }
 0x806   :  { %v6566_v26 = vpop.f32.mrf.mxu1 }
 0x807   :  { %v6643_v60 = vpop.f32.mrf.mxu0  ;;  %v6567_v14 = vadd.f32 %v6566_v26, %v6461_v36  ;;  %v6642_v35 = vadd.f32 %v6641_v56, %v6565_v3 }
 0x809   :  { %v6570_v42 = vpop.f32.mrf.mxu1  ;;  %v6644_v9 = vadd.f32 %v6643_v60, %v6567_v14 }
 0x80a   :  { %v6571_v32 = vadd.f32 %v6570_v42, %v6465_v21 }
 0x80b   :  { %v6572_v39 = vpop.f32.mrf.mxu1  ;;  %v6647_v37 = vpop.f32.mrf.mxu0 }
 0x80c   :  { %v6573_v40 = vadd.f32 %v6572_v39, %v6467_v44  ;;  %v6648_v51 = vadd.f32 %v6647_v37, %v6571_v32 }
 0x80d   :  { %v6649_v53 = vpop.f32.mrf.mxu0 }
 0x80e   :  { %v6650_v23 = vadd.f32 %v6649_v53, %v6573_v40 }
 0x810   :  { %v6902_v54 = vpop.f32.mrf.mxu1 }
 0x812   :  { %v6904_v50 = vpop.f32.mrf.mxu1 }
 0x814   :  { %v6908_v28 = vpop.f32.mrf.mxu1 }
 0x816   :  { %v6910_v58 = vpop.f32.mrf.mxu1 }
 0x847   :  { %v6825_v24 = vpop.f32.mrf.mxu0 }
 0x848   :  { %v6903_v49 = vadd.f32 %v6902_v54, %v6825_v24 }
 0x849   :  { %v6827_v1 = vpop.f32.mrf.mxu0 }
 0x84a   :  { %v6913_v57 = vadd.f32 %v6903_v49, %v6642_v35  ;;  %v6905_v48 = vadd.f32 %v6904_v50, %v6827_v1 }
 0x84b   :  { %v6831_v33 = vpop.f32.mrf.mxu0 }
 0x84c   :  { %v6928_v5 = vadd.f32 %v6921_v61, %v6913_v57  ;;  %v6914_v8 = vadd.f32 %v6905_v48, %v6644_v9  ;;  %v6909_v47 = vadd.f32 %v6908_v28, %v6831_v33 }
 0x84d   :  { %v6833_v41 = vpop.f32.mrf.mxu0 }
 0x84e   :  { %vm6932_vm13 = vcmp.ge.f32.partialorder %v6928_v5, 0.0  ;;  %v6936_v10 = vmul.f32 0.01, %v6928_v5  ;;  %v6929_v20 = vadd.f32 %v6925_v13, %v6914_v8  ;;  %v6915_v27 = vadd.f32 %v6909_v47, %v6648_v51 }
 0x84f   :  { %v6911_v6 = vadd.f32 %v6910_v58, %v6833_v41 }
 0x850   :  { %v6940_v52 = vsel %vm6932_vm13, %v6928_v5, %v6936_v10  ;;  %vm6933_vm5 = vcmp.ge.f32.partialorder %v6929_v20, 0.0  ;;  %v6937_v46 = vmul.f32 0.01, %v6929_v20  ;;  %v6930_v11 = vadd.f32 %v6921_v61, %v6915_v27 }
 0x851   :  { %6944 = vst [vmem:[#allocation18 + $0x20] sm:$0xff] %v6940_v52  ;;  %v6916_v45 = vadd.f32 %v6911_v6, %v6650_v23 }
 0x852   :  { %v6941_v34 = vsel %vm6933_vm5, %v6929_v20, %v6937_v46  ;;  %vm6934_vm7 = vcmp.ge.f32.partialorder %v6930_v11, 0.0  ;;  %v6938_v15 = vmul.f32 0.01, %v6930_v11 }
 0x853   :  { %6945 = vst [vmem:[#allocation18 + $0x28] sm:$0xff] %v6941_v34  ;;  %v6931_v4 = vadd.f32 %v6925_v13, %v6916_v45 }
 0x854   :  { %v6942_v19 = vsel %vm6934_vm7, %v6930_v11, %v6938_v15 }
 0x855   :  { %6946 = vst [vmem:[#allocation18 + $0x30] sm:$0xff] %v6942_v19  ;;  %vm6935_vm12 = vcmp.ge.f32.partialorder %v6931_v4, 0.0  ;;  %v6939_v17 = vmul.f32 0.01, %v6931_v4 }
 0x857   :  { %v6943_v63 = vsel %vm6935_vm12, %v6931_v4, %v6939_v17 }
 0x858   :  { %6947 = vst [vmem:[#allocation18 + $0x38] sm:$0xff] %v6943_v63 }
 0x859   :  { %7820 = shalt.err (!%p7817_p7)
}
 0x85a   :  { %6959 = dma.vmem_to_hbm [thread:$0]  %s6954_s5, 1024, %s9499_s11, [#allocation5], %s7847_s18, %s7847_s18, %s7848_s19  }
 0x85b   :  { %7839 = dma.done.wait [#allocation5], 1024  }
 0x85c   :  { %7840 = vsyncadd [#allocation5], 4294966272 }
 0x85d   :  { %6963 = vsyncpa [#allocation4], 1 }
 0x85e   :  { %6964 = vsyncpa [#allocation7], 1 }
 0x85f   :  { %6965 = vsyncpa [#allocation10], 1 }
 0x860   :  { %6966 = vsyncpa [#allocation13], 1 }
 0x861   :  { %6967 = vsyncpa [#allocation16], 1 }
 0x862   :  { %6968 = vsyncpa [#allocation5], 1 }

</bundles_post_ra>
